<compile_context>
chip_gen: v5e
topology: v5e:2x2
jax: 0.10.0
libtpu: 0.0.40
codegen_flags: <defaults>
</compile_context>

<pallas_src>
import functools

import numpy as np
import jax
import jax.numpy as jnp
from jax.experimental import pallas as pl
from jax.experimental.pallas import tpu as pltpu

K = 5            # conv kernel size
LANES = 128      # lane width of the single-column activation slabs


# ----------------------------------------------------------------------------
# Parameter init (torch layouts) + one-time repacking into kernel layouts
# ----------------------------------------------------------------------------

def init_lenet_params(key):
    """Deterministic parameter init matching the torch module's shapes."""
    def uniform(key, shape, fan_in):
        bound = 1.0 / jnp.sqrt(float(fan_in))
        return jax.random.uniform(key, shape, jnp.float32, -bound, bound)

    ks = jax.random.split(key, 10)
    return {
        "conv1_w": uniform(ks[0], (6, 3, 5, 5), 3 * 5 * 5),
        "conv1_b": uniform(ks[1], (6,), 3 * 5 * 5),
        "conv2_w": uniform(ks[2], (16, 6, 5, 5), 6 * 5 * 5),
        "conv2_b": uniform(ks[3], (16,), 6 * 5 * 5),
        "fc1_w": uniform(ks[4], (256, 400), 400),   # torch Linear: (out, in)
        "fc1_b": uniform(ks[5], (256,), 400),
        "fc2_w": uniform(ks[6], (128, 256), 256),
        "fc2_b": uniform(ks[7], (128,), 256),
        "fc3_w": uniform(ks[8], (100, 128), 128),
        "fc3_b": uniform(ks[9], (100,), 128),
    }


def _banded_conv_weight(w, in_pitch, out_pitch, n_out_cols, in_lanes):
    """Fused even|odd banded matrices.

    (row slab) @ W[di] computes conv output columns j = 2*j' (even) in lanes
    [out_pitch*j' + co] and j = 2*j'+1 (odd) in lanes [128 + out_pitch*j' + co].
    Tap di (the vertical offset) is handled by a row shift of the activation
    slab inside the kernel.  Input lane map: in_pitch * j_in + c.
    """
    cout, cin, _, _ = w.shape
    big = np.zeros((K, in_lanes, 2 * LANES), np.float32)
    jp = np.arange(n_out_cols)
    for parity in (0, 1):
        base = parity * LANES
        for di in range(K):
            for dj in range(K):
                for c in range(cin):
                    for co in range(cout):
                        big[di,
                            in_pitch * (2 * jp + parity + dj) + c,
                            base + out_pitch * jp + co] = w[co, c, di, dj]
    return big


def _banded_bias(b, out_pitch, n_out_cols):
    bb = np.zeros((1, LANES), np.float32)
    for jp in range(n_out_cols):
        bb[0, out_pitch * jp: out_pitch * jp + b.shape[0]] = b
    return bb


def pack_lenet_params(raw):
    """One-time repack (transpose / permute / pad / cast) into kernel layouts.

    Matmul weights are stored in bfloat16 (MXU-native on v5e/v6e/v7x); biases
    stay float32 (they are added in the f32 epilogues).
    """
    w1 = np.asarray(raw["conv1_w"]); b1 = np.asarray(raw["conv1_b"])
    w2 = np.asarray(raw["conv2_w"]); b2 = np.asarray(raw["conv2_b"])
    f1w = np.asarray(raw["fc1_w"]); f1b = np.asarray(raw["fc1_b"])
    f2w = np.asarray(raw["fc2_w"]); f2b = np.asarray(raw["fc2_b"])
    f3w = np.asarray(raw["fc3_w"]); f3b = np.asarray(raw["fc3_b"])

    packed_w = {
        # conv1: input lanes 3*j+c (96 wide), output lanes 6*j'+co, j' < 14
        "w1": _banded_conv_weight(w1, 3, 6, 14, 96),
        # conv2: input lanes 6*j'+c (<=83), output lanes 16*j''+co, j'' < 5
        "w2": _banded_conv_weight(w2, 6, 16, 5, LANES),
    }
    packed_b = {
        "b1": _banded_bias(b1, 6, 14),
        "b2": _banded_bias(b2, 16, 5),
    }

    # fc1: the kernel feeds 5 pooled rows (index i2) whose lanes are 16*j2+co.
    # torch flattens (16,5,5) as co*25 + i2*5 + j2 -> permute columns to match.
    wf1 = np.zeros((K, LANES, 256), np.float32)
    for i2 in range(5):
        for j2 in range(5):
            for co in range(16):
                wf1[i2, 16 * j2 + co, :] = f1w[:, co * 25 + i2 * 5 + j2]
    packed_w["wf1"] = wf1
    packed_b["bf1"] = f1b.reshape(1, 256).astype(np.float32)

    packed_w["wf2"] = np.ascontiguousarray(f2w.T)                    # (256, 128)
    packed_b["bf2"] = f2b.reshape(1, LANES).astype(np.float32)

    wf3 = np.zeros((LANES, LANES), np.float32)                       # pad 100 -> 128
    wf3[:, :100] = f3w.T
    bf3 = np.zeros((1, LANES), np.float32)
    bf3[0, :100] = f3b
    packed_w["wf3"] = wf3
    packed_b["bf3"] = bf3

    out = {k: jnp.asarray(v, dtype=jnp.bfloat16) for k, v in packed_w.items()}
    out.update({k: jnp.asarray(v, dtype=jnp.float32) for k, v in packed_b.items()})
    return out


# ----------------------------------------------------------------------------
# The single fused Pallas kernel
# ----------------------------------------------------------------------------

def _lenet_fused_kernel(x_ref, w1_ref, b1_ref, w2_ref, b2_ref,
                        wf1_ref, bf1_ref, wf2_ref, bf2_ref, wf3_ref, bf3_ref,
                        out_ref, sc, s1, s2, s3, s4, *, bn):
    f32, bf16 = jnp.float32, jnp.bfloat16
    R = bn * 32                       # active rows; per-image row pitch is 32

    # One-time tail hygiene.  Correctness does NOT depend on the tails (valid
    # rows never read tail rows); they are only kept finite & deterministic.
    # Scratch persists across grid steps and the tails are never written again.
    @pl.when(pl.program_id(0) == 0)
    def _():
        tail = jnp.zeros((8, LANES), f32)
        s1[pl.ds(R, 8), :] = tail
        s2[pl.ds(R, 8), :] = tail
        s3[pl.ds(R, 8), :] = tail

    # ---- conv1: 5 row-shifted banded matmuls, even|odd output columns fused
    #      into one 256-lane matmul per tap; accumulate in VMEM scratch. ----
    sc[...] = jnp.dot(x_ref[0, pl.ds(0, R), :].astype(bf16), w1_ref[0],
                      preferred_element_type=f32)
    for di in range(1, K):
        sc[...] += jnp.dot(x_ref[0, pl.ds(di, R), :].astype(bf16), w1_ref[di],
                           preferred_element_type=f32)
    # Horizontal half of pool1: even/odd halves share a lane map -> elementwise max.
    s1[pl.ds(0, R), :] = jnp.maximum(sc[:, pl.ds(0, LANES)],
                                     sc[:, pl.ds(LANES, LANES)])
    # Vertical half of pool1 + bias + ReLU (valid rows: n*32 + 2*i').
    s2[pl.ds(0, R), :] = jnp.maximum(
        jnp.maximum(s1[pl.ds(0, R), :], s1[pl.ds(1, R), :]) + b1_ref[...], 0.0)

    # ---- conv2 (+ horizontal half of pool2); pooled input rows have pitch 2. ----
    sc[...] = jnp.dot(s2[pl.ds(0, R), :].astype(bf16), w2_ref[0],
                      preferred_element_type=f32)
    for di in range(1, K):
        sc[...] += jnp.dot(s2[pl.ds(2 * di, R), :].astype(bf16), w2_ref[di],
                           preferred_element_type=f32)
    s3[pl.ds(0, R), :] = jnp.maximum(sc[:, pl.ds(0, LANES)],
                                     sc[:, pl.ds(LANES, LANES)])
    # Vertical half of pool2 + bias + ReLU (valid rows: n*32 + 4*i'').
    s4[...] = jnp.maximum(
        jnp.maximum(s3[pl.ds(0, R), :], s3[pl.ds(2, R), :]) + b2_ref[...], 0.0)

    # ---- fc1 -> fc2 -> fc3 on COMPACT (bn, .) slabs.  The 5 pooled rows of
    #      image n sit at rows n*32 + 4*i2 -> gather them with stride-32 reads
    #      so no work is spent on the 31-of-32 garbage rows. ----
    z = jnp.dot(s4[pl.ds(0, bn, stride=32), :].astype(bf16), wf1_ref[0],
                preferred_element_type=f32)
    for i2 in range(1, K):
        z = z + jnp.dot(s4[pl.ds(4 * i2, bn, stride=32), :].astype(bf16),
                        wf1_ref[i2], preferred_element_type=f32)
    z = jnp.maximum(z + bf1_ref[...], 0.0)                            # (bn, 256)
    z = jnp.maximum(jnp.dot(z.astype(bf16), wf2_ref[...],
                            preferred_element_type=f32) + bf2_ref[...], 0.0)
    z = jnp.dot(z.astype(bf16), wf3_ref[...],
                preferred_element_type=f32) + bf3_ref[...]            # (bn, 128)
    out_ref[0, :, :] = z                                              # one lane-dense row per image


# ----------------------------------------------------------------------------
# Forward wrapper
# ----------------------------------------------------------------------------

def _round_up(a, m):
    return ((a + m - 1) // m) * m


def _pack_input_rows(x, g, bn):
    """NCHW -> rows = (image, H) with pitch 32, lanes = W*C (= 96), +8 tail rows.

    Pure layout plumbing (one small XLA transpose + pad).  For repeated
    inference this can be hoisted out of the hot path by feeding pre-packed
    inputs to the pallas_call directly.
    """
    xr = jnp.transpose(x, (0, 2, 3, 1)).reshape(g, bn * 32, 96)
    return jnp.pad(xr, ((0, 0), (0, 8), (0, 0)))


def lenet_forward(packed, x, *, max_chunk=32):
    """x: (N, 3, 32, 32) float32 -> (logits (N, 100), shape_dict)."""
    n = x.shape[0]

    # Batch chunk: a multiple of 8 (clean sublane tiling for the compact fc
    # rows), capped by max_chunk; when the batch allows, keep >= 2 grid steps
    # so the "parallel" axis can feed both TensorCores on v7x.
    bn = min(max_chunk, _round_up(n, 8))
    if n > 8 and -(-n // bn) < 2:
        bn = max(8, _round_up(-(-n // 2), 8))
    g = -(-n // bn)
    npad = g * bn
    if npad != n:
        x = jnp.concatenate(
            [x, jnp.zeros((npad - n,) + x.shape[1:], x.dtype)], axis=0)

    x_rows = _pack_input_rows(x, g, bn)
    R = bn * 32
    rb = R + 8
    kern = functools.partial(_lenet_fused_kernel, bn=bn)

    out = pl.pallas_call(
        kern,
        out_shape=jax.ShapeDtypeStruct((g, bn, LANES), jnp.float32),
        grid=(g,),
        in_specs=[
            pl.BlockSpec((1, rb, 96), lambda i: (i, 0, 0)),             # input rows
            pl.BlockSpec((K, 96, 2 * LANES), lambda i: (0, 0, 0)),      # w1 (even|odd)
            pl.BlockSpec((1, LANES), lambda i: (0, 0)),                 # b1 (banded)
            pl.BlockSpec((K, LANES, 2 * LANES), lambda i: (0, 0, 0)),   # w2 (even|odd)
            pl.BlockSpec((1, LANES), lambda i: (0, 0)),                 # b2 (banded)
            pl.BlockSpec((K, LANES, 256), lambda i: (0, 0, 0)),         # fc1 (permuted)
            pl.BlockSpec((1, 256), lambda i: (0, 0)),                   # fc1 bias
            pl.BlockSpec((256, LANES), lambda i: (0, 0)),               # fc2
            pl.BlockSpec((1, LANES), lambda i: (0, 0)),                 # fc2 bias
            pl.BlockSpec((LANES, LANES), lambda i: (0, 0)),             # fc3 (padded)
            pl.BlockSpec((1, LANES), lambda i: (0, 0)),                 # fc3 bias
        ],
        out_specs=pl.BlockSpec((1, bn, LANES), lambda i: (i, 0, 0)),
        scratch_shapes=[
            pltpu.VMEM((R, 2 * LANES), jnp.float32),    # sc  conv accumulator
            pltpu.VMEM((rb, LANES), jnp.float32),       # s1  conv1 hpooled
            pltpu.VMEM((rb, LANES), jnp.float32),       # s2  pool1 output
            pltpu.VMEM((rb, LANES), jnp.float32),       # s3  conv2 hpooled
            pltpu.VMEM((R, LANES), jnp.float32),        # s4  pool2 output
        ],
        compiler_params=pltpu.CompilerParams(
            dimension_semantics=("parallel",),
            vmem_limit_bytes=32 * 1024 * 1024,
        ),
    )(x_rows, packed["w1"], packed["b1"], packed["w2"], packed["b2"],
      packed["wf1"], packed["bf1"], packed["wf2"], packed["bf2"],
      packed["wf3"], packed["bf3"])

    # One valid row per image, already compact; drop padded lanes 100..127.
    logits = out.reshape(g * bn, LANES)[:n, :100]

    shape_dict = {
        1: [n, 6, 14, 14],
        2: [n, 16, 5, 5],
        3: [n, 400],
        4: [n, 256],
        5: [n, 128],
        6: [n, 100],
    }
    return logits, shape_dict


# ----------------------------------------------------------------------------
# Pure-JAX reference (for a correctness spot-check)
# ----------------------------------------------------------------------------

def lenet_reference(raw, x):
    def conv_relu(x, w, b):
        y = jax.lax.conv_general_dilated(
            x, w, window_strides=(1, 1), padding="VALID",
            dimension_numbers=("NCHW", "OIHW", "NCHW"))
        return jax.nn.relu(y + b[None, :, None, None])

    def pool(x):
        return jax.lax.reduce_window(x, -jnp.inf, jax.lax.max,
                                     (1, 1, 2, 2), (1, 1, 2, 2), "VALID")

    x = pool(conv_relu(x, raw["conv1_w"], raw["conv1_b"]))
    x = pool(conv_relu(x, raw["conv2_w"], raw["conv2_b"]))
    x = x.reshape(-1, 400)
    x = jax.nn.relu(x @ raw["fc1_w"].T + raw["fc1_b"])
    x = jax.nn.relu(x @ raw["fc2_w"].T + raw["fc2_b"])
    return x @ raw["fc3_w"].T + raw["fc3_b"]


if __name__ == "__main__":
    key = jax.random.PRNGKey(0)
    pkey, xkey = jax.random.split(key)

    raw_params = init_lenet_params(pkey)
    packed_params = pack_lenet_params(raw_params)

    # LeNet requires 3x32x32 input for the flatten to 400 features; batch = 2.
    x = jax.random.normal(xkey, (2, 3, 32, 32), dtype=jnp.float32)

    out, shape_dict = lenet_forward(packed_params, x)
    out = jax.block_until_ready(out)

    assert out.shape == (2, 100), out.shape
    assert shape_dict[1] == [2, 6, 14, 14]
    assert shape_dict[2] == [2, 16, 5, 5]
    assert shape_dict[3] == [2, 400]
    assert shape_dict[4] == [2, 256]
    assert shape_dict[5] == [2, 128]
    assert shape_dict[6] == [2, 100]

    # Tolerance accounts for bf16 matmul operands (f32 accumulation).
    ref = jax.block_until_ready(lenet_reference(raw_params, x))
    err = float(jnp.max(jnp.abs(out - ref)))
    scale = float(jnp.max(jnp.abs(ref))) + 1e-6
    assert err <= 5e-2 * scale + 3e-3, (err, scale)

    print("KERNEL_OK")
</pallas_src>

<mosaic_0001>
module attributes {stable_mosaic.version = 11 : i64} {
  func.func @_lenet_fused_kernel(%arg0: i32, %arg1: memref<1x264x96xf32, #tpu.memory_space<vmem>>, %arg2: memref<5x96x256xbf16, #tpu.memory_space<vmem>>, %arg3: memref<1x128xf32, #tpu.memory_space<vmem>>, %arg4: memref<5x128x256xbf16, #tpu.memory_space<vmem>>, %arg5: memref<1x128xf32, #tpu.memory_space<vmem>>, %arg6: memref<5x128x256xbf16, #tpu.memory_space<vmem>>, %arg7: memref<1x256xf32, #tpu.memory_space<vmem>>, %arg8: memref<256x128xbf16, #tpu.memory_space<vmem>>, %arg9: memref<1x128xf32, #tpu.memory_space<vmem>>, %arg10: memref<128x128xbf16, #tpu.memory_space<vmem>>, %arg11: memref<1x128xf32, #tpu.memory_space<vmem>>, %arg12: memref<1x8x128xf32, #tpu.memory_space<vmem>>, %arg13: memref<256x256xf32, #tpu.memory_space<vmem>>, %arg14: memref<264x128xf32, #tpu.memory_space<vmem>>, %arg15: memref<264x128xf32, #tpu.memory_space<vmem>>, %arg16: memref<264x128xf32, #tpu.memory_space<vmem>>, %arg17: memref<256x128xf32, #tpu.memory_space<vmem>>) attributes {dimension_semantics = [#tpu.dimension_semantics<parallel>], iteration_bounds = array<i64: 1>, scalar_prefetch = 0 : i64, scratch_operands = 5 : i64, tpu.core_type = #tpu.core_type<tc>, window_params = [{transform_indices = @transform_0, window_bounds = array<i64: 1, 264, 96>}, {pipeline_mode = #tpu.pipeline_mode<synchronous>, transform_indices = @transform_1, window_bounds = array<i64: 5, 96, 256>}, {pipeline_mode = #tpu.pipeline_mode<synchronous>, transform_indices = @transform_2, window_bounds = array<i64: 1, 128>}, {pipeline_mode = #tpu.pipeline_mode<synchronous>, transform_indices = @transform_3, window_bounds = array<i64: 5, 128, 256>}, {pipeline_mode = #tpu.pipeline_mode<synchronous>, transform_indices = @transform_4, window_bounds = array<i64: 1, 128>}, {pipeline_mode = #tpu.pipeline_mode<synchronous>, transform_indices = @transform_5, window_bounds = array<i64: 5, 128, 256>}, {pipeline_mode = #tpu.pipeline_mode<synchronous>, transform_indices = @transform_6, window_bounds = array<i64: 1, 256>}, {pipeline_mode = #tpu.pipeline_mode<synchronous>, transform_indices = @transform_7, window_bounds = array<i64: 256, 128>}, {pipeline_mode = #tpu.pipeline_mode<synchronous>, transform_indices = @transform_8, window_bounds = array<i64: 1, 128>}, {pipeline_mode = #tpu.pipeline_mode<synchronous>, transform_indices = @transform_9, window_bounds = array<i64: 128, 128>}, {pipeline_mode = #tpu.pipeline_mode<synchronous>, transform_indices = @transform_10, window_bounds = array<i64: 1, 128>}, {transform_indices = @transform_11, window_bounds = array<i64: 1, 8, 128>}]} {
    %c0_i32 = arith.constant 0 : i32
    %0 = arith.cmpi eq, %arg0, %c0_i32 : i32
    %1 = arith.extui %0 : i1 to i32
    %c0_i32_0 = arith.constant 0 : i32
    %2 = arith.cmpi ne, %1, %c0_i32_0 : i32
    scf.if %2 {
      %cst_168 = arith.constant 0.000000e+00 : f32
      %161 = vector.broadcast %cst_168 : f32 to vector<8x128xf32>
      %c256 = arith.constant 256 : index
      %c0_169 = arith.constant 0 : index
      %162 = vector.load %arg14[%c256, %c0_169] : memref<264x128xf32, #tpu.memory_space<vmem>>, vector<8x128xf32>
      tpu.vector_store %arg14[%c256, %c0_169], %161 {strides = array<i32>} : memref<264x128xf32, #tpu.memory_space<vmem>>, vector<8x128xf32>,
      %c256_170 = arith.constant 256 : index
      %c0_171 = arith.constant 0 : index
      %163 = vector.load %arg15[%c256_170, %c0_171] : memref<264x128xf32, #tpu.memory_space<vmem>>, vector<8x128xf32>
      tpu.vector_store %arg15[%c256_170, %c0_171], %161 {strides = array<i32>} : memref<264x128xf32, #tpu.memory_space<vmem>>, vector<8x128xf32>,
      %c256_172 = arith.constant 256 : index
      %c0_173 = arith.constant 0 : index
      %164 = vector.load %arg16[%c256_172, %c0_173] : memref<264x128xf32, #tpu.memory_space<vmem>>, vector<8x128xf32>
      tpu.vector_store %arg16[%c256_172, %c0_173], %161 {strides = array<i32>} : memref<264x128xf32, #tpu.memory_space<vmem>>, vector<8x128xf32>,
    } else {
    }
    %c0 = arith.constant 0 : index
    %c0_1 = arith.constant 0 : index
    %c0_2 = arith.constant 0 : index
    %3 = vector.load %arg1[%c0, %c0_1, %c0_2] : memref<1x264x96xf32, #tpu.memory_space<vmem>>, vector<1x256x96xf32>
    %4 = vector.shape_cast %3 : vector<1x256x96xf32> to vector<256x96xf32>
    %5 = arith.truncf %4 : vector<256x96xf32> to vector<256x96xbf16>
    %c0_3 = arith.constant 0 : index
    %c0_4 = arith.constant 0 : index
    %c0_5 = arith.constant 0 : index
    %6 = vector.load %arg2[%c0_3, %c0_4, %c0_5] : memref<5x96x256xbf16, #tpu.memory_space<vmem>>, vector<1x96x256xbf16>
    %7 = vector.shape_cast %6 : vector<1x96x256xbf16> to vector<96x256xbf16>
    %cst = arith.constant dense<0.000000e+00> : vector<256x256xf32>
    %8 = tpu.matmul %5, %7, %cst {dimension_numbers = #tpu.dot_dimension_numbers<[1], [0], [0], [1], [0, 0, 1, 1], [], []>} : vector<256x96xbf16>, vector<96x256xbf16>, vector<256x256xf32> -> vector<256x256xf32>
    %c0_6 = arith.constant 0 : index
    %c0_7 = arith.constant 0 : index
    %9 = vector.load %arg13[%c0_6, %c0_7] : memref<256x256xf32, #tpu.memory_space<vmem>>, vector<256x256xf32>
    tpu.vector_store %arg13[%c0_6, %c0_7], %8 {strides = array<i32>} : memref<256x256xf32, #tpu.memory_space<vmem>>, vector<256x256xf32>,
    %c0_8 = arith.constant 0 : index
    %c0_9 = arith.constant 0 : index
    %10 = vector.load %arg13[%c0_8, %c0_9] : memref<256x256xf32, #tpu.memory_space<vmem>>, vector<256x256xf32>
    %c0_10 = arith.constant 0 : index
    %c1 = arith.constant 1 : index
    %c0_11 = arith.constant 0 : index
    %11 = vector.load %arg1[%c0_10, %c1, %c0_11] : memref<1x264x96xf32, #tpu.memory_space<vmem>>, vector<1x256x96xf32>
    %12 = vector.shape_cast %11 : vector<1x256x96xf32> to vector<256x96xf32>
    %13 = arith.truncf %12 : vector<256x96xf32> to vector<256x96xbf16>
    %c1_12 = arith.constant 1 : index
    %c0_13 = arith.constant 0 : index
    %c0_14 = arith.constant 0 : index
    %14 = vector.load %arg2[%c1_12, %c0_13, %c0_14] : memref<5x96x256xbf16, #tpu.memory_space<vmem>>, vector<1x96x256xbf16>
    %15 = vector.shape_cast %14 : vector<1x96x256xbf16> to vector<96x256xbf16>
    %cst_15 = arith.constant dense<0.000000e+00> : vector<256x256xf32>
    %16 = tpu.matmul %13, %15, %cst_15 {dimension_numbers = #tpu.dot_dimension_numbers<[1], [0], [0], [1], [0, 0, 1, 1], [], []>} : vector<256x96xbf16>, vector<96x256xbf16>, vector<256x256xf32> -> vector<256x256xf32>
    %17 = arith.addf %10, %16 : vector<256x256xf32>
    %c0_16 = arith.constant 0 : index
    %c0_17 = arith.constant 0 : index
    %18 = vector.load %arg13[%c0_16, %c0_17] : memref<256x256xf32, #tpu.memory_space<vmem>>, vector<256x256xf32>
    tpu.vector_store %arg13[%c0_16, %c0_17], %17 {strides = array<i32>} : memref<256x256xf32, #tpu.memory_space<vmem>>, vector<256x256xf32>,
    %c0_18 = arith.constant 0 : index
    %c0_19 = arith.constant 0 : index
    %19 = vector.load %arg13[%c0_18, %c0_19] : memref<256x256xf32, #tpu.memory_space<vmem>>, vector<256x256xf32>
    %c0_20 = arith.constant 0 : index
    %c2 = arith.constant 2 : index
    %c0_21 = arith.constant 0 : index
    %20 = vector.load %arg1[%c0_20, %c2, %c0_21] : memref<1x264x96xf32, #tpu.memory_space<vmem>>, vector<1x256x96xf32>
    %21 = vector.shape_cast %20 : vector<1x256x96xf32> to vector<256x96xf32>
    %22 = arith.truncf %21 : vector<256x96xf32> to vector<256x96xbf16>
    %c2_22 = arith.constant 2 : index
    %c0_23 = arith.constant 0 : index
    %c0_24 = arith.constant 0 : index
    %23 = vector.load %arg2[%c2_22, %c0_23, %c0_24] : memref<5x96x256xbf16, #tpu.memory_space<vmem>>, vector<1x96x256xbf16>
    %24 = vector.shape_cast %23 : vector<1x96x256xbf16> to vector<96x256xbf16>
    %cst_25 = arith.constant dense<0.000000e+00> : vector<256x256xf32>
    %25 = tpu.matmul %22, %24, %cst_25 {dimension_numbers = #tpu.dot_dimension_numbers<[1], [0], [0], [1], [0, 0, 1, 1], [], []>} : vector<256x96xbf16>, vector<96x256xbf16>, vector<256x256xf32> -> vector<256x256xf32>
    %26 = arith.addf %19, %25 : vector<256x256xf32>
    %c0_26 = arith.constant 0 : index
    %c0_27 = arith.constant 0 : index
    %27 = vector.load %arg13[%c0_26, %c0_27] : memref<256x256xf32, #tpu.memory_space<vmem>>, vector<256x256xf32>
    tpu.vector_store %arg13[%c0_26, %c0_27], %26 {strides = array<i32>} : memref<256x256xf32, #tpu.memory_space<vmem>>, vector<256x256xf32>,
    %c0_28 = arith.constant 0 : index
    %c0_29 = arith.constant 0 : index
    %28 = vector.load %arg13[%c0_28, %c0_29] : memref<256x256xf32, #tpu.memory_space<vmem>>, vector<256x256xf32>
    %c0_30 = arith.constant 0 : index
    %c3 = arith.constant 3 : index
    %c0_31 = arith.constant 0 : index
    %29 = vector.load %arg1[%c0_30, %c3, %c0_31] : memref<1x264x96xf32, #tpu.memory_space<vmem>>, vector<1x256x96xf32>
    %30 = vector.shape_cast %29 : vector<1x256x96xf32> to vector<256x96xf32>
    %31 = arith.truncf %30 : vector<256x96xf32> to vector<256x96xbf16>
    %c3_32 = arith.constant 3 : index
    %c0_33 = arith.constant 0 : index
    %c0_34 = arith.constant 0 : index
    %32 = vector.load %arg2[%c3_32, %c0_33, %c0_34] : memref<5x96x256xbf16, #tpu.memory_space<vmem>>, vector<1x96x256xbf16>
    %33 = vector.shape_cast %32 : vector<1x96x256xbf16> to vector<96x256xbf16>
    %cst_35 = arith.constant dense<0.000000e+00> : vector<256x256xf32>
    %34 = tpu.matmul %31, %33, %cst_35 {dimension_numbers = #tpu.dot_dimension_numbers<[1], [0], [0], [1], [0, 0, 1, 1], [], []>} : vector<256x96xbf16>, vector<96x256xbf16>, vector<256x256xf32> -> vector<256x256xf32>
    %35 = arith.addf %28, %34 : vector<256x256xf32>
    %c0_36 = arith.constant 0 : index
    %c0_37 = arith.constant 0 : index
    %36 = vector.load %arg13[%c0_36, %c0_37] : memref<256x256xf32, #tpu.memory_space<vmem>>, vector<256x256xf32>
    tpu.vector_store %arg13[%c0_36, %c0_37], %35 {strides = array<i32>} : memref<256x256xf32, #tpu.memory_space<vmem>>, vector<256x256xf32>,
    %c0_38 = arith.constant 0 : index
    %c0_39 = arith.constant 0 : index
    %37 = vector.load %arg13[%c0_38, %c0_39] : memref<256x256xf32, #tpu.memory_space<vmem>>, vector<256x256xf32>
    %c0_40 = arith.constant 0 : index
    %c4 = arith.constant 4 : index
    %c0_41 = arith.constant 0 : index
    %38 = vector.load %arg1[%c0_40, %c4, %c0_41] : memref<1x264x96xf32, #tpu.memory_space<vmem>>, vector<1x256x96xf32>
    %39 = vector.shape_cast %38 : vector<1x256x96xf32> to vector<256x96xf32>
    %40 = arith.truncf %39 : vector<256x96xf32> to vector<256x96xbf16>
    %c4_42 = arith.constant 4 : index
    %c0_43 = arith.constant 0 : index
    %c0_44 = arith.constant 0 : index
    %41 = vector.load %arg2[%c4_42, %c0_43, %c0_44] : memref<5x96x256xbf16, #tpu.memory_space<vmem>>, vector<1x96x256xbf16>
    %42 = vector.shape_cast %41 : vector<1x96x256xbf16> to vector<96x256xbf16>
    %cst_45 = arith.constant dense<0.000000e+00> : vector<256x256xf32>
    %43 = tpu.matmul %40, %42, %cst_45 {dimension_numbers = #tpu.dot_dimension_numbers<[1], [0], [0], [1], [0, 0, 1, 1], [], []>} : vector<256x96xbf16>, vector<96x256xbf16>, vector<256x256xf32> -> vector<256x256xf32>
    %44 = arith.addf %37, %43 : vector<256x256xf32>
    %c0_46 = arith.constant 0 : index
    %c0_47 = arith.constant 0 : index
    %45 = vector.load %arg13[%c0_46, %c0_47] : memref<256x256xf32, #tpu.memory_space<vmem>>, vector<256x256xf32>
    tpu.vector_store %arg13[%c0_46, %c0_47], %44 {strides = array<i32>} : memref<256x256xf32, #tpu.memory_space<vmem>>, vector<256x256xf32>,
    %c0_48 = arith.constant 0 : index
    %c0_49 = arith.constant 0 : index
    %46 = vector.load %arg13[%c0_48, %c0_49] : memref<256x256xf32, #tpu.memory_space<vmem>>, vector<256x128xf32>
    %c0_50 = arith.constant 0 : index
    %c128 = arith.constant 128 : index
    %47 = vector.load %arg13[%c0_50, %c128] : memref<256x256xf32, #tpu.memory_space<vmem>>, vector<256x128xf32>
    %48 = arith.maximumf %46, %47 : vector<256x128xf32>
    %c0_51 = arith.constant 0 : index
    %c0_52 = arith.constant 0 : index
    %49 = vector.load %arg14[%c0_51, %c0_52] : memref<264x128xf32, #tpu.memory_space<vmem>>, vector<256x128xf32>
    tpu.vector_store %arg14[%c0_51, %c0_52], %48 {strides = array<i32>} : memref<264x128xf32, #tpu.memory_space<vmem>>, vector<256x128xf32>,
    %c0_53 = arith.constant 0 : index
    %c0_54 = arith.constant 0 : index
    %50 = vector.load %arg14[%c0_53, %c0_54] : memref<264x128xf32, #tpu.memory_space<vmem>>, vector<256x128xf32>
    %c1_55 = arith.constant 1 : index
    %c0_56 = arith.constant 0 : index
    %51 = vector.load %arg14[%c1_55, %c0_56] : memref<264x128xf32, #tpu.memory_space<vmem>>, vector<256x128xf32>
    %52 = arith.maximumf %50, %51 : vector<256x128xf32>
    %c0_57 = arith.constant 0 : index
    %c0_58 = arith.constant 0 : index
    %53 = vector.load %arg3[%c0_57, %c0_58] : memref<1x128xf32, #tpu.memory_space<vmem>>, vector<1x128xf32>
    %54 = vector.broadcast %53 : vector<1x128xf32> to vector<256x128xf32>
    %55 = arith.addf %52, %54 : vector<256x128xf32>
    %cst_59 = arith.constant 0.000000e+00 : f32
    %56 = vector.broadcast %cst_59 : f32 to vector<256x128xf32>
    %57 = arith.maximumf %55, %56 : vector<256x128xf32>
    %c0_60 = arith.constant 0 : index
    %c0_61 = arith.constant 0 : index
    %58 = vector.load %arg15[%c0_60, %c0_61] : memref<264x128xf32, #tpu.memory_space<vmem>>, vector<256x128xf32>
    tpu.vector_store %arg15[%c0_60, %c0_61], %57 {strides = array<i32>} : memref<264x128xf32, #tpu.memory_space<vmem>>, vector<256x128xf32>,
    %c0_62 = arith.constant 0 : index
    %c0_63 = arith.constant 0 : index
    %59 = vector.load %arg15[%c0_62, %c0_63] : memref<264x128xf32, #tpu.memory_space<vmem>>, vector<256x128xf32>
    %60 = arith.truncf %59 : vector<256x128xf32> to vector<256x128xbf16>
    %c0_64 = arith.constant 0 : index
    %c0_65 = arith.constant 0 : index
    %c0_66 = arith.constant 0 : index
    %61 = vector.load %arg4[%c0_64, %c0_65, %c0_66] : memref<5x128x256xbf16, #tpu.memory_space<vmem>>, vector<1x128x256xbf16>
    %62 = vector.shape_cast %61 : vector<1x128x256xbf16> to vector<128x256xbf16>
    %cst_67 = arith.constant dense<0.000000e+00> : vector<256x256xf32>
    %63 = tpu.matmul %60, %62, %cst_67 {dimension_numbers = #tpu.dot_dimension_numbers<[1], [0], [0], [1], [0, 0, 1, 1], [], []>} : vector<256x128xbf16>, vector<128x256xbf16>, vector<256x256xf32> -> vector<256x256xf32>
    %c0_68 = arith.constant 0 : index
    %c0_69 = arith.constant 0 : index
    %64 = vector.load %arg13[%c0_68, %c0_69] : memref<256x256xf32, #tpu.memory_space<vmem>>, vector<256x256xf32>
    tpu.vector_store %arg13[%c0_68, %c0_69], %63 {strides = array<i32>} : memref<256x256xf32, #tpu.memory_space<vmem>>, vector<256x256xf32>,
    %c0_70 = arith.constant 0 : index
    %c0_71 = arith.constant 0 : index
    %65 = vector.load %arg13[%c0_70, %c0_71] : memref<256x256xf32, #tpu.memory_space<vmem>>, vector<256x256xf32>
    %c2_72 = arith.constant 2 : index
    %c0_73 = arith.constant 0 : index
    %66 = vector.load %arg15[%c2_72, %c0_73] : memref<264x128xf32, #tpu.memory_space<vmem>>, vector<256x128xf32>
    %67 = arith.truncf %66 : vector<256x128xf32> to vector<256x128xbf16>
    %c1_74 = arith.constant 1 : index
    %c0_75 = arith.constant 0 : index
    %c0_76 = arith.constant 0 : index
    %68 = vector.load %arg4[%c1_74, %c0_75, %c0_76] : memref<5x128x256xbf16, #tpu.memory_space<vmem>>, vector<1x128x256xbf16>
    %69 = vector.shape_cast %68 : vector<1x128x256xbf16> to vector<128x256xbf16>
    %cst_77 = arith.constant dense<0.000000e+00> : vector<256x256xf32>
    %70 = tpu.matmul %67, %69, %cst_77 {dimension_numbers = #tpu.dot_dimension_numbers<[1], [0], [0], [1], [0, 0, 1, 1], [], []>} : vector<256x128xbf16>, vector<128x256xbf16>, vector<256x256xf32> -> vector<256x256xf32>
    %71 = arith.addf %65, %70 : vector<256x256xf32>
    %c0_78 = arith.constant 0 : index
    %c0_79 = arith.constant 0 : index
    %72 = vector.load %arg13[%c0_78, %c0_79] : memref<256x256xf32, #tpu.memory_space<vmem>>, vector<256x256xf32>
    tpu.vector_store %arg13[%c0_78, %c0_79], %71 {strides = array<i32>} : memref<256x256xf32, #tpu.memory_space<vmem>>, vector<256x256xf32>,
    %c0_80 = arith.constant 0 : index
    %c0_81 = arith.constant 0 : index
    %73 = vector.load %arg13[%c0_80, %c0_81] : memref<256x256xf32, #tpu.memory_space<vmem>>, vector<256x256xf32>
    %c4_82 = arith.constant 4 : index
    %c0_83 = arith.constant 0 : index
    %74 = vector.load %arg15[%c4_82, %c0_83] : memref<264x128xf32, #tpu.memory_space<vmem>>, vector<256x128xf32>
    %75 = arith.truncf %74 : vector<256x128xf32> to vector<256x128xbf16>
    %c2_84 = arith.constant 2 : index
    %c0_85 = arith.constant 0 : index
    %c0_86 = arith.constant 0 : index
    %76 = vector.load %arg4[%c2_84, %c0_85, %c0_86] : memref<5x128x256xbf16, #tpu.memory_space<vmem>>, vector<1x128x256xbf16>
    %77 = vector.shape_cast %76 : vector<1x128x256xbf16> to vector<128x256xbf16>
    %cst_87 = arith.constant dense<0.000000e+00> : vector<256x256xf32>
    %78 = tpu.matmul %75, %77, %cst_87 {dimension_numbers = #tpu.dot_dimension_numbers<[1], [0], [0], [1], [0, 0, 1, 1], [], []>} : vector<256x128xbf16>, vector<128x256xbf16>, vector<256x256xf32> -> vector<256x256xf32>
    %79 = arith.addf %73, %78 : vector<256x256xf32>
    %c0_88 = arith.constant 0 : index
    %c0_89 = arith.constant 0 : index
    %80 = vector.load %arg13[%c0_88, %c0_89] : memref<256x256xf32, #tpu.memory_space<vmem>>, vector<256x256xf32>
    tpu.vector_store %arg13[%c0_88, %c0_89], %79 {strides = array<i32>} : memref<256x256xf32, #tpu.memory_space<vmem>>, vector<256x256xf32>,
    %c0_90 = arith.constant 0 : index
    %c0_91 = arith.constant 0 : index
    %81 = vector.load %arg13[%c0_90, %c0_91] : memref<256x256xf32, #tpu.memory_space<vmem>>, vector<256x256xf32>
    %c6 = arith.constant 6 : index
    %c0_92 = arith.constant 0 : index
    %82 = vector.load %arg15[%c6, %c0_92] : memref<264x128xf32, #tpu.memory_space<vmem>>, vector<256x128xf32>
    %83 = arith.truncf %82 : vector<256x128xf32> to vector<256x128xbf16>
    %c3_93 = arith.constant 3 : index
    %c0_94 = arith.constant 0 : index
    %c0_95 = arith.constant 0 : index
    %84 = vector.load %arg4[%c3_93, %c0_94, %c0_95] : memref<5x128x256xbf16, #tpu.memory_space<vmem>>, vector<1x128x256xbf16>
    %85 = vector.shape_cast %84 : vector<1x128x256xbf16> to vector<128x256xbf16>
    %cst_96 = arith.constant dense<0.000000e+00> : vector<256x256xf32>
    %86 = tpu.matmul %83, %85, %cst_96 {dimension_numbers = #tpu.dot_dimension_numbers<[1], [0], [0], [1], [0, 0, 1, 1], [], []>} : vector<256x128xbf16>, vector<128x256xbf16>, vector<256x256xf32> -> vector<256x256xf32>
    %87 = arith.addf %81, %86 : vector<256x256xf32>
    %c0_97 = arith.constant 0 : index
    %c0_98 = arith.constant 0 : index
    %88 = vector.load %arg13[%c0_97, %c0_98] : memref<256x256xf32, #tpu.memory_space<vmem>>, vector<256x256xf32>
    tpu.vector_store %arg13[%c0_97, %c0_98], %87 {strides = array<i32>} : memref<256x256xf32, #tpu.memory_space<vmem>>, vector<256x256xf32>,
    %c0_99 = arith.constant 0 : index
    %c0_100 = arith.constant 0 : index
    %89 = vector.load %arg13[%c0_99, %c0_100] : memref<256x256xf32, #tpu.memory_space<vmem>>, vector<256x256xf32>
    %c8 = arith.constant 8 : index
    %c0_101 = arith.constant 0 : index
    %90 = vector.load %arg15[%c8, %c0_101] : memref<264x128xf32, #tpu.memory_space<vmem>>, vector<256x128xf32>
    %91 = arith.truncf %90 : vector<256x128xf32> to vector<256x128xbf16>
    %c4_102 = arith.constant 4 : index
    %c0_103 = arith.constant 0 : index
    %c0_104 = arith.constant 0 : index
    %92 = vector.load %arg4[%c4_102, %c0_103, %c0_104] : memref<5x128x256xbf16, #tpu.memory_space<vmem>>, vector<1x128x256xbf16>
    %93 = vector.shape_cast %92 : vector<1x128x256xbf16> to vector<128x256xbf16>
    %cst_105 = arith.constant dense<0.000000e+00> : vector<256x256xf32>
    %94 = tpu.matmul %91, %93, %cst_105 {dimension_numbers = #tpu.dot_dimension_numbers<[1], [0], [0], [1], [0, 0, 1, 1], [], []>} : vector<256x128xbf16>, vector<128x256xbf16>, vector<256x256xf32> -> vector<256x256xf32>
    %95 = arith.addf %89, %94 : vector<256x256xf32>
    %c0_106 = arith.constant 0 : index
    %c0_107 = arith.constant 0 : index
    %96 = vector.load %arg13[%c0_106, %c0_107] : memref<256x256xf32, #tpu.memory_space<vmem>>, vector<256x256xf32>
    tpu.vector_store %arg13[%c0_106, %c0_107], %95 {strides = array<i32>} : memref<256x256xf32, #tpu.memory_space<vmem>>, vector<256x256xf32>,
    %c0_108 = arith.constant 0 : index
    %c0_109 = arith.constant 0 : index
    %97 = vector.load %arg13[%c0_108, %c0_109] : memref<256x256xf32, #tpu.memory_space<vmem>>, vector<256x128xf32>
    %c0_110 = arith.constant 0 : index
    %c128_111 = arith.constant 128 : index
    %98 = vector.load %arg13[%c0_110, %c128_111] : memref<256x256xf32, #tpu.memory_space<vmem>>, vector<256x128xf32>
    %99 = arith.maximumf %97, %98 : vector<256x128xf32>
    %c0_112 = arith.constant 0 : index
    %c0_113 = arith.constant 0 : index
    %100 = vector.load %arg16[%c0_112, %c0_113] : memref<264x128xf32, #tpu.memory_space<vmem>>, vector<256x128xf32>
    tpu.vector_store %arg16[%c0_112, %c0_113], %99 {strides = array<i32>} : memref<264x128xf32, #tpu.memory_space<vmem>>, vector<256x128xf32>,
    %c0_114 = arith.constant 0 : index
    %c0_115 = arith.constant 0 : index
    %101 = vector.load %arg16[%c0_114, %c0_115] : memref<264x128xf32, #tpu.memory_space<vmem>>, vector<256x128xf32>
    %c2_116 = arith.constant 2 : index
    %c0_117 = arith.constant 0 : index
    %102 = vector.load %arg16[%c2_116, %c0_117] : memref<264x128xf32, #tpu.memory_space<vmem>>, vector<256x128xf32>
    %103 = arith.maximumf %101, %102 : vector<256x128xf32>
    %c0_118 = arith.constant 0 : index
    %c0_119 = arith.constant 0 : index
    %104 = vector.load %arg5[%c0_118, %c0_119] : memref<1x128xf32, #tpu.memory_space<vmem>>, vector<1x128xf32>
    %105 = vector.broadcast %104 : vector<1x128xf32> to vector<256x128xf32>
    %106 = arith.addf %103, %105 : vector<256x128xf32>
    %cst_120 = arith.constant 0.000000e+00 : f32
    %107 = vector.broadcast %cst_120 : f32 to vector<256x128xf32>
    %108 = arith.maximumf %106, %107 : vector<256x128xf32>
    %c0_121 = arith.constant 0 : index
    %c0_122 = arith.constant 0 : index
    %109 = vector.load %arg17[%c0_121, %c0_122] : memref<256x128xf32, #tpu.memory_space<vmem>>, vector<256x128xf32>
    tpu.vector_store %arg17[%c0_121, %c0_122], %108 {strides = array<i32>} : memref<256x128xf32, #tpu.memory_space<vmem>>, vector<256x128xf32>,
    %c0_123 = arith.constant 0 : index
    %c0_124 = arith.constant 0 : index
    %110 = tpu.strided_load %arg17[%c0_123, %c0_124] {strides = array<i32: 32, 1>} : memref<256x128xf32, #tpu.memory_space<vmem>>, vector<8x128xf32>
    %111 = arith.truncf %110 : vector<8x128xf32> to vector<8x128xbf16>
    %c0_125 = arith.constant 0 : index
    %c0_126 = arith.constant 0 : index
    %c0_127 = arith.constant 0 : index
    %112 = vector.load %arg6[%c0_125, %c0_126, %c0_127] : memref<5x128x256xbf16, #tpu.memory_space<vmem>>, vector<1x128x256xbf16>
    %113 = vector.shape_cast %112 : vector<1x128x256xbf16> to vector<128x256xbf16>
    %cst_128 = arith.constant dense<0.000000e+00> : vector<8x256xf32>
    %114 = tpu.matmul %111, %113, %cst_128 {dimension_numbers = #tpu.dot_dimension_numbers<[1], [0], [0], [1], [0, 0, 1, 1], [], []>} : vector<8x128xbf16>, vector<128x256xbf16>, vector<8x256xf32> -> vector<8x256xf32>
    %c4_129 = arith.constant 4 : index
    %c0_130 = arith.constant 0 : index
    %115 = tpu.strided_load %arg17[%c4_129, %c0_130] {strides = array<i32: 32, 1>} : memref<256x128xf32, #tpu.memory_space<vmem>>, vector<8x128xf32>
    %116 = arith.truncf %115 : vector<8x128xf32> to vector<8x128xbf16>
    %c1_131 = arith.constant 1 : index
    %c0_132 = arith.constant 0 : index
    %c0_133 = arith.constant 0 : index
    %117 = vector.load %arg6[%c1_131, %c0_132, %c0_133] : memref<5x128x256xbf16, #tpu.memory_space<vmem>>, vector<1x128x256xbf16>
    %118 = vector.shape_cast %117 : vector<1x128x256xbf16> to vector<128x256xbf16>
    %cst_134 = arith.constant dense<0.000000e+00> : vector<8x256xf32>
    %119 = tpu.matmul %116, %118, %cst_134 {dimension_numbers = #tpu.dot_dimension_numbers<[1], [0], [0], [1], [0, 0, 1, 1], [], []>} : vector<8x128xbf16>, vector<128x256xbf16>, vector<8x256xf32> -> vector<8x256xf32>
    %120 = arith.addf %114, %119 : vector<8x256xf32>
    %c8_135 = arith.constant 8 : index
    %c0_136 = arith.constant 0 : index
    %121 = tpu.strided_load %arg17[%c8_135, %c0_136] {strides = array<i32: 32, 1>} : memref<256x128xf32, #tpu.memory_space<vmem>>, vector<8x128xf32>
    %122 = arith.truncf %121 : vector<8x128xf32> to vector<8x128xbf16>
    %c2_137 = arith.constant 2 : index
    %c0_138 = arith.constant 0 : index
    %c0_139 = arith.constant 0 : index
    %123 = vector.load %arg6[%c2_137, %c0_138, %c0_139] : memref<5x128x256xbf16, #tpu.memory_space<vmem>>, vector<1x128x256xbf16>
    %124 = vector.shape_cast %123 : vector<1x128x256xbf16> to vector<128x256xbf16>
    %cst_140 = arith.constant dense<0.000000e+00> : vector<8x256xf32>
    %125 = tpu.matmul %122, %124, %cst_140 {dimension_numbers = #tpu.dot_dimension_numbers<[1], [0], [0], [1], [0, 0, 1, 1], [], []>} : vector<8x128xbf16>, vector<128x256xbf16>, vector<8x256xf32> -> vector<8x256xf32>
    %126 = arith.addf %120, %125 : vector<8x256xf32>
    %c12 = arith.constant 12 : index
    %c0_141 = arith.constant 0 : index
    %127 = tpu.strided_load %arg17[%c12, %c0_141] {strides = array<i32: 32, 1>} : memref<256x128xf32, #tpu.memory_space<vmem>>, vector<8x128xf32>
    %128 = arith.truncf %127 : vector<8x128xf32> to vector<8x128xbf16>
    %c3_142 = arith.constant 3 : index
    %c0_143 = arith.constant 0 : index
    %c0_144 = arith.constant 0 : index
    %129 = vector.load %arg6[%c3_142, %c0_143, %c0_144] : memref<5x128x256xbf16, #tpu.memory_space<vmem>>, vector<1x128x256xbf16>
    %130 = vector.shape_cast %129 : vector<1x128x256xbf16> to vector<128x256xbf16>
    %cst_145 = arith.constant dense<0.000000e+00> : vector<8x256xf32>
    %131 = tpu.matmul %128, %130, %cst_145 {dimension_numbers = #tpu.dot_dimension_numbers<[1], [0], [0], [1], [0, 0, 1, 1], [], []>} : vector<8x128xbf16>, vector<128x256xbf16>, vector<8x256xf32> -> vector<8x256xf32>
    %132 = arith.addf %126, %131 : vector<8x256xf32>
    %c16 = arith.constant 16 : index
    %c0_146 = arith.constant 0 : index
    %133 = tpu.strided_load %arg17[%c16, %c0_146] {strides = array<i32: 32, 1>} : memref<256x128xf32, #tpu.memory_space<vmem>>, vector<8x128xf32>
    %134 = arith.truncf %133 : vector<8x128xf32> to vector<8x128xbf16>
    %c4_147 = arith.constant 4 : index
    %c0_148 = arith.constant 0 : index
    %c0_149 = arith.constant 0 : index
    %135 = vector.load %arg6[%c4_147, %c0_148, %c0_149] : memref<5x128x256xbf16, #tpu.memory_space<vmem>>, vector<1x128x256xbf16>
    %136 = vector.shape_cast %135 : vector<1x128x256xbf16> to vector<128x256xbf16>
    %cst_150 = arith.constant dense<0.000000e+00> : vector<8x256xf32>
    %137 = tpu.matmul %134, %136, %cst_150 {dimension_numbers = #tpu.dot_dimension_numbers<[1], [0], [0], [1], [0, 0, 1, 1], [], []>} : vector<8x128xbf16>, vector<128x256xbf16>, vector<8x256xf32> -> vector<8x256xf32>
    %138 = arith.addf %132, %137 : vector<8x256xf32>
    %c0_151 = arith.constant 0 : index
    %c0_152 = arith.constant 0 : index
    %139 = vector.load %arg7[%c0_151, %c0_152] : memref<1x256xf32, #tpu.memory_space<vmem>>, vector<1x256xf32>
    %140 = vector.broadcast %139 : vector<1x256xf32> to vector<8x256xf32>
    %141 = arith.addf %138, %140 : vector<8x256xf32>
    %cst_153 = arith.constant 0.000000e+00 : f32
    %142 = vector.broadcast %cst_153 : f32 to vector<8x256xf32>
    %143 = arith.maximumf %141, %142 : vector<8x256xf32>
    %144 = arith.truncf %143 : vector<8x256xf32> to vector<8x256xbf16>
    %c0_154 = arith.constant 0 : index
    %c0_155 = arith.constant 0 : index
    %145 = vector.load %arg8[%c0_154, %c0_155] : memref<256x128xbf16, #tpu.memory_space<vmem>>, vector<256x128xbf16>
    %cst_156 = arith.constant dense<0.000000e+00> : vector<8x128xf32>
    %146 = tpu.matmul %144, %145, %cst_156 {dimension_numbers = #tpu.dot_dimension_numbers<[1], [0], [0], [1], [0, 0, 1, 1], [], []>} : vector<8x256xbf16>, vector<256x128xbf16>, vector<8x128xf32> -> vector<8x128xf32>
    %c0_157 = arith.constant 0 : index
    %c0_158 = arith.constant 0 : index
    %147 = vector.load %arg9[%c0_157, %c0_158] : memref<1x128xf32, #tpu.memory_space<vmem>>, vector<1x128xf32>
    %148 = vector.broadcast %147 : vector<1x128xf32> to vector<8x128xf32>
    %149 = arith.addf %146, %148 : vector<8x128xf32>
    %cst_159 = arith.constant 0.000000e+00 : f32
    %150 = vector.broadcast %cst_159 : f32 to vector<8x128xf32>
    %151 = arith.maximumf %149, %150 : vector<8x128xf32>
    %152 = arith.truncf %151 : vector<8x128xf32> to vector<8x128xbf16>
    %c0_160 = arith.constant 0 : index
    %c0_161 = arith.constant 0 : index
    %153 = vector.load %arg10[%c0_160, %c0_161] : memref<128x128xbf16, #tpu.memory_space<vmem>>, vector<128x128xbf16>
    %cst_162 = arith.constant dense<0.000000e+00> : vector<8x128xf32>
    %154 = tpu.matmul %152, %153, %cst_162 {dimension_numbers = #tpu.dot_dimension_numbers<[1], [0], [0], [1], [0, 0, 1, 1], [], []>} : vector<8x128xbf16>, vector<128x128xbf16>, vector<8x128xf32> -> vector<8x128xf32>
    %c0_163 = arith.constant 0 : index
    %c0_164 = arith.constant 0 : index
    %155 = vector.load %arg11[%c0_163, %c0_164] : memref<1x128xf32, #tpu.memory_space<vmem>>, vector<1x128xf32>
    %156 = vector.broadcast %155 : vector<1x128xf32> to vector<8x128xf32>
    %157 = arith.addf %154, %156 : vector<8x128xf32>
    %c0_165 = arith.constant 0 : index
    %c0_166 = arith.constant 0 : index
    %c0_167 = arith.constant 0 : index
    %158 = vector.load %arg12[%c0_165, %c0_166, %c0_167] : memref<1x8x128xf32, #tpu.memory_space<vmem>>, vector<1x8x128xf32>
    %159 = vector.shape_cast %158 : vector<1x8x128xf32> to vector<8x128xf32>
    %160 = vector.shape_cast %157 : vector<8x128xf32> to vector<1x8x128xf32>
    tpu.vector_store %arg12[%c0_165, %c0_166, %c0_167], %160 {strides = array<i32>} : memref<1x8x128xf32, #tpu.memory_space<vmem>>, vector<1x8x128xf32>,
    return
  }
  func.func @transform_0(%arg0: i32) -> (i32, i32, i32) {
    %c0_i32 = arith.constant 0 : i32
    %c0_i32_0 = arith.constant 0 : i32
    %c0_i32_1 = arith.constant 0 : i32
    return %arg0, %c0_i32, %c0_i32_0 : i32, i32, i32
  }
  func.func @transform_1(%arg0: i32) -> (i32, i32, i32) {
    %c0_i32 = arith.constant 0 : i32
    %c0_i32_0 = arith.constant 0 : i32
    %c0_i32_1 = arith.constant 0 : i32
    %c0_i32_2 = arith.constant 0 : i32
    return %c0_i32, %c0_i32_0, %c0_i32_1 : i32, i32, i32
  }
  func.func @transform_2(%arg0: i32) -> (i32, i32) {
    %c0_i32 = arith.constant 0 : i32
    %c0_i32_0 = arith.constant 0 : i32
    %c0_i32_1 = arith.constant 0 : i32
    return %c0_i32, %c0_i32_0 : i32, i32
  }
  func.func @transform_3(%arg0: i32) -> (i32, i32, i32) {
    %c0_i32 = arith.constant 0 : i32
    %c0_i32_0 = arith.constant 0 : i32
    %c0_i32_1 = arith.constant 0 : i32
    %c0_i32_2 = arith.constant 0 : i32
    return %c0_i32, %c0_i32_0, %c0_i32_1 : i32, i32, i32
  }
  func.func @transform_4(%arg0: i32) -> (i32, i32) {
    %c0_i32 = arith.constant 0 : i32
    %c0_i32_0 = arith.constant 0 : i32
    %c0_i32_1 = arith.constant 0 : i32
    return %c0_i32, %c0_i32_0 : i32, i32
  }
  func.func @transform_5(%arg0: i32) -> (i32, i32, i32) {
    %c0_i32 = arith.constant 0 : i32
    %c0_i32_0 = arith.constant 0 : i32
    %c0_i32_1 = arith.constant 0 : i32
    %c0_i32_2 = arith.constant 0 : i32
    return %c0_i32, %c0_i32_0, %c0_i32_1 : i32, i32, i32
  }
  func.func @transform_6(%arg0: i32) -> (i32, i32) {
    %c0_i32 = arith.constant 0 : i32
    %c0_i32_0 = arith.constant 0 : i32
    %c0_i32_1 = arith.constant 0 : i32
    return %c0_i32, %c0_i32_0 : i32, i32
  }
  func.func @transform_7(%arg0: i32) -> (i32, i32) {
    %c0_i32 = arith.constant 0 : i32
    %c0_i32_0 = arith.constant 0 : i32
    %c0_i32_1 = arith.constant 0 : i32
    return %c0_i32, %c0_i32_0 : i32, i32
  }
  func.func @transform_8(%arg0: i32) -> (i32, i32) {
    %c0_i32 = arith.constant 0 : i32
    %c0_i32_0 = arith.constant 0 : i32
    %c0_i32_1 = arith.constant 0 : i32
    return %c0_i32, %c0_i32_0 : i32, i32
  }
  func.func @transform_9(%arg0: i32) -> (i32, i32) {
    %c0_i32 = arith.constant 0 : i32
    %c0_i32_0 = arith.constant 0 : i32
    %c0_i32_1 = arith.constant 0 : i32
    return %c0_i32, %c0_i32_0 : i32, i32
  }
  func.func @transform_10(%arg0: i32) -> (i32, i32) {
    %c0_i32 = arith.constant 0 : i32
    %c0_i32_0 = arith.constant 0 : i32
    %c0_i32_1 = arith.constant 0 : i32
    return %c0_i32, %c0_i32_0 : i32, i32
  }
  func.func @transform_11(%arg0: i32) -> (i32, i32, i32) {
    %c0_i32 = arith.constant 0 : i32
    %c0_i32_0 = arith.constant 0 : i32
    %c0_i32_1 = arith.constant 0 : i32
    return %arg0, %c0_i32, %c0_i32_0 : i32, i32, i32
  }
}

</mosaic_0001>

<bundles_post_ra>
// kernel: tpu_custom_call.1
= control target key start
LH: loop header
LB: loop body
LE: loop exit
PB: predicated region body
PF: predicated region fallthrough
CT: control target
= control target key end

     0   :  { %16 = vsyncpa [#allocation8], 0  ;;  %s10245_s0 = inlined_call_operand.hbm [shape: f32[1,264,96], index: 0, kind: input, shape index: {}]   ;;  %s10246_s1 = inlined_call_operand.hbm [shape: bf16[5,96,256], index: 1, kind: input, shape index: {}]   ;;  %s10247_s2 = inlined_call_operand.vmem [shape: f32[1,128], index: 2, kind: input, shape index: {}]   ;;  %s10248_s3 = inlined_call_operand.hbm [shape: bf16[5,128,256], index: 3, kind: input, shape index: {}]   ;;  %s10249_s4 = inlined_call_operand.hbm [shape: f32[1,128], index: 4, kind: input, shape index: {}]   ;;  %s10250_s5 = inlined_call_operand.hbm [shape: bf16[5,128,256], index: 5, kind: input, shape index: {}]   ;;  %s10251_s6 = inlined_call_operand.vmem [shape: f32[1,256], index: 6, kind: input, shape index: {}]   ;;  %s10252_s7 = inlined_call_operand.hbm [shape: bf16[256,128], index: 7, kind: input, shape index: {}]   ;;  %s10253_s8 = inlined_call_operand.vmem [shape: f32[1,128], index: 8, kind: input, shape index: {}]   ;;  %s10254_s9 = inlined_call_operand.hbm [shape: bf16[128,128], index: 9, kind: input, shape index: {}]   ;;  %s10255_s10 = inlined_call_operand.vmem [shape: f32[1,128], index: 10, kind: input, shape index: {}]   ;;  %s10256_s11 = inlined_call_operand.hbm [shape: f32[1,8,128], index: 11, kind: output, shape index: {}]  }
   0x1   :  { %17 = vsyncpa [#allocation11], 0 }
   0x2   :  { %18 = vsyncpa [#allocation14], 0 }
   0x3   :  { %19 = vsyncpa [#allocation17], 0 }
   0x4   :  { %20 = vsyncpa [#allocation9], 0  ;;  %s38_s19 = sshll.u32 %s10246_s1, 4  ;;  %s8401_s20 = smov [#allocation10]   ;;  %s39_s19 = int_to_ptr.hbm [resolvable:$true] %s38_s19 }
   0x5   :  { %s40_s21 = sshll.u32 %s8401_s20, 4  ;;  %s67_s24 = sshll.u32 %s10249_s4, 4  ;;  %s41_s21 = int_to_ptr.vmem [resolvable:$true] %s40_s21  ;;  %s68_s24 = int_to_ptr.hbm [resolvable:$true] %s67_s24 }
   0x6   :  { %s8402_s25 = smov 128   ;;  %s8403_s26 = smov 8  }
   0x7   :  { %46 = dma.hbm_to_vmem [thread:$0]  %s39_s19, 7680, %s41_s21, [#allocation11], %s8402_s25, %s8402_s25, %s8403_s26  }
   0x8   :  { %s8404_s27 = smov [#allocation13]   ;;  %s92_s1 = sshll.u32 %s10252_s7, 4  ;;  %s93_s1 = int_to_ptr.hbm [resolvable:$true] %s92_s1 }
   0x9   :  { %s69_s28 = sshll.u32 %s8404_s27, 4  ;;  %s8405_s12 = smov [#allocation16]   ;;  %s70_s28 = int_to_ptr.vmem [resolvable:$true] %s69_s28 }
   0xa   :  { %72 = dma.hbm_to_vmem [thread:$0]  %s68_s24, 16, %s70_s28, [#allocation14]  }
   0xb   :  { %s94_s13 = sshll.u32 %s8405_s12, 4  ;;  %s25_s15 = sshll.u32 %s10245_s0, 4  ;;  %s95_s13 = int_to_ptr.vmem [resolvable:$true] %s94_s13  ;;  %s26_s15 = int_to_ptr.hbm [resolvable:$true] %s25_s15 }
   0xc   :  { %s8406_s16 = smov 64   ;;  %s8407_s17 = smov 4  }
   0xd   :  { %100 = dma.hbm_to_vmem [thread:$0]  %s93_s1, 2048, %s95_s13, [#allocation17], %s8406_s16, %s8406_s16, %s8407_s17  }
   0xe   :  { %s8408_s18 = smov [#allocation7]   ;;  %s53_s7 = sshll.u32 %s10248_s3, 4  ;;  %s54_s7 = int_to_ptr.hbm [resolvable:$true] %s53_s7 }
   0xf   :  { %s27_s19 = sshll.u32 %s8408_s18, 4  ;;  %s77_s0 = sshll.u32 %s10250_s5, 4  ;;  %s28_s19 = int_to_ptr.vmem [resolvable:$true] %s27_s19  ;;  %s78_s0 = int_to_ptr.hbm [resolvable:$true] %s77_s0 }
  0x10   :  { %33 = dma.hbm_to_vmem [thread:$0]  %s26_s15, 4224, %s28_s19, [#allocation8], %s8402_s25, %s8402_s25, %s8403_s26  }
  0x11   :  { %s8409_s24 = smov [#allocation12]   ;;  %s8410_s28 = smov [#allocation15]  }
  0x12   :  { %s55_s27 = sshll.u32 %s8409_s24, 4  ;;  %s79_s3 = sshll.u32 %s8410_s28, 4  ;;  %s56_s27 = int_to_ptr.vmem [resolvable:$true] %s55_s27  ;;  %s80_s3 = int_to_ptr.vmem [resolvable:$true] %s79_s3 }
  0x13   :  { %61 = dma.hbm_to_vmem [thread:$0]  %s54_s7, 10240, %s56_s27, [#allocation11], %s8402_s25, %s8402_s25, %s8403_s26  }
  0x14   :  { %s107_s1 = sshll.u32 %s10254_s9, 4  ;;  %s8411_s5 = smov [#allocation18]   ;;  %s108_s1 = int_to_ptr.hbm [resolvable:$true] %s107_s1 }
  0x15   :  { %85 = dma.hbm_to_vmem [thread:$0]  %s78_s0, 10240, %s80_s3, [#allocation14], %s8402_s25, %s8402_s25, %s8403_s26  }
  0x16   :  { %s109_s12 = sshll.u32 %s8411_s5, 4  ;;  %s110_s12 = int_to_ptr.vmem [resolvable:$true] %s109_s12 }
  0x17   :  { %115 = dma.hbm_to_vmem [thread:$0]  %s108_s1, 1024, %s110_s12, [#allocation17], %s8406_s16, %s8406_s16, %s8407_s17  }
  0x18   :  { %8391 = dma.done.wait [#allocation8], 4224  }
  0x19   :  { %8392 = vsyncadd [#allocation8], 4294963072 }
  0x1a   :  { %8393 = dma.done.wait [#allocation11], 17920  }
  0x1b   :  { %8394 = vsyncadd [#allocation11], 4294949376 }
  0x1c   :  { %8395 = dma.done.wait [#allocation14], 10256  }
  0x1d   :  { %8396 = vsyncadd [#allocation14], 4294957040 }
  0x1e   :  { %8397 = dma.done.wait [#allocation17], 3072  }
  0x1f   :  { %8398 = vsyncadd [#allocation17], 4294964224  ;;  %v6835_v0 = vld [vmem:[#allocation10 + $0x50] sm:$0xf]  ;;  %v7940_v1 = vld [vmem:[#allocation10 + $0x54] sm:$0xf0] }
  0x20   :  { %v6915_v2 = vld [vmem:[#allocation10 + $0xb0] sm:$0xf]  ;;  %v6836_v3 = vor.u32 %v7940_v1, %v6835_v0  ;;  %v7952_v4 = vld [vmem:[#allocation10 + $0xb4] sm:$0xf0]  ;;  %v6827_v5 = vld [vmem:[#allocation10 + $0x40] sm:$0xf] }
  0x21   :  { %v7938_v6 = vld [vmem:[#allocation10 + $0x44] sm:$0xf0]  ;;  %v6916_v7 = vor.u32 %v7952_v4, %v6915_v2  ;;  %v6907_v8 = vld [vmem:[#allocation10 + $0xa0] sm:$0xf]  ;;  %v6819_v12 = vld [vmem:[#allocation10 + $0x30] sm:$0xf] }
  0x22   :  { %v7950_v9 = vld [vmem:[#allocation10 + $0xa4] sm:$0xf0]  ;;  %325 = vmatpush.bf16.msra.mxu0 %v6836_v3  ;;  %8173 = vmatpush.bf16.msra.mxu1 %v6836_v3  ;;  %v6828_v10 = vor.u32 %v7938_v6, %v6827_v5  ;;  %v7936_v13 = vld [vmem:[#allocation10 + $0x34] sm:$0xf0]  ;;  %v6899_v14 = vld [vmem:[#allocation10 + $0x90] sm:$0xf] }
  0x23   :  { %800 = vmatpush.bf16.msra.mxu2 %v6916_v7  ;;  %v6908_v11 = vor.u32 %v7950_v9, %v6907_v8  ;;  %v7948_v15 = vld [vmem:[#allocation10 + $0x94] sm:$0xf0]  ;;  %v7951_v16 = vld [vmem:[#allocation10 + $0xb4] sm:$0xf]  ;;  %v6917_v17 = vld [vmem:[#allocation10 + $0xb8] sm:$0xf0]  ;;  %v6820_v19 = vor.u32 %v7936_v13, %v6819_v12 }
  0x24   :  { %v6920_v18 = vor.u32 %v7951_v16, %v6917_v17  ;;  %v7949_v20 = vld [vmem:[#allocation10 + $0xa4] sm:$0xf]  ;;  %v6909_v21 = vld [vmem:[#allocation10 + $0xa8] sm:$0xf0]  ;;  %v6900_v22 = vor.u32 %v7948_v15, %v6899_v14  ;;  %v6811_v23 = vld [vmem:[#allocation10 + $0x20] sm:$0xf] }
  0x25   :  { %v7934_v24 = vld [vmem:[#allocation10 + $0x24] sm:$0xf0]  ;;  %v6912_v25 = vor.u32 %v7949_v20, %v6909_v21  ;;  %v6891_v26 = vld [vmem:[#allocation10 + $0x80] sm:$0xf]  ;;  %v6803_v29 = vld [vmem:[#allocation10 + $0x10] sm:$0xf] }
  0x26   :  { %326 = vmatpush.bf16.msra.mxu0 %v6828_v10  ;;  %8174 = vmatpush.bf16.msra.mxu1 %v6828_v10  ;;  %v7946_v27 = vld [vmem:[#allocation10 + $0x84] sm:$0xf0]  ;;  %v6812_v28 = vor.u32 %v7934_v24, %v6811_v23  ;;  %v7932_v30 = vld [vmem:[#allocation10 + $0x14] sm:$0xf0]  ;;  %v6883_v32 = vld [vmem:[#allocation10 + $0x70] sm:$0xf] }
  0x27   :  { %801 = vmatpush.bf16.msra.mxu2 %v6908_v11  ;;  %889 = vmatpush.bf16.msra.mxu3 %v6920_v18  ;;  %v6892_v31 = vor.u32 %v7946_v27, %v6891_v26  ;;  %v7947_v33 = vld [vmem:[#allocation10 + $0x94] sm:$0xf]  ;;  %v6901_v34 = vld [vmem:[#allocation10 + $0x98] sm:$0xf0]  ;;  %v7944_v35 = vld [vmem:[#allocation10 + $0x74] sm:$0xf0]  ;;  %v6804_v39 = vor.u32 %v7932_v30, %v6803_v29 }
  0x28   :  { %v6904_v36 = vor.u32 %v7947_v33, %v6901_v34  ;;  %v7945_v37 = vld [vmem:[#allocation10 + $0x84] sm:$0xf]  ;;  %v6893_v38 = vld [vmem:[#allocation10 + $0x88] sm:$0xf0]  ;;  %v6795_v40 = vld [vmem:[#allocation10] sm:$0xf]  ;;  %v6884_v42 = vor.u32 %v7944_v35, %v6883_v32 }
  0x29   :  { %v7930_v41 = vld [vmem:[#allocation10 + $0x4] sm:$0xf0]  ;;  %v6875_v43 = vld [vmem:[#allocation10 + $0x60] sm:$0xf]  ;;  %v7939_v45 = vld [vmem:[#allocation10 + $0x54] sm:$0xf]  ;;  %v6896_v46 = vor.u32 %v7945_v37, %v6893_v38 }
  0x2a   :  { %327 = vmatpush.bf16.msra.mxu0 %v6820_v19  ;;  %8175 = vmatpush.bf16.msra.mxu1 %v6820_v19  ;;  %v7942_v44 = vld [vmem:[#allocation10 + $0x64] sm:$0xf0]  ;;  %v6837_v47 = vld [vmem:[#allocation10 + $0x58] sm:$0xf0]  ;;  %v155_v49 = vld [vmem:[#allocation7 + $0x8] sm:$0xff]  ;;  %v6796_v53 = vor.u32 %v7930_v41, %v6795_v40  ;;  %vm274_vm0 = vcmask 785408  }
  0x2b   :  { %802 = vmatpush.bf16.msra.mxu2 %v6900_v22  ;;  %890 = vmatpush.bf16.msra.mxu3 %v6912_v25  ;;  %v154_v48 = vld [vmem:[#allocation7] sm:$0xff]  ;;  %v184_v50 = vld [vmem:[#allocation7 + $0xf0] sm:$0xff]  ;;  %v7943_v51 = vld [vmem:[#allocation10 + $0x74] sm:$0xf]  ;;  %v6876_v57 = vor.u32 %v7942_v44, %v6875_v43  ;;  %v6840_v58 = vor.u32 %v7939_v45, %v6837_v47  ;;  %s8413_s17 = smov [#allocation19]   ;;  %s6780_s21 = sshll.u32 %s10256_s11, 4  ;;  %s6781_s21 = int_to_ptr.hbm [resolvable:$true] %s6780_s21 }
  0x2c   :  { %v6885_v52 = vld [vmem:[#allocation10 + $0x78] sm:$0xf0]  ;;  %v185_v54 = vld [vmem:[#allocation7 + $0xf8] sm:$0xff]  ;;  %v630_v56 = vld [vmem:[#allocation7 + $0x9] sm:$0xff]  ;;  %v186_v62 = vpack.c.bf16 %v155_v49, %v154_v48  ;;  %s6778_s18 = sshll.u32 %s8413_s17, 4  ;;  %s6779_s18 = int_to_ptr.vmem [resolvable:$true] %s6778_s18 }
  0x2d   :  { %v629_v55 = vld [vmem:[#allocation7 + $0x1] sm:$0xff]  ;;  %v7937_v59 = vld [vmem:[#allocation10 + $0x44] sm:$0xf]  ;;  %v6829_v60 = vld [vmem:[#allocation10 + $0x48] sm:$0xf0]  ;;  %v6888_v61 = vor.u32 %v7943_v51, %v6885_v52  ;;  %v8507_v63 = vpack.c.bf16 %v185_v54, %v184_v50 }
  0x2e   :  { %328 = vmatpush.bf16.msra.mxu0 %v6812_v28  ;;  %8176 = vmatpush.bf16.msra.mxu1 %v6812_v28  ;;  %v7941_v0 = vld [vmem:[#allocation10 + $0x64] sm:$0xf]  ;;  %v6877_v1 = vld [vmem:[#allocation10 + $0x68] sm:$0xf0]  ;;  %v661_v2 = vpack.c.bf16 %v630_v56, %v629_v55  ;;  %v6832_v3 = vor.u32 %v7937_v59, %v6829_v60  ;;  %v7935_v4 = vld [vmem:[#allocation10 + $0x34] sm:$0xf] }
  0x2f   :  { %803 = vmatpush.bf16.msra.mxu2 %v6892_v31  ;;  %891 = vmatpush.bf16.msra.mxu3 %v6904_v36  ;;  %v6821_v5 = vld [vmem:[#allocation10 + $0x38] sm:$0xf0]  ;;  %v6880_v6 = vor.u32 %v7941_v0, %v6877_v1  ;;  %v7933_v8 = vld [vmem:[#allocation10 + $0x24] sm:$0xf]  ;;  %v6813_v9 = vld [vmem:[#allocation10 + $0x28] sm:$0xf0] }
  0x30   :  { %v6824_v7 = vor.u32 %v7935_v4, %v6821_v5  ;;  %v6995_v10 = vld [vmem:[#allocation10 + $0x110] sm:$0xf]  ;;  %v7964_v11 = vld [vmem:[#allocation10 + $0x114] sm:$0xf0]  ;;  %v6816_v12 = vor.u32 %v7933_v8, %v6813_v9  ;;  %v7931_v14 = vld [vmem:[#allocation10 + $0x14] sm:$0xf] }
  0x31   :  { %v6996_v13 = vor.u32 %v7964_v11, %v6995_v10  ;;  %v6805_v15 = vld [vmem:[#allocation10 + $0x18] sm:$0xf0]  ;;  %v156_v16 = vld [vmem:[#allocation7 + $0x10] sm:$0xff]  ;;  %v157_v17 = vld [vmem:[#allocation7 + $0x18] sm:$0xff] }
  0x32   :  { %329 = vmatpush.bf16.msra.mxu0 %v6804_v39  ;;  %8177 = vmatpush.bf16.msra.mxu1 %v6804_v39  ;;  %v6808_v18 = vor.u32 %v7931_v14, %v6805_v15  ;;  %v631_v19 = vld [vmem:[#allocation7 + $0x11] sm:$0xff]  ;;  %v632_v20 = vld [vmem:[#allocation7 + $0x19] sm:$0xff]  ;;  %v7929_v21 = vld [vmem:[#allocation10 + $0x4] sm:$0xf]  ;;  %v187_v23 = vpack.c.bf16 %v157_v17, %v156_v16 }
  0x33   :  { %804 = vmatpush.bf16.msra.mxu2 %v6884_v42  ;;  %892 = vmatpush.bf16.msra.mxu3 %v6896_v46  ;;  %v6797_v22 = vld [vmem:[#allocation10 + $0x8] sm:$0xf0]  ;;  %v7963_v24 = vld [vmem:[#allocation10 + $0x114] sm:$0xf]  ;;  %v6997_v25 = vld [vmem:[#allocation10 + $0x118] sm:$0xf0]  ;;  %v662_v26 = vpack.c.bf16 %v632_v20, %v631_v19 }
  0x34   :  { %v6800_v27 = vor.u32 %v7929_v21, %v6797_v22  ;;  %v7000_v28 = vor.u32 %v7963_v24, %v6997_v25  ;;  %v158_v29 = vld [vmem:[#allocation7 + $0x20] sm:$0xff]  ;;  %v159_v30 = vld [vmem:[#allocation7 + $0x28] sm:$0xff]  ;;  %v6989_v36 = vld [vmem:[#allocation10 + $0x108] sm:$0xf0] }
  0x35   :  { %v633_v31 = vld [vmem:[#allocation7 + $0x21] sm:$0xff]  ;;  %v634_v32 = vld [vmem:[#allocation7 + $0x29] sm:$0xff]  ;;  %v188_v33 = vpack.c.bf16 %v159_v30, %v158_v29  ;;  %v161_v42 = vld [vmem:[#allocation7 + $0x38] sm:$0xff] }
  0x36   :  { %330 = vmatpush.bf16.msra.mxu0 %v6796_v53  ;;  %8178 = vmatpush.bf16.msra.mxu1 %v6796_v53  ;;  %v663_v34 = vpack.c.bf16 %v634_v32, %v633_v31  ;;  %v7961_v35 = vld [vmem:[#allocation10 + $0x104] sm:$0xf]  ;;  %v6987_v38 = vld [vmem:[#allocation10 + $0x100] sm:$0xf]  ;;  %v7962_v39 = vld [vmem:[#allocation10 + $0x104] sm:$0xf0] }
  0x37   :  { %805 = vmatpush.bf16.msra.mxu2 %v6876_v57  ;;  %893 = vmatpush.bf16.msra.mxu3 %v6888_v61  ;;  %v6992_v37 = vor.u32 %v7961_v35, %v6989_v36  ;;  %v6988_v40 = vor.u32 %v7962_v39, %v6987_v38  ;;  %v160_v41 = vld [vmem:[#allocation7 + $0x30] sm:$0xff]  ;;  %v636_v44 = vld [vmem:[#allocation7 + $0x39] sm:$0xff]  ;;  %v163_v48 = vld [vmem:[#allocation7 + $0x48] sm:$0xff] }
  0x38   :  { %v635_v43 = vld [vmem:[#allocation7 + $0x31] sm:$0xff]  ;;  %v189_v45 = vpack.c.bf16 %v161_v42, %v160_v41  ;;  %v162_v47 = vld [vmem:[#allocation7 + $0x40] sm:$0xff]  ;;  %v638_v50 = vld [vmem:[#allocation7 + $0x49] sm:$0xff] }
  0x39   :  { %6841 = vmatmul.msk.bf16.vlgmr.msra.gmra.mxu0 %vm274_vm0, %v186_v62  ;;  %6856 = vmatmul.msk.bf16.vlgmr.msra.gmra.mxu1 %vm274_vm0, %v8507_v63  ;;  %v664_v46 = vpack.c.bf16 %v636_v44, %v635_v43  ;;  %v637_v49 = vld [vmem:[#allocation7 + $0x41] sm:$0xff]  ;;  %v190_v51 = vpack.c.bf16 %v163_v48, %v162_v47  ;;  %v7959_v53 = vld [vmem:[#allocation10 + $0xf4] sm:$0xf]  ;;  %v164_v56 = vld [vmem:[#allocation7 + $0x50] sm:$0xff] }
  0x3a   :  { %414 = vmatpush.bf16.msrb.mxu1 %v6840_v58  ;;  %6921 = vmatmul.msk.bf16.vlgmr.msra.gmra.mxu2 %vm274_vm0, %v661_v2  ;;  %v665_v52 = vpack.c.bf16 %v638_v50, %v637_v49  ;;  %v6981_v54 = vld [vmem:[#allocation10 + $0xf8] sm:$0xf0]  ;;  %v165_v57 = vld [vmem:[#allocation7 + $0x58] sm:$0xff]  ;;  %v7960_v0 = vld [vmem:[#allocation10 + $0xf4] sm:$0xf0] }
  0x3b   :  { %894 = vmatpush.bf16.msra.mxu3 %v6880_v6  ;;  %1339 = vmatpush.bf16.msrb.mxu0 %v6996_v13  ;;  %v6984_v55 = vor.u32 %v7959_v53, %v6981_v54  ;;  %v639_v58 = vld [vmem:[#allocation7 + $0x51] sm:$0xff]  ;;  %v640_v59 = vld [vmem:[#allocation7 + $0x59] sm:$0xff]  ;;  %v191_v60 = vpack.c.bf16 %v165_v57, %v164_v56  ;;  %v641_v4 = vld [vmem:[#allocation7 + $0x61] sm:$0xff] }
  0x3c   :  { %v666_v61 = vpack.c.bf16 %v640_v59, %v639_v58  ;;  %v642_v5 = vld [vmem:[#allocation7 + $0x69] sm:$0xff]  ;;  %v169_v9 = vld [vmem:[#allocation7 + $0x78] sm:$0xff]  ;;  %v6973_v15 = vld [vmem:[#allocation10 + $0xe8] sm:$0xf0] }
  0x3d   :  { %v168_v8 = vld [vmem:[#allocation7 + $0x70] sm:$0xff]  ;;  %v644_v11 = vld [vmem:[#allocation7 + $0x79] sm:$0xff]  ;;  %v7957_v14 = vld [vmem:[#allocation10 + $0xe4] sm:$0xf] }
  0x3e   :  { %415 = vmatpush.bf16.msrb.mxu1 %v6832_v3  ;;  %6937 = vmatmul.msk.bf16.vlgmr.msra.gmra.mxu3 %vm274_vm0, %v661_v2  ;;  %v166_v2 = vld [vmem:[#allocation7 + $0x60] sm:$0xff]  ;;  %v167_v3 = vld [vmem:[#allocation7 + $0x68] sm:$0xff]  ;;  %v643_v10 = vld [vmem:[#allocation7 + $0x71] sm:$0xff]  ;;  %v6976_v16 = vor.u32 %v7957_v14, %v6973_v15 }
  0x3f   :  { %1340 = vmatpush.bf16.msrb.mxu0 %v6988_v40  ;;  %v192_v6 = vpack.c.bf16 %v167_v3, %v166_v2  ;;  %v668_v13 = vpack.c.bf16 %v644_v11, %v643_v10  ;;  %v170_v17 = vld [vmem:[#allocation7 + $0x80] sm:$0xff]  ;;  %v646_v20 = vld [vmem:[#allocation7 + $0x89] sm:$0xff]  ;;  %v173_v32 = vld [vmem:[#allocation7 + $0x98] sm:$0xff] }
  0x40   :  { %v645_v19 = vld [vmem:[#allocation7 + $0x81] sm:$0xff]  ;;  %v7958_v25 = vld [vmem:[#allocation10 + $0xe4] sm:$0xf0]  ;;  %v648_v36 = vld [vmem:[#allocation7 + $0x99] sm:$0xff] }
  0x41   :  { %v6971_v24 = vld [vmem:[#allocation10 + $0xe0] sm:$0xf]  ;;  %v172_v31 = vld [vmem:[#allocation7 + $0x90] sm:$0xff]  ;;  %v174_v48 = vld [vmem:[#allocation7 + $0xa0] sm:$0xff] }
  0x42   :  { %416 = vmatpush.bf16.msrb.mxu1 %v6824_v7  ;;  %v667_v7 = vpack.c.bf16 %v642_v5, %v641_v4  ;;  %v647_v35 = vld [vmem:[#allocation7 + $0x91] sm:$0xff]  ;;  %v195_v38 = vpack.c.bf16 %v173_v32, %v172_v31  ;;  %v175_v49 = vld [vmem:[#allocation7 + $0xa8] sm:$0xff]  ;;  %v7955_v4 = vld [vmem:[#allocation10 + $0xd4] sm:$0xf] }
  0x43   :  { %v670_v41 = vpack.c.bf16 %v648_v36, %v647_v35  ;;  %v650_v53 = vld [vmem:[#allocation7 + $0xa9] sm:$0xff]  ;;  %v196_v56 = vpack.c.bf16 %v175_v49, %v174_v48  ;;  %v6965_v5 = vld [vmem:[#allocation10 + $0xd8] sm:$0xf0] }
  0x44   :  { %v176_v15 = vld [vmem:[#allocation7 + $0xb0] sm:$0xff]  ;;  %v178_v36 = vld [vmem:[#allocation7 + $0xc0] sm:$0xff] }
  0x46   :  { %417 = vmatpush.bf16.msrb.mxu1 %v6816_v12  ;;  %v193_v12 = vpack.c.bf16 %v169_v9, %v168_v8 }
  0x49   :  { %6842 = vmatmul.msk.bf16.gmra.mxu0 %vm274_vm0, %v187_v23 }
  0x4a   :  { %418 = vmatpush.bf16.msrb.mxu1 %v6808_v18  ;;  %6922 = vmatmul.msk.bf16.gmra.mxu2 %vm274_vm0, %v662_v26  ;;  %v171_v18 = vld [vmem:[#allocation7 + $0x88] sm:$0xff] }
  0x4b   :  { %v194_v21 = vpack.c.bf16 %v171_v18, %v170_v17 }
  0x4e   :  { %419 = vmatpush.bf16.msrb.mxu1 %v6800_v27  ;;  %6938 = vmatmul.msk.bf16.gmra.mxu3 %vm274_vm0, %v662_v26  ;;  %v6972_v26 = vor.u32 %v7958_v25, %v6971_v24 }
  0x51   :  { %6857 = vmatmul.msk.bf16.vlgmr.msrb.gmra.mxu1 %vm274_vm0, %v186_v62  ;;  %v6979_v62 = vld [vmem:[#allocation10 + $0xf0] sm:$0xf] }
  0x52   :  { %1428 = vmatpush.bf16.msra.mxu1 %v7000_v28  ;;  %v6980_v1 = vor.u32 %v7960_v0, %v6979_v62  ;;  %v7975_v62 = vld [vmem:[#allocation10 + $0x174] sm:$0xf] }
  0x54   :  { %1341 = vmatpush.bf16.msrb.mxu0 %v6980_v1  ;;  %v7077_v1 = vld [vmem:[#allocation10 + $0x178] sm:$0xf0] }
  0x55   :  { %v7080_v2 = vor.u32 %v7975_v62, %v7077_v1  ;;  %v656_v1 = vld [vmem:[#allocation7 + $0xd9] sm:$0xff] }
  0x56   :  { %1429 = vmatpush.bf16.msra.mxu1 %v6992_v37 }
  0x57   :  { %1967 = vmatpush.bf16.msrb.mxu3 %v7080_v2 }
  0x58   :  { %1342 = vmatpush.bf16.msrb.mxu0 %v6972_v26 }
  0x59   :  { %6843 = vmatmul.msk.bf16.gmra.mxu0 %vm274_vm0, %v188_v33 }
  0x5a   :  { %6923 = vmatmul.msk.bf16.gmra.mxu2 %vm274_vm0, %v663_v34  ;;  %1430 = vmatpush.bf16.msra.mxu1 %v6984_v55 }
  0x5e   :  { %6939 = vmatmul.msk.bf16.gmra.mxu3 %vm274_vm0, %v663_v34  ;;  %1431 = vmatpush.bf16.msra.mxu1 %v6976_v16  ;;  %v177_v16 = vld [vmem:[#allocation7 + $0xb8] sm:$0xff] }
  0x61   :  { %6858 = vmatmul.msk.bf16.gmra.mxu1 %vm274_vm0, %v187_v23  ;;  %v669_v23 = vpack.c.bf16 %v646_v20, %v645_v19  ;;  %v651_v19 = vld [vmem:[#allocation7 + $0xb1] sm:$0xff]  ;;  %v652_v20 = vld [vmem:[#allocation7 + $0xb9] sm:$0xff] }
  0x62   :  { %v672_v26 = vpack.c.bf16 %v652_v20, %v651_v19  ;;  %v6957_v19 = vld [vmem:[#allocation10 + $0xc8] sm:$0xf0] }
  0x69   :  { %6844 = vmatmul.msk.bf16.gmra.mxu0 %vm274_vm0, %v189_v45 }
  0x6a   :  { %6924 = vmatmul.msk.bf16.gmra.mxu2 %vm274_vm0, %v664_v46 }
  0x6e   :  { %6940 = vmatmul.msk.bf16.gmra.mxu3 %vm274_vm0, %v664_v46 }
  0x71   :  { %6859 = vmatmul.msk.bf16.gmra.mxu1 %vm274_vm0, %v188_v33 }
  0x79   :  { %6845 = vmatmul.msk.bf16.gmra.mxu0 %vm274_vm0, %v190_v51 }
  0x7a   :  { %6925 = vmatmul.msk.bf16.gmra.mxu2 %vm274_vm0, %v665_v52 }
  0x7e   :  { %6941 = vmatmul.msk.bf16.gmra.mxu3 %vm274_vm0, %v665_v52  ;;  %v649_v52 = vld [vmem:[#allocation7 + $0xa1] sm:$0xff] }
  0x7f   :  { %v671_v59 = vpack.c.bf16 %v650_v53, %v649_v52 }
  0x81   :  { %6860 = vmatmul.msk.bf16.gmra.mxu1 %vm274_vm0, %v189_v45 }
  0x89   :  { %6846 = vmatmul.msk.bf16.gmra.mxu0 %vm274_vm0, %v191_v60 }
  0x8a   :  { %6926 = vmatmul.msk.bf16.gmra.mxu2 %vm274_vm0, %v666_v61 }
  0x8e   :  { %6942 = vmatmul.msk.bf16.gmra.mxu3 %vm274_vm0, %v666_v61  ;;  %v7976_v61 = vld [vmem:[#allocation10 + $0x174] sm:$0xf0] }
  0x91   :  { %6861 = vmatmul.msk.bf16.gmra.mxu1 %vm274_vm0, %v190_v51 }
  0x99   :  { %6847 = vmatmul.msk.bf16.gmra.mxu0 %vm274_vm0, %v192_v6 }
  0x9a   :  { %6927 = vmatmul.msk.bf16.gmra.mxu2 %vm274_vm0, %v667_v7 }
  0x9e   :  { %6943 = vmatmul.msk.bf16.gmra.mxu3 %vm274_vm0, %v667_v7  ;;  %v6968_v7 = vor.u32 %v7955_v4, %v6965_v5  ;;  %v7974_v4 = vld [vmem:[#allocation10 + $0x164] sm:$0xf0]  ;;  %v7973_v5 = vld [vmem:[#allocation10 + $0x164] sm:$0xf] }
  0xa0   :  { %1432 = vmatpush.bf16.msra.mxu1 %v6968_v7 }
  0xa1   :  { %6862 = vmatmul.msk.bf16.gmra.mxu1 %vm274_vm0, %v191_v60  ;;  %v7075_v60 = vld [vmem:[#allocation10 + $0x170] sm:$0xf] }
  0xa2   :  { %v7076_v0 = vor.u32 %v7976_v61, %v7075_v60  ;;  %v181_v60 = vld [vmem:[#allocation7 + $0xd8] sm:$0xff] }
  0xa4   :  { %1878 = vmatpush.bf16.msrb.mxu2 %v7076_v0  ;;  %v655_v0 = vld [vmem:[#allocation7 + $0xd1] sm:$0xff] }
  0xa9   :  { %6848 = vmatmul.msk.bf16.gmra.mxu0 %vm274_vm0, %v193_v12 }
  0xaa   :  { %6928 = vmatmul.msk.bf16.gmra.mxu2 %vm274_vm0, %v668_v13 }
  0xae   :  { %6944 = vmatmul.msk.bf16.gmra.mxu3 %vm274_vm0, %v668_v13  ;;  %v7956_v13 = vld [vmem:[#allocation10 + $0xd4] sm:$0xf0] }
  0xb1   :  { %6863 = vmatmul.msk.bf16.gmra.mxu1 %vm274_vm0, %v192_v6 }
  0xb6   :  { %v332_v22 = vpop.f32.mrf.mxu0  ;;  %v8542_v27 = vpop.f32.mrf.mxu1 }
  0xb7   :  { %10257 = vst [vmem:[#allocation25_spill] sm:$0xff] %v8542_v27 }
  0xb9   :  { %6849 = vmatmul.msk.bf16.gmra.mxu0 %vm274_vm0, %v194_v21 }
  0xba   :  { %6929 = vmatmul.msk.bf16.gmra.mxu2 %vm274_vm0, %v669_v23 }
  0xbd   :  { %v807_v28 = vpop.f32.mrf.mxu2 }
  0xbe   :  { %v8546_v29 = vadd.f32 %v807_v28, %v332_v22  ;;  %v334_v30 = vpop.f32.mrf.mxu0  ;;  %6945 = vmatmul.msk.bf16.gmra.mxu3 %vm274_vm0, %v669_v23  ;;  %v8550_v34 = vpop.f32.mrf.mxu1  ;;  %v197_v23 = vpack.c.bf16 %v177_v16, %v176_v15  ;;  %v674_v16 = vpack.c.bf16 %v656_v1, %v655_v0 }
  0xbf   :  { %10258 = vst [vmem:[#allocation26_spill] sm:$0xff] %v8550_v34 }
  0xc1   :  { %6864 = vmatmul.msk.bf16.gmra.mxu1 %vm274_vm0, %v193_v12  ;;  %v896_v33 = vpop.f32.mrf.mxu3  ;;  %v6963_v12 = vld [vmem:[#allocation10 + $0xd0] sm:$0xf] }
  0xc2   :  { %v6964_v14 = vor.u32 %v7956_v13, %v6963_v12  ;;  %v6955_v12 = vld [vmem:[#allocation10 + $0xc0] sm:$0xf]  ;;  %v7954_v13 = vld [vmem:[#allocation10 + $0xc4] sm:$0xf0] }
  0xc3   :  { %v6956_v20 = vor.u32 %v7954_v13, %v6955_v12 }
  0xc4   :  { %1343 = vmatpush.bf16.msrb.mxu0 %v6964_v14 }
  0xc5   :  { %v809_v37 = vpop.f32.mrf.mxu2 }
  0xc6   :  { %v8552_v39 = vadd.f32 %v809_v37, %v334_v30  ;;  %v337_v40 = vpop.f32.mrf.mxu0  ;;  %v179_v37 = vld [vmem:[#allocation7 + $0xc8] sm:$0xff] }
  0xc8   :  { %1344 = vmatpush.bf16.msrb.mxu0 %v6956_v20 }
  0xc9   :  { %6850 = vmatmul.msk.bf16.gmra.mxu0 %vm274_vm0, %v195_v38  ;;  %v898_v42 = vpop.f32.mrf.mxu3 }
  0xca   :  { %6930 = vmatmul.msk.bf16.gmra.mxu2 %vm274_vm0, %v670_v41 }
  0xcd   :  { %v812_v45 = vpop.f32.mrf.mxu2 }
  0xce   :  { %v421_v43 = vpop.f32.mrf.mxu1  ;;  %v8558_v46 = vadd.f32 %v812_v45, %v337_v40  ;;  %v339_v47 = vpop.f32.mrf.mxu0  ;;  %6946 = vmatmul.msk.bf16.gmra.mxu3 %vm274_vm0, %v670_v41  ;;  %v653_v41 = vld [vmem:[#allocation7 + $0xc1] sm:$0xff] }
  0xcf   :  { %v8556_v44 = vadd.f32 %v896_v33, %v421_v43 }
  0xd1   :  { %6865 = vmatmul.msk.bf16.gmra.mxu1 %vm274_vm0, %v194_v21  ;;  %v901_v50 = vpop.f32.mrf.mxu3 }
  0xd5   :  { %v814_v55 = vpop.f32.mrf.mxu2 }
  0xd6   :  { %v423_v51 = vpop.f32.mrf.mxu1  ;;  %v8564_v57 = vadd.f32 %v814_v55, %v339_v47  ;;  %v342_v58 = vpop.f32.mrf.mxu0  ;;  %v198_v47 = vpack.c.bf16 %v179_v37, %v178_v36  ;;  %v7970_v36 = vld [vmem:[#allocation10 + $0x144] sm:$0xf0] }
  0xd7   :  { %v8562_v54 = vadd.f32 %v898_v42, %v423_v51  ;;  %v654_v42 = vld [vmem:[#allocation7 + $0xc9] sm:$0xff] }
  0xd9   :  { %6851 = vmatmul.msk.bf16.gmra.mxu0 %vm274_vm0, %v196_v56  ;;  %v903_v3 = vpop.f32.mrf.mxu3 }
  0xda   :  { %6931 = vmatmul.msk.bf16.gmra.mxu2 %vm274_vm0, %v671_v59 }
  0xdd   :  { %v817_v9 = vpop.f32.mrf.mxu2 }
  0xde   :  { %v426_v6 = vpop.f32.mrf.mxu1  ;;  %v8570_v10 = vadd.f32 %v817_v9, %v342_v58  ;;  %v344_v11 = vpop.f32.mrf.mxu0  ;;  %6947 = vmatmul.msk.bf16.gmra.mxu3 %vm274_vm0, %v671_v59  ;;  %v180_v59 = vld [vmem:[#allocation7 + $0xd0] sm:$0xff] }
  0xdf   :  { %v8568_v8 = vadd.f32 %v901_v50, %v426_v6  ;;  %v673_v50 = vpack.c.bf16 %v654_v42, %v653_v41  ;;  %v8600_v7 = vpack.c.bf16 %v181_v60, %v180_v59  ;;  %v7043_v42 = vld [vmem:[#allocation10 + $0x130] sm:$0xf]  ;;  %v658_v59 = vld [vmem:[#allocation7 + $0xe9] sm:$0xff] }
  0xe1   :  { %6866 = vmatmul.msk.bf16.gmra.mxu1 %vm274_vm0, %v195_v38  ;;  %v906_v17 = vpop.f32.mrf.mxu3 }
  0xe5   :  { %v819_v22 = vpop.f32.mrf.mxu2 }
  0xe6   :  { %v428_v18 = vpop.f32.mrf.mxu1  ;;  %v8576_v24 = vadd.f32 %v819_v22, %v344_v11  ;;  %v347_v25 = vpop.f32.mrf.mxu0  ;;  %v7069_v11 = vld [vmem:[#allocation10 + $0x168] sm:$0xf0] }
  0xe7   :  { %v8574_v21 = vadd.f32 %v903_v3, %v428_v18  ;;  %v7067_v3 = vld [vmem:[#allocation10 + $0x160] sm:$0xf]  ;;  %v7953_v18 = vld [vmem:[#allocation10 + $0xc4] sm:$0xf] }
  0xe8   :  { %v7068_v9 = vor.u32 %v7974_v4, %v7067_v3  ;;  %v6960_v22 = vor.u32 %v7953_v18, %v6957_v19  ;;  %v7053_v18 = vld [vmem:[#allocation10 + $0x148] sm:$0xf0] }
  0xe9   :  { %6852 = vmatmul.msk.bf16.gmra.mxu0 %vm274_vm0, %v197_v23  ;;  %v908_v28 = vpop.f32.mrf.mxu3 }
  0xea   :  { %6932 = vmatmul.msk.bf16.gmra.mxu2 %vm274_vm0, %v672_v26  ;;  %1433 = vmatpush.bf16.msra.mxu1 %v6960_v22 }
  0xeb   :  { %1879 = vmatpush.bf16.msrb.mxu2 %v7068_v9  ;;  %v7061_v9 = vld [vmem:[#allocation10 + $0x158] sm:$0xf0] }
  0xed   :  { %v822_v32 = vpop.f32.mrf.mxu2 }
  0xee   :  { %v431_v30 = vpop.f32.mrf.mxu1  ;;  %v8582_v33 = vadd.f32 %v822_v32, %v347_v25  ;;  %v349_v35 = vpop.f32.mrf.mxu0  ;;  %6948 = vmatmul.msk.bf16.gmra.mxu3 %vm274_vm0, %v672_v26  ;;  %v7972_v25 = vld [vmem:[#allocation10 + $0x154] sm:$0xf0] }
  0xef   :  { %v8580_v31 = vadd.f32 %v906_v17, %v431_v30  ;;  %v7072_v17 = vor.u32 %v7973_v5, %v7069_v11 }
  0xf1   :  { %6867 = vmatmul.msk.bf16.gmra.mxu1 %vm274_vm0, %v196_v56  ;;  %v911_v38 = vpop.f32.mrf.mxu3  ;;  %1968 = vmatpush.bf16.msrb.mxu3 %v7072_v17  ;;  %v7969_v17 = vld [vmem:[#allocation10 + $0x144] sm:$0xf] }
  0xf2   :  { %v7056_v22 = vor.u32 %v7969_v17, %v7053_v18 }
  0xf5   :  { %v824_v45 = vpop.f32.mrf.mxu2 }
  0xf6   :  { %v433_v40 = vpop.f32.mrf.mxu1  ;;  %v8588_v48 = vadd.f32 %v824_v45, %v349_v35  ;;  %v352_v49 = vpop.f32.mrf.mxu0  ;;  %v7051_v35 = vld [vmem:[#allocation10 + $0x140] sm:$0xf]  ;;  %v7968_v45 = vld [vmem:[#allocation10 + $0x134] sm:$0xf0] }
  0xf7   :  { %v8586_v43 = vadd.f32 %v908_v28, %v433_v40 }
  0xf9   :  { %6853 = vmatmul.msk.bf16.gmra.mxu0 %vm274_vm0, %v198_v47  ;;  %v913_v51 = vpop.f32.mrf.mxu3 }
  0xfa   :  { %6933 = vmatmul.msk.bf16.gmra.mxu2 %vm274_vm0, %v673_v50 }
  0xfd   :  { %v827_v55 = vpop.f32.mrf.mxu2 }
  0xfe   :  { %v436_v52 = vpop.f32.mrf.mxu1  ;;  %v8594_v56 = vadd.f32 %v827_v55, %v352_v49  ;;  %v354_v58 = vpop.f32.mrf.mxu0  ;;  %6949 = vmatmul.msk.bf16.gmra.mxu3 %vm274_vm0, %v673_v50  ;;  %v7044_v49 = vor.u32 %v7968_v45, %v7043_v42  ;;  %v182_v50 = vld [vmem:[#allocation7 + $0xe0] sm:$0xff] }
  0xff   :  { %v8592_v53 = vadd.f32 %v911_v38, %v436_v52  ;;  %v7052_v38 = vor.u32 %v7970_v36, %v7051_v35 }
 0x101   :  { %6868 = vmatmul.msk.bf16.gmra.mxu1 %vm274_vm0, %v197_v23  ;;  %v916_v61 = vpop.f32.mrf.mxu3  ;;  %v7059_v23 = vld [vmem:[#allocation10 + $0x150] sm:$0xf] }
 0x102   :  { %v7060_v26 = vor.u32 %v7972_v25, %v7059_v23  ;;  %v7967_v23 = vld [vmem:[#allocation10 + $0x134] sm:$0xf]  ;;  %v7045_v25 = vld [vmem:[#allocation10 + $0x138] sm:$0xf0] }
 0x103   :  { %v7048_v35 = vor.u32 %v7967_v23, %v7045_v25 }
 0x104   :  { %1880 = vmatpush.bf16.msrb.mxu2 %v7060_v26  ;;  %v1168_v26 = vld [vmem:[#allocation7 + $0x2] sm:$0xff] }
 0x105   :  { %v829_v6 = vpop.f32.mrf.mxu2 }
 0x106   :  { %v438_v62 = vpop.f32.mrf.mxu1  ;;  %v8602_v14 = vadd.f32 %v829_v6, %v354_v58  ;;  %v357_v15 = vpop.f32.mrf.mxu0  ;;  %v657_v58 = vld [vmem:[#allocation7 + $0xe1] sm:$0xff]  ;;  %v7971_v6 = vld [vmem:[#allocation10 + $0x154] sm:$0xf] }
 0x107   :  { %v8598_v2 = vadd.f32 %v913_v51, %v438_v62  ;;  %v183_v51 = vld [vmem:[#allocation7 + $0xe8] sm:$0xff]  ;;  %v7966_v62 = vld [vmem:[#allocation10 + $0x124] sm:$0xf0]  ;;  %v675_v5 = vpack.c.bf16 %v658_v59, %v657_v58  ;;  %v7064_v12 = vor.u32 %v7971_v6, %v7061_v9  ;;  %v7987_v6 = vld [vmem:[#allocation10 + $0x1d4] sm:$0xf] }
 0x108   :  { %1881 = vmatpush.bf16.msrb.mxu2 %v7052_v38  ;;  %v200_v1 = vpack.c.bf16 %v183_v51, %v182_v50  ;;  %v660_v38 = vld [vmem:[#allocation7 + $0xf9] sm:$0xff] }
 0x109   :  { %6854 = vmatmul.msk.bf16.gmra.mxu0 %vm274_vm0, %v8600_v7  ;;  %v918_v28 = vpop.f32.mrf.mxu3  ;;  %1969 = vmatpush.bf16.msrb.mxu3 %v7064_v12 }
 0x10a   :  { %6934 = vmatmul.msk.bf16.gmra.mxu2 %vm274_vm0, %v674_v16 }
 0x10c   :  { %1882 = vmatpush.bf16.msrb.mxu2 %v7044_v49  ;;  %v7037_v49 = vld [vmem:[#allocation10 + $0x128] sm:$0xf0] }
 0x10d   :  { %v832_v37 = vpop.f32.mrf.mxu2  ;;  %1970 = vmatpush.bf16.msrb.mxu3 %v7056_v22  ;;  %v1708_v22 = vld [vmem:[#allocation7 + $0xb] sm:$0xff] }
 0x10e   :  { %v441_v30 = vpop.f32.mrf.mxu1  ;;  %v8609_v40 = vadd.f32 %v832_v37, %v357_v15  ;;  %v359_v41 = vpop.f32.mrf.mxu0  ;;  %6950 = vmatmul.msk.bf16.gmra.mxu3 %vm274_vm0, %v674_v16  ;;  %v659_v37 = vld [vmem:[#allocation7 + $0xf1] sm:$0xff] }
 0x10f   :  { %v8607_v32 = vadd.f32 %v916_v61, %v441_v30  ;;  %v7035_v61 = vld [vmem:[#allocation10 + $0x120] sm:$0xf] }
 0x111   :  { %6869 = vmatmul.msk.bf16.gmra.mxu1 %vm274_vm0, %v198_v47  ;;  %v921_v52 = vpop.f32.mrf.mxu3  ;;  %v7036_v47 = vor.u32 %v7966_v62, %v7035_v61  ;;  %1971 = vmatpush.bf16.msrb.mxu3 %v7048_v35 }
 0x113   :  { %1883 = vmatpush.bf16.msrb.mxu2 %v7036_v47 }
 0x115   :  { %v834_v0 = vpop.f32.mrf.mxu2 }
 0x116   :  { %v443_v55 = vpop.f32.mrf.mxu1  ;;  %v8615_v3 = vadd.f32 %v834_v0, %v359_v41  ;;  %v362_v4 = vpop.f32.mrf.mxu0 }
 0x117   :  { %v8613_v60 = vadd.f32 %v918_v28, %v443_v55  ;;  %v1169_v28 = vld [vmem:[#allocation7 + $0xa] sm:$0xff] }
 0x118   :  { %v8628_v45 = vpack.c.bf16 %v1169_v28, %v1168_v26 }
 0x119   :  { %6855 = vmatmul.msk.bf16.gmra.mxu0 %vm274_vm0, %v200_v1  ;;  %v923_v11 = vpop.f32.mrf.mxu3 }
 0x11a   :  { %6935 = vmatmul.msk.bf16.gmra.mxu2 %vm274_vm0, %v675_v5 }
 0x11d   :  { %v837_v16 = vpop.f32.mrf.mxu2 }
 0x11e   :  { %v446_v13 = vpop.f32.mrf.mxu1  ;;  %v8621_v19 = vadd.f32 %v837_v16, %v362_v4  ;;  %v364_v20 = vpop.f32.mrf.mxu0  ;;  %6951 = vmatmul.msk.bf16.gmra.mxu3 %vm274_vm0, %v675_v5  ;;  %v7155_v4 = vld [vmem:[#allocation10 + $0x1d0] sm:$0xf]  ;;  %v7988_v5 = vld [vmem:[#allocation10 + $0x1d4] sm:$0xf0] }
 0x11f   :  { %v8619_v15 = vadd.f32 %v921_v52, %v446_v13  ;;  %v676_v52 = vpack.c.bf16 %v660_v38, %v659_v37  ;;  %v7156_v9 = vor.u32 %v7988_v5, %v7155_v4  ;;  %v1170_v13 = vld [vmem:[#allocation7 + $0x12] sm:$0xff]  ;;  %v1171_v16 = vld [vmem:[#allocation7 + $0x1a] sm:$0xff] }
 0x121   :  { %6870 = vmatmul.msk.bf16.gmra.mxu1 %vm274_vm0, %v8600_v7  ;;  %v926_v30 = vpop.f32.mrf.mxu3  ;;  %v7965_v7 = vld [vmem:[#allocation10 + $0x124] sm:$0xf]  ;;  %2417 = vmatpush.bf16.msra.mxu0 %v7156_v9 }
 0x122   :  { %v7040_v55 = vor.u32 %v7965_v7, %v7037_v49  ;;  %v1172_v49 = vld [vmem:[#allocation7 + $0x22] sm:$0xff] }
 0x124   :  { %1972 = vmatpush.bf16.msrb.mxu3 %v7040_v55 }
 0x125   :  { %v839_v42 = vpop.f32.mrf.mxu2 }
 0x126   :  { %v448_v36 = vpop.f32.mrf.mxu1  ;;  %v8630_v50 = vadd.f32 %v839_v42, %v364_v20  ;;  %v367_v51 = vpop.f32.mrf.mxu0  ;;  %v1707_v20 = vld [vmem:[#allocation7 + $0x3] sm:$0xff] }
 0x127   :  { %v8626_v41 = vadd.f32 %v923_v11, %v448_v36  ;;  %v7157_v11 = vld [vmem:[#allocation10 + $0x1d8] sm:$0xf0] }
 0x128   :  { %v7160_v12 = vor.u32 %v7987_v6, %v7157_v11 }
 0x129   :  { %7001 = vmatmul.msk.bf16.vlgmr.msrb.gmra.mxu0 %vm274_vm0, %v8628_v45  ;;  %v928_v58 = vpop.f32.mrf.mxu3 }
 0x12a   :  { %6936 = vmatmul.msk.bf16.gmra.mxu2 %vm274_vm0, %v676_v52  ;;  %2506 = vmatpush.bf16.msrb.mxu1 %v7160_v12 }
 0x12d   :  { %v842_v62 = vpop.f32.mrf.mxu2 }
 0x12e   :  { %v451_v59 = vpop.f32.mrf.mxu1  ;;  %v8637_v0 = vadd.f32 %v842_v62, %v367_v51  ;;  %v369_v47 = vpop.f32.mrf.mxu0  ;;  %6952 = vmatmul.msk.bf16.gmra.mxu3 %vm274_vm0, %v676_v52  ;;  %v1173_v51 = vld [vmem:[#allocation7 + $0x2a] sm:$0xff] }
 0x12f   :  { %v8635_v61 = vadd.f32 %v926_v30, %v451_v59  ;;  %v1739_v30 = vpack.c.bf16 %v1708_v22, %v1707_v20  ;;  %v1710_v59 = vld [vmem:[#allocation7 + $0x1b] sm:$0xff]  ;;  %v8659_v4 = vpack.c.bf16 %v1173_v51, %v1172_v49 }
 0x130   :  { %v1175_v20 = vld [vmem:[#allocation7 + $0x3a] sm:$0xff] }
 0x131   :  { %6871 = vmatmul.msk.bf16.gmra.mxu1 %vm274_vm0, %v200_v1  ;;  %v931_v17 = vpop.f32.mrf.mxu3  ;;  %v8643_v1 = vpack.c.bf16 %v1171_v16, %v1170_v13 }
 0x135   :  { %v844_v25 = vpop.f32.mrf.mxu2 }
 0x136   :  { %v453_v18 = vpop.f32.mrf.mxu1  ;;  %v8645_v26 = vadd.f32 %v844_v25, %v369_v47  ;;  %v372_v28 = vpop.f32.mrf.mxu0 }
 0x137   :  { %v8641_v23 = vadd.f32 %v928_v58, %v453_v18  ;;  %v1709_v58 = vld [vmem:[#allocation7 + $0x13] sm:$0xff] }
 0x138   :  { %v1740_v9 = vpack.c.bf16 %v1710_v59, %v1709_v58  ;;  %v1174_v18 = vld [vmem:[#allocation7 + $0x32] sm:$0xff]  ;;  %v7985_v58 = vld [vmem:[#allocation10 + $0x1c4] sm:$0xf] }
 0x139   :  { %7002 = vmatmul.msk.bf16.gmra.mxu0 %vm274_vm0, %v8643_v1  ;;  %v933_v35 = vpop.f32.mrf.mxu3 }
 0x13a   :  { %7081 = vmatmul.msk.bf16.vlgmr.msrb.gmra.mxu2 %vm274_vm0, %v1739_v30 }
 0x13d   :  { %v847_v38 = vpop.f32.mrf.mxu2 }
 0x13e   :  { %v456_v36 = vpop.f32.mrf.mxu1  ;;  %v8652_v42 = vadd.f32 %v847_v38, %v372_v28  ;;  %v374_v7 = vpop.f32.mrf.mxu0  ;;  %7097 = vmatmul.msk.bf16.vlgmr.msrb.gmra.mxu3 %vm274_vm0, %v1739_v30  ;;  %v1711_v28 = vld [vmem:[#allocation7 + $0x23] sm:$0xff]  ;;  %v1712_v30 = vld [vmem:[#allocation7 + $0x2b] sm:$0xff]  ;;  %v8675_v38 = vpack.c.bf16 %v1175_v20, %v1174_v18 }
 0x13f   :  { %v8650_v37 = vadd.f32 %v931_v17, %v456_v36  ;;  %v1741_v51 = vpack.c.bf16 %v1712_v30, %v1711_v28  ;;  %v1176_v18 = vld [vmem:[#allocation7 + $0x42] sm:$0xff]  ;;  %v1177_v20 = vld [vmem:[#allocation7 + $0x4a] sm:$0xff]  ;;  %v1713_v30 = vld [vmem:[#allocation7 + $0x33] sm:$0xff] }
 0x141   :  { %6872 = vmatmul.msk.bf16.gmra.mxu1 %vm274_vm0, %v8507_v63  ;;  %v936_v52 = vpop.f32.mrf.mxu3 }
 0x145   :  { %v849_v47 = vpop.f32.mrf.mxu2 }
 0x146   :  { %v458_v55 = vpop.f32.mrf.mxu1  ;;  %v8661_v5 = vadd.f32 %v849_v47, %v374_v7  ;;  %v377_v6 = vpop.f32.mrf.mxu0 }
 0x147   :  { %v8657_v62 = vadd.f32 %v933_v35, %v458_v55  ;;  %v7986_v55 = vld [vmem:[#allocation10 + $0x1c4] sm:$0xf0] }
 0x149   :  { %7003 = vmatmul.msk.bf16.gmra.mxu0 %vm274_vm0, %v8659_v4  ;;  %v938_v63 = vpop.f32.mrf.mxu3 }
 0x14a   :  { %7082 = vmatmul.msk.bf16.gmra.mxu2 %vm274_vm0, %v1740_v9 }
 0x14d   :  { %v852_v13 = vpop.f32.mrf.mxu2 }
 0x14e   :  { %v461_v11 = vpop.f32.mrf.mxu1  ;;  %v8668_v16 = vadd.f32 %v852_v13, %v377_v6  ;;  %v379_v17 = vpop.f32.mrf.mxu0  ;;  %7098 = vmatmul.msk.bf16.gmra.mxu3 %vm274_vm0, %v1740_v9  ;;  %v7149_v6 = vld [vmem:[#allocation10 + $0x1c8] sm:$0xf0] }
 0x14f   :  { %v8666_v12 = vadd.f32 %v936_v52, %v461_v11  ;;  %v7147_v52 = vld [vmem:[#allocation10 + $0x1c0] sm:$0xf] }
 0x150   :  { %v7148_v47 = vor.u32 %v7986_v55, %v7147_v52  ;;  %v8691_v55 = vpack.c.bf16 %v1177_v20, %v1176_v18 }
 0x151   :  { %7017 = vmatmul.msk.bf16.vlgmr.msra.gmra.mxu1 %vm274_vm0, %v8628_v45  ;;  %v941_v22 = vpop.f32.mrf.mxu3 }
 0x152   :  { %2418 = vmatpush.bf16.msra.mxu0 %v7148_v47 }
 0x155   :  { %v854_v36 = vpop.f32.mrf.mxu2 }
 0x156   :  { %v463_v25 = vpop.f32.mrf.mxu1  ;;  %v8677_v7 = vadd.f32 %v854_v36, %v379_v17  ;;  %v382_v49 = vpop.f32.mrf.mxu0  ;;  %v1714_v36 = vld [vmem:[#allocation7 + $0x3b] sm:$0xff] }
 0x157   :  { %v8673_v35 = vadd.f32 %v938_v63, %v463_v25  ;;  %v7152_v63 = vor.u32 %v7985_v58, %v7149_v6 }
 0x159   :  { %7004 = vmatmul.msk.bf16.gmra.mxu0 %vm274_vm0, %v8675_v38  ;;  %v943_v45 = vpop.f32.mrf.mxu3  ;;  %2507 = vmatpush.bf16.msrb.mxu1 %v7152_v63 }
 0x15a   :  { %7083 = vmatmul.msk.bf16.gmra.mxu2 %vm274_vm0, %v1741_v51 }
 0x15d   :  { %v857_v11 = vpop.f32.mrf.mxu2 }
 0x15e   :  { %v466_v59 = vpop.f32.mrf.mxu1  ;;  %v8684_v13 = vadd.f32 %v857_v11, %v382_v49  ;;  %v384_v17 = vpop.f32.mrf.mxu0  ;;  %7099 = vmatmul.msk.bf16.gmra.mxu3 %vm274_vm0, %v1741_v51  ;;  %v1178_v11 = vld [vmem:[#allocation7 + $0x52] sm:$0xff] }
 0x15f   :  { %v8682_v9 = vadd.f32 %v941_v22, %v466_v59  ;;  %v1742_v59 = vpack.c.bf16 %v1714_v36, %v1713_v30  ;;  %v1716_v30 = vld [vmem:[#allocation7 + $0x4b] sm:$0xff] }
 0x161   :  { %7018 = vmatmul.msk.bf16.gmra.mxu1 %vm274_vm0, %v8643_v1  ;;  %v946_v25 = vpop.f32.mrf.mxu3 }
 0x165   :  { %v859_v52 = vpop.f32.mrf.mxu2 }
 0x166   :  { %v468_v28 = vpop.f32.mrf.mxu1  ;;  %v8693_v49 = vadd.f32 %v859_v52, %v384_v17  ;;  %v387_v58 = vpop.f32.mrf.mxu0  ;;  %v1179_v17 = vld [vmem:[#allocation7 + $0x5a] sm:$0xff] }
 0x167   :  { %v8689_v22 = vadd.f32 %v943_v45, %v468_v28  ;;  %v1715_v28 = vld [vmem:[#allocation7 + $0x43] sm:$0xff] }
 0x169   :  { %10259 = vst [vmem:[#allocation27_spill] sm:$0xff] %v8689_v22  ;;  %7005 = vmatmul.msk.bf16.gmra.mxu0 %vm274_vm0, %v8691_v55  ;;  %v948_v1 = vpop.f32.mrf.mxu3 }
 0x16a   :  { %7084 = vmatmul.msk.bf16.gmra.mxu2 %vm274_vm0, %v1742_v59 }
 0x16d   :  { %v862_v6 = vpop.f32.mrf.mxu2 }
 0x16e   :  { %v471_v51 = vpop.f32.mrf.mxu1  ;;  %v8700_v63 = vadd.f32 %v862_v6, %v387_v58  ;;  %v389_v45 = vpop.f32.mrf.mxu0  ;;  %7100 = vmatmul.msk.bf16.gmra.mxu3 %vm274_vm0, %v1742_v59  ;;  %v1743_v6 = vpack.c.bf16 %v1716_v30, %v1715_v28  ;;  %v1717_v28 = vld [vmem:[#allocation7 + $0x53] sm:$0xff]  ;;  %v1718_v30 = vld [vmem:[#allocation7 + $0x5b] sm:$0xff] }
 0x16f   :  { %v8698_v47 = vadd.f32 %v946_v25, %v471_v51  ;;  %v8707_v25 = vpack.c.bf16 %v1179_v17, %v1178_v11  ;;  %v1181_v11 = vld [vmem:[#allocation7 + $0x6a] sm:$0xff] }
 0x171   :  { %10260 = vst [vmem:[#allocation28_spill] sm:$0xff] %v8698_v47  ;;  %7019 = vmatmul.msk.bf16.gmra.mxu1 %vm274_vm0, %v8659_v4  ;;  %v951_v18 = vpop.f32.mrf.mxu3 }
 0x175   :  { %v864_v52 = vpop.f32.mrf.mxu2 }
 0x176   :  { %v473_v20 = vpop.f32.mrf.mxu1  ;;  %v8709_v51 = vadd.f32 %v864_v52, %v389_v45  ;;  %v392_v58 = vpop.f32.mrf.mxu0  ;;  %v1180_v45 = vld [vmem:[#allocation7 + $0x62] sm:$0xff] }
 0x177   :  { %v8705_v36 = vadd.f32 %v948_v1, %v473_v20 }
 0x178   :  { %10262 = vst [vmem:[#allocation30_spill] sm:$0xff] %v8709_v51 }
 0x179   :  { %10261 = vst [vmem:[#allocation29_spill] sm:$0xff] %v8705_v36  ;;  %7006 = vmatmul.msk.bf16.gmra.mxu0 %vm274_vm0, %v8707_v25  ;;  %v953_v4 = vpop.f32.mrf.mxu3 }
 0x17a   :  { %7085 = vmatmul.msk.bf16.gmra.mxu2 %vm274_vm0, %v1743_v6 }
 0x17d   :  { %v867_v27 = vpop.f32.mrf.mxu2 }
 0x17e   :  { %v476_v59 = vpop.f32.mrf.mxu1  ;;  %v8716_v47 = vadd.f32 %v867_v27, %v392_v58  ;;  %v394_v1 = vpop.f32.mrf.mxu0  ;;  %7101 = vmatmul.msk.bf16.gmra.mxu3 %vm274_vm0, %v1743_v6  ;;  %v1744_v58 = vpack.c.bf16 %v1718_v30, %v1717_v28  ;;  %v7141_v6 = vld [vmem:[#allocation10 + $0x1b8] sm:$0xf0] }
 0x17f   :  { %v8714_v34 = vadd.f32 %v951_v18, %v476_v59  ;;  %v8723_v18 = vpack.c.bf16 %v1181_v11, %v1180_v45 }
 0x180   :  { %10264 = vst [vmem:[#allocation32_spill] sm:$0xff] %v8716_v47  ;;  %v7984_v47 = vld [vmem:[#allocation10 + $0x1b4] sm:$0xf0] }
 0x181   :  { %10263 = vst [vmem:[#allocation31_spill] sm:$0xff] %v8714_v34  ;;  %7020 = vmatmul.msk.bf16.gmra.mxu1 %vm274_vm0, %v8675_v38  ;;  %v956_v17 = vpop.f32.mrf.mxu3  ;;  %v7139_v34 = vld [vmem:[#allocation10 + $0x1b0] sm:$0xf]  ;;  %v7983_v38 = vld [vmem:[#allocation10 + $0x1b4] sm:$0xf] }
 0x182   :  { %v7140_v22 = vor.u32 %v7984_v47, %v7139_v34  ;;  %v7144_v51 = vor.u32 %v7983_v38, %v7141_v6  ;;  %v1182_v34 = vld [vmem:[#allocation7 + $0x72] sm:$0xff]  ;;  %v1183_v47 = vld [vmem:[#allocation7 + $0x7a] sm:$0xff]  ;;  %v1719_v38 = vld [vmem:[#allocation7 + $0x63] sm:$0xff] }
 0x183   :  { %v1720_v6 = vld [vmem:[#allocation7 + $0x6b] sm:$0xff] }
 0x184   :  { %2419 = vmatpush.bf16.msra.mxu0 %v7140_v22  ;;  %2508 = vmatpush.bf16.msrb.mxu1 %v7144_v51 }
 0x185   :  { %v869_v36 = vpop.f32.mrf.mxu2 }
 0x186   :  { %v478_v20 = vpop.f32.mrf.mxu1  ;;  %v8725_v59 = vadd.f32 %v869_v36, %v394_v1  ;;  %v397_v27 = vpop.f32.mrf.mxu0 }
 0x187   :  { %v8721_v52 = vadd.f32 %v953_v4, %v478_v20 }
 0x189   :  { %10265 = vst [vmem:[#allocation33_spill] sm:$0xff] %v8721_v52  ;;  %7007 = vmatmul.msk.bf16.gmra.mxu0 %vm274_vm0, %v8723_v18  ;;  %v958_v4 = vpop.f32.mrf.mxu3 }
 0x18a   :  { %7086 = vmatmul.msk.bf16.gmra.mxu2 %vm274_vm0, %v1744_v58 }
 0x18d   :  { %v872_v36 = vpop.f32.mrf.mxu2 }
 0x18e   :  { %v481_v20 = vpop.f32.mrf.mxu1  ;;  %v8732_v1 = vadd.f32 %v872_v36, %v397_v27  ;;  %v399_v11 = vpop.f32.mrf.mxu0  ;;  %7102 = vmatmul.msk.bf16.gmra.mxu3 %vm274_vm0, %v1744_v58  ;;  %v1745_v36 = vpack.c.bf16 %v1720_v6, %v1719_v38  ;;  %v1721_v38 = vld [vmem:[#allocation7 + $0x73] sm:$0xff]  ;;  %v1722_v6 = vld [vmem:[#allocation7 + $0x7b] sm:$0xff] }
 0x18f   :  { %v8730_v45 = vadd.f32 %v956_v17, %v481_v20  ;;  %v8739_v17 = vpack.c.bf16 %v1183_v47, %v1182_v34  ;;  %v1185_v34 = vld [vmem:[#allocation7 + $0x8a] sm:$0xff] }
 0x190   :  { %10267 = vst [vmem:[#allocation35_spill] sm:$0xff] %v8732_v1 }
 0x191   :  { %10266 = vst [vmem:[#allocation34_spill] sm:$0xff] %v8730_v45  ;;  %7021 = vmatmul.msk.bf16.gmra.mxu1 %vm274_vm0, %v8691_v55  ;;  %v961_v28 = vpop.f32.mrf.mxu3 }
 0x195   :  { %v874_v51 = vpop.f32.mrf.mxu2 }
 0x196   :  { %v483_v30 = vpop.f32.mrf.mxu1  ;;  %v8741_v20 = vadd.f32 %v874_v51, %v399_v11  ;;  %v402_v27 = vpop.f32.mrf.mxu0  ;;  %v1184_v11 = vld [vmem:[#allocation7 + $0x82] sm:$0xff] }
 0x197   :  { %v8737_v22 = vadd.f32 %v958_v4, %v483_v30 }
 0x199   :  { %10268 = vst [vmem:[#allocation36_spill] sm:$0xff] %v8737_v22  ;;  %7008 = vmatmul.msk.bf16.gmra.mxu0 %vm274_vm0, %v8739_v17  ;;  %v963_v55 = vpop.f32.mrf.mxu3 }
 0x19a   :  { %7087 = vmatmul.msk.bf16.gmra.mxu2 %vm274_vm0, %v1745_v36 }
 0x19d   :  { %v877_v52 = vpop.f32.mrf.mxu2 }
 0x19e   :  { %v486_v58 = vpop.f32.mrf.mxu1  ;;  %v8748_v1 = vadd.f32 %v877_v52, %v402_v27  ;;  %v404_v4 = vpop.f32.mrf.mxu0  ;;  %7103 = vmatmul.msk.bf16.gmra.mxu3 %vm274_vm0, %v1745_v36  ;;  %v1746_v27 = vpack.c.bf16 %v1722_v6, %v1721_v38  ;;  %v7133_v38 = vld [vmem:[#allocation10 + $0x1a8] sm:$0xf0] }
 0x19f   :  { %v8746_v45 = vadd.f32 %v961_v28, %v486_v58  ;;  %v8755_v28 = vpack.c.bf16 %v1185_v34, %v1184_v11  ;;  %v7981_v11 = vld [vmem:[#allocation10 + $0x1a4] sm:$0xf] }
 0x1a0   :  { %10270 = vst [vmem:[#allocation38_spill] sm:$0xff] %v8748_v1  ;;  %v7136_v6 = vor.u32 %v7981_v11, %v7133_v38 }
 0x1a1   :  { %10269 = vst [vmem:[#allocation37_spill] sm:$0xff] %v8746_v45  ;;  %7022 = vmatmul.msk.bf16.gmra.mxu1 %vm274_vm0, %v8707_v25  ;;  %v966_v47 = vpop.f32.mrf.mxu3 }
 0x1a2   :  { %2509 = vmatpush.bf16.msrb.mxu1 %v7136_v6 }
 0x1a5   :  { %v879_v22 = vpop.f32.mrf.mxu2 }
 0x1a6   :  { %v488_v30 = vpop.f32.mrf.mxu1  ;;  %v8757_v58 = vadd.f32 %v879_v22, %v404_v4  ;;  %v1346_v52 = vpop.f32.mrf.mxu0  ;;  %v7982_v4 = vld [vmem:[#allocation10 + $0x1a4] sm:$0xf0] }
 0x1a7   :  { %v8753_v51 = vadd.f32 %v963_v55, %v488_v30  ;;  %v1515_v45 = vadd.f32 %v1346_v52, %v8546_v29  ;;  %v7131_v29 = vld [vmem:[#allocation10 + $0x1a0] sm:$0xf]  ;;  %v1186_v52 = vld [vmem:[#allocation7 + $0x92] sm:$0xff] }
 0x1a8   :  { %10272 = vst [vmem:[#allocation40_spill] sm:$0xff] %v8757_v58  ;;  %v7132_v34 = vor.u32 %v7982_v4, %v7131_v29 }
 0x1a9   :  { %10271 = vst [vmem:[#allocation39_spill] sm:$0xff] %v8753_v51  ;;  %7009 = vmatmul.msk.bf16.gmra.mxu0 %vm274_vm0, %v8755_v28  ;;  %v968_v25 = vpop.f32.mrf.mxu3  ;;  %v1187_v51 = vld [vmem:[#allocation7 + $0x9a] sm:$0xff] }
 0x1aa   :  { %7088 = vmatmul.msk.bf16.gmra.mxu2 %vm274_vm0, %v1746_v27  ;;  %2420 = vmatpush.bf16.msra.mxu0 %v7132_v34 }
 0x1ad   :  { %v8765_v55 = vpop.f32.mrf.mxu2 }
 0x1ae   :  { %v491_v36 = vpop.f32.mrf.mxu1  ;;  %10274 = vst [vmem:[#allocation42_spill] sm:$0xff] %v8765_v55  ;;  %v1348_v30 = vpop.f32.mrf.mxu0  ;;  %7104 = vmatmul.msk.bf16.gmra.mxu3 %vm274_vm0, %v1746_v27  ;;  %v1724_v55 = vld [vmem:[#allocation7 + $0x8b] sm:$0xff] }
 0x1af   :  { %v8763_v1 = vadd.f32 %v966_v47, %v491_v36  ;;  %v1517_v22 = vadd.f32 %v1348_v30, %v8552_v39  ;;  %v8775_v39 = vpack.c.bf16 %v1187_v51, %v1186_v52  ;;  %v1189_v51 = vld [vmem:[#allocation7 + $0xaa] sm:$0xff] }
 0x1b1   :  { %10273 = vst [vmem:[#allocation41_spill] sm:$0xff] %v8763_v1  ;;  %7023 = vmatmul.msk.bf16.gmra.mxu1 %vm274_vm0, %v8723_v18  ;;  %v971_v47 = vpop.f32.mrf.mxu3  ;;  %v1723_v1 = vld [vmem:[#allocation7 + $0x83] sm:$0xff] }
 0x1b2   :  { %v1747_v30 = vpack.c.bf16 %v1724_v55, %v1723_v1 }
 0x1b5   :  { %v8773_v18 = vpop.f32.mrf.mxu2 }
 0x1b6   :  { %v493_v36 = vpop.f32.mrf.mxu1  ;;  %v1351_v27 = vpop.f32.mrf.mxu0 }
 0x1b7   :  { %v8771_v58 = vadd.f32 %v968_v25, %v493_v36  ;;  %v1519_v29 = vadd.f32 %v1351_v27, %v8558_v46  ;;  %v1188_v46 = vld [vmem:[#allocation7 + $0xa2] sm:$0xff]  ;;  %v1725_v36 = vld [vmem:[#allocation7 + $0x93] sm:$0xff] }
 0x1b8   :  { %v1726_v27 = vld [vmem:[#allocation7 + $0x9b] sm:$0xff] }
 0x1b9   :  { %10275 = vst [vmem:[#allocation43_spill] sm:$0xff] %v8771_v58  ;;  %7010 = vmatmul.msk.bf16.gmra.mxu0 %vm274_vm0, %v8775_v39  ;;  %v973_v4 = vpop.f32.mrf.mxu3 }
 0x1ba   :  { %7089 = vmatmul.msk.bf16.gmra.mxu2 %vm274_vm0, %v1747_v30 }
 0x1bd   :  { %v1885_v38 = vpop.f32.mrf.mxu2 }
 0x1be   :  { %v496_v11 = vpop.f32.mrf.mxu1  ;;  %v8783_v25 = vadd.f32 %v1885_v38, %v1515_v45  ;;  %v1353_v6 = vpop.f32.mrf.mxu0  ;;  %7105 = vmatmul.msk.bf16.gmra.mxu3 %vm274_vm0, %v1747_v30 }
 0x1bf   :  { %v8781_v34 = vadd.f32 %v971_v47, %v496_v11  ;;  %v1521_v1 = vadd.f32 %v1353_v6, %v8564_v57  ;;  %v8791_v11 = vpack.c.bf16 %v1189_v51, %v1188_v46  ;;  %v1190_v51 = vld [vmem:[#allocation7 + $0xb2] sm:$0xff] }
 0x1c0   :  { %10276 = vst [vmem:[#allocation44_spill] sm:$0xff] %v8783_v25  ;;  %v1748_v25 = vpack.c.bf16 %v1726_v27, %v1725_v36  ;;  %v1191_v36 = vld [vmem:[#allocation7 + $0xba] sm:$0xff] }
 0x1c1   :  { %7024 = vmatmul.msk.bf16.gmra.mxu1 %vm274_vm0, %v8739_v17  ;;  %v1974_v55 = vpop.f32.mrf.mxu3 }
 0x1c5   :  { %v1887_v47 = vpop.f32.mrf.mxu2 }
 0x1c6   :  { %v498_v52 = vpop.f32.mrf.mxu1  ;;  %v8793_v45 = vadd.f32 %v1887_v47, %v1517_v22  ;;  %v1356_v38 = vpop.f32.mrf.mxu0 }
 0x1c7   :  { %v8789_v58 = vadd.f32 %v973_v4, %v498_v52  ;;  %v1523_v17 = vadd.f32 %v1356_v38, %v8570_v10  ;;  %v1727_v38 = vld [vmem:[#allocation7 + $0xa3] sm:$0xff] }
 0x1c8   :  { %10278 = vst [vmem:[#allocation46_spill] sm:$0xff] %v8793_v45  ;;  %v1728_v45 = vld [vmem:[#allocation7 + $0xab] sm:$0xff] }
 0x1c9   :  { %10277 = vst [vmem:[#allocation45_spill] sm:$0xff] %v8789_v58  ;;  %7011 = vmatmul.msk.bf16.gmra.mxu0 %vm274_vm0, %v8791_v11  ;;  %v1976_v57 = vpop.f32.mrf.mxu3  ;;  %v7253_v58 = vld [vmem:[#allocation12 + $0x78] sm:$0xf0] }
 0x1ca   :  { %7090 = vmatmul.msk.bf16.gmra.mxu2 %vm274_vm0, %v1748_v25 }
 0x1cd   :  { %v1890_v4 = vpop.f32.mrf.mxu2 }
 0x1ce   :  { %v1435_v30 = vpop.f32.mrf.mxu1  ;;  %v8800_v52 = vadd.f32 %v1890_v4, %v1519_v29  ;;  %v1358_v22 = vpop.f32.mrf.mxu0  ;;  %7106 = vmatmul.msk.bf16.gmra.mxu3 %vm274_vm0, %v1748_v25  ;;  %v1749_v4 = vpack.c.bf16 %v1728_v45, %v1727_v38  ;;  %v7251_v25 = vld [vmem:[#allocation12 + $0x70] sm:$0xf] }
 0x1cf   :  { %v1516_v6 = vadd.f32 %v1435_v30, %v8556_v44  ;;  %v1525_v10 = vadd.f32 %v1358_v22, %v8576_v24  ;;  %v8809_v30 = vpack.c.bf16 %v1191_v36, %v1190_v51  ;;  %v8004_v22 = vld [vmem:[#allocation12 + $0x74] sm:$0xf0] }
 0x1d0   :  { %10279 = vst [vmem:[#allocation47_spill] sm:$0xff] %v8800_v52  ;;  %v8003_v52 = vld [vmem:[#allocation12 + $0x74] sm:$0xf]  ;;  %v7980_v36 = vld [vmem:[#allocation10 + $0x194] sm:$0xf0] }
 0x1d1   :  { %v8802_v46 = vadd.f32 %v1974_v55, %v1516_v6  ;;  %7025 = vmatmul.msk.bf16.gmra.mxu1 %vm274_vm0, %v8755_v28  ;;  %v1979_v27 = vpop.f32.mrf.mxu3 }
 0x1d3   :  { %10280 = vst [vmem:[#allocation48_spill] sm:$0xff] %v8802_v46  ;;  %v7252_v46 = vor.u32 %v8004_v22, %v7251_v25  ;;  %v1193_v22 = vld [vmem:[#allocation7 + $0xca] sm:$0xff] }
 0x1d5   :  { %v1892_v29 = vpop.f32.mrf.mxu2  ;;  %3189 = vmatpush.bf16.msra.mxu2 %v7252_v46  ;;  %v1192_v46 = vld [vmem:[#allocation7 + $0xc2] sm:$0xff] }
 0x1d6   :  { %v1437_v47 = vpop.f32.mrf.mxu1  ;;  %v8811_v55 = vadd.f32 %v1892_v29, %v1521_v1  ;;  %v1361_v28 = vpop.f32.mrf.mxu0  ;;  %v7123_v1 = vld [vmem:[#allocation10 + $0x190] sm:$0xf] }
 0x1d7   :  { %v1518_v44 = vadd.f32 %v1437_v47, %v8562_v54  ;;  %v1527_v24 = vadd.f32 %v1361_v28, %v8582_v33  ;;  %v7256_v54 = vor.u32 %v8003_v52, %v7253_v58  ;;  %v7124_v45 = vor.u32 %v7980_v36, %v7123_v1  ;;  %v7125_v33 = vld [vmem:[#allocation10 + $0x198] sm:$0xf0]  ;;  %v1729_v1 = vld [vmem:[#allocation7 + $0xb3] sm:$0xff]  ;;  %v1730_v36 = vld [vmem:[#allocation7 + $0xbb] sm:$0xff] }
 0x1d9   :  { %v8813_v6 = vadd.f32 %v1976_v57, %v1518_v44  ;;  %7012 = vmatmul.msk.bf16.gmra.mxu0 %vm274_vm0, %v8809_v30  ;;  %v1981_v51 = vpop.f32.mrf.mxu3  ;;  %v7979_v57 = vld [vmem:[#allocation10 + $0x194] sm:$0xf]  ;;  %3278 = vmatpush.bf16.msra.mxu3 %v7256_v54 }
 0x1da   :  { %7091 = vmatmul.msk.bf16.gmra.mxu2 %vm274_vm0, %v1749_v4  ;;  %v7128_v44 = vor.u32 %v7979_v57, %v7125_v33  ;;  %2421 = vmatpush.bf16.msra.mxu0 %v7124_v45 }
 0x1dc   :  { %2510 = vmatpush.bf16.msrb.mxu1 %v7128_v44 }
 0x1dd   :  { %v1895_v29 = vpop.f32.mrf.mxu2 }
 0x1de   :  { %v1440_v47 = vpop.f32.mrf.mxu1  ;;  %v8820_v28 = vadd.f32 %v1895_v29, %v1523_v17  ;;  %v1363_v58 = vpop.f32.mrf.mxu0  ;;  %7107 = vmatmul.msk.bf16.gmra.mxu3 %vm274_vm0, %v1749_v4 }
 0x1df   :  { %v1520_v38 = vadd.f32 %v1440_v47, %v8568_v8  ;;  %v1529_v52 = vadd.f32 %v1363_v58, %v8588_v48  ;;  %v1750_v48 = vpack.c.bf16 %v1730_v36, %v1729_v1  ;;  %v1194_v58 = vld [vmem:[#allocation7 + $0xd2] sm:$0xff]  ;;  %v1731_v1 = vld [vmem:[#allocation7 + $0xc3] sm:$0xff] }
 0x1e1   :  { %v8822_v25 = vadd.f32 %v1979_v27, %v1520_v38  ;;  %7026 = vmatmul.msk.bf16.gmra.mxu1 %vm274_vm0, %v8775_v39  ;;  %v1984_v54 = vpop.f32.mrf.mxu3  ;;  %v8829_v27 = vpack.c.bf16 %v1193_v22, %v1192_v46  ;;  %v1195_v46 = vld [vmem:[#allocation7 + $0xda] sm:$0xff] }
 0x1e5   :  { %v1897_v57 = vpop.f32.mrf.mxu2 }
 0x1e6   :  { %v1442_v8 = vpop.f32.mrf.mxu1  ;;  %v8831_v47 = vadd.f32 %v1897_v57, %v1525_v10  ;;  %v1366_v39 = vpop.f32.mrf.mxu0 }
 0x1e7   :  { %v1522_v17 = vadd.f32 %v1442_v8, %v8574_v21  ;;  %v1531_v4 = vadd.f32 %v1366_v39, %v8594_v56 }
 0x1e9   :  { %v8833_v45 = vadd.f32 %v1981_v51, %v1522_v17  ;;  %7013 = vmatmul.msk.bf16.gmra.mxu0 %vm274_vm0, %v8829_v27  ;;  %v1986_v33 = vpop.f32.mrf.mxu3 }
 0x1ea   :  { %7092 = vmatmul.msk.bf16.gmra.mxu2 %vm274_vm0, %v1750_v48 }
 0x1ed   :  { %v1900_v44 = vpop.f32.mrf.mxu2 }
 0x1ee   :  { %v1445_v38 = vpop.f32.mrf.mxu1  ;;  %v8840_v29 = vadd.f32 %v1900_v44, %v1527_v24  ;;  %v1368_v51 = vpop.f32.mrf.mxu0  ;;  %7108 = vmatmul.msk.bf16.gmra.mxu3 %vm274_vm0, %v1750_v48  ;;  %v7243_v48 = vld [vmem:[#allocation12 + $0x60] sm:$0xf] }
 0x1ef   :  { %v1524_v21 = vadd.f32 %v1445_v38, %v8580_v31  ;;  %v8847_v56 = vadd.f32 %v1368_v51, %v8602_v14  ;;  %v1732_v31 = vld [vmem:[#allocation7 + $0xcb] sm:$0xff]  ;;  %v7245_v51 = vld [vmem:[#allocation12 + $0x68] sm:$0xf0] }
 0x1f0   :  { %v1751_v14 = vpack.c.bf16 %v1732_v31, %v1731_v1  ;;  %v8002_v38 = vld [vmem:[#allocation12 + $0x64] sm:$0xf0] }
 0x1f1   :  { %v8842_v10 = vadd.f32 %v1984_v54, %v1524_v21  ;;  %7027 = vmatmul.msk.bf16.gmra.mxu1 %vm274_vm0, %v8791_v11  ;;  %v1989_v22 = vpop.f32.mrf.mxu3  ;;  %v8851_v54 = vpack.c.bf16 %v1195_v46, %v1194_v58  ;;  %v8001_v21 = vld [vmem:[#allocation12 + $0x64] sm:$0xf]  ;;  %v7244_v44 = vor.u32 %v8002_v38, %v7243_v48  ;;  %v1733_v38 = vld [vmem:[#allocation7 + $0xd3] sm:$0xff] }
 0x1f3   :  { %3190 = vmatpush.bf16.msra.mxu2 %v7244_v44 }
 0x1f5   :  { %v1902_v36 = vpop.f32.mrf.mxu2 }
 0x1f6   :  { %v1447_v8 = vpop.f32.mrf.mxu1  ;;  %v8853_v17 = vadd.f32 %v1902_v36, %v1529_v52  ;;  %v1371_v11 = vpop.f32.mrf.mxu0  ;;  %v1197_v36 = vld [vmem:[#allocation7 + $0xea] sm:$0xff] }
 0x1f7   :  { %v1526_v24 = vadd.f32 %v1447_v8, %v8586_v43  ;;  %v1535_v39 = vadd.f32 %v1371_v11, %v8609_v40  ;;  %v7248_v43 = vor.u32 %v8001_v21, %v7245_v51  ;;  %v7115_v21 = vld [vmem:[#allocation10 + $0x180] sm:$0xf] }
 0x1f9   :  { %v8855_v57 = vadd.f32 %v1986_v33, %v1526_v24  ;;  %7014 = vmatmul.msk.bf16.gmra.mxu0 %vm274_vm0, %v8851_v54  ;;  %v1991_v58 = vpop.f32.mrf.mxu3  ;;  %3279 = vmatpush.bf16.msra.mxu3 %v7248_v43  ;;  %v1196_v24 = vld [vmem:[#allocation7 + $0xe2] sm:$0xff] }
 0x1fa   :  { %7093 = vmatmul.msk.bf16.gmra.mxu2 %vm274_vm0, %v1751_v14  ;;  %v8875_v51 = vpack.c.bf16 %v1197_v36, %v1196_v24 }
 0x1fd   :  { %v1905_v46 = vpop.f32.mrf.mxu2 }
 0x1fe   :  { %v1450_v52 = vpop.f32.mrf.mxu1  ;;  %v8862_v8 = vadd.f32 %v1905_v46, %v1531_v4  ;;  %v1373_v1 = vpop.f32.mrf.mxu0  ;;  %7109 = vmatmul.msk.bf16.gmra.mxu3 %vm274_vm0, %v1751_v14  ;;  %v7977_v14 = vld [vmem:[#allocation10 + $0x184] sm:$0xf] }
 0x1ff   :  { %v1528_v33 = vadd.f32 %v1450_v52, %v8592_v53  ;;  %v8869_v31 = vadd.f32 %v1373_v1, %v8615_v3  ;;  %v1734_v53 = vld [vmem:[#allocation7 + $0xdb] sm:$0xff] }
 0x200   :  { %v1752_v52 = vpack.c.bf16 %v1734_v53, %v1733_v38 }
 0x201   :  { %v8864_v40 = vadd.f32 %v1989_v22, %v1528_v33  ;;  %7028 = vmatmul.msk.bf16.gmra.mxu1 %vm274_vm0, %v8809_v30  ;;  %v1994_v11 = vpop.f32.mrf.mxu3  ;;  %v7978_v22 = vld [vmem:[#allocation10 + $0x184] sm:$0xf0]  ;;  %v7117_v33 = vld [vmem:[#allocation10 + $0x188] sm:$0xf0] }
 0x202   :  { %v7116_v30 = vor.u32 %v7978_v22, %v7115_v21  ;;  %v7120_v1 = vor.u32 %v7977_v14, %v7117_v33  ;;  %v1199_v21 = vld [vmem:[#allocation7 + $0xfa] sm:$0xff] }
 0x204   :  { %2422 = vmatpush.bf16.msra.mxu0 %v7116_v30  ;;  %2511 = vmatpush.bf16.msrb.mxu1 %v7120_v1  ;;  %v7235_v1 = vld [vmem:[#allocation12 + $0x50] sm:$0xf] }
 0x205   :  { %v8873_v44 = vpop.f32.mrf.mxu2 }
 0x206   :  { %v1452_v48 = vpop.f32.mrf.mxu1  ;;  %v1376_v3 = vpop.f32.mrf.mxu0 }
 0x207   :  { %v1530_v4 = vadd.f32 %v1452_v48, %v8598_v2  ;;  %v1539_v46 = vadd.f32 %v1376_v3, %v8621_v19  ;;  %v1735_v3 = vld [vmem:[#allocation7 + $0xe3] sm:$0xff] }
 0x209   :  { %v8877_v43 = vadd.f32 %v1991_v58, %v1530_v4  ;;  %7015 = vmatmul.msk.bf16.gmra.mxu0 %vm274_vm0, %v8875_v51  ;;  %v8883_v2 = vpop.f32.mrf.mxu3  ;;  %v1198_v4 = vld [vmem:[#allocation7 + $0xf2] sm:$0xff] }
 0x20a   :  { %7094 = vmatmul.msk.bf16.gmra.mxu2 %vm274_vm0, %v1752_v52  ;;  %v8901_v14 = vpack.c.bf16 %v1199_v21, %v1198_v4 }
 0x20d   :  { %v1910_v36 = vpop.f32.mrf.mxu2 }
 0x20e   :  { %v1455_v24 = vpop.f32.mrf.mxu1  ;;  %v8886_v48 = vadd.f32 %v1910_v36, %v1535_v39  ;;  %v1378_v53 = vpop.f32.mrf.mxu0  ;;  %7110 = vmatmul.msk.bf16.gmra.mxu3 %vm274_vm0, %v1752_v52  ;;  %v7999_v52 = vld [vmem:[#allocation12 + $0x54] sm:$0xf]  ;;  %v7237_v36 = vld [vmem:[#allocation12 + $0x58] sm:$0xf0] }
 0x20f   :  { %v1532_v58 = vadd.f32 %v1455_v24, %v8607_v32  ;;  %v8893_v19 = vadd.f32 %v1378_v53, %v8630_v50  ;;  %v1736_v32 = vld [vmem:[#allocation7 + $0xeb] sm:$0xff]  ;;  %v8000_v24 = vld [vmem:[#allocation12 + $0x54] sm:$0xf0]  ;;  %v7240_v53 = vor.u32 %v7999_v52, %v7237_v36  ;;  %v1737_v36 = vld [vmem:[#allocation7 + $0xf3] sm:$0xff] }
 0x211   :  { %v8888_v38 = vadd.f32 %v1994_v11, %v1532_v58  ;;  %7029 = vmatmul.msk.bf16.gmra.mxu1 %vm274_vm0, %v8829_v27  ;;  %v1999_v22 = vpop.f32.mrf.mxu3  ;;  %v1753_v27 = vpack.c.bf16 %v1736_v32, %v1735_v3  ;;  %v7236_v58 = vor.u32 %v8000_v24, %v7235_v1  ;;  %3280 = vmatpush.bf16.msra.mxu3 %v7240_v53  ;;  %v2246_v1 = vld [vmem:[#allocation7 + $0x4] sm:$0xff]  ;;  %v2247_v24 = vld [vmem:[#allocation7 + $0xc] sm:$0xff] }
 0x212   :  { %v2278_v53 = vpack.c.bf16 %v2247_v24, %v2246_v1  ;;  %v2248_v1 = vld [vmem:[#allocation7 + $0x14] sm:$0xff]  ;;  %v2249_v24 = vld [vmem:[#allocation7 + $0x1c] sm:$0xff] }
 0x213   :  { %3191 = vmatpush.bf16.msra.mxu2 %v7236_v58 }
 0x215   :  { %v8899_v11 = vpop.f32.mrf.mxu2 }
 0x216   :  { %v1457_v30 = vpop.f32.mrf.mxu1  ;;  %v1381_v33 = vpop.f32.mrf.mxu0 }
 0x217   :  { %v8897_v39 = vadd.f32 %v1457_v30, %v8613_v60  ;;  %v1543_v50 = vadd.f32 %v1381_v33, %v8637_v0 }
 0x219   :  { %7016 = vmatmul.msk.bf16.gmra.mxu0 %vm274_vm0, %v8901_v14  ;;  %v8907_v60 = vpop.f32.mrf.mxu3 }
 0x21a   :  { %7095 = vmatmul.msk.bf16.gmra.mxu2 %vm274_vm0, %v1753_v27 }
 0x21d   :  { %v1915_v21 = vpop.f32.mrf.mxu2 }
 0x21e   :  { %v1460_v30 = vpop.f32.mrf.mxu1  ;;  %v8910_v0 = vadd.f32 %v1915_v21, %v1539_v46  ;;  %v1383_v32 = vpop.f32.mrf.mxu0  ;;  %7111 = vmatmul.msk.bf16.gmra.mxu3 %vm274_vm0, %v1753_v27 }
 0x21f   :  { %v1536_v4 = vadd.f32 %v1460_v30, %v8619_v15  ;;  %v8917_v33 = vadd.f32 %v1383_v32, %v8645_v26  ;;  %v1738_v15 = vld [vmem:[#allocation7 + $0xfb] sm:$0xff] }
 0x221   :  { %v8912_v3 = vadd.f32 %v1999_v22, %v1536_v4  ;;  %7030 = vmatmul.msk.bf16.gmra.mxu1 %vm274_vm0, %v8851_v54  ;;  %10281 = vst [vmem:[#allocation49_spill] sm:$0xff] %v8917_v33  ;;  %v2004_v52 = vpop.f32.mrf.mxu3  ;;  %v1754_v4 = vpack.c.bf16 %v1738_v15, %v1737_v36 }
 0x225   :  { %v8923_v22 = vpop.f32.mrf.mxu2 }
 0x226   :  { %v1462_v58 = vpop.f32.mrf.mxu1  ;;  %v1386_v30 = vpop.f32.mrf.mxu0 }
 0x227   :  { %v8921_v46 = vadd.f32 %v1462_v58, %v8626_v41  ;;  %v1547_v54 = vadd.f32 %v1386_v30, %v8652_v42 }
 0x229   :  { %7161 = vmatmul.msk.bf16.vlgmr.msra.gmra.mxu0 %vm274_vm0, %v2278_v53  ;;  %v8928_v26 = vpop.f32.mrf.mxu3 }
 0x22a   :  { %7096 = vmatmul.msk.bf16.gmra.mxu2 %vm274_vm0, %v1754_v4 }
 0x22d   :  { %v1920_v32 = vpop.f32.mrf.mxu2 }
 0x22e   :  { %v1465_v27 = vpop.f32.mrf.mxu1  ;;  %v8931_v33 = vadd.f32 %v1920_v32, %v1543_v50  ;;  %v1388_v58 = vpop.f32.mrf.mxu0  ;;  %7112 = vmatmul.msk.bf16.gmra.mxu3 %vm274_vm0, %v1754_v4 }
 0x22f   :  { %v1540_v21 = vadd.f32 %v1465_v27, %v8635_v61  ;;  %v8938_v42 = vadd.f32 %v1388_v58, %v8661_v5  ;;  %v7997_v5 = vld [vmem:[#allocation12 + $0x44] sm:$0xf]  ;;  %v7229_v58 = vld [vmem:[#allocation12 + $0x48] sm:$0xf0] }
 0x230   :  { %v7232_v4 = vor.u32 %v7997_v5, %v7229_v58  ;;  %v2251_v5 = vld [vmem:[#allocation7 + $0x2c] sm:$0xff] }
 0x231   :  { %v8933_v41 = vadd.f32 %v2004_v52, %v1540_v21  ;;  %7031 = vmatmul.msk.bf16.gmra.mxu1 %vm274_vm0, %v8875_v51  ;;  %10282 = vst [vmem:[#allocation50_spill] sm:$0xff] %v8938_v42  ;;  %v2009_v36 = vpop.f32.mrf.mxu3  ;;  %v8946_v52 = vpack.c.bf16 %v2249_v24, %v2248_v1  ;;  %v7227_v51 = vld [vmem:[#allocation12 + $0x40] sm:$0xf]  ;;  %v7998_v21 = vld [vmem:[#allocation12 + $0x44] sm:$0xf0] }
 0x232   :  { %v7228_v32 = vor.u32 %v7998_v21, %v7227_v51  ;;  %3281 = vmatpush.bf16.msra.mxu3 %v7232_v4  ;;  %v2250_v21 = vld [vmem:[#allocation7 + $0x24] sm:$0xff] }
 0x234   :  { %3192 = vmatpush.bf16.msra.mxu2 %v7228_v32 }
 0x235   :  { %v8944_v50 = vpop.f32.mrf.mxu2 }
 0x236   :  { %v1467_v15 = vpop.f32.mrf.mxu1  ;;  %v1391_v30 = vpop.f32.mrf.mxu0 }
 0x237   :  { %v8942_v61 = vadd.f32 %v1467_v15, %v8641_v23  ;;  %v1551_v27 = vadd.f32 %v1391_v30, %v8668_v16 }
 0x239   :  { %7162 = vmatmul.msk.bf16.gmra.mxu0 %vm274_vm0, %v8946_v52  ;;  %v8951_v42 = vpop.f32.mrf.mxu3 }
 0x23d   :  { %v1925_v24 = vpop.f32.mrf.mxu2 }
 0x23e   :  { %v1470_v23 = vpop.f32.mrf.mxu1  ;;  %v8954_v15 = vadd.f32 %v1925_v24, %v1547_v54  ;;  %v1393_v30 = vpop.f32.mrf.mxu0  ;;  %v2280_v54 = vpack.c.bf16 %v2251_v5, %v2250_v21  ;;  %v2252_v5 = vld [vmem:[#allocation7 + $0x34] sm:$0xff] }
 0x23f   :  { %v1544_v1 = vadd.f32 %v1470_v23, %v8650_v37  ;;  %v8961_v51 = vadd.f32 %v1393_v30, %v8677_v7 }
 0x241   :  { %v8956_v16 = vadd.f32 %v2009_v36, %v1544_v1  ;;  %7032 = vmatmul.msk.bf16.gmra.mxu1 %vm274_vm0, %v8901_v14  ;;  %10283 = vst [vmem:[#allocation51_spill] sm:$0xff] %v8961_v51  ;;  %v2014_v58 = vpop.f32.mrf.mxu3 }
 0x245   :  { %v8966_v37 = vpop.f32.mrf.mxu2 }
 0x246   :  { %v1472_v32 = vpop.f32.mrf.mxu1  ;;  %10284 = vst [vmem:[#allocation52_spill] sm:$0xff] %v8966_v37  ;;  %v1396_v23 = vpop.f32.mrf.mxu0 }
 0x247   :  { %v8964_v4 = vadd.f32 %v1472_v32, %v8657_v62  ;;  %v1555_v36 = vadd.f32 %v1396_v23, %v8684_v13  ;;  %v2253_v13 = vld [vmem:[#allocation7 + $0x3c] sm:$0xff] }
 0x249   :  { %7163 = vmatmul.msk.bf16.gmra.mxu0 %vm274_vm0, %v2280_v54  ;;  %v8970_v1 = vpop.f32.mrf.mxu3 }
 0x24a   :  { %10285 = vst [vmem:[#allocation53_spill] sm:$0xff] %v8970_v1 }
 0x24d   :  { %v1930_v24 = vpop.f32.mrf.mxu2 }
 0x24e   :  { %v1475_v14 = vpop.f32.mrf.mxu1  ;;  %v8973_v30 = vadd.f32 %v1930_v24, %v1551_v27  ;;  %v1398_v62 = vpop.f32.mrf.mxu0 }
 0x24f   :  { %v1548_v7 = vadd.f32 %v1475_v14, %v8666_v12  ;;  %v8979_v21 = vadd.f32 %v1398_v62, %v8693_v49  ;;  %v8986_v12 = vpack.c.bf16 %v2253_v13, %v2252_v5  ;;  %v7219_v14 = vld [vmem:[#allocation12 + $0x30] sm:$0xf]  ;;  %v7221_v49 = vld [vmem:[#allocation12 + $0x38] sm:$0xf0] }
 0x250   :  { %10286 = vst [vmem:[#allocation54_spill] sm:$0xff] %v8973_v30  ;;  %v8020_v30 = vld [vmem:[#allocation12 + $0xf4] sm:$0xf0] }
 0x251   :  { %v8975_v51 = vadd.f32 %v2014_v58, %v1548_v7  ;;  %7177 = vmatmul.msk.bf16.vlgmr.msrb.gmra.mxu1 %vm274_vm0, %v2278_v53  ;;  %10287 = vst [vmem:[#allocation55_spill] sm:$0xff] %v8979_v21  ;;  %v2019_v32 = vpop.f32.mrf.mxu3  ;;  %v7996_v7 = vld [vmem:[#allocation12 + $0x34] sm:$0xf0]  ;;  %v7995_v53 = vld [vmem:[#allocation12 + $0x34] sm:$0xf] }
 0x252   :  { %v7220_v24 = vor.u32 %v7996_v7, %v7219_v14  ;;  %v7224_v62 = vor.u32 %v7995_v53, %v7221_v49  ;;  %v10292_v14 = vld [vmem:[#allocation30_spill] sm:$0xff]  ;;  %v2254_v53 = vld [vmem:[#allocation7 + $0x44] sm:$0xff]  ;;  %v2255_v49 = vld [vmem:[#allocation7 + $0x4c] sm:$0xff] }
 0x254   :  { %3193 = vmatpush.bf16.msra.mxu2 %v7220_v24  ;;  %3282 = vmatpush.bf16.msra.mxu3 %v7224_v62 }
 0x255   :  { %v8984_v37 = vpop.f32.mrf.mxu2 }
 0x256   :  { %v1477_v23 = vpop.f32.mrf.mxu1  ;;  %10288 = vst [vmem:[#allocation56_spill] sm:$0xff] %v8984_v37  ;;  %v1401_v27 = vpop.f32.mrf.mxu0  ;;  %v10294_v37 = vld [vmem:[#allocation27_spill] sm:$0xff] }
 0x257   :  { %v8982_v1 = vadd.f32 %v1477_v23, %v8673_v35  ;;  %v1559_v58 = vadd.f32 %v1401_v27, %v8700_v63 }
 0x259   :  { %7164 = vmatmul.msk.bf16.gmra.mxu0 %vm274_vm0, %v8986_v12  ;;  %v8991_v21 = vpop.f32.mrf.mxu3 }
 0x25a   :  { %10289 = vst [vmem:[#allocation57_spill] sm:$0xff] %v8991_v21 }
 0x25d   :  { %v1935_v13 = vpop.f32.mrf.mxu2 }
 0x25e   :  { %v1480_v35 = vpop.f32.mrf.mxu1  ;;  %v8994_v23 = vadd.f32 %v1935_v13, %v1555_v36  ;;  %v1403_v27 = vpop.f32.mrf.mxu0  ;;  %v2282_v36 = vpack.c.bf16 %v2255_v49, %v2254_v53  ;;  %v2256_v49 = vld [vmem:[#allocation7 + $0x54] sm:$0xff] }
 0x25f   :  { %v1552_v5 = vadd.f32 %v1480_v35, %v8682_v9  ;;  %v9001_v7 = vadd.f32 %v1403_v27, %v10292_v14  ;;  %v10299_v27 = vld [vmem:[#allocation28_spill] sm:$0xff] }
 0x260   :  { %10290 = vst [vmem:[#allocation58_spill] sm:$0xff] %v8994_v23 }
 0x261   :  { %v8996_v63 = vadd.f32 %v2019_v32, %v1552_v5  ;;  %7178 = vmatmul.msk.bf16.gmra.mxu1 %vm274_vm0, %v8946_v52  ;;  %10293 = vst [vmem:[#allocation30_spill] sm:$0xff] %v9001_v7  ;;  %v2024_v21 = vpop.f32.mrf.mxu3  ;;  %v10297_v32 = vld [vmem:[#allocation32_spill] sm:$0xff] }
 0x263   :  { %10291 = vst [vmem:[#allocation59_spill] sm:$0xff] %v8996_v63 }
 0x265   :  { %v9006_v9 = vpop.f32.mrf.mxu2 }
 0x266   :  { %v1482_v24 = vpop.f32.mrf.mxu1  ;;  %10296 = vst [vmem:[#allocation60_spill] sm:$0xff] %v9006_v9  ;;  %v1406_v35 = vpop.f32.mrf.mxu0  ;;  %v10303_v9 = vld [vmem:[#allocation29_spill] sm:$0xff] }
 0x267   :  { %v9004_v62 = vadd.f32 %v1482_v24, %v10294_v37  ;;  %v1563_v5 = vadd.f32 %v1406_v35, %v10297_v32  ;;  %v2257_v24 = vld [vmem:[#allocation7 + $0x5c] sm:$0xff] }
 0x269   :  { %10295 = vst [vmem:[#allocation27_spill] sm:$0xff] %v9004_v62  ;;  %7165 = vmatmul.msk.bf16.gmra.mxu0 %vm274_vm0, %v2282_v36  ;;  %v9010_v13 = vpop.f32.mrf.mxu3 }
 0x26a   :  { %10298 = vst [vmem:[#allocation32_spill] sm:$0xff] %v9010_v13 }
 0x26d   :  { %v1940_v7 = vpop.f32.mrf.mxu2 }
 0x26e   :  { %v1485_v52 = vpop.f32.mrf.mxu1  ;;  %v9013_v23 = vadd.f32 %v1940_v7, %v1559_v58  ;;  %v1408_v37 = vpop.f32.mrf.mxu0 }
 0x26f   :  { %v1556_v14 = vadd.f32 %v1485_v52, %v10299_v27  ;;  %v9019_v53 = vadd.f32 %v1408_v37, %v8725_v59  ;;  %v9026_v52 = vpack.c.bf16 %v2257_v24, %v2256_v49  ;;  %v7211_v27 = vld [vmem:[#allocation12 + $0x20] sm:$0xf]  ;;  %v7213_v59 = vld [vmem:[#allocation12 + $0x28] sm:$0xf0] }
 0x270   :  { %10300 = vst [vmem:[#allocation28_spill] sm:$0xff] %v9013_v23 }
 0x271   :  { %v9015_v63 = vadd.f32 %v2024_v21, %v1556_v14  ;;  %7179 = vmatmul.msk.bf16.gmra.mxu1 %vm274_vm0, %v2280_v54  ;;  %10302 = vst [vmem:[#allocation62_spill] sm:$0xff] %v9019_v53  ;;  %v2029_v35 = vpop.f32.mrf.mxu3  ;;  %v10306_v21 = vld [vmem:[#allocation35_spill] sm:$0xff]  ;;  %v7994_v14 = vld [vmem:[#allocation12 + $0x24] sm:$0xf0]  ;;  %v7993_v54 = vld [vmem:[#allocation12 + $0x24] sm:$0xf] }
 0x272   :  { %v7212_v23 = vor.u32 %v7994_v14, %v7211_v27  ;;  %v7216_v37 = vor.u32 %v7993_v54, %v7213_v59  ;;  %v2258_v14 = vld [vmem:[#allocation7 + $0x64] sm:$0xff]  ;;  %v2259_v54 = vld [vmem:[#allocation7 + $0x6c] sm:$0xff] }
 0x273   :  { %10301 = vst [vmem:[#allocation61_spill] sm:$0xff] %v9015_v63 }
 0x274   :  { %3194 = vmatpush.bf16.msra.mxu2 %v7212_v23  ;;  %3283 = vmatpush.bf16.msra.mxu3 %v7216_v37 }
 0x275   :  { %v9024_v62 = vpop.f32.mrf.mxu2 }
 0x276   :  { %v1487_v32 = vpop.f32.mrf.mxu1  ;;  %10305 = vst [vmem:[#allocation63_spill] sm:$0xff] %v9024_v62  ;;  %v1411_v58 = vpop.f32.mrf.mxu0 }
 0x277   :  { %v9022_v13 = vadd.f32 %v1487_v32, %v10303_v9  ;;  %v1567_v7 = vadd.f32 %v1411_v58, %v10306_v21  ;;  %v10308_v32 = vld [vmem:[#allocation31_spill] sm:$0xff] }
 0x279   :  { %10304 = vst [vmem:[#allocation29_spill] sm:$0xff] %v9022_v13  ;;  %7166 = vmatmul.msk.bf16.gmra.mxu0 %vm274_vm0, %v9026_v52  ;;  %v9031_v53 = vpop.f32.mrf.mxu3  ;;  %v10324_v13 = vld [vmem:[#allocation25_spill] sm:$0xff] }
 0x27a   :  { %10307 = vst [vmem:[#allocation35_spill] sm:$0xff] %v9031_v53  ;;  %v10312_v53 = vld [vmem:[#allocation33_spill] sm:$0xff] }
 0x27d   :  { %v1945_v24 = vpop.f32.mrf.mxu2 }
 0x27e   :  { %v1490_v9 = vpop.f32.mrf.mxu1  ;;  %v9034_v62 = vadd.f32 %v1945_v24, %v1563_v5  ;;  %v1413_v21 = vpop.f32.mrf.mxu0  ;;  %v2284_v5 = vpack.c.bf16 %v2259_v54, %v2258_v14  ;;  %v2260_v54 = vld [vmem:[#allocation7 + $0x74] sm:$0xff] }
 0x27f   :  { %v1560_v49 = vadd.f32 %v1490_v9, %v10308_v32  ;;  %v9041_v27 = vadd.f32 %v1413_v21, %v8741_v20  ;;  %v10317_v20 = vld [vmem:[#allocation34_spill] sm:$0xff] }
 0x280   :  { %10309 = vst [vmem:[#allocation31_spill] sm:$0xff] %v9034_v62 }
 0x281   :  { %v9036_v58 = vadd.f32 %v2029_v35, %v1560_v49  ;;  %7180 = vmatmul.msk.bf16.gmra.mxu1 %vm274_vm0, %v8986_v12  ;;  %10311 = vst [vmem:[#allocation65_spill] sm:$0xff] %v9041_v27  ;;  %v2034_v59 = vpop.f32.mrf.mxu3  ;;  %v10315_v35 = vld [vmem:[#allocation38_spill] sm:$0xff] }
 0x283   :  { %10310 = vst [vmem:[#allocation64_spill] sm:$0xff] %v9036_v58 }
 0x285   :  { %v9046_v9 = vpop.f32.mrf.mxu2 }
 0x286   :  { %v1492_v23 = vpop.f32.mrf.mxu1  ;;  %10314 = vst [vmem:[#allocation66_spill] sm:$0xff] %v9046_v9  ;;  %v1416_v32 = vpop.f32.mrf.mxu0 }
 0x287   :  { %v9044_v37 = vadd.f32 %v1492_v23, %v10312_v53  ;;  %v1571_v49 = vadd.f32 %v1416_v32, %v10315_v35  ;;  %v10320_v23 = vld [vmem:[#allocation40_spill] sm:$0xff]  ;;  %v2261_v32 = vld [vmem:[#allocation7 + $0x7c] sm:$0xff] }
 0x289   :  { %10313 = vst [vmem:[#allocation33_spill] sm:$0xff] %v9044_v37  ;;  %7167 = vmatmul.msk.bf16.gmra.mxu0 %vm274_vm0, %v2284_v5  ;;  %v9050_v24 = vpop.f32.mrf.mxu3  ;;  %v10322_v37 = vld [vmem:[#allocation36_spill] sm:$0xff] }
 0x28a   :  { %10316 = vst [vmem:[#allocation38_spill] sm:$0xff] %v9050_v24 }
 0x28d   :  { %v1950_v27 = vpop.f32.mrf.mxu2 }
 0x28e   :  { %v1495_v12 = vpop.f32.mrf.mxu1  ;;  %v9053_v62 = vadd.f32 %v1950_v27, %v1567_v7  ;;  %v1418_v53 = vpop.f32.mrf.mxu0  ;;  %v2285_v27 = vpack.c.bf16 %v2261_v32, %v2260_v54 }
 0x28f   :  { %v1564_v21 = vadd.f32 %v1495_v12, %v10317_v20  ;;  %v9059_v14 = vadd.f32 %v1418_v53, %v10320_v23  ;;  %v10325_v12 = vld [vmem:[#allocation42_spill] sm:$0xff]  ;;  %v7205_v23 = vld [vmem:[#allocation12 + $0x18] sm:$0xf0] }
 0x290   :  { %10318 = vst [vmem:[#allocation34_spill] sm:$0xff] %v9053_v62  ;;  %v1036_v20 = vadd.f32 %v10325_v12, %v10324_v13  ;;  %v7203_v62 = vld [vmem:[#allocation12 + $0x10] sm:$0xf] }
 0x291   :  { %v9055_v58 = vadd.f32 %v2034_v59, %v1564_v21  ;;  %7181 = vmatmul.msk.bf16.gmra.mxu1 %vm274_vm0, %v2282_v36  ;;  %10321 = vst [vmem:[#allocation40_spill] sm:$0xff] %v9059_v14  ;;  %v2039_v9 = vpop.f32.mrf.mxu3  ;;  %v7992_v36 = vld [vmem:[#allocation12 + $0x14] sm:$0xf0] }
 0x292   :  { %v7204_v53 = vor.u32 %v7992_v36, %v7203_v62 }
 0x293   :  { %10319 = vst [vmem:[#allocation67_spill] sm:$0xff] %v9055_v58  ;;  %v7991_v58 = vld [vmem:[#allocation12 + $0x14] sm:$0xf] }
 0x294   :  { %v7208_v14 = vor.u32 %v7991_v58, %v7205_v23  ;;  %3195 = vmatpush.bf16.msra.mxu2 %v7204_v53 }
 0x295   :  { %v9066_v7 = vpop.f32.mrf.mxu2 }
 0x296   :  { %v1497_v35 = vpop.f32.mrf.mxu1  ;;  %10326 = vst [vmem:[#allocation25_spill] sm:$0xff] %v9066_v7  ;;  %v1421_v59 = vpop.f32.mrf.mxu0  ;;  %3284 = vmatpush.bf16.msra.mxu3 %v7208_v14  ;;  %v2263_v14 = vld [vmem:[#allocation7 + $0x8c] sm:$0xff] }
 0x297   :  { %v9062_v24 = vadd.f32 %v1497_v35, %v10322_v37  ;;  %v1575_v21 = vadd.f32 %v1421_v59, %v1036_v20  ;;  %v10327_v37 = vld [vmem:[#allocation37_spill] sm:$0xff]  ;;  %v2262_v59 = vld [vmem:[#allocation7 + $0x84] sm:$0xff] }
 0x299   :  { %10323 = vst [vmem:[#allocation36_spill] sm:$0xff] %v9062_v24  ;;  %7168 = vmatmul.msk.bf16.gmra.mxu0 %vm274_vm0, %v2285_v27  ;;  %v10328_v24 = vld [vmem:[#allocation26_spill] sm:$0xff]  ;;  %v9072_v54 = vpop.f32.mrf.mxu3 }
 0x29a   :  { %v1038_v13 = vadd.f32 %v8773_v18, %v10328_v24  ;;  %10329 = vst [vmem:[#allocation42_spill] sm:$0xff] %v9072_v54  ;;  %v2286_v24 = vpack.c.bf16 %v2263_v14, %v2262_v59  ;;  %v10340_v14 = vld [vmem:[#allocation43_spill] sm:$0xff] }
 0x29d   :  { %v1955_v12 = vpop.f32.mrf.mxu2 }
 0x29e   :  { %v1500_v63 = vpop.f32.mrf.mxu1  ;;  %v9074_v32 = vadd.f32 %v1955_v12, %v1571_v49  ;;  %v1423_v62 = vpop.f32.mrf.mxu0 }
 0x29f   :  { %v1568_v35 = vadd.f32 %v1500_v63, %v10327_v37  ;;  %v9080_v58 = vadd.f32 %v1423_v62, %v1038_v13  ;;  %v10333_v63 = vld [vmem:[#allocation39_spill] sm:$0xff]  ;;  %v10336_v37 = vld [vmem:[#allocation41_spill] sm:$0xff] }
 0x2a0   :  { %10330 = vst [vmem:[#allocation37_spill] sm:$0xff] %v9074_v32 }
 0x2a1   :  { %v9076_v20 = vadd.f32 %v2039_v9, %v1568_v35  ;;  %7182 = vmatmul.msk.bf16.gmra.mxu1 %vm274_vm0, %v9026_v52  ;;  %10332 = vst [vmem:[#allocation68_spill] sm:$0xff] %v9080_v58  ;;  %v2044_v49 = vpop.f32.mrf.mxu3  ;;  %v2265_v58 = vld [vmem:[#allocation7 + $0x9c] sm:$0xff] }
 0x2a3   :  { %10331 = vst [vmem:[#allocation26_spill] sm:$0xff] %v9076_v20 }
 0x2a5   :  { %v9085_v18 = vpop.f32.mrf.mxu2 }
 0x2a6   :  { %v1502_v36 = vpop.f32.mrf.mxu1  ;;  %10335 = vst [vmem:[#allocation69_spill] sm:$0xff] %v9085_v18  ;;  %v2424_v23 = vpop.f32.mrf.mxu0 }
 0x2a7   :  { %v9083_v53 = vadd.f32 %v1502_v36, %v10333_v63  ;;  %v2264_v63 = vld [vmem:[#allocation7 + $0x94] sm:$0xff] }
 0x2a8   :  { %v2287_v32 = vpack.c.bf16 %v2265_v58, %v2264_v63  ;;  %v7195_v63 = vld [vmem:[#allocation12] sm:$0xf] }
 0x2a9   :  { %10334 = vst [vmem:[#allocation39_spill] sm:$0xff] %v9083_v53  ;;  %7169 = vmatmul.msk.bf16.gmra.mxu0 %vm274_vm0, %v2286_v24  ;;  %v9094_v36 = vpop.f32.mrf.mxu3 }
 0x2aa   :  { %10339 = vst [vmem:[#allocation71_spill] sm:$0xff] %v9094_v36  ;;  %v10343_v36 = vld [vmem:[#allocation45_spill] sm:$0xff] }
 0x2ad   :  { %v1960_v12 = vpop.f32.mrf.mxu2 }
 0x2ae   :  { %v1505_v9 = vpop.f32.mrf.mxu1  ;;  %v9089_v52 = vadd.f32 %v1960_v12, %v1575_v21  ;;  %v2426_v62 = vpop.f32.mrf.mxu0  ;;  %v2267_v12 = vld [vmem:[#allocation7 + $0xac] sm:$0xff] }
 0x2af   :  { %v1572_v35 = vadd.f32 %v1505_v9, %v10336_v37 }
 0x2b0   :  { %10337 = vst [vmem:[#allocation41_spill] sm:$0xff] %v9089_v52 }
 0x2b1   :  { %v9091_v13 = vadd.f32 %v2044_v49, %v1572_v35  ;;  %7183 = vmatmul.msk.bf16.gmra.mxu1 %vm274_vm0, %v2284_v5  ;;  %v2049_v21 = vpop.f32.mrf.mxu3  ;;  %v2266_v5 = vld [vmem:[#allocation7 + $0xa4] sm:$0xff] }
 0x2b3   :  { %10338 = vst [vmem:[#allocation70_spill] sm:$0xff] %v9091_v13 }
 0x2b6   :  { %v1507_v59 = vpop.f32.mrf.mxu1  ;;  %v2429_v54 = vpop.f32.mrf.mxu0 }
 0x2b7   :  { %v9097_v18 = vadd.f32 %v1507_v59, %v10340_v14  ;;  %v9107_v59 = vpack.c.bf16 %v2267_v12, %v2266_v5  ;;  %v7990_v14 = vld [vmem:[#allocation12 + $0x4] sm:$0xf0] }
 0x2b8   :  { %v7196_v53 = vor.u32 %v7990_v14, %v7195_v63  ;;  %v2269_v63 = vld [vmem:[#allocation7 + $0xbc] sm:$0xff] }
 0x2b9   :  { %10341 = vst [vmem:[#allocation43_spill] sm:$0xff] %v9097_v18  ;;  %7170 = vmatmul.msk.bf16.gmra.mxu0 %vm274_vm0, %v2287_v32  ;;  %v7989_v18 = vld [vmem:[#allocation12 + $0x4] sm:$0xf] }
 0x2ba   :  { %3196 = vmatpush.bf16.msra.mxu2 %v7196_v53 }
 0x2be   :  { %v1510_v9 = vpop.f32.mrf.mxu1  ;;  %v2431_v35 = vpop.f32.mrf.mxu0 }
 0x2bf   :  { %v1576_v49 = vadd.f32 %v1510_v9, %v8781_v34  ;;  %v7197_v34 = vld [vmem:[#allocation12 + $0x8] sm:$0xf0] }
 0x2c0   :  { %v7200_v9 = vor.u32 %v7989_v18, %v7197_v34  ;;  %v10347_v18 = vld [vmem:[#allocation46_spill] sm:$0xff] }
 0x2c1   :  { %v9101_v37 = vadd.f32 %v2049_v21, %v1576_v49  ;;  %7184 = vmatmul.msk.bf16.gmra.mxu1 %vm274_vm0, %v2285_v27  ;;  %v10345_v21 = vld [vmem:[#allocation44_spill] sm:$0xff]  ;;  %v2595_v34 = vadd.f32 %v2426_v62, %v10347_v18  ;;  %v9131_v62 = vld [vmem:[%s10247_s2] ss:$0 sm:$0xff] }
 0x2c2   :  { %3285 = vmatpush.bf16.msra.mxu3 %v7200_v9  ;;  %v2593_v49 = vadd.f32 %v2424_v23, %v10345_v21  ;;  %v2270_v18 = vld [vmem:[#allocation7 + $0xc4] sm:$0xff] }
 0x2c3   :  { %10342 = vst [vmem:[#allocation72_spill] sm:$0xff] %v9101_v37 }
 0x2c6   :  { %v1512_v52 = vpop.f32.mrf.mxu1  ;;  %v9109_v58 = vpop.f32.mrf.mxu0 }
 0x2c7   :  { %v9105_v13 = vadd.f32 %v1512_v52, %v10343_v36  ;;  %v10346_v52 = vld [vmem:[#allocation48_spill] sm:$0xff] }
 0x2c9   :  { %10344 = vst [vmem:[#allocation45_spill] sm:$0xff] %v9105_v13  ;;  %7171 = vmatmul.msk.bf16.gmra.mxu0 %vm274_vm0, %v9107_v59  ;;  %v2268_v13 = vld [vmem:[#allocation7 + $0xb4] sm:$0xff] }
 0x2ca   :  { %v9120_v53 = vpack.c.bf16 %v2269_v63, %v2268_v13 }
 0x2ce   :  { %v2513_v27 = vpop.f32.mrf.mxu1  ;;  %v9115_v12 = vpop.f32.mrf.mxu0 }
 0x2cf   :  { %v2594_v36 = vadd.f32 %v2513_v27, %v10346_v52  ;;  %v10348_v27 = vld [vmem:[#allocation47_spill] sm:$0xff]  ;;  %v7379_v52 = vld [vmem:[#allocation12 + $0x170] sm:$0xf] }
 0x2d1   :  { %v2785_v5 = vmax.f32 %v2593_v49, %v2594_v36  ;;  %7185 = vmatmul.msk.bf16.gmra.mxu1 %vm274_vm0, %v2286_v24  ;;  %v2597_v24 = vadd.f32 %v2429_v54, %v10348_v27  ;;  %v8036_v36 = vld [vmem:[#allocation12 + $0x174] sm:$0xf0]  ;;  %v7381_v54 = vld [vmem:[#allocation12 + $0x178] sm:$0xf0] }
 0x2d2   :  { %v7380_v63 = vor.u32 %v8036_v36, %v7379_v52 }
 0x2d3   :  { %2817 = vst [vmem:[#allocation3] sm:$0xff] %v2785_v5 }
 0x2d4   :  { %4155 = vmatpush.bf16.msrb.mxu2 %v7380_v63 }
 0x2d6   :  { %v2515_v14 = vpop.f32.mrf.mxu1  ;;  %v9122_v7 = vpop.f32.mrf.mxu0 }
 0x2d7   :  { %v2596_v37 = vadd.f32 %v2515_v14, %v8813_v6  ;;  %v8035_v14 = vld [vmem:[#allocation12 + $0x174] sm:$0xf] }
 0x2d9   :  { %v2786_v9 = vmax.f32 %v2595_v34, %v2596_v37  ;;  %7172 = vmatmul.msk.bf16.gmra.mxu0 %vm274_vm0, %v9120_v53  ;;  %v2271_v34 = vld [vmem:[#allocation7 + $0xcc] sm:$0xff] }
 0x2db   :  { %2818 = vst [vmem:[#allocation3 + $0x8] sm:$0xff] %v2786_v9 }
 0x2de   :  { %v2518_v23 = vpop.f32.mrf.mxu1  ;;  %v9133_v13 = vpop.f32.mrf.mxu0 }
 0x2df   :  { %v2598_v21 = vadd.f32 %v2518_v23, %v8822_v25  ;;  %v7384_v23 = vor.u32 %v8035_v14, %v7381_v54 }
 0x2e1   :  { %v2787_v6 = vmax.f32 %v2597_v24, %v2598_v21  ;;  %7186 = vmatmul.msk.bf16.gmra.mxu1 %vm274_vm0, %v2287_v32  ;;  %v2599_v24 = vadd.f32 %v2431_v35, %v8811_v55  ;;  %4244 = vmatpush.bf16.msrb.mxu3 %v7384_v23  ;;  %v8019_v55 = vld [vmem:[#allocation12 + $0xf4] sm:$0xf]  ;;  %v7317_v35 = vld [vmem:[#allocation12 + $0xf8] sm:$0xf0]  ;;  %v8018_v23 = vld [vmem:[#allocation12 + $0xe4] sm:$0xf0] }
 0x2e2   :  { %v2881_v37 = vld [vmem:[#allocation3 + $0x1] sm:$0xff]  ;;  %v7320_v14 = vor.u32 %v8019_v55, %v7317_v35 }
 0x2e3   :  { %v2913_v49 = vmax.f32 %v2785_v5, %v2881_v37  ;;  %2819 = vst [vmem:[#allocation3 + $0x10] sm:$0xff] %v2787_v6  ;;  %v9139_v5 = vpack.c.bf16 %v2271_v34, %v2270_v18  ;;  %v7307_v34 = vld [vmem:[#allocation12 + $0xe0] sm:$0xf] }
 0x2e4   :  { %3729 = vmatpush.bf16.msra.mxu1 %v7320_v14  ;;  %v8014_v14 = vld [vmem:[#allocation12 + $0xc4] sm:$0xf0] }
 0x2e5   :  { %v2949_v25 = vadd.f32 %v9131_v62, %v2913_v49  ;;  %v7315_v49 = vld [vmem:[#allocation12 + $0xf0] sm:$0xf] }
 0x2e6   :  { %v2520_v27 = vpop.f32.mrf.mxu1  ;;  %v9141_v52 = vpop.f32.mrf.mxu0  ;;  %v7316_v63 = vor.u32 %v8020_v30, %v7315_v49  ;;  %v2272_v49 = vld [vmem:[#allocation7 + $0xd4] sm:$0xff] }
 0x2e7   :  { %v2981_v21 = vmax.f32 %v2949_v25, 0.0  ;;  %v2600_v32 = vadd.f32 %v2520_v27, %v8833_v45  ;;  %v2601_v25 = vadd.f32 %v9109_v58, %v8820_v28  ;;  %v7308_v27 = vor.u32 %v8018_v23, %v7307_v34  ;;  %v7299_v28 = vld [vmem:[#allocation12 + $0xd0] sm:$0xf] }
 0x2e8   :  { %3640 = vmatpush.bf16.msrb.mxu0 %v7316_v63  ;;  %v2273_v63 = vld [vmem:[#allocation7 + $0xdc] sm:$0xff] }
 0x2e9   :  { %3013 = vst [vmem:[#allocation4] sm:$0xff] %v2981_v21  ;;  %v2788_v37 = vmax.f32 %v2599_v24, %v2600_v32  ;;  %7173 = vmatmul.msk.bf16.gmra.mxu0 %vm274_vm0, %v9139_v5 }
 0x2ea   :  { %v2882_v36 = vld [vmem:[#allocation3 + $0x9] sm:$0xff] }
 0x2eb   :  { %v2914_v20 = vmax.f32 %v2786_v9, %v2882_v36  ;;  %2820 = vst [vmem:[#allocation3 + $0x18] sm:$0xff] %v2788_v37 }
 0x2ec   :  { %3641 = vmatpush.bf16.msrb.mxu0 %v7308_v27  ;;  %v7283_v27 = vld [vmem:[#allocation12 + $0xb0] sm:$0xf] }
 0x2ed   :  { %v2950_v45 = vadd.f32 %v9131_v62, %v2914_v20 }
 0x2ee   :  { %v2523_v54 = vpop.f32.mrf.mxu1  ;;  %v9151_v30 = vpop.f32.mrf.mxu0 }
 0x2ef   :  { %v2982_v18 = vmax.f32 %v2950_v45, 0.0  ;;  %v2602_v9 = vadd.f32 %v2523_v54, %v8842_v10  ;;  %v8016_v10 = vld [vmem:[#allocation12 + $0xd4] sm:$0xf0]  ;;  %v9160_v54 = vpack.c.bf16 %v2273_v63, %v2272_v49 }
 0x2f0   :  { %v7300_v58 = vor.u32 %v8016_v10, %v7299_v28  ;;  %v7275_v10 = vld [vmem:[#allocation12 + $0xa0] sm:$0xf] }
 0x2f1   :  { %3014 = vst [vmem:[#allocation4 + $0x8] sm:$0xff] %v2982_v18  ;;  %v9149_v24 = vmax.f32 %v2601_v25, %v2602_v9  ;;  %7187 = vmatmul.msk.bf16.gmra.mxu1 %vm274_vm0, %v9107_v59  ;;  %v3077_v20 = vpack.c.bf16 %v2982_v18, %v2981_v21  ;;  %v2603_v59 = vadd.f32 %v9115_v12, %v8831_v47  ;;  %v8012_v47 = vld [vmem:[#allocation12 + $0xb4] sm:$0xf0] }
 0x2f2   :  { %v2883_v32 = vld [vmem:[#allocation3 + $0x11] sm:$0xff]  ;;  %3642 = vmatpush.bf16.msrb.mxu0 %v7300_v58 }
 0x2f3   :  { %v2915_v36 = vmax.f32 %v2787_v6, %v2883_v32  ;;  %2821 = vst [vmem:[#allocation3 + $0x20] sm:$0xff] %v9149_v24  ;;  %3197 = vmatmul.bf16.vlgmr.msra.gmra.mxu2 %v3077_v20  ;;  %3286 = vmatmul.bf16.vlgmr.msra.gmra.mxu3 %v3077_v20  ;;  %v7291_v6 = vld [vmem:[#allocation12 + $0xc0] sm:$0xf]  ;;  %v2605_v32 = vadd.f32 %v9122_v7, %v8840_v29 }
 0x2f4   :  { %v7292_v25 = vor.u32 %v8014_v14, %v7291_v6  ;;  %v7371_v29 = vld [vmem:[#allocation12 + $0x160] sm:$0xf]  ;;  %v7373_v6 = vld [vmem:[#allocation12 + $0x168] sm:$0xf0]  ;;  %v7267_v14 = vld [vmem:[#allocation12 + $0x90] sm:$0xf] }
 0x2f5   :  { %v2951_v55 = vadd.f32 %v9131_v62, %v2915_v36 }
 0x2f6   :  { %v2525_v35 = vpop.f32.mrf.mxu1  ;;  %v9164_v9 = vpop.f32.mrf.mxu0  ;;  %3643 = vmatpush.bf16.msrb.mxu0 %v7292_v25  ;;  %v2274_v25 = vld [vmem:[#allocation7 + $0xe4] sm:$0xff] }
 0x2f7   :  { %v2604_v21 = vadd.f32 %v2525_v35, %v8855_v57  ;;  %v2983_v45 = vmax.f32 %v2951_v55, 0.0  ;;  %v7284_v57 = vor.u32 %v8012_v47, %v7283_v27 }
 0x2f9   :  { %v9162_v18 = vmax.f32 %v2603_v59, %v2604_v21  ;;  %3015 = vst [vmem:[#allocation4 + $0x10] sm:$0xff] %v2983_v45  ;;  %7174 = vmatmul.msk.bf16.gmra.mxu0 %vm274_vm0, %v9160_v54  ;;  %v8033_v21 = vld [vmem:[#allocation12 + $0x164] sm:$0xf] }
 0x2fa   :  { %v2884_v34 = vld [vmem:[#allocation3 + $0x19] sm:$0xff]  ;;  %3644 = vmatpush.bf16.msrb.mxu0 %v7284_v57 }
 0x2fb   :  { %v2916_v23 = vmax.f32 %v2788_v37, %v2884_v34  ;;  %2822 = vst [vmem:[#allocation3 + $0x28] sm:$0xff] %v9162_v18  ;;  %v8010_v37 = vld [vmem:[#allocation12 + $0xa4] sm:$0xf0] }
 0x2fc   :  { %v7276_v58 = vor.u32 %v8010_v37, %v7275_v10  ;;  %v2275_v34 = vld [vmem:[#allocation7 + $0xec] sm:$0xff] }
 0x2fd   :  { %v2952_v12 = vadd.f32 %v9131_v62, %v2916_v23  ;;  %v7376_v23 = vor.u32 %v8033_v21, %v7373_v6 }
 0x2fe   :  { %v2528_v20 = vpop.f32.mrf.mxu1  ;;  %v9175_v63 = vpop.f32.mrf.mxu0  ;;  %3645 = vmatpush.bf16.msrb.mxu0 %v7276_v58 }
 0x2ff   :  { %v2606_v36 = vadd.f32 %v2528_v20, %v8864_v40  ;;  %v2984_v28 = vmax.f32 %v2952_v12, 0.0  ;;  %v8034_v40 = vld [vmem:[#allocation12 + $0x164] sm:$0xf0]  ;;  %4245 = vmatpush.bf16.msrb.mxu3 %v7376_v23  ;;  %v7259_v20 = vld [vmem:[#allocation12 + $0x80] sm:$0xf] }
 0x300   :  { %v7372_v7 = vor.u32 %v8034_v40, %v7371_v29  ;;  %v2609_v29 = vadd.f32 %v9141_v52, %v8862_v8  ;;  %v2072_v8 = vadd.f32 %v8873_v44, %v8847_v56  ;;  %v2276_v52 = vld [vmem:[#allocation7 + $0xf4] sm:$0xff] }
 0x301   :  { %v9173_v49 = vmax.f32 %v2605_v32, %v2606_v36  ;;  %7188 = vmatmul.msk.bf16.gmra.mxu1 %vm274_vm0, %v9120_v53  ;;  %3016 = vst [vmem:[#allocation4 + $0x18] sm:$0xff] %v2984_v28  ;;  %v3078_v55 = vpack.c.bf16 %v2984_v28, %v2983_v45  ;;  %v8008_v45 = vld [vmem:[#allocation12 + $0x94] sm:$0xf0]  ;;  %v8006_v32 = vld [vmem:[#allocation12 + $0x84] sm:$0xf0]  ;;  %v9185_v36 = vpack.c.bf16 %v2275_v34, %v2274_v25 }
 0x302   :  { %v2885_v35 = vld [vmem:[#allocation3 + $0x21] sm:$0xff]  ;;  %4156 = vmatpush.bf16.msrb.mxu2 %v7372_v7  ;;  %v7268_v47 = vor.u32 %v8008_v45, %v7267_v14  ;;  %v7260_v37 = vor.u32 %v8006_v32, %v7259_v20  ;;  %v2277_v34 = vld [vmem:[#allocation7 + $0xfc] sm:$0xff]  ;;  %v2611_v23 = vadd.f32 %v9151_v30, %v2072_v8  ;;  %v7293_v30 = vld [vmem:[#allocation12 + $0xc8] sm:$0xf0]  ;;  %v2077_v8 = vadd.f32 %v8907_v60, %v8921_v46 }
 0x303   :  { %v2917_v59 = vmax.f32 %v9149_v24, %v2885_v35  ;;  %2823 = vst [vmem:[#allocation3 + $0x30] sm:$0xff] %v9173_v49  ;;  %3202 = vmatmul.bf16.gmra.mxu2 %v3078_v55  ;;  %3291 = vmatmul.bf16.gmra.mxu3 %v3078_v55  ;;  %v2607_v24 = vadd.f32 %v9133_v13, %v8853_v17  ;;  %v8017_v35 = vld [vmem:[#allocation12 + $0xe4] sm:$0xf]  ;;  %v7309_v17 = vld [vmem:[#allocation12 + $0xe8] sm:$0xf0] }
 0x304   :  { %3646 = vmatpush.bf16.msrb.mxu0 %v7268_v47  ;;  %v8015_v47 = vld [vmem:[#allocation12 + $0xd4] sm:$0xf]  ;;  %v3495_v60 = vld [vmem:[#allocation4 + $0x2] sm:$0xff] }
 0x305   :  { %v2953_v53 = vadd.f32 %v9131_v62, %v2917_v59 }
 0x306   :  { %v2530_v27 = vpop.f32.mrf.mxu1  ;;  %v9187_v10 = vpop.f32.mrf.mxu0 }
 0x307   :  { %v2608_v57 = vadd.f32 %v2530_v27, %v8877_v43  ;;  %v2985_v12 = vmax.f32 %v2953_v53, 0.0  ;;  %v7312_v43 = vor.u32 %v8017_v35, %v7309_v17  ;;  %v7285_v17 = vld [vmem:[#allocation12 + $0xb8] sm:$0xf0] }
 0x308   :  { %3647 = vmatpush.bf16.msrb.mxu0 %v7260_v37 }
 0x309   :  { %v2792_v28 = vmax.f32 %v2607_v24, %v2608_v57  ;;  %3017 = vst [vmem:[#allocation4 + $0x20] sm:$0xff] %v2985_v12  ;;  %7175 = vmatmul.msk.bf16.gmra.mxu0 %vm274_vm0, %v9185_v36  ;;  %3730 = vmatpush.bf16.msra.mxu1 %v7312_v43  ;;  %v7301_v24 = vld [vmem:[#allocation12 + $0xd8] sm:$0xf0] }
 0x30a   :  { %v2886_v58 = vld [vmem:[#allocation3 + $0x29] sm:$0xff]  ;;  %v7304_v56 = vor.u32 %v8015_v47, %v7301_v24  ;;  %v8007_v47 = vld [vmem:[#allocation12 + $0x94] sm:$0xf]  ;;  %v7269_v24 = vld [vmem:[#allocation12 + $0x98] sm:$0xf0] }
 0x30b   :  { %v2918_v55 = vmax.f32 %v9162_v18, %v2886_v58  ;;  %2824 = vst [vmem:[#allocation3 + $0x38] sm:$0xff] %v2792_v28  ;;  %v2613_v58 = vadd.f32 %v9164_v9, %v8886_v48  ;;  %v7363_v48 = vld [vmem:[#allocation12 + $0x150] sm:$0xf]  ;;  %v7272_v46 = vor.u32 %v8007_v47, %v7269_v24 }
 0x30d   :  { %v2954_v13 = vadd.f32 %v9131_v62, %v2918_v55  ;;  %3731 = vmatpush.bf16.msra.mxu1 %v7304_v56 }
 0x30e   :  { %v2533_v59 = vpop.f32.mrf.mxu1  ;;  %v9198_v18 = vpop.f32.mrf.mxu0 }
 0x30f   :  { %v2610_v40 = vadd.f32 %v2533_v59, %v8888_v38  ;;  %v2986_v7 = vmax.f32 %v2954_v13, 0.0  ;;  %v2073_v38 = vadd.f32 %v8883_v2, %v8897_v39  ;;  %v8013_v39 = vld [vmem:[#allocation12 + $0xc4] sm:$0xf] }
 0x310   :  { %v7296_v32 = vor.u32 %v8013_v39, %v7293_v30  ;;  %v7261_v39 = vld [vmem:[#allocation12 + $0x88] sm:$0xf0] }
 0x311   :  { %v9196_v21 = vmax.f32 %v2609_v29, %v2610_v40  ;;  %7189 = vmatmul.msk.bf16.gmra.mxu1 %vm274_vm0, %v9139_v5  ;;  %3018 = vst [vmem:[#allocation4 + $0x28] sm:$0xff] %v2986_v7  ;;  %v3079_v6 = vpack.c.bf16 %v2986_v7, %v2985_v12 }
 0x312   :  { %v2887_v14 = vld [vmem:[#allocation3 + $0x31] sm:$0xff]  ;;  %3732 = vmatpush.bf16.msra.mxu1 %v7296_v32 }
 0x313   :  { %v2919_v25 = vmax.f32 %v9173_v49, %v2887_v14  ;;  %2825 = vst [vmem:[#allocation3 + $0x40] sm:$0xff] %v9196_v21  ;;  %3207 = vmatmul.bf16.gmra.mxu2 %v3079_v6  ;;  %3296 = vmatmul.bf16.gmra.mxu3 %v3079_v6  ;;  %v9210_v49 = vpack.c.bf16 %v2277_v34, %v2276_v52  ;;  %v8031_v6 = vld [vmem:[#allocation12 + $0x154] sm:$0xf]  ;;  %v7365_v14 = vld [vmem:[#allocation12 + $0x158] sm:$0xf0] }
 0x314   :  { %v7277_v52 = vld [vmem:[#allocation12 + $0xa8] sm:$0xf0] }
 0x315   :  { %v2955_v53 = vadd.f32 %v9131_v62, %v2919_v25  ;;  %v8009_v25 = vld [vmem:[#allocation12 + $0xa4] sm:$0xf] }
 0x316   :  { %v2535_v5 = vpop.f32.mrf.mxu1  ;;  %v9214_v12 = vpop.f32.mrf.mxu0 }
 0x317   :  { %v2612_v45 = vadd.f32 %v2535_v5, %v2073_v38  ;;  %v2987_v27 = vmax.f32 %v2955_v53, 0.0  ;;  %v7280_v53 = vor.u32 %v8009_v25, %v7277_v52 }
 0x319   :  { %v9212_v57 = vmax.f32 %v2611_v23, %v2612_v45  ;;  %3019 = vst [vmem:[#allocation4 + $0x30] sm:$0xff] %v2987_v27  ;;  %7176 = vmatmul.msk.bf16.gmra.mxu0 %vm274_vm0, %v9210_v49  ;;  %v3496_v45 = vld [vmem:[#allocation4 + $0xa] sm:$0xff] }
 0x31a   :  { %v2888_v44 = vld [vmem:[#allocation3 + $0x39] sm:$0xff] }
 0x31b   :  { %v2920_v2 = vmax.f32 %v2792_v28, %v2888_v44  ;;  %2826 = vst [vmem:[#allocation3 + $0x48] sm:$0xff] %v9212_v57  ;;  %v8011_v28 = vld [vmem:[#allocation12 + $0xb4] sm:$0xf]  ;;  %v9239_v44 = vpack.c.bf16 %v3496_v45, %v3495_v60  ;;  %v2085_v45 = vadd.f32 %v8951_v42, %v8964_v4 }
 0x31c   :  { %v7288_v29 = vor.u32 %v8011_v28, %v7285_v17 }
 0x31d   :  { %v2956_v20 = vadd.f32 %v9131_v62, %v2920_v2 }
 0x31e   :  { %v2538_v37 = vpop.f32.mrf.mxu1  ;;  %v9225_v13 = vpop.f32.mrf.mxu0  ;;  %3733 = vmatpush.bf16.msra.mxu1 %v7288_v29 }
 0x31f   :  { %v2614_v55 = vadd.f32 %v2538_v37, %v8912_v3  ;;  %v2988_v35 = vmax.f32 %v2956_v20, 0.0  ;;  %v8032_v3 = vld [vmem:[#allocation12 + $0x154] sm:$0xf0]  ;;  %v2617_v37 = vadd.f32 %v9187_v10, %v8910_v0  ;;  %v2080_v0 = vadd.f32 %v8923_v22, %v8893_v19 }
 0x320   :  { %v7364_v9 = vor.u32 %v8032_v3, %v7363_v48  ;;  %v3500_v60 = vld [vmem:[#allocation4 + $0x2a] sm:$0xff] }
 0x321   :  { %v9223_v43 = vmax.f32 %v2613_v58, %v2614_v55  ;;  %7190 = vmatmul.msk.bf16.gmra.mxu1 %vm274_vm0, %v9160_v54  ;;  %3020 = vst [vmem:[#allocation4 + $0x38] sm:$0xff] %v2988_v35  ;;  %v3080_v59 = vpack.c.bf16 %v2988_v35, %v2987_v27  ;;  %v2076_v54 = vadd.f32 %v8899_v11, %v8869_v31 }
 0x322   :  { %v2889_v40 = vld [vmem:[#allocation3 + $0x41] sm:$0xff]  ;;  %4157 = vmatpush.bf16.msrb.mxu2 %v7364_v9  ;;  %3734 = vmatpush.bf16.msra.mxu1 %v7280_v53 }
 0x323   :  { %v2921_v7 = vmax.f32 %v9196_v21, %v2889_v40  ;;  %2827 = vst [vmem:[#allocation3 + $0x50] sm:$0xff] %v9223_v43  ;;  %3212 = vmatmul.bf16.gmra.mxu2 %v3080_v59  ;;  %3301 = vmatmul.bf16.gmra.mxu3 %v3080_v59  ;;  %v7368_v21 = vor.u32 %v8031_v6, %v7365_v14  ;;  %v8030_v53 = vld [vmem:[#allocation12 + $0x144] sm:$0xf0] }
 0x324   :  { %v2615_v5 = vadd.f32 %v9175_v63, %v2076_v54  ;;  %v8005_v63 = vld [vmem:[#allocation12 + $0x84] sm:$0xf]  ;;  %v2619_v40 = vadd.f32 %v9198_v18, %v2080_v0 }
 0x325   :  { %v2957_v38 = vadd.f32 %v9131_v62, %v2921_v7  ;;  %4246 = vmatpush.bf16.msrb.mxu3 %v7368_v21  ;;  %v7264_v20 = vor.u32 %v8005_v63, %v7261_v39  ;;  %v3498_v7 = vld [vmem:[#allocation4 + $0x1a] sm:$0xff]  ;;  %v3499_v63 = vld [vmem:[#allocation4 + $0x22] sm:$0xff] }
 0x326   :  { %v2540_v34 = vpop.f32.mrf.mxu1  ;;  %v9237_v11 = vpop.f32.mrf.mxu0  ;;  %3735 = vmatpush.bf16.msra.mxu1 %v7272_v46  ;;  %v9279_v39 = vpack.c.bf16 %v3500_v60, %v3499_v63 }
 0x327   :  { %v2616_v23 = vadd.f32 %v2540_v34, %v2077_v8  ;;  %v2989_v27 = vmax.f32 %v2957_v38, 0.0  ;;  %v7355_v34 = vld [vmem:[#allocation12 + $0x140] sm:$0xf] }
 0x329   :  { %v2796_v31 = vmax.f32 %v2615_v5, %v2616_v23  ;;  %3021 = vst [vmem:[#allocation4 + $0x40] sm:$0xff] %v2989_v27  ;;  %3648 = vmatmul.bf16.vlgmr.msrb.gmra.mxu0 %v9239_v44  ;;  %v7356_v5 = vor.u32 %v8030_v53, %v7355_v34  ;;  %v7347_v34 = vld [vmem:[#allocation12 + $0x130] sm:$0xf]  ;;  %v8028_v53 = vld [vmem:[#allocation12 + $0x134] sm:$0xf0] }
 0x32a   :  { %v2890_v56 = vld [vmem:[#allocation3 + $0x49] sm:$0xff]  ;;  %3736 = vmatpush.bf16.msra.mxu1 %v7264_v20 }
 0x32b   :  { %v2922_v2 = vmax.f32 %v9212_v57, %v2890_v56  ;;  %2828 = vst [vmem:[#allocation3 + $0x58] sm:$0xff] %v2796_v31  ;;  %4158 = vmatpush.bf16.msrb.mxu2 %v7356_v5  ;;  %v7348_v5 = vor.u32 %v8028_v53, %v7347_v34  ;;  %v10365_v53 = vld [vmem:[#allocation28_spill] sm:$0xff] }
 0x32d   :  { %v2958_v30 = vadd.f32 %v9131_v62, %v2922_v2 }
 0x32e   :  { %v2543_v32 = vpop.f32.mrf.mxu1  ;;  %v9247_v28 = vpop.f32.mrf.mxu0 }
 0x32f   :  { %v2618_v58 = vadd.f32 %v2543_v32, %v8933_v41  ;;  %v2990_v55 = vmax.f32 %v2958_v30, 0.0  ;;  %v2081_v41 = vadd.f32 %v8928_v26, %v8942_v61  ;;  %v2621_v61 = vadd.f32 %v9214_v12, %v8931_v33  ;;  %v8029_v33 = vld [vmem:[#allocation12 + $0x144] sm:$0xf]  ;;  %v7357_v12 = vld [vmem:[#allocation12 + $0x148] sm:$0xf0]  ;;  %4159 = vmatpush.bf16.msrb.mxu2 %v7348_v5 }
 0x331   :  { %v2797_v35 = vmax.f32 %v2617_v37, %v2618_v58  ;;  %7191 = vmatmul.msk.bf16.gmra.mxu1 %vm274_vm0, %v9185_v36  ;;  %3022 = vst [vmem:[#allocation4 + $0x48] sm:$0xff] %v2990_v55  ;;  %v3081_v57 = vpack.c.bf16 %v2990_v55, %v2989_v27  ;;  %v7360_v27 = vor.u32 %v8029_v33, %v7357_v12  ;;  %v8027_v33 = vld [vmem:[#allocation12 + $0x134] sm:$0xf]  ;;  %v10355_v12 = vld [vmem:[#allocation51_spill] sm:$0xff] }
 0x332   :  { %v2891_v17 = vld [vmem:[#allocation3 + $0x51] sm:$0xff] }
 0x333   :  { %v2923_v59 = vmax.f32 %v9223_v43, %v2891_v17  ;;  %2829 = vst [vmem:[#allocation3 + $0x60] sm:$0xff] %v2797_v35  ;;  %3217 = vmatmul.bf16.gmra.mxu2 %v3081_v57  ;;  %3306 = vmatmul.bf16.gmra.mxu3 %v3081_v57  ;;  %v3497_v43 = vld [vmem:[#allocation4 + $0x12] sm:$0xff]  ;;  %v10350_v17 = vld [vmem:[#allocation50_spill] sm:$0xff] }
 0x334   :  { %v9260_v14 = vpack.c.bf16 %v3498_v7, %v3497_v43  ;;  %4247 = vmatpush.bf16.msrb.mxu3 %v7360_v27 }
 0x335   :  { %v2959_v10 = vadd.f32 %v9131_v62, %v2923_v59  ;;  %v10351_v59 = vld [vmem:[#allocation52_spill] sm:$0xff] }
 0x336   :  { %v2545_v29 = vpop.f32.mrf.mxu1  ;;  %v9258_v9 = vpop.f32.mrf.mxu0  ;;  %v2088_v0 = vadd.f32 %v10351_v59, %v10350_v17 }
 0x337   :  { %v2620_v36 = vadd.f32 %v2545_v29, %v2081_v41  ;;  %v2991_v48 = vmax.f32 %v2959_v10, 0.0 }
 0x338   :  { %v2627_v10 = vadd.f32 %v9247_v28, %v2088_v0 }
 0x339   :  { %v2798_v3 = vmax.f32 %v2619_v40, %v2620_v36  ;;  %3023 = vst [vmem:[#allocation4 + $0x50] sm:$0xff] %v2991_v48  ;;  %3653 = vmatmul.bf16.gmra.mxu0 %v9260_v14 }
 0x33a   :  { %v2892_v6 = vld [vmem:[#allocation3 + $0x59] sm:$0xff] }
 0x33b   :  { %v2924_v19 = vmax.f32 %v2796_v31, %v2892_v6  ;;  %2830 = vst [vmem:[#allocation3 + $0x68] sm:$0xff] %v2798_v3 }
 0x33d   :  { %v2960_v22 = vadd.f32 %v9131_v62, %v2924_v19 }
 0x33e   :  { %v2548_v26 = vpop.f32.mrf.mxu1  ;;  %v9267_v8 = vpop.f32.mrf.mxu0 }
 0x33f   :  { %v2622_v18 = vadd.f32 %v2548_v26, %v8956_v16  ;;  %v2992_v25 = vmax.f32 %v2960_v22, 0.0  ;;  %v10349_v16 = vld [vmem:[#allocation49_spill] sm:$0xff]  ;;  %v10353_v22 = vld [vmem:[#allocation54_spill] sm:$0xff]  ;;  %v10354_v26 = vld [vmem:[#allocation59_spill] sm:$0xff] }
 0x340   :  { %v2084_v23 = vadd.f32 %v8944_v50, %v10349_v16  ;;  %v2629_v28 = vadd.f32 %v9258_v9, %v10353_v22  ;;  %v7349_v9 = vld [vmem:[#allocation12 + $0x138] sm:$0xf0]  ;;  %v10356_v16 = vld [vmem:[#allocation56_spill] sm:$0xff] }
 0x341   :  { %v2799_v54 = vmax.f32 %v2621_v61, %v2622_v18  ;;  %7192 = vmatmul.msk.bf16.gmra.mxu1 %vm274_vm0, %v9210_v49  ;;  %3024 = vst [vmem:[#allocation4 + $0x58] sm:$0xff] %v2992_v25  ;;  %v3082_v38 = vpack.c.bf16 %v2992_v25, %v2991_v48  ;;  %v3501_v48 = vld [vmem:[#allocation4 + $0x32] sm:$0xff] }
 0x342   :  { %v2893_v21 = vld [vmem:[#allocation3 + $0x61] sm:$0xff]  ;;  %v2623_v24 = vadd.f32 %v9225_v13, %v2084_v23  ;;  %v2625_v13 = vadd.f32 %v9237_v11, %v8954_v15  ;;  %v10352_v15 = vld [vmem:[#allocation53_spill] sm:$0xff]  ;;  %v2092_v23 = vadd.f32 %v10356_v16, %v10355_v12 }
 0x343   :  { %v2925_v52 = vmax.f32 %v2797_v35, %v2893_v21  ;;  %2831 = vst [vmem:[#allocation3 + $0x70] sm:$0xff] %v2799_v54  ;;  %3222 = vmatmul.bf16.gmra.mxu2 %v3082_v38  ;;  %3311 = vmatmul.bf16.gmra.mxu3 %v3082_v38  ;;  %v2089_v11 = vadd.f32 %v10352_v15, %v8982_v1 }
 0x345   :  { %v2961_v49 = vadd.f32 %v9131_v62, %v2925_v52 }
 0x346   :  { %v2550_v47 = vpop.f32.mrf.mxu1  ;;  %v9277_v2 = vpop.f32.mrf.mxu0 }
 0x347   :  { %v2624_v31 = vadd.f32 %v2550_v47, %v2085_v45  ;;  %v2993_v46 = vmax.f32 %v2961_v49, 0.0  ;;  %v10357_v45 = vld [vmem:[#allocation27_spill] sm:$0xff]  ;;  %v10358_v49 = vld [vmem:[#allocation57_spill] sm:$0xff]  ;;  %v7352_v47 = vor.u32 %v8027_v33, %v7349_v9  ;;  %v10366_v33 = vld [vmem:[#allocation64_spill] sm:$0xff] }
 0x348   :  { %v2093_v27 = vadd.f32 %v10358_v49, %v10357_v45 }
 0x349   :  { %v2800_v56 = vmax.f32 %v2623_v24, %v2624_v31  ;;  %3025 = vst [vmem:[#allocation4 + $0x60] sm:$0xff] %v2993_v46  ;;  %3658 = vmatmul.bf16.gmra.mxu0 %v9279_v39  ;;  %v2631_v31 = vadd.f32 %v9267_v8, %v2092_v23  ;;  %4248 = vmatpush.bf16.msrb.mxu3 %v7352_v47  ;;  %v7339_v47 = vld [vmem:[#allocation12 + $0x120] sm:$0xf] }
 0x34a   :  { %v2894_v50 = vld [vmem:[#allocation3 + $0x69] sm:$0xff] }
 0x34b   :  { %v2926_v42 = vmax.f32 %v2798_v3, %v2894_v50  ;;  %2832 = vst [vmem:[#allocation3 + $0x78] sm:$0xff] %v2800_v56 }
 0x34d   :  { %v2962_v4 = vadd.f32 %v9131_v62, %v2926_v42  ;;  %v3503_v42 = vld [vmem:[#allocation4 + $0x42] sm:$0xff] }
 0x34e   :  { %v2553_v30 = vpop.f32.mrf.mxu1  ;;  %v9286_v58 = vpop.f32.mrf.mxu0 }
 0x34f   :  { %v2626_v20 = vadd.f32 %v2553_v30, %v8975_v51  ;;  %v2994_v32 = vmax.f32 %v2962_v4, 0.0 }
 0x351   :  { %v2801_v37 = vmax.f32 %v2625_v13, %v2626_v20  ;;  %3737 = vmatmul.bf16.vlgmr.msra.gmra.mxu1 %v9239_v44  ;;  %3026 = vst [vmem:[#allocation4 + $0x68] sm:$0xff] %v2994_v32  ;;  %v3083_v55 = vpack.c.bf16 %v2994_v32, %v2993_v46  ;;  %v3502_v44 = vld [vmem:[#allocation4 + $0x3a] sm:$0xff]  ;;  %v3504_v46 = vld [vmem:[#allocation4 + $0x4a] sm:$0xff]  ;;  %v9319_v32 = vpop.f32.mrf.mxu2 }
 0x352   :  { %v2895_v35 = vld [vmem:[#allocation3 + $0x71] sm:$0xff]  ;;  %v9297_v43 = vpack.c.bf16 %v3502_v44, %v3501_v48  ;;  %v9315_v30 = vpack.c.bf16 %v3504_v46, %v3503_v42 }
 0x353   :  { %v2927_v57 = vmax.f32 %v2799_v54, %v2895_v35  ;;  %2833 = vst [vmem:[#allocation3 + $0x80] sm:$0xff] %v2801_v37  ;;  %3227 = vmatmul.bf16.gmra.mxu2 %v3083_v55  ;;  %3316 = vmatmul.bf16.gmra.mxu3 %v3083_v55  ;;  %v10359_v55 = vld [vmem:[#allocation58_spill] sm:$0xff]  ;;  %v10369_v42 = vld [vmem:[#allocation33_spill] sm:$0xff] }
 0x354   :  { %v2633_v35 = vadd.f32 %v9277_v2, %v10359_v55  ;;  %v10364_v2 = vld [vmem:[#allocation32_spill] sm:$0xff]  ;;  %v10367_v46 = vld [vmem:[#allocation30_spill] sm:$0xff] }
 0x355   :  { %v2963_v51 = vadd.f32 %v9131_v62, %v2927_v57  ;;  %v10360_v57 = vld [vmem:[#allocation61_spill] sm:$0xff] }
 0x356   :  { %v2555_v41 = vpop.f32.mrf.mxu1  ;;  %v9295_v7 = vpop.f32.mrf.mxu0 }
 0x357   :  { %v2628_v29 = vadd.f32 %v2555_v41, %v2089_v11  ;;  %v2995_v40 = vmax.f32 %v2963_v51, 0.0  ;;  %v2637_v5 = vadd.f32 %v9295_v7, %v10365_v53  ;;  %v10375_v53 = vld [vmem:[#allocation36_spill] sm:$0xff] }
 0x359   :  { %v2802_v36 = vmax.f32 %v2627_v10, %v2628_v29  ;;  %3027 = vst [vmem:[#allocation4 + $0x70] sm:$0xff] %v2995_v40  ;;  %3663 = vmatmul.bf16.gmra.mxu0 %v9297_v43  ;;  %v10361_v10 = vld [vmem:[#allocation55_spill] sm:$0xff]  ;;  %v10362_v29 = vld [vmem:[#allocation60_spill] sm:$0xff] }
 0x35a   :  { %v2896_v3 = vld [vmem:[#allocation3 + $0x79] sm:$0xff]  ;;  %v2096_v44 = vadd.f32 %v10362_v29, %v10361_v10 }
 0x35b   :  { %v2928_v6 = vmax.f32 %v2800_v56, %v2896_v3  ;;  %2834 = vst [vmem:[#allocation3 + $0x88] sm:$0xff] %v2802_v36 }
 0x35d   :  { %v2964_v1 = vadd.f32 %v9131_v62, %v2928_v6 }
 0x35e   :  { %v2558_v19 = vpop.f32.mrf.mxu1  ;;  %v9304_v54 = vpop.f32.mrf.mxu0 }
 0x35f   :  { %v2630_v61 = vadd.f32 %v2558_v19, %v10354_v26  ;;  %v2996_v18 = vmax.f32 %v2964_v1, 0.0  ;;  %v3506_v19 = vld [vmem:[#allocation4 + $0x5a] sm:$0xff] }
 0x361   :  { %v2803_v25 = vmax.f32 %v2629_v28, %v2630_v61  ;;  %3742 = vmatmul.bf16.gmra.mxu1 %v9260_v14  ;;  %3028 = vst [vmem:[#allocation4 + $0x78] sm:$0xff] %v2996_v18  ;;  %v3084_v38 = vpack.c.bf16 %v2996_v18, %v2995_v40  ;;  %v10363_v40 = vld [vmem:[#allocation29_spill] sm:$0xff]  ;;  %v3505_v18 = vld [vmem:[#allocation4 + $0x52] sm:$0xff] }
 0x362   :  { %v2897_v21 = vld [vmem:[#allocation3 + $0x81] sm:$0xff] }
 0x363   :  { %v2929_v52 = vmax.f32 %v2801_v37, %v2897_v21  ;;  %2835 = vst [vmem:[#allocation3 + $0x90] sm:$0xff] %v2803_v25  ;;  %3232 = vmatmul.bf16.gmra.mxu2 %v3084_v38  ;;  %3321 = vmatmul.bf16.gmra.mxu3 %v3084_v38  ;;  %v9321_v37 = vpop.f32.mrf.mxu3  ;;  %v9341_v38 = vpack.c.bf16 %v3506_v19, %v3505_v18 }
 0x365   :  { %v2965_v14 = vadd.f32 %v9131_v62, %v2929_v52 }
 0x366   :  { %v2560_v24 = vpop.f32.mrf.mxu1  ;;  %v9313_v50 = vpop.f32.mrf.mxu0 }
 0x367   :  { %v2632_v60 = vadd.f32 %v2560_v24, %v2093_v27  ;;  %v2997_v56 = vmax.f32 %v2965_v14, 0.0  ;;  %v8026_v24 = vld [vmem:[#allocation12 + $0x124] sm:$0xf0] }
 0x368   :  { %v7340_v7 = vor.u32 %v8026_v24, %v7339_v47 }
 0x369   :  { %v2804_v63 = vmax.f32 %v2631_v31, %v2632_v60  ;;  %3029 = vst [vmem:[#allocation4 + $0x80] sm:$0xff] %v2997_v56  ;;  %3668 = vmatmul.bf16.gmra.mxu0 %v9315_v30  ;;  %v8025_v31 = vld [vmem:[#allocation12 + $0x124] sm:$0xf]  ;;  %v7341_v60 = vld [vmem:[#allocation12 + $0x128] sm:$0xf0] }
 0x36a   :  { %v2898_v4 = vld [vmem:[#allocation3 + $0x89] sm:$0xff]  ;;  %4160 = vmatpush.bf16.msrb.mxu2 %v7340_v7 }
 0x36b   :  { %v2930_v13 = vmax.f32 %v2802_v36, %v2898_v4  ;;  %2836 = vst [vmem:[#allocation3 + $0x98] sm:$0xff] %v2804_v63  ;;  %v2097_v36 = vadd.f32 %v10364_v2, %v10363_v40  ;;  %v10370_v4 = vld [vmem:[#allocation35_spill] sm:$0xff] }
 0x36d   :  { %v2966_v20 = vadd.f32 %v9131_v62, %v2930_v13  ;;  %v2101_v13 = vadd.f32 %v10370_v4, %v10369_v42  ;;  %v10377_v4 = vld [vmem:[#allocation34_spill] sm:$0xff] }
 0x36e   :  { %v2563_v8 = vpop.f32.mrf.mxu1  ;;  %v9326_v15 = vpop.f32.mrf.mxu0 }
 0x36f   :  { %v2634_v17 = vadd.f32 %v2563_v8, %v10360_v57  ;;  %v2998_v59 = vmax.f32 %v2966_v20, 0.0  ;;  %v7344_v20 = vor.u32 %v8025_v31, %v7341_v60  ;;  %v3509_v31 = vld [vmem:[#allocation4 + $0x72] sm:$0xff] }
 0x371   :  { %v2805_v0 = vmax.f32 %v2633_v35, %v2634_v17  ;;  %3747 = vmatmul.bf16.gmra.mxu1 %v9279_v39  ;;  %3030 = vst [vmem:[#allocation4 + $0x88] sm:$0xff] %v2998_v59  ;;  %v3085_v11 = vpack.c.bf16 %v2998_v59, %v2997_v56  ;;  %v2635_v39 = vadd.f32 %v9286_v58, %v2096_v44  ;;  %v10368_v56 = vld [vmem:[#allocation63_spill] sm:$0xff]  ;;  %v3508_v17 = vld [vmem:[#allocation4 + $0x6a] sm:$0xff] }
 0x372   :  { %v2899_v51 = vld [vmem:[#allocation3 + $0x91] sm:$0xff]  ;;  %4249 = vmatpush.bf16.msrb.mxu3 %v7344_v20 }
 0x373   :  { %v2931_v41 = vmax.f32 %v2803_v25, %v2899_v51  ;;  %2837 = vst [vmem:[#allocation3 + $0xa0] sm:$0xff] %v2805_v0  ;;  %3237 = vmatmul.bf16.gmra.mxu2 %v3085_v11  ;;  %3326 = vmatmul.bf16.gmra.mxu3 %v3085_v11 }
 0x375   :  { %v2967_v48 = vadd.f32 %v9131_v62, %v2931_v41  ;;  %v3507_v41 = vld [vmem:[#allocation4 + $0x62] sm:$0xff] }
 0x376   :  { %v2565_v3 = vpop.f32.mrf.mxu1  ;;  %v9334_v6 = vpop.f32.mrf.mxu2  ;;  %v9367_v29 = vpack.c.bf16 %v3508_v17, %v3507_v41  ;;  %v8024_v41 = vld [vmem:[#allocation12 + $0x114] sm:$0xf0] }
 0x377   :  { %v2636_v1 = vadd.f32 %v2565_v3, %v2097_v36  ;;  %v9337_v22 = vpop.f32.mrf.mxu3  ;;  %v2999_v28 = vmax.f32 %v2967_v48, 0.0  ;;  %v9339_v61 = vpop.f32.mrf.mxu0  ;;  %v10371_v36 = vld [vmem:[#allocation31_spill] sm:$0xff] }
 0x378   :  { %v2641_v48 = vadd.f32 %v9313_v50, %v10371_v36  ;;  %v10372_v3 = vld [vmem:[#allocation67_spill] sm:$0xff]  ;;  %v10380_v36 = vld [vmem:[#allocation25_spill] sm:$0xff] }
 0x379   :  { %v2806_v26 = vmax.f32 %v2635_v39, %v2636_v1  ;;  %3031 = vst [vmem:[#allocation4 + $0x90] sm:$0xff] %v2999_v28  ;;  %3673 = vmatmul.bf16.gmra.mxu0 %v9341_v38 }
 0x37a   :  { %v2900_v25 = vld [vmem:[#allocation3 + $0x99] sm:$0xff] }
 0x37b   :  { %v2932_v21 = vmax.f32 %v2804_v63, %v2900_v25  ;;  %2838 = vst [vmem:[#allocation3 + $0xa8] sm:$0xff] %v2806_v26  ;;  %v2100_v63 = vadd.f32 %v10368_v56, %v10367_v46 }
 0x37d   :  { %v2968_v52 = vadd.f32 %v9131_v62, %v2932_v21  ;;  %v2639_v35 = vadd.f32 %v9304_v54, %v2100_v63 }
 0x37e   :  { %v2568_v58 = vpop.f32.mrf.mxu1  ;;  %v9345_v34 = vpop.f32.mrf.mxu2 }
 0x37f   :  { %v2638_v9 = vadd.f32 %v2568_v58, %v10366_v33  ;;  %v9350_v12 = vpop.f32.mrf.mxu3  ;;  %v3000_v16 = vmax.f32 %v2968_v52, 0.0  ;;  %v9352_v45 = vpop.f32.mrf.mxu0  ;;  %v10373_v52 = vld [vmem:[#allocation62_spill] sm:$0xff] }
 0x380   :  { %v10374_v58 = vld [vmem:[#allocation66_spill] sm:$0xff] }
 0x381   :  { %v2807_v23 = vmax.f32 %v2637_v5, %v2638_v9  ;;  %3752 = vmatmul.bf16.gmra.mxu1 %v9297_v43  ;;  %3032 = vst [vmem:[#allocation4 + $0x98] sm:$0xff] %v3000_v16  ;;  %v3086_v49 = vpack.c.bf16 %v3000_v16, %v2999_v28  ;;  %v2104_v50 = vadd.f32 %v10374_v58, %v10373_v52  ;;  %v10376_v5 = vld [vmem:[#allocation38_spill] sm:$0xff] }
 0x382   :  { %v2901_v27 = vld [vmem:[#allocation3 + $0xa1] sm:$0xff]  ;;  %v2105_v33 = vadd.f32 %v10376_v5, %v10375_v53 }
 0x383   :  { %v2933_v14 = vmax.f32 %v2805_v0, %v2901_v27  ;;  %2839 = vst [vmem:[#allocation3 + $0xb0] sm:$0xff] %v2807_v23  ;;  %3242 = vmatmul.bf16.gmra.mxu2 %v3086_v49  ;;  %3331 = vmatmul.bf16.gmra.mxu3 %v3086_v49 }
 0x385   :  { %v2969_v43 = vadd.f32 %v9131_v62, %v2933_v14  ;;  %v3510_v14 = vld [vmem:[#allocation4 + $0x7a] sm:$0xff] }
 0x386   :  { %v2570_v8 = vpop.f32.mrf.mxu1  ;;  %v9360_v55 = vpop.f32.mrf.mxu2  ;;  %v9393_v46 = vpack.c.bf16 %v3510_v14, %v3509_v31 }
 0x387   :  { %v2640_v57 = vadd.f32 %v2570_v8, %v2101_v13  ;;  %v9363_v59 = vpop.f32.mrf.mxu3  ;;  %v3001_v0 = vmax.f32 %v2969_v43, 0.0  ;;  %v9365_v51 = vpop.f32.mrf.mxu0  ;;  %v2645_v13 = vadd.f32 %v9339_v61, %v10377_v4  ;;  %v10378_v43 = vld [vmem:[#allocation26_spill] sm:$0xff] }
 0x388   :  { %v7331_v61 = vld [vmem:[#allocation12 + $0x110] sm:$0xf] }
 0x389   :  { %v2808_v11 = vmax.f32 %v2639_v35, %v2640_v57  ;;  %3033 = vst [vmem:[#allocation4 + $0xa0] sm:$0xff] %v3001_v0  ;;  %3678 = vmatmul.bf16.gmra.mxu0 %v9367_v29 }
 0x38a   :  { %v2902_v10 = vld [vmem:[#allocation3 + $0xa9] sm:$0xff] }
 0x38b   :  { %v2934_v44 = vmax.f32 %v2806_v26, %v2902_v10  ;;  %2840 = vst [vmem:[#allocation3 + $0xb8] sm:$0xff] %v2808_v11  ;;  %v7332_v10 = vor.u32 %v8024_v41, %v7331_v61  ;;  %v10386_v61 = vld [vmem:[#allocation69_spill] sm:$0xff] }
 0x38d   :  { %v2970_v54 = vadd.f32 %v9131_v62, %v2934_v44  ;;  %v8023_v44 = vld [vmem:[#allocation12 + $0x114] sm:$0xf]  ;;  %4161 = vmatpush.bf16.msrb.mxu2 %v7332_v10  ;;  %v10387_v10 = vld [vmem:[#allocation43_spill] sm:$0xff] }
 0x38e   :  { %v2573_v40 = vpop.f32.mrf.mxu1  ;;  %v9371_v2 = vpop.f32.mrf.mxu2 }
 0x38f   :  { %v2642_v39 = vadd.f32 %v2573_v40, %v10372_v3  ;;  %v9376_v1 = vpop.f32.mrf.mxu3  ;;  %v3002_v19 = vmax.f32 %v2970_v54, 0.0  ;;  %v9378_v18 = vpop.f32.mrf.mxu0  ;;  %v7333_v54 = vld [vmem:[#allocation12 + $0x118] sm:$0xf0]  ;;  %v10379_v40 = vld [vmem:[#allocation65_spill] sm:$0xff] }
 0x390   :  { %v10381_v3 = vld [vmem:[#allocation39_spill] sm:$0xff] }
 0x391   :  { %v2809_v28 = vmax.f32 %v2641_v48, %v2642_v39  ;;  %3757 = vmatmul.bf16.gmra.mxu1 %v9315_v30  ;;  %3034 = vst [vmem:[#allocation4 + $0xa8] sm:$0xff] %v3002_v19  ;;  %v3087_v26 = vpack.c.bf16 %v3002_v19, %v3001_v0  ;;  %v2643_v30 = vadd.f32 %v9326_v15, %v2104_v50  ;;  %v10382_v39 = vld [vmem:[#allocation42_spill] sm:$0xff] }
 0x392   :  { %v2903_v25 = vld [vmem:[#allocation3 + $0xb1] sm:$0xff]  ;;  %v2108_v48 = vadd.f32 %v10380_v36, %v10379_v40  ;;  %v2109_v19 = vadd.f32 %v10382_v39, %v10381_v3  ;;  %v3514_v3 = vld [vmem:[#allocation4 + $0x9a] sm:$0xff] }
 0x393   :  { %v2935_v21 = vmax.f32 %v2807_v23, %v2903_v25  ;;  %2841 = vst [vmem:[#allocation3 + $0xc0] sm:$0xff] %v2809_v28  ;;  %3247 = vmatmul.bf16.gmra.mxu2 %v3087_v26  ;;  %3336 = vmatmul.bf16.gmra.mxu3 %v3087_v26  ;;  %v7336_v26 = vor.u32 %v8023_v44, %v7333_v54  ;;  %v3512_v50 = vld [vmem:[#allocation4 + $0x8a] sm:$0xff]  ;;  %v10388_v44 = vld [vmem:[#allocation71_spill] sm:$0xff] }
 0x394   :  { %v2647_v52 = vadd.f32 %v9352_v45, %v2108_v48  ;;  %v8412_v45 = vmov 0.0   ;;  %v2113_v54 = vadd.f32 %v10388_v44, %v10387_v10 }
 0x395   :  { %v2971_v9 = vadd.f32 %v9131_v62, %v2935_v21  ;;  %4250 = vmatpush.bf16.msrb.mxu3 %v7336_v26  ;;  %151 = vst [vmem:[#allocation3 + $0x100] sm:$0xff] %v8412_v45  ;;  %v3513_v26 = vld [vmem:[#allocation4 + $0x92] sm:$0xff] }
 0x396   :  { %v2575_v16 = vpop.f32.mrf.mxu1  ;;  %v9386_v49 = vpop.f32.mrf.mxu2  ;;  %152 = vst [vmem:[#allocation4 + $0x100] sm:$0xff] %v8412_v45 }
 0x397   :  { %v2644_v27 = vadd.f32 %v2575_v16, %v2105_v33  ;;  %v9389_v47 = vpop.f32.mrf.mxu3  ;;  %v3003_v23 = vmax.f32 %v2971_v9, 0.0  ;;  %v9391_v7 = vpop.f32.mrf.mxu0  ;;  %v3511_v16 = vld [vmem:[#allocation4 + $0x82] sm:$0xff]  ;;  %153 = vst [vmem:[#allocation5 + $0x100] sm:$0xff] %v8412_v45 }
 0x398   :  { %v9428_v14 = vpack.c.bf16 %v3512_v50, %v3511_v16  ;;  %v7323_v50 = vld [vmem:[#allocation12 + $0x100] sm:$0xf]  ;;  %v8021_v16 = vld [vmem:[#allocation12 + $0x104] sm:$0xf] }
 0x399   :  { %v2810_v24 = vmax.f32 %v2643_v30, %v2644_v27  ;;  %3035 = vst [vmem:[#allocation4 + $0xb0] sm:$0xff] %v3003_v23  ;;  %3683 = vmatmul.bf16.gmra.mxu0 %v9393_v46 }
 0x39a   :  { %v2904_v60 = vld [vmem:[#allocation3 + $0xb9] sm:$0xff] }
 0x39b   :  { %v2936_v56 = vmax.f32 %v2808_v11, %v2904_v60  ;;  %2842 = vst [vmem:[#allocation3 + $0xc8] sm:$0xff] %v2810_v24 }
 0x39d   :  { %v2972_v63 = vadd.f32 %v9131_v62, %v2936_v56 }
 0x39e   :  { %v2578_v15 = vpop.f32.mrf.mxu1  ;;  %v9397_v42 = vpop.f32.mrf.mxu2 }
 0x39f   :  { %v2646_v20 = vadd.f32 %v2578_v15, %v10378_v43  ;;  %v9402_v8 = vpop.f32.mrf.mxu3  ;;  %v3004_v35 = vmax.f32 %v2972_v63, 0.0  ;;  %v9406_v17 = vpop.f32.mrf.mxu0  ;;  %v10383_v63 = vld [vmem:[#allocation37_spill] sm:$0xff] }
 0x3a0   :  { %v2649_v15 = vadd.f32 %v9365_v51, %v10383_v63  ;;  %v10385_v51 = vld [vmem:[#allocation40_spill] sm:$0xff] }
 0x3a1   :  { %v9404_v57 = vmax.f32 %v2645_v13, %v2646_v20  ;;  %3762 = vmatmul.bf16.gmra.mxu1 %v9341_v38  ;;  %3036 = vst [vmem:[#allocation4 + $0xb8] sm:$0xff] %v3004_v35  ;;  %v3088_v0 = vpack.c.bf16 %v3004_v35, %v3003_v23  ;;  %v9417_v38 = vld [vmem:[%s10247_s2] ss:$0 sm:$0xff]  ;;  %v2112_v41 = vadd.f32 %v10386_v61, %v10385_v51 }
 0x3a2   :  { %v2905_v62 = vld [vmem:[#allocation3 + $0xc1] sm:$0xff] }
 0x3a3   :  { %v2937_v11 = vmax.f32 %v2809_v28, %v2905_v62  ;;  %2843 = vst [vmem:[#allocation3 + $0xd0] sm:$0xff] %v9404_v57  ;;  %3252 = vmatmul.bf16.gmra.mxu2 %v3088_v0  ;;  %3341 = vmatmul.bf16.gmra.mxu3 %v3088_v0  ;;  %v2651_v48 = vadd.f32 %v9378_v18, %v2112_v41  ;;  %v10392_v41 = vld [vmem:[#allocation45_spill] sm:$0xff] }
 0x3a4   :  { %v2117_v10 = vadd.f32 %v9321_v37, %v10392_v41  ;;  %v8067_v41 = vld [vmem:[#allocation12 + $0x274] sm:$0xf] }
 0x3a5   :  { %v2973_v28 = vadd.f32 %v9417_v38, %v2937_v11 }
 0x3a6   :  { %v2580_v25 = vpop.f32.mrf.mxu1  ;;  %v9420_v21 = vpop.f32.mrf.mxu2 }
 0x3a7   :  { %v2648_v58 = vadd.f32 %v2580_v25, %v2109_v19  ;;  %v9423_v53 = vpop.f32.mrf.mxu3  ;;  %v3005_v5 = vmax.f32 %v2973_v28, 0.0  ;;  %v3649_v9 = vpop.f32.mrf.mxu0 }
 0x3a8   :  { %v9426_v27 = vadd.f32 %v3649_v9, %v9334_v6  ;;  %v10384_v6 = vld [vmem:[#allocation70_spill] sm:$0xff] }
 0x3a9   :  { %v2812_v33 = vmax.f32 %v2647_v52, %v2648_v58  ;;  %3037 = vst [vmem:[#allocation4 + $0xc0] sm:$0xff] %v3005_v5  ;;  %3688 = vmatmul.bf16.gmra.mxu0 %v9428_v14  ;;  %v9457_v58 = vpack.c.bf16 %v3514_v3, %v3513_v26 }
 0x3aa   :  { %v2906_v30 = vld [vmem:[#allocation3 + $0xc9] sm:$0xff] }
 0x3ab   :  { %v2938_v23 = vmax.f32 %v2810_v24, %v2906_v30  ;;  %2844 = vst [vmem:[#allocation3 + $0xd8] sm:$0xff] %v2812_v33  ;;  %v7325_v30 = vld [vmem:[#allocation12 + $0x108] sm:$0xf0] }
 0x3ad   :  { %v2974_v31 = vadd.f32 %v9417_v38, %v2938_v23  ;;  %v7328_v23 = vor.u32 %v8021_v16, %v7325_v30 }
 0x3ae   :  { %v2583_v60 = vpop.f32.mrf.mxu1  ;;  %v9432_v56 = vpop.f32.mrf.mxu2 }
 0x3af   :  { %v2650_v4 = vadd.f32 %v2583_v60, %v10384_v6  ;;  %v9437_v13 = vpop.f32.mrf.mxu3  ;;  %v3006_v24 = vmax.f32 %v2974_v31, 0.0  ;;  %v3651_v20 = vpop.f32.mrf.mxu0  ;;  %4251 = vmatpush.bf16.msrb.mxu3 %v7328_v23 }
 0x3b0   :  { %v9441_v62 = vadd.f32 %v3651_v20, %v9345_v34 }
 0x3b1   :  { %v2813_v43 = vmax.f32 %v2649_v15, %v2650_v4  ;;  %3767 = vmatmul.bf16.gmra.mxu1 %v9367_v29  ;;  %3038 = vst [vmem:[#allocation4 + $0xc8] sm:$0xff] %v3006_v24  ;;  %v3089_v35 = vpack.c.bf16 %v3006_v24, %v3005_v5  ;;  %v8022_v5 = vld [vmem:[#allocation12 + $0x104] sm:$0xf0] }
 0x3b2   :  { %v2907_v0 = vld [vmem:[#allocation3 + $0xd1] sm:$0xff]  ;;  %v7324_v18 = vor.u32 %v8022_v5, %v7323_v50  ;;  %v10390_v15 = vld [vmem:[#allocation72_spill] sm:$0xff] }
 0x3b3   :  { %v2939_v11 = vmax.f32 %v9404_v57, %v2907_v0  ;;  %2845 = vst [vmem:[#allocation3 + $0xe0] sm:$0xff] %v2813_v43  ;;  %3257 = vmatmul.bf16.gmra.mxu2 %v3089_v35  ;;  %3346 = vmatmul.bf16.gmra.mxu3 %v3089_v35 }
 0x3b4   :  { %4162 = vmatpush.bf16.msrb.mxu2 %v7324_v18 }
 0x3b5   :  { %v2975_v40 = vadd.f32 %v9417_v38, %v2939_v11 }
 0x3b6   :  { %v2585_v29 = vpop.f32.mrf.mxu1  ;;  %v9449_v36 = vpop.f32.mrf.mxu2 }
 0x3b7   :  { %v2652_v34 = vadd.f32 %v2585_v29, %v2113_v54  ;;  %v9452_v39 = vpop.f32.mrf.mxu3  ;;  %v3007_v57 = vmax.f32 %v2975_v40, 0.0  ;;  %v3654_v28 = vpop.f32.mrf.mxu0 }
 0x3b8   :  { %v9455_v52 = vadd.f32 %v3654_v28, %v9360_v55  ;;  %v10389_v55 = vld [vmem:[#allocation41_spill] sm:$0xff] }
 0x3b9   :  { %v2814_v19 = vmax.f32 %v2651_v48, %v2652_v34  ;;  %3039 = vst [vmem:[#allocation4 + $0xd0] sm:$0xff] %v3007_v57  ;;  %3693 = vmatmul.bf16.gmra.mxu0 %v9457_v58  ;;  %v2653_v63 = vadd.f32 %v9391_v7, %v10389_v55  ;;  %v10391_v7 = vld [vmem:[#allocation68_spill] sm:$0xff] }
 0x3ba   :  { %v2908_v25 = vld [vmem:[#allocation3 + $0xd9] sm:$0xff]  ;;  %v2116_v61 = vadd.f32 %v9319_v32, %v10391_v7 }
 0x3bb   :  { %v2940_v9 = vmax.f32 %v2812_v33, %v2908_v25  ;;  %2846 = vst [vmem:[#allocation3 + $0xe8] sm:$0xff] %v2814_v19  ;;  %v8068_v7 = vld [vmem:[#allocation12 + $0x274] sm:$0xf0] }
 0x3bc   :  { %v2655_v40 = vadd.f32 %v9406_v17, %v2116_v61 }
 0x3bd   :  { %v2976_v45 = vadd.f32 %v9417_v38, %v2940_v9 }
 0x3be   :  { %v2588_v31 = vpop.f32.mrf.mxu1  ;;  %v9461_v60 = vpop.f32.mrf.mxu2 }
 0x3bf   :  { %v2654_v6 = vadd.f32 %v2588_v31, %v10390_v15  ;;  %v9466_v33 = vpop.f32.mrf.mxu3  ;;  %v3008_v4 = vmax.f32 %v2976_v45, 0.0  ;;  %v3656_v20 = vpop.f32.mrf.mxu0 }
 0x3c0   :  { %v9470_v11 = vadd.f32 %v3656_v20, %v9371_v2  ;;  %v3516_v2 = vld [vmem:[#allocation4 + $0xaa] sm:$0xff] }
 0x3c1   :  { %v2815_v24 = vmax.f32 %v2653_v63, %v2654_v6  ;;  %3772 = vmatmul.bf16.gmra.mxu1 %v9393_v46  ;;  %3040 = vst [vmem:[#allocation4 + $0xd8] sm:$0xff] %v3008_v4  ;;  %v3090_v35 = vpack.c.bf16 %v3008_v4, %v3007_v57  ;;  %v3515_v57 = vld [vmem:[#allocation4 + $0xa2] sm:$0xff] }
 0x3c2   :  { %v2909_v0 = vld [vmem:[#allocation3 + $0xe1] sm:$0xff]  ;;  %v9485_v37 = vpack.c.bf16 %v3516_v2, %v3515_v57  ;;  %v8052_v2 = vld [vmem:[#allocation12 + $0x1f4] sm:$0xf0] }
 0x3c3   :  { %v2941_v51 = vmax.f32 %v2813_v43, %v2909_v0  ;;  %2847 = vst [vmem:[#allocation3 + $0xf0] sm:$0xff] %v2815_v24  ;;  %3262 = vmatmul.bf16.gmra.mxu2 %v3090_v35  ;;  %3351 = vmatmul.bf16.gmra.mxu3 %v3090_v35 }
 0x3c5   :  { %v2977_v44 = vadd.f32 %v9417_v38, %v2941_v51 }
 0x3c6   :  { %v2590_v54 = vpop.f32.mrf.mxu1  ;;  %v9477_v46 = vpop.f32.mrf.mxu2 }
 0x3c7   :  { %v2656_v29 = vadd.f32 %v2590_v54, %v2117_v10  ;;  %v9480_v48 = vpop.f32.mrf.mxu3  ;;  %v3009_v43 = vmax.f32 %v2977_v44, 0.0  ;;  %v3659_v3 = vpop.f32.mrf.mxu0  ;;  %v7509_v10 = vld [vmem:[#allocation12 + $0x278] sm:$0xf0] }
 0x3c8   :  { %v9483_v28 = vadd.f32 %v3659_v3, %v9386_v49  ;;  %v7512_v44 = vor.u32 %v8067_v41, %v7509_v10  ;;  %v7445_v3 = vld [vmem:[#allocation12 + $0x1f8] sm:$0xf0] }
 0x3c9   :  { %v2816_v34 = vmax.f32 %v2655_v40, %v2656_v29  ;;  %3041 = vst [vmem:[#allocation4 + $0xe0] sm:$0xff] %v3009_v43  ;;  %3698 = vmatmul.bf16.gmra.mxu0 %v9485_v37 }
 0x3ca   :  { %v2910_v32 = vld [vmem:[#allocation3 + $0xe9] sm:$0xff]  ;;  %5274 = vmatpush.bf16.msra.mxu3 %v7512_v44 }
 0x3cb   :  { %v2942_v26 = vmax.f32 %v2814_v19, %v2910_v32  ;;  %2848 = vst [vmem:[#allocation3 + $0xf8] sm:$0xff] %v2816_v34 }
 0x3cd   :  { %v2978_v17 = vadd.f32 %v9417_v38, %v2942_v26 }
 0x3ce   :  { %v9489_v25 = vpop.f32.mrf.mxu1  ;;  %v9491_v50 = vpop.f32.mrf.mxu2 }
 0x3cf   :  { %v9493_v5 = vpop.f32.mrf.mxu3  ;;  %v3010_v9 = vmax.f32 %v2978_v17, 0.0  ;;  %v3661_v18 = vpop.f32.mrf.mxu0 }
 0x3d0   :  { %v9497_v19 = vadd.f32 %v3661_v18, %v9397_v42  ;;  %v3517_v42 = vld [vmem:[#allocation4 + $0xb2] sm:$0xff]  ;;  %v3520_v18 = vld [vmem:[#allocation4 + $0xca] sm:$0xff]  ;;  %v3522_v44 = vld [vmem:[#allocation4 + $0xda] sm:$0xff] }
 0x3d1   :  { %3777 = vmatmul.bf16.gmra.mxu1 %v9428_v14  ;;  %3042 = vst [vmem:[#allocation4 + $0xe8] sm:$0xff] %v3010_v9  ;;  %v3091_v49 = vpack.c.bf16 %v3010_v9, %v3009_v43  ;;  %v3518_v14 = vld [vmem:[#allocation4 + $0xba] sm:$0xff]  ;;  %v8051_v43 = vld [vmem:[#allocation12 + $0x1f4] sm:$0xf] }
 0x3d2   :  { %v2911_v16 = vld [vmem:[#allocation3 + $0xf1] sm:$0xff]  ;;  %v2912_v30 = vld [vmem:[#allocation3 + $0xf9] sm:$0xff]  ;;  %v9510_v51 = vpack.c.bf16 %v3518_v14, %v3517_v42  ;;  %v7448_v32 = vor.u32 %v8051_v43, %v7445_v3 }
 0x3d3   :  { %v2943_v23 = vmax.f32 %v2815_v24, %v2911_v16  ;;  %v2944_v45 = vmax.f32 %v2816_v34, %v2912_v30  ;;  %3267 = vmatmul.bf16.gmra.mxu2 %v3091_v49  ;;  %3356 = vmatmul.bf16.gmra.mxu3 %v3091_v49  ;;  %v3519_v30 = vld [vmem:[#allocation4 + $0xc2] sm:$0xff]  ;;  %v7435_v14 = vld [vmem:[#allocation12 + $0x1e0] sm:$0xf] }
 0x3d4   :  { %4759 = vmatpush.bf16.msrb.mxu1 %v7448_v32  ;;  %v7499_v32 = vld [vmem:[#allocation12 + $0x260] sm:$0xf] }
 0x3d5   :  { %v2979_v31 = vadd.f32 %v9417_v38, %v2943_v23  ;;  %v2980_v55 = vadd.f32 %v9417_v38, %v2944_v45  ;;  %v7507_v38 = vld [vmem:[#allocation12 + $0x270] sm:$0xf] }
 0x3d6   :  { %v9501_v63 = vpop.f32.mrf.mxu1  ;;  %v9503_v15 = vpop.f32.mrf.mxu2  ;;  %v7508_v61 = vor.u32 %v8068_v7, %v7507_v38  ;;  %v7427_v38 = vld [vmem:[#allocation12 + $0x1d0] sm:$0xf]  ;;  %v8048_v7 = vld [vmem:[#allocation12 + $0x1d4] sm:$0xf0] }
 0x3d7   :  { %v9505_v6 = vpop.f32.mrf.mxu3  ;;  %v3011_v4 = vmax.f32 %v2979_v31, 0.0  ;;  %v3012_v20 = vmax.f32 %v2980_v55, 0.0  ;;  %v3664_v35 = vpop.f32.mrf.mxu0  ;;  %v4011_v31 = vld [vmem:[#allocation4 + $0xc] sm:$0xff] }
 0x3d8   :  { %v9508_v0 = vadd.f32 %v3664_v35, %v9420_v21  ;;  %5185 = vmatpush.bf16.msra.mxu2 %v7508_v61  ;;  %v7443_v21 = vld [vmem:[#allocation12 + $0x1f0] sm:$0xf]  ;;  %v7428_v61 = vor.u32 %v8048_v7, %v7427_v38  ;;  %v8049_v7 = vld [vmem:[#allocation12 + $0x1e4] sm:$0xf] }
 0x3d9   :  { %3043 = vst [vmem:[#allocation4 + $0xf0] sm:$0xff] %v3011_v4  ;;  %v3092_v24 = vpack.c.bf16 %v3012_v20, %v3011_v4  ;;  %3703 = vmatmul.bf16.gmra.mxu0 %v9510_v51  ;;  %v7444_v34 = vor.u32 %v8052_v2, %v7443_v21  ;;  %v8050_v4 = vld [vmem:[#allocation12 + $0x1e4] sm:$0xf0]  ;;  %v7419_v2 = vld [vmem:[#allocation12 + $0x1c0] sm:$0xf] }
 0x3da   :  { %3044 = vst [vmem:[#allocation4 + $0xf8] sm:$0xff] %v3012_v20  ;;  %v4010_v20 = vld [vmem:[#allocation4 + $0x4] sm:$0xff]  ;;  %v7436_v35 = vor.u32 %v8050_v4, %v7435_v14  ;;  %v8044_v4 = vld [vmem:[#allocation12 + $0x1b4] sm:$0xf0] }
 0x3db   :  { %4670 = vmatpush.bf16.msra.mxu0 %v7444_v34  ;;  %v7411_v14 = vld [vmem:[#allocation12 + $0x1b0] sm:$0xf] }
 0x3de   :  { %v9513_v54 = vpop.f32.mrf.mxu1  ;;  %v9515_v40 = vpop.f32.mrf.mxu2 }
 0x3df   :  { %v9517_v29 = vpop.f32.mrf.mxu3  ;;  %v3666_v57 = vpop.f32.mrf.mxu0  ;;  %4671 = vmatpush.bf16.msra.mxu0 %v7436_v35  ;;  %v7412_v35 = vor.u32 %v8044_v4, %v7411_v14 }
 0x3e0   :  { %10393 = vst [vmem:[#allocation44_spill] sm:$0xff] %v9517_v29  ;;  %v9521_v26 = vadd.f32 %v3666_v57, %v9432_v56 }
 0x3e1   :  { %3782 = vmatmul.bf16.gmra.mxu1 %v9457_v58  ;;  %v9532_v58 = vpack.c.bf16 %v3520_v18, %v3519_v30  ;;  %v8066_v18 = vld [vmem:[#allocation12 + $0x264] sm:$0xf0] }
 0x3e2   :  { %v7500_v30 = vor.u32 %v8066_v18, %v7499_v32 }
 0x3e3   :  { %3272 = vmatmul.bf16.gmra.mxu2 %v3092_v24  ;;  %3361 = vmatmul.bf16.gmra.mxu3 %v3092_v24 }
 0x3e4   :  { %4672 = vmatpush.bf16.msra.mxu0 %v7428_v61  ;;  %5186 = vmatpush.bf16.msra.mxu2 %v7500_v30  ;;  %v7437_v61 = vld [vmem:[#allocation12 + $0x1e8] sm:$0xf0]  ;;  %v8040_v30 = vld [vmem:[#allocation12 + $0x194] sm:$0xf0] }
 0x3e6   :  { %v9523_v17 = vpop.f32.mrf.mxu1  ;;  %v9525_v9 = vpop.f32.mrf.mxu2 }
 0x3e7   :  { %v9527_v49 = vpop.f32.mrf.mxu3  ;;  %v3669_v16 = vpop.f32.mrf.mxu0 }
 0x3e8   :  { %10394 = vst [vmem:[#allocation48_spill] sm:$0xff] %v9527_v49  ;;  %v9530_v23 = vadd.f32 %v3669_v16, %v9449_v36  ;;  %v4042_v36 = vpack.c.bf16 %v4011_v31, %v4010_v20  ;;  %v8065_v16 = vld [vmem:[#allocation12 + $0x264] sm:$0xf]  ;;  %v7501_v31 = vld [vmem:[#allocation12 + $0x268] sm:$0xf0] }
 0x3e9   :  { %3708 = vmatmul.bf16.gmra.mxu0 %v9532_v58  ;;  %v7504_v20 = vor.u32 %v8065_v16, %v7501_v31  ;;  %v7395_v16 = vld [vmem:[#allocation12 + $0x190] sm:$0xf] }
 0x3ea   :  { %v7396_v31 = vor.u32 %v8040_v30, %v7395_v16 }
 0x3eb   :  { %5275 = vmatpush.bf16.msra.mxu3 %v7504_v20  ;;  %v3524_v20 = vld [vmem:[#allocation4 + $0xea] sm:$0xff] }
 0x3ee   :  { %v9535_v56 = vpop.f32.mrf.mxu1  ;;  %v9537_v45 = vpop.f32.mrf.mxu2 }
 0x3ef   :  { %v9539_v55 = vpop.f32.mrf.mxu3  ;;  %v3671_v42 = vpop.f32.mrf.mxu0 }
 0x3f0   :  { %10395 = vst [vmem:[#allocation46_spill] sm:$0xff] %v9539_v55  ;;  %v9543_v24 = vadd.f32 %v3671_v42, %v9461_v60  ;;  %v3521_v60 = vld [vmem:[#allocation4 + $0xd2] sm:$0xff]  ;;  %v8045_v55 = vld [vmem:[#allocation12 + $0x1c4] sm:$0xf] }
 0x3f1   :  { %3787 = vmatmul.bf16.gmra.mxu1 %v9485_v37  ;;  %v8046_v37 = vld [vmem:[#allocation12 + $0x1c4] sm:$0xf0]  ;;  %v9554_v57 = vpack.c.bf16 %v3522_v44, %v3521_v60  ;;  %v7403_v44 = vld [vmem:[#allocation12 + $0x1a0] sm:$0xf] }
 0x3f2   :  { %v7420_v43 = vor.u32 %v8046_v37, %v7419_v2  ;;  %v4012_v2 = vld [vmem:[#allocation4 + $0x14] sm:$0xff]  ;;  %v7440_v37 = vor.u32 %v8049_v7, %v7437_v61 }
 0x3f3   :  { %4163 = vmatmul.bf16.vlgmr.msrb.gmra.mxu2 %v4042_v36  ;;  %4252 = vmatmul.bf16.vlgmr.msrb.gmra.mxu3 %v4042_v36 }
 0x3f4   :  { %4673 = vmatpush.bf16.msra.mxu0 %v7420_v43  ;;  %v8042_v43 = vld [vmem:[#allocation12 + $0x1a4] sm:$0xf0]  ;;  %4760 = vmatpush.bf16.msrb.mxu1 %v7440_v37 }
 0x3f5   :  { %v7404_v32 = vor.u32 %v8042_v43, %v7403_v44 }
 0x3f6   :  { %v9545_v41 = vpop.f32.mrf.mxu1  ;;  %v9547_v10 = vpop.f32.mrf.mxu2 }
 0x3f7   :  { %v9549_v21 = vpop.f32.mrf.mxu3  ;;  %v3674_v34 = vpop.f32.mrf.mxu0 }
 0x3f8   :  { %10396 = vst [vmem:[#allocation47_spill] sm:$0xff] %v9549_v21  ;;  %v9552_v3 = vadd.f32 %v3674_v34, %v9477_v46  ;;  %v4013_v46 = vld [vmem:[#allocation4 + $0x1c] sm:$0xff]  ;;  %4674 = vmatpush.bf16.msra.mxu0 %v7412_v35 }
 0x3f9   :  { %3713 = vmatmul.bf16.gmra.mxu0 %v9554_v57  ;;  %v4043_v60 = vpack.c.bf16 %v4013_v46, %v4012_v2  ;;  %v8038_v46 = vld [vmem:[#allocation12 + $0x184] sm:$0xf0] }
 0x3fc   :  { %4675 = vmatpush.bf16.msra.mxu0 %v7404_v32  ;;  %v4014_v32 = vld [vmem:[#allocation4 + $0x24] sm:$0xff] }
 0x3fe   :  { %v9557_v42 = vpop.f32.mrf.mxu1  ;;  %v9559_v36 = vpop.f32.mrf.mxu2 }
 0x3ff   :  { %v9561_v38 = vpop.f32.mrf.mxu3  ;;  %v3676_v34 = vpop.f32.mrf.mxu0 }
 0x400   :  { %10397 = vst [vmem:[#allocation49_spill] sm:$0xff] %v9561_v38  ;;  %v9565_v18 = vadd.f32 %v3676_v34, %v9491_v50  ;;  %4676 = vmatpush.bf16.msra.mxu0 %v7396_v31  ;;  %v3523_v50 = vld [vmem:[#allocation4 + $0xe2] sm:$0xff]  ;;  %v4015_v34 = vld [vmem:[#allocation4 + $0x2c] sm:$0xff]  ;;  %v7493_v38 = vld [vmem:[#allocation12 + $0x258] sm:$0xf0] }
 0x401   :  { %3792 = vmatmul.bf16.gmra.mxu1 %v9510_v51  ;;  %v7387_v51 = vld [vmem:[#allocation12 + $0x180] sm:$0xf]  ;;  %v9576_v2 = vpack.c.bf16 %v3524_v20, %v3523_v50  ;;  %v4044_v30 = vpack.c.bf16 %v4015_v34, %v4014_v32  ;;  %v8047_v50 = vld [vmem:[#allocation12 + $0x1d4] sm:$0xf]  ;;  %v8064_v32 = vld [vmem:[#allocation12 + $0x254] sm:$0xf0] }
 0x402   :  { %v7388_v61 = vor.u32 %v8038_v46, %v7387_v51  ;;  %v3525_v51 = vld [vmem:[#allocation4 + $0xf2] sm:$0xff]  ;;  %v3526_v46 = vld [vmem:[#allocation4 + $0xfa] sm:$0xff] }
 0x403   :  { %4168 = vmatmul.bf16.gmra.mxu2 %v4043_v60  ;;  %4257 = vmatmul.bf16.gmra.mxu3 %v4043_v60  ;;  %v9598_v34 = vpack.c.bf16 %v3526_v46, %v3525_v51  ;;  %v4016_v51 = vld [vmem:[#allocation4 + $0x34] sm:$0xff] }
 0x404   :  { %4677 = vmatpush.bf16.msra.mxu0 %v7388_v61  ;;  %v7429_v61 = vld [vmem:[#allocation12 + $0x1d8] sm:$0xf0] }
 0x405   :  { %v7413_v46 = vld [vmem:[#allocation12 + $0x1b8] sm:$0xf0] }
 0x406   :  { %v9567_v14 = vpop.f32.mrf.mxu1  ;;  %v9569_v4 = vpop.f32.mrf.mxu2 }
 0x407   :  { %v9571_v35 = vpop.f32.mrf.mxu3  ;;  %v3679_v7 = vpop.f32.mrf.mxu0 }
 0x408   :  { %10398 = vst [vmem:[#allocation50_spill] sm:$0xff] %v9571_v35  ;;  %v9574_v44 = vadd.f32 %v3679_v7, %v9503_v15  ;;  %v7432_v35 = vor.u32 %v8047_v50, %v7429_v61 }
 0x409   :  { %3718 = vmatmul.bf16.gmra.mxu0 %v9576_v2 }
 0x40a   :  { %4761 = vmatpush.bf16.msrb.mxu1 %v7432_v35  ;;  %v8043_v35 = vld [vmem:[#allocation12 + $0x1b4] sm:$0xf] }
 0x40e   :  { %v9579_v37 = vpop.f32.mrf.mxu1  ;;  %v9581_v43 = vpop.f32.mrf.mxu2 }
 0x40f   :  { %v9583_v60 = vpop.f32.mrf.mxu3  ;;  %v3681_v16 = vpop.f32.mrf.mxu0 }
 0x410   :  { %10399 = vst [vmem:[#allocation52_spill] sm:$0xff] %v9583_v60  ;;  %v9587_v15 = vadd.f32 %v3681_v16, %v9515_v40  ;;  %v7491_v40 = vld [vmem:[#allocation12 + $0x250] sm:$0xf]  ;;  %v8063_v16 = vld [vmem:[#allocation12 + $0x254] sm:$0xf] }
 0x411   :  { %3797 = vmatmul.bf16.gmra.mxu1 %v9532_v58  ;;  %v7496_v21 = vor.u32 %v8063_v16, %v7493_v38 }
 0x412   :  { %10400 = vst [vmem:[#allocation53_spill] sm:$0xff] %v9587_v15 }
 0x413   :  { %4173 = vmatmul.bf16.gmra.mxu2 %v4044_v30  ;;  %4262 = vmatmul.bf16.gmra.mxu3 %v4044_v30  ;;  %v7492_v30 = vor.u32 %v8064_v32, %v7491_v40  ;;  %v7416_v40 = vor.u32 %v8043_v35, %v7413_v46  ;;  %v4525_v35 = vld [vmem:[#allocation4 + $0x6] sm:$0xff] }
 0x414   :  { %5276 = vmatpush.bf16.msra.mxu3 %v7496_v21 }
 0x415   :  { %5187 = vmatpush.bf16.msra.mxu2 %v7492_v30  ;;  %v4526_v30 = vld [vmem:[#allocation4 + $0xe] sm:$0xff] }
 0x416   :  { %v9589_v31 = vpop.f32.mrf.mxu1  ;;  %v9591_v20 = vpop.f32.mrf.mxu2 }
 0x417   :  { %v9593_v7 = vpop.f32.mrf.mxu3  ;;  %v3684_v60 = vpop.f32.mrf.mxu0 }
 0x418   :  { %10401 = vst [vmem:[#allocation54_spill] sm:$0xff] %v9593_v7  ;;  %v9596_v58 = vadd.f32 %v3684_v60, %v9525_v9  ;;  %v7421_v7 = vld [vmem:[#allocation12 + $0x1c8] sm:$0xf0]  ;;  %v4017_v9 = vld [vmem:[#allocation4 + $0x3c] sm:$0xff] }
 0x419   :  { %3723 = vmatmul.bf16.gmra.mxu0 %v9598_v34  ;;  %v7424_v49 = vor.u32 %v8045_v55, %v7421_v7  ;;  %v4045_v38 = vpack.c.bf16 %v4017_v9, %v4016_v51  ;;  %v8041_v55 = vld [vmem:[#allocation12 + $0x1a4] sm:$0xf]  ;;  %v7405_v7 = vld [vmem:[#allocation12 + $0x1a8] sm:$0xf0]  ;;  %v7397_v9 = vld [vmem:[#allocation12 + $0x198] sm:$0xf0] }
 0x41a   :  { %10402 = vst [vmem:[#allocation59_spill] sm:$0xff] %v9596_v58  ;;  %v7408_v21 = vor.u32 %v8041_v55, %v7405_v7  ;;  %v4018_v58 = vld [vmem:[#allocation4 + $0x44] sm:$0xff] }
 0x41b   :  { %4762 = vmatpush.bf16.msrb.mxu1 %v7424_v49 }
 0x41e   :  { %v9601_v15 = vpop.f32.mrf.mxu1  ;;  %v9603_v50 = vpop.f32.mrf.mxu2 }
 0x41f   :  { %v9605_v60 = vpop.f32.mrf.mxu3  ;;  %v3686_v61 = vpop.f32.mrf.mxu0  ;;  %4763 = vmatpush.bf16.msrb.mxu1 %v7416_v40  ;;  %v7389_v40 = vld [vmem:[#allocation12 + $0x188] sm:$0xf0] }
 0x420   :  { %10403 = vst [vmem:[#allocation51_spill] sm:$0xff] %v9605_v60  ;;  %v9609_v32 = vadd.f32 %v3686_v61, %v9537_v45  ;;  %v4557_v61 = vpack.c.bf16 %v4526_v30, %v4525_v35 }
 0x421   :  { %3802 = vmatmul.bf16.gmra.mxu1 %v9554_v57  ;;  %v8039_v57 = vld [vmem:[#allocation12 + $0x194] sm:$0xf] }
 0x422   :  { %10404 = vst [vmem:[#allocation56_spill] sm:$0xff] %v9609_v32  ;;  %v7400_v45 = vor.u32 %v8039_v57, %v7397_v9 }
 0x423   :  { %4178 = vmatmul.bf16.gmra.mxu2 %v4045_v38  ;;  %4267 = vmatmul.bf16.gmra.mxu3 %v4045_v38  ;;  %v8037_v38 = vld [vmem:[#allocation12 + $0x184] sm:$0xf] }
 0x424   :  { %4764 = vmatpush.bf16.msrb.mxu1 %v7408_v21  ;;  %v7392_v55 = vor.u32 %v8037_v38, %v7389_v40  ;;  %v4527_v38 = vld [vmem:[#allocation4 + $0x16] sm:$0xff] }
 0x426   :  { %v9611_v16 = vpop.f32.mrf.mxu1  ;;  %v9613_v49 = vpop.f32.mrf.mxu2 }
 0x427   :  { %v9615_v60 = vpop.f32.mrf.mxu3  ;;  %v3689_v51 = vpop.f32.mrf.mxu0 }
 0x428   :  { %10405 = vst [vmem:[#allocation27_spill] sm:$0xff] %v9615_v60  ;;  %v9618_v46 = vadd.f32 %v3689_v51, %v9547_v10  ;;  %4765 = vmatpush.bf16.msrb.mxu1 %v7400_v45  ;;  %v4019_v60 = vld [vmem:[#allocation4 + $0x4c] sm:$0xff]  ;;  %v4528_v51 = vld [vmem:[#allocation4 + $0x1e] sm:$0xff] }
 0x429   :  { %4678 = vmatmul.bf16.vlgmr.msra.gmra.mxu0 %v4557_v61  ;;  %v4046_v10 = vpack.c.bf16 %v4019_v60, %v4018_v58  ;;  %v8062_v58 = vld [vmem:[#allocation12 + $0x244] sm:$0xf0]  ;;  %v7485_v60 = vld [vmem:[#allocation12 + $0x248] sm:$0xf0] }
 0x42a   :  { %10406 = vst [vmem:[#allocation57_spill] sm:$0xff] %v9618_v46 }
 0x42c   :  { %4766 = vmatpush.bf16.msrb.mxu1 %v7392_v55  ;;  %v9639_v55 = vpack.c.bf16 %v4528_v51, %v4527_v38 }
 0x42e   :  { %v9620_v7 = vpop.f32.mrf.mxu1  ;;  %v9622_v32 = vpop.f32.mrf.mxu2 }
 0x42f   :  { %v9624_v21 = vpop.f32.mrf.mxu3  ;;  %v3691_v29 = vpop.f32.mrf.mxu0 }
 0x430   :  { %10407 = vst [vmem:[#allocation58_spill] sm:$0xff] %v9624_v21  ;;  %v9628_v30 = vadd.f32 %v3691_v29, %v9559_v36  ;;  %v8061_v29 = vld [vmem:[#allocation12 + $0x244] sm:$0xf] }
 0x431   :  { %3807 = vmatmul.bf16.gmra.mxu1 %v9576_v2  ;;  %v7483_v2 = vld [vmem:[#allocation12 + $0x240] sm:$0xf] }
 0x432   :  { %10408 = vst [vmem:[#allocation61_spill] sm:$0xff] %v9628_v30  ;;  %v7484_v36 = vor.u32 %v8062_v58, %v7483_v2 }
 0x433   :  { %4183 = vmatmul.bf16.gmra.mxu2 %v4046_v10  ;;  %4272 = vmatmul.bf16.gmra.mxu3 %v4046_v10  ;;  %v7488_v10 = vor.u32 %v8061_v29, %v7485_v60  ;;  %v4530_v29 = vld [vmem:[#allocation4 + $0x2e] sm:$0xff] }
 0x434   :  { %5188 = vmatpush.bf16.msra.mxu2 %v7484_v36 }
 0x435   :  { %5277 = vmatpush.bf16.msra.mxu3 %v7488_v10  ;;  %v4529_v10 = vld [vmem:[#allocation4 + $0x26] sm:$0xff] }
 0x436   :  { %v9630_v57 = vpop.f32.mrf.mxu1  ;;  %v9632_v9 = vpop.f32.mrf.mxu2 }
 0x437   :  { %v9634_v35 = vpop.f32.mrf.mxu3  ;;  %v3694_v45 = vpop.f32.mrf.mxu0 }
 0x438   :  { %10409 = vst [vmem:[#allocation55_spill] sm:$0xff] %v9634_v35  ;;  %v9637_v40 = vadd.f32 %v3694_v45, %v9569_v4  ;;  %v4021_v35 = vld [vmem:[#allocation4 + $0x5c] sm:$0xff]  ;;  %v4020_v4 = vld [vmem:[#allocation4 + $0x54] sm:$0xff] }
 0x439   :  { %4683 = vmatmul.bf16.gmra.mxu0 %v9639_v55  ;;  %v4047_v45 = vpack.c.bf16 %v4021_v35, %v4020_v4  ;;  %v4023_v35 = vld [vmem:[#allocation4 + $0x6c] sm:$0xff] }
 0x43a   :  { %10410 = vst [vmem:[#allocation60_spill] sm:$0xff] %v9637_v40  ;;  %v4559_v40 = vpack.c.bf16 %v4530_v29, %v4529_v10 }
 0x43e   :  { %v9642_v21 = vpop.f32.mrf.mxu1  ;;  %v9644_v30 = vpop.f32.mrf.mxu2 }
 0x43f   :  { %10411 = vst [vmem:[#allocation29_spill] sm:$0xff] %v9642_v21  ;;  %v9646_v46 = vpop.f32.mrf.mxu3  ;;  %v3696_v51 = vpop.f32.mrf.mxu0 }
 0x440   :  { %10412 = vst [vmem:[#allocation32_spill] sm:$0xff] %v9646_v46  ;;  %v9650_v38 = vadd.f32 %v3696_v51, %v9581_v43  ;;  %v4022_v51 = vld [vmem:[#allocation4 + $0x64] sm:$0xff] }
 0x441   :  { %3812 = vmatmul.bf16.gmra.mxu1 %v9598_v34 }
 0x442   :  { %10413 = vst [vmem:[#allocation28_spill] sm:$0xff] %v9650_v38  ;;  %v4048_v38 = vpack.c.bf16 %v4023_v35, %v4022_v51  ;;  %v8060_v35 = vld [vmem:[#allocation12 + $0x234] sm:$0xf0] }
 0x443   :  { %4188 = vmatmul.bf16.gmra.mxu2 %v4047_v45  ;;  %4277 = vmatmul.bf16.gmra.mxu3 %v4047_v45 }
 0x446   :  { %v9652_v2 = vpop.f32.mrf.mxu1  ;;  %v9654_v58 = vpop.f32.mrf.mxu2 }
 0x447   :  { %10414 = vst [vmem:[#allocation64_spill] sm:$0xff] %v9652_v2  ;;  %v9656_v36 = vpop.f32.mrf.mxu3  ;;  %v3699_v60 = vpop.f32.mrf.mxu0 }
 0x448   :  { %10415 = vst [vmem:[#allocation30_spill] sm:$0xff] %v9656_v36  ;;  %v9659_v46 = vadd.f32 %v3699_v60, %v9591_v20  ;;  %v4532_v60 = vld [vmem:[#allocation4 + $0x3e] sm:$0xff] }
 0x449   :  { %4688 = vmatmul.bf16.gmra.mxu0 %v4559_v40 }
 0x44a   :  { %10416 = vst [vmem:[#allocation63_spill] sm:$0xff] %v9659_v46 }
 0x44e   :  { %v9661_v34 = vpop.f32.mrf.mxu1  ;;  %v9663_v43 = vpop.f32.mrf.mxu2 }
 0x44f   :  { %10417 = vst [vmem:[#allocation33_spill] sm:$0xff] %v9661_v34  ;;  %v9665_v4 = vpop.f32.mrf.mxu3  ;;  %v3701_v45 = vpop.f32.mrf.mxu0  ;;  %v4531_v34 = vld [vmem:[#allocation4 + $0x36] sm:$0xff] }
 0x450   :  { %10418 = vst [vmem:[#allocation35_spill] sm:$0xff] %v9665_v4  ;;  %v9668_v36 = vadd.f32 %v3701_v45, %v9603_v50  ;;  %v9679_v2 = vpack.c.bf16 %v4532_v60, %v4531_v34  ;;  %v8059_v50 = vld [vmem:[#allocation12 + $0x234] sm:$0xf]  ;;  %v7477_v45 = vld [vmem:[#allocation12 + $0x238] sm:$0xf0] }
 0x451   :  { %4767 = vmatmul.bf16.vlgmr.msrb.gmra.mxu1 %v4557_v61  ;;  %v7475_v61 = vld [vmem:[#allocation12 + $0x230] sm:$0xf] }
 0x452   :  { %10419 = vst [vmem:[#allocation31_spill] sm:$0xff] %v9668_v36  ;;  %v7476_v51 = vor.u32 %v8060_v35, %v7475_v61 }
 0x453   :  { %4193 = vmatmul.bf16.gmra.mxu2 %v4048_v38  ;;  %4282 = vmatmul.bf16.gmra.mxu3 %v4048_v38  ;;  %v7480_v38 = vor.u32 %v8059_v50, %v7477_v45  ;;  %v4534_v50 = vld [vmem:[#allocation4 + $0x4e] sm:$0xff] }
 0x454   :  { %5189 = vmatpush.bf16.msra.mxu2 %v7476_v51 }
 0x455   :  { %5278 = vmatpush.bf16.msra.mxu3 %v7480_v38  ;;  %v4533_v38 = vld [vmem:[#allocation4 + $0x46] sm:$0xff] }
 0x456   :  { %v9670_v20 = vpop.f32.mrf.mxu1  ;;  %v9672_v29 = vpop.f32.mrf.mxu2 }
 0x457   :  { %10420 = vst [vmem:[#allocation67_spill] sm:$0xff] %v9670_v20  ;;  %v9674_v10 = vpop.f32.mrf.mxu3  ;;  %v3704_v46 = vpop.f32.mrf.mxu0 }
 0x458   :  { %10421 = vst [vmem:[#allocation62_spill] sm:$0xff] %v9674_v10  ;;  %v9677_v4 = vadd.f32 %v3704_v46, %v9613_v49  ;;  %v4025_v10 = vld [vmem:[#allocation4 + $0x7c] sm:$0xff]  ;;  %v4024_v49 = vld [vmem:[#allocation4 + $0x74] sm:$0xff] }
 0x459   :  { %4693 = vmatmul.bf16.gmra.mxu0 %v9679_v2  ;;  %v4049_v34 = vpack.c.bf16 %v4025_v10, %v4024_v49  ;;  %v4027_v10 = vld [vmem:[#allocation4 + $0x8c] sm:$0xff] }
 0x45a   :  { %10422 = vst [vmem:[#allocation66_spill] sm:$0xff] %v9677_v4  ;;  %v9701_v4 = vpack.c.bf16 %v4534_v50, %v4533_v38  ;;  %v4536_v38 = vld [vmem:[#allocation4 + $0x5e] sm:$0xff] }
 0x45e   :  { %v9682_v36 = vpop.f32.mrf.mxu1  ;;  %v9684_v20 = vpop.f32.mrf.mxu2 }
 0x45f   :  { %v9686_v21 = vpop.f32.mrf.mxu3  ;;  %v3706_v46 = vpop.f32.mrf.mxu0 }
 0x460   :  { %10423 = vst [vmem:[#allocation36_spill] sm:$0xff] %v9686_v21  ;;  %v9690_v60 = vadd.f32 %v3706_v46, %v9622_v32  ;;  %v4026_v46 = vld [vmem:[#allocation4 + $0x84] sm:$0xff] }
 0x461   :  { %4772 = vmatmul.bf16.gmra.mxu1 %v9639_v55 }
 0x462   :  { %10424 = vst [vmem:[#allocation38_spill] sm:$0xff] %v9690_v60 }
 0x463   :  { %4198 = vmatmul.bf16.gmra.mxu2 %v4049_v34  ;;  %4287 = vmatmul.bf16.gmra.mxu3 %v4049_v34 }
 0x466   :  { %v9692_v61 = vpop.f32.mrf.mxu1  ;;  %v9694_v35 = vpop.f32.mrf.mxu2 }
 0x467   :  { %v9696_v51 = vpop.f32.mrf.mxu3  ;;  %v3709_v45 = vpop.f32.mrf.mxu0 }
 0x468   :  { %10425 = vst [vmem:[#allocation34_spill] sm:$0xff] %v9696_v51  ;;  %v9699_v21 = vadd.f32 %v3709_v45, %v9632_v9  ;;  %v4050_v51 = vpack.c.bf16 %v4027_v10, %v4026_v46  ;;  %v3819_v9 = vadd.f32 %v9489_v25, %v9337_v22  ;;  %v4535_v10 = vld [vmem:[#allocation4 + $0x56] sm:$0xff] }
 0x469   :  { %4698 = vmatmul.bf16.gmra.mxu0 %v9701_v4  ;;  %v9725_v46 = vpack.c.bf16 %v4536_v38, %v4535_v10  ;;  %v8057_v22 = vld [vmem:[#allocation12 + $0x224] sm:$0xf]  ;;  %v4028_v10 = vld [vmem:[#allocation4 + $0x94] sm:$0xff] }
 0x46a   :  { %10426 = vst [vmem:[#allocation26_spill] sm:$0xff] %v9699_v21 }
 0x46e   :  { %v9704_v32 = vpop.f32.mrf.mxu1  ;;  %v9706_v55 = vpop.f32.mrf.mxu2 }
 0x46f   :  { %10427 = vst [vmem:[#allocation65_spill] sm:$0xff] %v9704_v32  ;;  %v9708_v49 = vpop.f32.mrf.mxu3  ;;  %v3711_v34 = vpop.f32.mrf.mxu0 }
 0x470   :  { %10428 = vst [vmem:[#allocation25_spill] sm:$0xff] %v9708_v49  ;;  %v9711_v60 = vadd.f32 %v3711_v34, %v9644_v30  ;;  %v8058_v34 = vld [vmem:[#allocation12 + $0x224] sm:$0xf0] }
 0x471   :  { %4777 = vmatmul.bf16.gmra.mxu1 %v4559_v40 }
 0x472   :  { %10429 = vst [vmem:[#allocation39_spill] sm:$0xff] %v9711_v60  ;;  %v7469_v60 = vld [vmem:[#allocation12 + $0x228] sm:$0xf0] }
 0x473   :  { %4203 = vmatmul.bf16.gmra.mxu2 %v4050_v51  ;;  %4292 = vmatmul.bf16.gmra.mxu3 %v4050_v51  ;;  %v7467_v51 = vld [vmem:[#allocation12 + $0x220] sm:$0xf] }
 0x474   :  { %v7468_v25 = vor.u32 %v8058_v34, %v7467_v51 }
 0x476   :  { %v9715_v50 = vpop.f32.mrf.mxu1  ;;  %v4164_v45 = vpop.f32.mrf.mxu2  ;;  %5190 = vmatpush.bf16.msra.mxu2 %v7468_v25 }
 0x477   :  { %10430 = vst [vmem:[#allocation42_spill] sm:$0xff] %v9715_v50  ;;  %v9718_v21 = vadd.f32 %v4164_v45, %v9426_v27  ;;  %v4253_v49 = vpop.f32.mrf.mxu3  ;;  %v3714_v40 = vpop.f32.mrf.mxu0  ;;  %v7472_v50 = vor.u32 %v8057_v22, %v7469_v60  ;;  %v3821_v27 = vadd.f32 %v9501_v63, %v9350_v12  ;;  %v4029_v45 = vld [vmem:[#allocation4 + $0x9c] sm:$0xff]  ;;  %v3823_v12 = vadd.f32 %v9513_v54, %v9363_v59 }
 0x478   :  { %v9720_v32 = vadd.f32 %v4253_v49, %v3819_v9  ;;  %v9723_v30 = vadd.f32 %v3714_v40, %v9654_v58  ;;  %v4051_v60 = vpack.c.bf16 %v4029_v45, %v4028_v10  ;;  %v3825_v59 = vadd.f32 %v9523_v17, %v9376_v1 }
 0x479   :  { %4703 = vmatmul.bf16.gmra.mxu0 %v9725_v46  ;;  %5279 = vmatpush.bf16.msra.mxu3 %v7472_v50  ;;  %v4538_v50 = vld [vmem:[#allocation4 + $0x6e] sm:$0xff]  ;;  %v3827_v1 = vadd.f32 %v9535_v56, %v9389_v47 }
 0x47a   :  { %v8055_v47 = vld [vmem:[#allocation12 + $0x214] sm:$0xf] }
 0x47e   :  { %v9730_v49 = vpop.f32.mrf.mxu1  ;;  %v4166_v9 = vpop.f32.mrf.mxu2 }
 0x47f   :  { %v9733_v58 = vadd.f32 %v4166_v9, %v9441_v62  ;;  %v4255_v38 = vpop.f32.mrf.mxu3  ;;  %v3716_v51 = vpop.f32.mrf.mxu0  ;;  %v4537_v9 = vld [vmem:[#allocation4 + $0x66] sm:$0xff] }
 0x480   :  { %v9735_v40 = vadd.f32 %v4255_v38, %v3821_v27  ;;  %v9739_v34 = vadd.f32 %v3716_v51, %v9663_v43  ;;  %v9753_v45 = vpack.c.bf16 %v4538_v50, %v4537_v9 }
 0x481   :  { %4782 = vmatmul.bf16.gmra.mxu1 %v9679_v2 }
 0x483   :  { %4208 = vmatmul.bf16.gmra.mxu2 %v4051_v60  ;;  %4297 = vmatmul.bf16.gmra.mxu3 %v4051_v60 }
 0x486   :  { %v9743_v63 = vpop.f32.mrf.mxu1  ;;  %v4169_v62 = vpop.f32.mrf.mxu2 }
 0x487   :  { %v9746_v22 = vadd.f32 %v4169_v62, %v9455_v52  ;;  %v4258_v25 = vpop.f32.mrf.mxu3  ;;  %v3719_v2 = vpop.f32.mrf.mxu0  ;;  %v4031_v52 = vld [vmem:[#allocation4 + $0xac] sm:$0xff] }
 0x488   :  { %v9748_v27 = vadd.f32 %v4258_v25, %v3823_v12  ;;  %v9751_v43 = vadd.f32 %v3719_v2, %v9672_v29  ;;  %v4030_v12 = vld [vmem:[#allocation4 + $0xa4] sm:$0xff] }
 0x489   :  { %4708 = vmatmul.bf16.gmra.mxu0 %v9753_v45  ;;  %v4052_v62 = vpack.c.bf16 %v4031_v52, %v4030_v12  ;;  %v4540_v25 = vld [vmem:[#allocation4 + $0x7e] sm:$0xff]  ;;  %v8056_v12 = vld [vmem:[#allocation12 + $0x214] sm:$0xf0] }
 0x48e   :  { %v9758_v54 = vpop.f32.mrf.mxu1  ;;  %v4171_v38 = vpop.f32.mrf.mxu2 }
 0x48f   :  { %v9761_v10 = vadd.f32 %v4171_v38, %v9470_v11  ;;  %v4260_v51 = vpop.f32.mrf.mxu3  ;;  %v3721_v29 = vpop.f32.mrf.mxu0  ;;  %v4539_v38 = vld [vmem:[#allocation4 + $0x76] sm:$0xff] }
 0x490   :  { %v9763_v60 = vadd.f32 %v4260_v51, %v3825_v59  ;;  %v9767_v50 = vadd.f32 %v3721_v29, %v9684_v20  ;;  %v9781_v52 = vpack.c.bf16 %v4540_v25, %v4539_v38  ;;  %v7459_v51 = vld [vmem:[#allocation12 + $0x210] sm:$0xf]  ;;  %v7461_v29 = vld [vmem:[#allocation12 + $0x218] sm:$0xf0] }
 0x491   :  { %4787 = vmatmul.bf16.gmra.mxu1 %v9701_v4  ;;  %v7460_v56 = vor.u32 %v8056_v12, %v7459_v51  ;;  %v4032_v38 = vld [vmem:[#allocation4 + $0xb4] sm:$0xff] }
 0x493   :  { %4213 = vmatmul.bf16.gmra.mxu2 %v4052_v62  ;;  %4302 = vmatmul.bf16.gmra.mxu3 %v4052_v62  ;;  %v7464_v62 = vor.u32 %v8055_v47, %v7461_v29 }
 0x494   :  { %5191 = vmatpush.bf16.msra.mxu2 %v7460_v56  ;;  %v4542_v56 = vld [vmem:[#allocation4 + $0x8e] sm:$0xff] }
 0x495   :  { %5280 = vmatpush.bf16.msra.mxu3 %v7464_v62 }
 0x496   :  { %v9771_v17 = vpop.f32.mrf.mxu1  ;;  %v4174_v11 = vpop.f32.mrf.mxu2 }
 0x497   :  { %v9774_v2 = vadd.f32 %v4174_v11, %v9483_v28  ;;  %v4263_v9 = vpop.f32.mrf.mxu3  ;;  %v3724_v4 = vpop.f32.mrf.mxu0  ;;  %v3829_v28 = vadd.f32 %v9545_v41, %v9402_v8  ;;  %v3831_v8 = vadd.f32 %v9557_v42, %v9423_v53  ;;  %v3833_v53 = vadd.f32 %v9567_v14, %v9437_v13 }
 0x498   :  { %v9776_v59 = vadd.f32 %v4263_v9, %v3827_v1  ;;  %v9779_v20 = vadd.f32 %v3724_v4, %v9694_v35  ;;  %v4033_v9 = vld [vmem:[#allocation4 + $0xbc] sm:$0xff]  ;;  %v3835_v13 = vadd.f32 %v9579_v37, %v9452_v39 }
 0x499   :  { %4713 = vmatmul.bf16.gmra.mxu0 %v9781_v52  ;;  %v4053_v12 = vpack.c.bf16 %v4033_v9, %v4032_v38  ;;  %v8053_v39 = vld [vmem:[#allocation12 + $0x204] sm:$0xf] }
 0x49e   :  { %v9786_v1 = vpop.f32.mrf.mxu1  ;;  %v4176_v11 = vpop.f32.mrf.mxu2 }
 0x49f   :  { %v9789_v35 = vadd.f32 %v4176_v11, %v9497_v19  ;;  %v4265_v25 = vpop.f32.mrf.mxu3  ;;  %v3726_v51 = vpop.f32.mrf.mxu0  ;;  %v4541_v11 = vld [vmem:[#allocation4 + $0x86] sm:$0xff] }
 0x4a0   :  { %v9791_v4 = vadd.f32 %v4265_v25, %v3829_v28  ;;  %v9795_v47 = vadd.f32 %v3726_v51, %v9706_v55  ;;  %v9809_v9 = vpack.c.bf16 %v4542_v56, %v4541_v11 }
 0x4a1   :  { %4792 = vmatmul.bf16.gmra.mxu1 %v9725_v46 }
 0x4a3   :  { %4218 = vmatmul.bf16.gmra.mxu2 %v4053_v12  ;;  %4307 = vmatmul.bf16.gmra.mxu3 %v4053_v12 }
 0x4a6   :  { %v9799_v41 = vpop.f32.mrf.mxu1  ;;  %v4179_v19 = vpop.f32.mrf.mxu2 }
 0x4a7   :  { %v9802_v29 = vadd.f32 %v4179_v19, %v9508_v0  ;;  %v4268_v62 = vpop.f32.mrf.mxu3  ;;  %v4679_v46 = vpop.f32.mrf.mxu0  ;;  %v4035_v0 = vld [vmem:[#allocation4 + $0xcc] sm:$0xff] }
 0x4a8   :  { %v9804_v28 = vadd.f32 %v4268_v62, %v3831_v8  ;;  %v9807_v55 = vadd.f32 %v4679_v46, %v9718_v21  ;;  %v4034_v8 = vld [vmem:[#allocation4 + $0xc4] sm:$0xff] }
 0x4a9   :  { %4718 = vmatmul.bf16.gmra.mxu0 %v9809_v9  ;;  %v4054_v19 = vpack.c.bf16 %v4035_v0, %v4034_v8  ;;  %v4544_v62 = vld [vmem:[#allocation4 + $0x9e] sm:$0xff] }
 0x4aa   :  { %v8054_v8 = vld [vmem:[#allocation12 + $0x204] sm:$0xf0] }
 0x4ae   :  { %v9814_v42 = vpop.f32.mrf.mxu1  ;;  %v4181_v25 = vpop.f32.mrf.mxu2 }
 0x4af   :  { %v9817_v38 = vadd.f32 %v4181_v25, %v9521_v26  ;;  %v4270_v51 = vpop.f32.mrf.mxu3  ;;  %v4681_v21 = vpop.f32.mrf.mxu0  ;;  %v4543_v25 = vld [vmem:[#allocation4 + $0x96] sm:$0xff] }
 0x4b0   :  { %v9819_v12 = vadd.f32 %v4270_v51, %v3833_v53  ;;  %v9823_v56 = vadd.f32 %v4681_v21, %v9733_v58  ;;  %v9837_v0 = vpack.c.bf16 %v4544_v62, %v4543_v25  ;;  %v7451_v51 = vld [vmem:[#allocation12 + $0x200] sm:$0xf]  ;;  %v7453_v21 = vld [vmem:[#allocation12 + $0x208] sm:$0xf0] }
 0x4b1   :  { %4797 = vmatmul.bf16.gmra.mxu1 %v9753_v45  ;;  %v7452_v37 = vor.u32 %v8054_v8, %v7451_v51  ;;  %v4036_v25 = vld [vmem:[#allocation4 + $0xd4] sm:$0xff] }
 0x4b3   :  { %4223 = vmatmul.bf16.gmra.mxu2 %v4054_v19  ;;  %4312 = vmatmul.bf16.gmra.mxu3 %v4054_v19  ;;  %v7456_v19 = vor.u32 %v8053_v39, %v7453_v21 }
 0x4b4   :  { %5192 = vmatpush.bf16.msra.mxu2 %v7452_v37  ;;  %v4546_v37 = vld [vmem:[#allocation4 + $0xae] sm:$0xff] }
 0x4b5   :  { %5281 = vmatpush.bf16.msra.mxu3 %v7456_v19 }
 0x4b6   :  { %v9827_v14 = vpop.f32.mrf.mxu1  ;;  %v4184_v26 = vpop.f32.mrf.mxu2 }
 0x4b7   :  { %v9830_v46 = vadd.f32 %v4184_v26, %v9530_v23  ;;  %v4273_v11 = vpop.f32.mrf.mxu3  ;;  %v4684_v45 = vpop.f32.mrf.mxu0  ;;  %v3837_v23 = vadd.f32 %v9589_v31, %v9466_v33  ;;  %v3839_v33 = vadd.f32 %v9601_v15, %v9480_v48  ;;  %v3841_v48 = vadd.f32 %v9611_v16, %v9493_v5 }
 0x4b8   :  { %v9832_v53 = vadd.f32 %v4273_v11, %v3835_v13  ;;  %v9835_v58 = vadd.f32 %v4684_v45, %v9746_v22  ;;  %v4037_v11 = vld [vmem:[#allocation4 + $0xdc] sm:$0xff]  ;;  %v3843_v5 = vadd.f32 %v9620_v7, %v9505_v6 }
 0x4b9   :  { %4723 = vmatmul.bf16.gmra.mxu0 %v9837_v0  ;;  %v4055_v8 = vpack.c.bf16 %v4037_v11, %v4036_v25  ;;  %v4039_v25 = vld [vmem:[#allocation4 + $0xec] sm:$0xff]  ;;  %v10431_v6 = vld [vmem:[#allocation44_spill] sm:$0xff] }
 0x4ba   :  { %v3845_v7 = vadd.f32 %v9630_v57, %v10431_v6  ;;  %v10435_v57 = vld [vmem:[#allocation48_spill] sm:$0xff] }
 0x4be   :  { %v9842_v13 = vpop.f32.mrf.mxu1  ;;  %v4186_v26 = vpop.f32.mrf.mxu2 }
 0x4bf   :  { %v9845_v22 = vadd.f32 %v4186_v26, %v9543_v24  ;;  %v4275_v62 = vpop.f32.mrf.mxu3  ;;  %v4686_v51 = vpop.f32.mrf.mxu0  ;;  %v4545_v26 = vld [vmem:[#allocation4 + $0xa6] sm:$0xff] }
 0x4c0   :  { %v9847_v45 = vadd.f32 %v4275_v62, %v3837_v23  ;;  %v9851_v39 = vadd.f32 %v4686_v51, %v9761_v10  ;;  %v9865_v11 = vpack.c.bf16 %v4546_v37, %v4545_v26 }
 0x4c1   :  { %4802 = vmatmul.bf16.gmra.mxu1 %v9781_v52 }
 0x4c3   :  { %4228 = vmatmul.bf16.gmra.mxu2 %v4055_v8  ;;  %4317 = vmatmul.bf16.gmra.mxu3 %v4055_v8 }
 0x4c6   :  { %v9855_v31 = vpop.f32.mrf.mxu1  ;;  %v4189_v24 = vpop.f32.mrf.mxu2 }
 0x4c7   :  { %v9858_v21 = vadd.f32 %v4189_v24, %v9552_v3  ;;  %v4278_v19 = vpop.f32.mrf.mxu3  ;;  %v4689_v52 = vpop.f32.mrf.mxu0 }
 0x4c8   :  { %v9860_v23 = vadd.f32 %v4278_v19, %v3839_v33  ;;  %v9863_v10 = vadd.f32 %v4689_v52, %v9774_v2  ;;  %v4038_v2 = vld [vmem:[#allocation4 + $0xe4] sm:$0xff] }
 0x4c9   :  { %4728 = vmatmul.bf16.gmra.mxu0 %v9865_v11  ;;  %v4056_v37 = vpack.c.bf16 %v4039_v25, %v4038_v2  ;;  %v4548_v52 = vld [vmem:[#allocation4 + $0xbe] sm:$0xff]  ;;  %v4040_v2 = vld [vmem:[#allocation4 + $0xf4] sm:$0xff] }
 0x4ce   :  { %v4768_v15 = vpop.f32.mrf.mxu1  ;;  %v4191_v62 = vpop.f32.mrf.mxu2 }
 0x4cf   :  { %v9871_v3 = vadd.f32 %v4768_v15, %v9720_v32  ;;  %v9874_v51 = vadd.f32 %v4191_v62, %v9565_v18  ;;  %v4280_v8 = vpop.f32.mrf.mxu3  ;;  %v4691_v24 = vpop.f32.mrf.mxu0 }
 0x4d0   :  { %v9876_v33 = vadd.f32 %v4280_v8, %v3841_v48  ;;  %v9880_v19 = vadd.f32 %v4691_v24, %v9789_v35  ;;  %v4547_v35 = vld [vmem:[#allocation4 + $0xb6] sm:$0xff] }
 0x4d1   :  { %4807 = vmatmul.bf16.gmra.mxu1 %v9809_v9  ;;  %v4568_v25 = vpack.c.bf16 %v4548_v52, %v4547_v35  ;;  %v4041_v24 = vld [vmem:[#allocation4 + $0xfc] sm:$0xff] }
 0x4d2   :  { %v4057_v52 = vpack.c.bf16 %v4041_v24, %v4040_v2  ;;  %v4549_v2 = vld [vmem:[#allocation4 + $0xc6] sm:$0xff] }
 0x4d3   :  { %4233 = vmatmul.bf16.gmra.mxu2 %v4056_v37  ;;  %4322 = vmatmul.bf16.gmra.mxu3 %v4056_v37  ;;  %v10432_v37 = vld [vmem:[#allocation53_spill] sm:$0xff]  ;;  %v10440_v24 = vld [vmem:[#allocation46_spill] sm:$0xff] }
 0x4d6   :  { %v4770_v16 = vpop.f32.mrf.mxu1  ;;  %v4194_v32 = vpop.f32.mrf.mxu2 }
 0x4d7   :  { %v9885_v18 = vadd.f32 %v4770_v16, %v9735_v40  ;;  %v9888_v26 = vadd.f32 %v4194_v32, %v9574_v44  ;;  %v4283_v48 = vpop.f32.mrf.mxu3  ;;  %v4694_v15 = vpop.f32.mrf.mxu0 }
 0x4d8   :  { %v9890_v9 = vadd.f32 %v4283_v48, %v3843_v5  ;;  %v9893_v62 = vadd.f32 %v4694_v15, %v9802_v29  ;;  %v10436_v15 = vld [vmem:[#allocation29_spill] sm:$0xff] }
 0x4d9   :  { %4733 = vmatmul.bf16.gmra.mxu0 %v4568_v25  ;;  %v3847_v35 = vadd.f32 %v10436_v15, %v10435_v57  ;;  %v5041_v15 = vld [vmem:[#allocation4 + $0x10] sm:$0xff] }
 0x4de   :  { %v4773_v8 = vpop.f32.mrf.mxu1  ;;  %v4196_v40 = vpop.f32.mrf.mxu2 }
 0x4df   :  { %v9898_v44 = vadd.f32 %v4773_v8, %v9748_v27  ;;  %v9901_v5 = vadd.f32 %v4196_v40, %v10432_v37  ;;  %v4285_v16 = vpop.f32.mrf.mxu3  ;;  %v4696_v29 = vpop.f32.mrf.mxu0  ;;  %v4550_v40 = vld [vmem:[#allocation4 + $0xce] sm:$0xff] }
 0x4e0   :  { %v9903_v32 = vadd.f32 %v4285_v16, %v3845_v7  ;;  %v9907_v48 = vadd.f32 %v4696_v29, %v9817_v38  ;;  %v10437_v7 = vld [vmem:[#allocation59_spill] sm:$0xff]  ;;  %v4569_v38 = vpack.c.bf16 %v4550_v40, %v4549_v2  ;;  %v10441_v29 = vld [vmem:[#allocation64_spill] sm:$0xff]  ;;  %v10446_v2 = vld [vmem:[#allocation33_spill] sm:$0xff] }
 0x4e1   :  { %10433 = vst [vmem:[#allocation37_spill] sm:$0xff] %v9901_v5  ;;  %4812 = vmatmul.bf16.gmra.mxu1 %v9837_v0 }
 0x4e2   :  { %10434 = vst [vmem:[#allocation70_spill] sm:$0xff] %v9903_v32 }
 0x4e3   :  { %4238 = vmatmul.bf16.gmra.mxu2 %v4057_v52  ;;  %4327 = vmatmul.bf16.gmra.mxu3 %v4057_v52  ;;  %v3849_v52 = vadd.f32 %v10441_v29, %v10440_v24 }
 0x4e6   :  { %v4775_v27 = vpop.f32.mrf.mxu1  ;;  %v4199_v6 = vpop.f32.mrf.mxu2 }
 0x4e7   :  { %v9912_v8 = vadd.f32 %v4775_v27, %v9763_v60  ;;  %v9915_v37 = vadd.f32 %v4199_v6, %v10437_v7  ;;  %v4288_v16 = vpop.f32.mrf.mxu3  ;;  %v10442_v60 = vld [vmem:[#allocation56_spill] sm:$0xff] }
 0x4e8   :  { %v9917_v0 = vadd.f32 %v4288_v16, %v3847_v35  ;;  %v5040_v35 = vld [vmem:[#allocation4 + $0x8] sm:$0xff]  ;;  %v10445_v16 = vld [vmem:[#allocation47_spill] sm:$0xff] }
 0x4e9   :  { %10438 = vst [vmem:[#allocation40_spill] sm:$0xff] %v9915_v37  ;;  %4738 = vmatmul.bf16.gmra.mxu0 %v4569_v38  ;;  %v5072_v40 = vpack.c.bf16 %v5041_v15, %v5040_v35  ;;  %v3851_v24 = vadd.f32 %v10446_v2, %v10445_v16  ;;  %v10449_v15 = vld [vmem:[#allocation49_spill] sm:$0xff]  ;;  %v10450_v35 = vld [vmem:[#allocation67_spill] sm:$0xff] }
 0x4ea   :  { %10439 = vst [vmem:[#allocation69_spill] sm:$0xff] %v9917_v0  ;;  %v5043_v2 = vld [vmem:[#allocation4 + $0x20] sm:$0xff] }
 0x4ee   :  { %v4778_v32 = vpop.f32.mrf.mxu1  ;;  %v4201_v57 = vpop.f32.mrf.mxu2 }
 0x4ef   :  { %v9922_v5 = vadd.f32 %v4778_v32, %v9776_v59  ;;  %v9925_v27 = vadd.f32 %v4201_v57, %v10442_v60  ;;  %v4290_v6 = vpop.f32.mrf.mxu3  ;;  %v4552_v32 = vld [vmem:[#allocation4 + $0xde] sm:$0xff] }
 0x4f0   :  { %v9927_v7 = vadd.f32 %v4290_v6, %v3849_v52  ;;  %v10447_v57 = vld [vmem:[#allocation57_spill] sm:$0xff] }
 0x4f1   :  { %10443 = vst [vmem:[#allocation43_spill] sm:$0xff] %v9925_v27  ;;  %4817 = vmatmul.bf16.gmra.mxu1 %v9865_v11 }
 0x4f2   :  { %10444 = vst [vmem:[#allocation71_spill] sm:$0xff] %v9927_v7  ;;  %v4551_v7 = vld [vmem:[#allocation4 + $0xd6] sm:$0xff] }
 0x4f3   :  { %5193 = vmatmul.bf16.vlgmr.msra.gmra.mxu2 %v5072_v40  ;;  %5282 = vmatmul.bf16.vlgmr.msra.gmra.mxu3 %v5072_v40  ;;  %v4570_v11 = vpack.c.bf16 %v4552_v32, %v4551_v7  ;;  %v3853_v40 = vadd.f32 %v10450_v35, %v10449_v15  ;;  %v10454_v7 = vld [vmem:[#allocation50_spill] sm:$0xff] }
 0x4f4   :  { %v3855_v32 = vadd.f32 %v9682_v36, %v10454_v7  ;;  %v5045_v36 = vld [vmem:[#allocation4 + $0x30] sm:$0xff]  ;;  %v10459_v7 = vld [vmem:[#allocation28_spill] sm:$0xff] }
 0x4f6   :  { %v4780_v29 = vpop.f32.mrf.mxu1  ;;  %v4204_v0 = vpop.f32.mrf.mxu2 }
 0x4f7   :  { %v9933_v59 = vadd.f32 %v4780_v29, %v9791_v4  ;;  %v9936_v60 = vadd.f32 %v4204_v0, %v10447_v57  ;;  %v4293_v52 = vpop.f32.mrf.mxu3  ;;  %v10451_v4 = vld [vmem:[#allocation61_spill] sm:$0xff] }
 0x4f8   :  { %v9938_v6 = vadd.f32 %v4293_v52, %v3851_v24  ;;  %v5042_v24 = vld [vmem:[#allocation4 + $0x18] sm:$0xff] }
 0x4f9   :  { %4743 = vmatmul.bf16.gmra.mxu0 %v4570_v11  ;;  %v5073_v52 = vpack.c.bf16 %v5043_v2, %v5042_v24  ;;  %v10458_v2 = vld [vmem:[#allocation52_spill] sm:$0xff] }
 0x4fa   :  { %10448 = vst [vmem:[#allocation41_spill] sm:$0xff] %v9938_v6  ;;  %v3857_v24 = vadd.f32 %v9692_v61, %v10458_v2  ;;  %v10464_v61 = vld [vmem:[#allocation63_spill] sm:$0xff] }
 0x4fe   :  { %v4783_v27 = vpop.f32.mrf.mxu1  ;;  %v4206_v16 = vpop.f32.mrf.mxu2 }
 0x4ff   :  { %v9943_v37 = vadd.f32 %v4783_v27, %v9804_v28  ;;  %v9946_v29 = vadd.f32 %v4206_v16, %v10451_v4  ;;  %v4295_v0 = vpop.f32.mrf.mxu3  ;;  %v4554_v28 = vld [vmem:[#allocation4 + $0xee] sm:$0xff]  ;;  %v10455_v27 = vld [vmem:[#allocation60_spill] sm:$0xff] }
 0x500   :  { %v9948_v57 = vadd.f32 %v4295_v0, %v3853_v40  ;;  %v4553_v0 = vld [vmem:[#allocation4 + $0xe6] sm:$0xff] }
 0x501   :  { %10452 = vst [vmem:[#allocation72_spill] sm:$0xff] %v9946_v29  ;;  %4822 = vmatmul.bf16.gmra.mxu1 %v4568_v25  ;;  %v4571_v25 = vpack.c.bf16 %v4554_v28, %v4553_v0  ;;  %v5044_v29 = vld [vmem:[#allocation4 + $0x28] sm:$0xff]  ;;  %v4555_v0 = vld [vmem:[#allocation4 + $0xf6] sm:$0xff] }
 0x502   :  { %10453 = vst [vmem:[#allocation68_spill] sm:$0xff] %v9948_v57 }
 0x503   :  { %5198 = vmatmul.bf16.gmra.mxu2 %v5073_v52  ;;  %5287 = vmatmul.bf16.gmra.mxu3 %v5073_v52 }
 0x506   :  { %v4785_v15 = vpop.f32.mrf.mxu1  ;;  %v4209_v35 = vpop.f32.mrf.mxu2 }
 0x507   :  { %v9953_v6 = vadd.f32 %v4785_v15, %v9819_v12  ;;  %v9956_v16 = vadd.f32 %v4209_v35, %v10455_v27  ;;  %v4298_v4 = vpop.f32.mrf.mxu3  ;;  %v5074_v35 = vpack.c.bf16 %v5045_v36, %v5044_v29  ;;  %v10463_v27 = vld [vmem:[#allocation65_spill] sm:$0xff] }
 0x508   :  { %v9958_v40 = vadd.f32 %v4298_v4, %v3855_v32  ;;  %v10462_v32 = vld [vmem:[#allocation54_spill] sm:$0xff]  ;;  %v5047_v36 = vld [vmem:[#allocation4 + $0x40] sm:$0xff] }
 0x509   :  { %10456 = vst [vmem:[#allocation45_spill] sm:$0xff] %v9956_v16  ;;  %4748 = vmatmul.bf16.gmra.mxu0 %v4571_v25  ;;  %v3859_v28 = vadd.f32 %v10463_v27, %v10462_v32 }
 0x50a   :  { %10457 = vst [vmem:[#allocation44_spill] sm:$0xff] %v9958_v40  ;;  %v4556_v40 = vld [vmem:[#allocation4 + $0xfe] sm:$0xff] }
 0x50e   :  { %v4211_v52 = vpop.f32.mrf.mxu2 }
 0x50f   :  { %v9963_v57 = vadd.f32 %v4211_v52, %v10459_v7  ;;  %v4300_v12 = vpop.f32.mrf.mxu3  ;;  %v4572_v7 = vpack.c.bf16 %v4556_v40, %v4555_v0  ;;  %v10470_v0 = vld [vmem:[#allocation66_spill] sm:$0xff] }
 0x510   :  { %v9965_v15 = vadd.f32 %v4300_v12, %v3857_v24  ;;  %v10465_v24 = vld [vmem:[#allocation51_spill] sm:$0xff]  ;;  %v10466_v12 = vld [vmem:[#allocation42_spill] sm:$0xff] }
 0x511   :  { %10460 = vst [vmem:[#allocation53_spill] sm:$0xff] %v9963_v57  ;;  %4827 = vmatmul.bf16.gmra.mxu1 %v4569_v38  ;;  %v3861_v38 = vadd.f32 %v10466_v12, %v10465_v24  ;;  %v5046_v57 = vld [vmem:[#allocation4 + $0x38] sm:$0xff] }
 0x512   :  { %10461 = vst [vmem:[#allocation48_spill] sm:$0xff] %v9965_v15 }
 0x513   :  { %5203 = vmatmul.bf16.gmra.mxu2 %v5074_v35  ;;  %5292 = vmatmul.bf16.gmra.mxu3 %v5074_v35  ;;  %v10467_v35 = vld [vmem:[#allocation31_spill] sm:$0xff] }
 0x516   :  { %v4214_v4 = vpop.f32.mrf.mxu2 }
 0x517   :  { %v9970_v2 = vadd.f32 %v4214_v4, %v10464_v61  ;;  %v4303_v16 = vpop.f32.mrf.mxu3  ;;  %v5075_v4 = vpack.c.bf16 %v5047_v36, %v5046_v57 }
 0x518   :  { %v9972_v52 = vadd.f32 %v4303_v16, %v3859_v28  ;;  %v10469_v16 = vld [vmem:[#allocation27_spill] sm:$0xff] }
 0x519   :  { %4753 = vmatmul.bf16.gmra.mxu0 %v4572_v7  ;;  %v3863_v40 = vadd.f32 %v9730_v49, %v10469_v16  ;;  %v10474_v16 = vld [vmem:[#allocation55_spill] sm:$0xff] }
 0x51e   :  { %v4216_v29 = vpop.f32.mrf.mxu2 }
 0x51f   :  { %v9977_v15 = vadd.f32 %v4216_v29, %v10467_v35  ;;  %v4305_v32 = vpop.f32.mrf.mxu3  ;;  %v10471_v29 = vld [vmem:[#allocation58_spill] sm:$0xff] }
 0x520   :  { %v9979_v27 = vadd.f32 %v4305_v32, %v3861_v38  ;;  %v3865_v35 = vadd.f32 %v9743_v63, %v10471_v29  ;;  %v5049_v32 = vld [vmem:[#allocation4 + $0x50] sm:$0xff] }
 0x521   :  { %4832 = vmatmul.bf16.gmra.mxu1 %v4570_v11 }
 0x522   :  { %10468 = vst [vmem:[#allocation29_spill] sm:$0xff] %v9979_v27  ;;  %v10472_v27 = vld [vmem:[#allocation38_spill] sm:$0xff] }
 0x523   :  { %5208 = vmatmul.bf16.gmra.mxu2 %v5075_v4  ;;  %5297 = vmatmul.bf16.gmra.mxu3 %v5075_v4  ;;  %v5048_v4 = vld [vmem:[#allocation4 + $0x48] sm:$0xff] }
 0x524   :  { %v5076_v49 = vpack.c.bf16 %v5049_v32, %v5048_v4 }
 0x526   :  { %v4219_v28 = vpop.f32.mrf.mxu2 }
 0x527   :  { %v9984_v61 = vadd.f32 %v4219_v28, %v10470_v0  ;;  %v4308_v24 = vpop.f32.mrf.mxu3  ;;  %v10475_v0 = vld [vmem:[#allocation26_spill] sm:$0xff] }
 0x528   :  { %v9986_v12 = vadd.f32 %v4308_v24, %v3863_v40  ;;  %v3867_v40 = vadd.f32 %v9758_v54, %v10474_v16  ;;  %v10478_v16 = vld [vmem:[#allocation30_spill] sm:$0xff] }
 0x52e   :  { %v4221_v38 = vpop.f32.mrf.mxu2 }
 0x52f   :  { %v9991_v11 = vadd.f32 %v4221_v38, %v10472_v27  ;;  %v4310_v57 = vpop.f32.mrf.mxu3  ;;  %v10476_v27 = vld [vmem:[#allocation32_spill] sm:$0xff] }
 0x530   :  { %v9993_v36 = vadd.f32 %v4310_v57, %v3865_v35  ;;  %v3869_v38 = vadd.f32 %v9771_v17, %v10476_v27  ;;  %v5051_v57 = vld [vmem:[#allocation4 + $0x60] sm:$0xff] }
 0x531   :  { %4837 = vmatmul.bf16.gmra.mxu1 %v4571_v25 }
 0x532   :  { %10473 = vst [vmem:[#allocation59_spill] sm:$0xff] %v9993_v36  ;;  %v10477_v36 = vld [vmem:[#allocation39_spill] sm:$0xff] }
 0x533   :  { %5213 = vmatmul.bf16.gmra.mxu2 %v5076_v49  ;;  %5302 = vmatmul.bf16.gmra.mxu3 %v5076_v49  ;;  %v5050_v49 = vld [vmem:[#allocation4 + $0x58] sm:$0xff] }
 0x534   :  { %v5077_v54 = vpack.c.bf16 %v5051_v57, %v5050_v49  ;;  %v5052_v49 = vld [vmem:[#allocation4 + $0x68] sm:$0xff] }
 0x536   :  { %v4224_v28 = vpop.f32.mrf.mxu2 }
 0x537   :  { %v9998_v24 = vadd.f32 %v4224_v28, %v10475_v0  ;;  %v4313_v63 = vpop.f32.mrf.mxu3 }
 0x538   :  { %v10000_v29 = vadd.f32 %v4313_v63, %v3867_v40  ;;  %v3871_v40 = vadd.f32 %v9786_v1, %v10478_v16 }
 0x53e   :  { %v4226_v35 = vpop.f32.mrf.mxu2 }
 0x53f   :  { %v10005_v25 = vadd.f32 %v4226_v35, %v10477_v36  ;;  %v4315_v32 = vpop.f32.mrf.mxu3  ;;  %v10479_v36 = vld [vmem:[#allocation35_spill] sm:$0xff] }
 0x540   :  { %v10007_v4 = vadd.f32 %v4315_v32, %v3869_v38  ;;  %v3873_v27 = vadd.f32 %v9799_v41, %v10479_v36  ;;  %v5053_v35 = vld [vmem:[#allocation4 + $0x70] sm:$0xff] }
 0x541   :  { %4842 = vmatmul.bf16.gmra.mxu1 %v4572_v7  ;;  %v5078_v1 = vpack.c.bf16 %v5053_v35, %v5052_v49  ;;  %v5054_v49 = vld [vmem:[#allocation4 + $0x78] sm:$0xff] }
 0x543   :  { %5218 = vmatmul.bf16.gmra.mxu2 %v5077_v54  ;;  %5307 = vmatmul.bf16.gmra.mxu3 %v5077_v54 }
 0x546   :  { %v4229_v28 = vpop.f32.mrf.mxu2 }
 0x547   :  { %v10012_v0 = vadd.f32 %v4229_v28, %v9723_v30  ;;  %v4318_v17 = vpop.f32.mrf.mxu3  ;;  %v10480_v30 = vld [vmem:[#allocation62_spill] sm:$0xff] }
 0x548   :  { %v10014_v63 = vadd.f32 %v4318_v17, %v3871_v40  ;;  %v3875_v54 = vadd.f32 %v9814_v42, %v10480_v30  ;;  %v10481_v17 = vld [vmem:[#allocation36_spill] sm:$0xff]  ;;  %v8100_v30 = vld [vmem:[#allocation15 + $0xf4] sm:$0xf0] }
 0x54e   :  { %v4231_v38 = vpop.f32.mrf.mxu2 }
 0x54f   :  { %v10019_v7 = vadd.f32 %v4231_v38, %v9739_v34  ;;  %v4320_v57 = vpop.f32.mrf.mxu3  ;;  %v3877_v34 = vadd.f32 %v9827_v14, %v10481_v17 }
 0x550   :  { %v10021_v32 = vadd.f32 %v4320_v57, %v3873_v27  ;;  %v5055_v27 = vld [vmem:[#allocation4 + $0x80] sm:$0xff] }
 0x551   :  { %v5079_v42 = vpack.c.bf16 %v5055_v27, %v5054_v49 }
 0x553   :  { %5223 = vmatmul.bf16.gmra.mxu2 %v5078_v1  ;;  %5312 = vmatmul.bf16.gmra.mxu3 %v5078_v1  ;;  %v7571_v1 = vld [vmem:[#allocation15 + $0xf0] sm:$0xf] }
 0x556   :  { %v4234_v16 = vpop.f32.mrf.mxu2 }
 0x557   :  { %v10026_v40 = vadd.f32 %v4234_v16, %v9751_v43  ;;  %v4323_v41 = vpop.f32.mrf.mxu3  ;;  %v7572_v43 = vor.u32 %v8100_v30, %v7571_v1  ;;  %v5056_v30 = vld [vmem:[#allocation4 + $0x88] sm:$0xff] }
 0x558   :  { %v10028_v28 = vadd.f32 %v4323_v41, %v3875_v54  ;;  %v10482_v54 = vld [vmem:[#allocation34_spill] sm:$0xff] }
 0x559   :  { %5961 = vmatpush.bf16.msrb.mxu0 %v7572_v43  ;;  %v3879_v16 = vadd.f32 %v9842_v13, %v10482_v54  ;;  %v8099_v43 = vld [vmem:[#allocation15 + $0xf4] sm:$0xf]  ;;  %v7573_v54 = vld [vmem:[#allocation15 + $0xf8] sm:$0xf0] }
 0x55e   :  { %v4236_v36 = vpop.f32.mrf.mxu2 }
 0x55f   :  { %v10033_v38 = vadd.f32 %v4236_v36, %v9767_v50  ;;  %v4325_v35 = vpop.f32.mrf.mxu3 }
 0x560   :  { %v10035_v57 = vadd.f32 %v4325_v35, %v3877_v34  ;;  %v10485_v34 = vld [vmem:[#allocation25_spill] sm:$0xff]  ;;  %v5057_v35 = vld [vmem:[#allocation4 + $0x90] sm:$0xff] }
 0x561   :  { %v3881_v36 = vadd.f32 %v9855_v31, %v10485_v34  ;;  %v5080_v13 = vpack.c.bf16 %v5057_v35, %v5056_v30 }
 0x563   :  { %5228 = vmatmul.bf16.gmra.mxu2 %v5079_v42  ;;  %5317 = vmatmul.bf16.gmra.mxu3 %v5079_v42 }
 0x566   :  { %v4239_v14 = vpop.f32.mrf.mxu2 }
 0x567   :  { %v10040_v41 = vadd.f32 %v4239_v14, %v9779_v20  ;;  %v4328_v50 = vpop.f32.mrf.mxu3  ;;  %v7635_v20 = vld [vmem:[#allocation15 + $0x70] sm:$0xf]  ;;  %v8084_v14 = vld [vmem:[#allocation15 + $0x74] sm:$0xf0] }
 0x568   :  { %v10042_v17 = vadd.f32 %v4328_v50, %v3879_v16  ;;  %v7576_v16 = vor.u32 %v8099_v43, %v7573_v54  ;;  %v7636_v50 = vor.u32 %v8084_v14, %v7635_v20  ;;  %v5058_v20 = vld [vmem:[#allocation4 + $0x98] sm:$0xff] }
 0x569   :  { %10483 = vst [vmem:[#allocation46_spill] sm:$0xff] %v10040_v41 }
 0x56a   :  { %10484 = vst [vmem:[#allocation64_spill] sm:$0xff] %v10042_v17  ;;  %5974 = vmatpush.bf16.msra.mxu1 %v7576_v16  ;;  %6067 = vmatpush.bf16.msrb.mxu2 %v7636_v50 }
 0x56e   :  { %v4241_v27 = vpop.f32.mrf.mxu2 }
 0x56f   :  { %v10047_v49 = vadd.f32 %v4241_v27, %v9795_v47  ;;  %v4330_v42 = vpop.f32.mrf.mxu3 }
 0x570   :  { %v10049_v1 = vadd.f32 %v4330_v42, %v3881_v36  ;;  %v8083_v42 = vld [vmem:[#allocation15 + $0x74] sm:$0xf] }
 0x571   :  { %10486 = vst [vmem:[#allocation56_spill] sm:$0xff] %v10047_v49  ;;  %v5059_v49 = vld [vmem:[#allocation4 + $0xa0] sm:$0xff] }
 0x572   :  { %10487 = vst [vmem:[#allocation47_spill] sm:$0xff] %v10049_v1  ;;  %v7637_v1 = vld [vmem:[#allocation15 + $0x78] sm:$0xf0]  ;;  %v5081_v16 = vpack.c.bf16 %v5059_v49, %v5058_v20 }
 0x573   :  { %5233 = vmatmul.bf16.gmra.mxu2 %v5080_v13  ;;  %5322 = vmatmul.bf16.gmra.mxu3 %v5080_v13  ;;  %v7640_v35 = vor.u32 %v8083_v42, %v7637_v1 }
 0x575   :  { %6080 = vmatpush.bf16.msrb.mxu3 %v7640_v35 }
 0x576   :  { %v5194_v31 = vpop.f32.mrf.mxu2 }
 0x577   :  { %v5363_v34 = vadd.f32 %v5194_v31, %v9807_v55  ;;  %v5283_v47 = vpop.f32.mrf.mxu3  ;;  %v10055_v55 = vpop.f32.mrf.mxu0 }
 0x578   :  { %v5364_v27 = vadd.f32 %v5283_v47, %v9871_v3  ;;  %v10057_v3 = vpop.f32.mrf.mxu1 }
 0x57a   :  { %v5555_v36 = vmax.f32 %v5363_v34, %v5364_v27  ;;  %v8098_v27 = vld [vmem:[#allocation15 + $0xe4] sm:$0xf0] }
 0x57c   :  { %5587 = vst [vmem:[#allocation5] sm:$0xff] %v5555_v36 }
 0x57e   :  { %v5196_v30 = vpop.f32.mrf.mxu2 }
 0x57f   :  { %v5365_v13 = vadd.f32 %v5196_v30, %v9823_v56  ;;  %v5285_v43 = vpop.f32.mrf.mxu3  ;;  %v10061_v56 = vld [vmem:[#allocation13] ss:$0 sm:$0xff]  ;;  %v10063_v30 = vpop.f32.mrf.mxu0 }
 0x580   :  { %v5366_v54 = vadd.f32 %v5285_v43, %v9885_v18  ;;  %v7563_v18 = vld [vmem:[#allocation15 + $0xe0] sm:$0xf] }
 0x581   :  { %v7564_v42 = vor.u32 %v8098_v27, %v7563_v18  ;;  %v7565_v18 = vld [vmem:[#allocation15 + $0xe8] sm:$0xf0] }
 0x582   :  { %v5556_v14 = vmax.f32 %v5365_v13, %v5366_v54  ;;  %v5061_v54 = vld [vmem:[#allocation4 + $0xb0] sm:$0xff] }
 0x583   :  { %5238 = vmatmul.bf16.gmra.mxu2 %v5081_v16  ;;  %5327 = vmatmul.bf16.gmra.mxu3 %v5081_v16 }
 0x584   :  { %5588 = vst [vmem:[#allocation5 + $0x8] sm:$0xff] %v5556_v14  ;;  %5962 = vmatpush.bf16.msrb.mxu0 %v7564_v42  ;;  %v7627_v42 = vld [vmem:[#allocation15 + $0x60] sm:$0xf] }
 0x586   :  { %v5199_v1 = vpop.f32.mrf.mxu2 }
 0x587   :  { %v5367_v50 = vadd.f32 %v5199_v1, %v9835_v58  ;;  %v5288_v31 = vpop.f32.mrf.mxu3  ;;  %v10066_v58 = vpop.f32.mrf.mxu1 }
 0x588   :  { %v5368_v34 = vadd.f32 %v5288_v31, %v9898_v44 }
 0x58a   :  { %v5557_v47 = vmax.f32 %v5367_v50, %v5368_v34  ;;  %v5060_v50 = vld [vmem:[#allocation4 + $0xa8] sm:$0xff]  ;;  %v8097_v34 = vld [vmem:[#allocation15 + $0xe4] sm:$0xf] }
 0x58b   :  { %v5651_v49 = vld [vmem:[#allocation5 + $0x2] sm:$0xff]  ;;  %v5082_v31 = vpack.c.bf16 %v5061_v54, %v5060_v50  ;;  %v10072_v54 = vpop.f32.mrf.mxu0  ;;  %v7629_v50 = vld [vmem:[#allocation15 + $0x68] sm:$0xf0] }
 0x58c   :  { %v5683_v35 = vmax.f32 %v5555_v36, %v5651_v49  ;;  %5589 = vst [vmem:[#allocation5 + $0x10] sm:$0xff] %v5557_v47  ;;  %v7568_v49 = vor.u32 %v8097_v34, %v7565_v18 }
 0x58e   :  { %v5719_v13 = vadd.f32 %v10061_v56, %v5683_v35  ;;  %v5201_v43 = vpop.f32.mrf.mxu2  ;;  %v8082_v35 = vld [vmem:[#allocation15 + $0x64] sm:$0xf0]  ;;  %5975 = vmatpush.bf16.msra.mxu1 %v7568_v49 }
 0x58f   :  { %v5369_v44 = vadd.f32 %v5201_v43, %v9851_v39  ;;  %v5290_v20 = vpop.f32.mrf.mxu3  ;;  %v7628_v41 = vor.u32 %v8082_v35, %v7627_v42  ;;  %v5062_v42 = vld [vmem:[#allocation4 + $0xb8] sm:$0xff] }
 0x590   :  { %v5751_v16 = vmax.f32 %v5719_v13, 0.0  ;;  %v5370_v1 = vadd.f32 %v5290_v20, %v9912_v8 }
 0x591   :  { %6068 = vmatpush.bf16.msrb.mxu2 %v7628_v41 }
 0x592   :  { %5783 = vst [vmem:[#allocation6] sm:$0xff] %v5751_v16  ;;  %v5558_v36 = vmax.f32 %v5369_v44, %v5370_v1  ;;  %v10075_v16 = vpop.f32.mrf.mxu1 }
 0x593   :  { %v5652_v27 = vld [vmem:[#allocation5 + $0xa] sm:$0xff]  ;;  %5243 = vmatmul.bf16.gmra.mxu2 %v5082_v31  ;;  %5332 = vmatmul.bf16.gmra.mxu3 %v5082_v31 }
 0x594   :  { %v5684_v17 = vmax.f32 %v5556_v14, %v5652_v27  ;;  %5590 = vst [vmem:[#allocation5 + $0x18] sm:$0xff] %v5558_v36  ;;  %v8081_v14 = vld [vmem:[#allocation15 + $0x64] sm:$0xf] }
 0x595   :  { %v7632_v36 = vor.u32 %v8081_v14, %v7629_v50  ;;  %v7555_v14 = vld [vmem:[#allocation15 + $0xd0] sm:$0xf] }
 0x596   :  { %v5720_v39 = vadd.f32 %v10061_v56, %v5684_v17  ;;  %v5204_v13 = vpop.f32.mrf.mxu2  ;;  %v5063_v17 = vld [vmem:[#allocation4 + $0xc0] sm:$0xff] }
 0x597   :  { %v5371_v8 = vadd.f32 %v5204_v13, %v9863_v10  ;;  %v5293_v43 = vpop.f32.mrf.mxu3  ;;  %6081 = vmatpush.bf16.msrb.mxu3 %v7632_v36  ;;  %v5083_v35 = vpack.c.bf16 %v5063_v17, %v5062_v42 }
 0x598   :  { %v5752_v44 = vmax.f32 %v5720_v39, 0.0  ;;  %v5372_v20 = vadd.f32 %v5293_v43, %v9922_v5  ;;  %v10080_v39 = vpop.f32.mrf.mxu0 }
 0x59a   :  { %5784 = vst [vmem:[#allocation6 + $0x8] sm:$0xff] %v5752_v44  ;;  %v5559_v1 = vmax.f32 %v5371_v8, %v5372_v20  ;;  %v10082_v8 = vpop.f32.mrf.mxu1 }
 0x59b   :  { %v5653_v31 = vld [vmem:[#allocation5 + $0x12] sm:$0xff] }
 0x59c   :  { %v5685_v34 = vmax.f32 %v5557_v47, %v5653_v31  ;;  %5591 = vst [vmem:[#allocation5 + $0x20] sm:$0xff] %v5559_v1 }
 0x59e   :  { %v5721_v41 = vadd.f32 %v10061_v56, %v5685_v34  ;;  %v5206_v10 = vpop.f32.mrf.mxu2 }
 0x59f   :  { %v5373_v18 = vadd.f32 %v5206_v10, %v9880_v19  ;;  %v5295_v27 = vpop.f32.mrf.mxu3 }
 0x5a0   :  { %v5753_v49 = vmax.f32 %v5721_v41, 0.0  ;;  %v5374_v5 = vadd.f32 %v5295_v27, %v9933_v59  ;;  %v8096_v59 = vld [vmem:[#allocation15 + $0xd4] sm:$0xf0]  ;;  %v10086_v36 = vpop.f32.mrf.mxu0 }
 0x5a1   :  { %v7556_v31 = vor.u32 %v8096_v59, %v7555_v14  ;;  %v8080_v14 = vld [vmem:[#allocation15 + $0x54] sm:$0xf0] }
 0x5a2   :  { %5785 = vst [vmem:[#allocation6 + $0x10] sm:$0xff] %v5753_v49  ;;  %v5560_v13 = vmax.f32 %v5373_v18, %v5374_v5  ;;  %v10088_v41 = vpop.f32.mrf.mxu1  ;;  %v5065_v18 = vld [vmem:[#allocation4 + $0xd0] sm:$0xff]  ;;  %v5064_v5 = vld [vmem:[#allocation4 + $0xc8] sm:$0xff] }
 0x5a3   :  { %5248 = vmatmul.bf16.gmra.mxu2 %v5083_v35  ;;  %5337 = vmatmul.bf16.gmra.mxu3 %v5083_v35  ;;  %v5084_v42 = vpack.c.bf16 %v5065_v18, %v5064_v5 }
 0x5a4   :  { %5592 = vst [vmem:[#allocation5 + $0x28] sm:$0xff] %v5560_v13  ;;  %5963 = vmatpush.bf16.msrb.mxu0 %v7556_v31 }
 0x5a6   :  { %v5209_v47 = vpop.f32.mrf.mxu2 }
 0x5a7   :  { %v5375_v43 = vadd.f32 %v5209_v47, %v9893_v62  ;;  %v5298_v44 = vpop.f32.mrf.mxu3  ;;  %v8095_v47 = vld [vmem:[#allocation15 + $0xd4] sm:$0xf] }
 0x5a8   :  { %v5376_v19 = vadd.f32 %v5298_v44, %v9943_v37  ;;  %v10097_v31 = vpop.f32.mrf.mxu0 }
 0x5aa   :  { %v5561_v20 = vmax.f32 %v5375_v43, %v5376_v19  ;;  %v7619_v19 = vld [vmem:[#allocation15 + $0x50] sm:$0xf] }
 0x5ab   :  { %v5655_v50 = vld [vmem:[#allocation5 + $0x22] sm:$0xff] }
 0x5ac   :  { %v5687_v34 = vmax.f32 %v5559_v1, %v5655_v50  ;;  %5593 = vst [vmem:[#allocation5 + $0x30] sm:$0xff] %v5561_v20  ;;  %v7557_v1 = vld [vmem:[#allocation15 + $0xd8] sm:$0xf0]  ;;  %v7620_v50 = vor.u32 %v8080_v14, %v7619_v19 }
 0x5ad   :  { %v7560_v44 = vor.u32 %v8095_v47, %v7557_v1  ;;  %v5067_v1 = vld [vmem:[#allocation4 + $0xe0] sm:$0xff] }
 0x5ae   :  { %v5723_v10 = vadd.f32 %v10061_v56, %v5687_v34  ;;  %v5211_v17 = vpop.f32.mrf.mxu2  ;;  %6069 = vmatpush.bf16.msrb.mxu2 %v7620_v50  ;;  %v5066_v50 = vld [vmem:[#allocation4 + $0xd8] sm:$0xff] }
 0x5af   :  { %v5377_v62 = vadd.f32 %v5211_v17, %v9907_v48  ;;  %v5300_v27 = vpop.f32.mrf.mxu3  ;;  %v4864_v48 = vadd.f32 %v10055_v55, %v9830_v46  ;;  %5976 = vmatpush.bf16.msra.mxu1 %v7560_v44  ;;  %v10100_v17 = vpop.f32.mrf.mxu1  ;;  %v7621_v46 = vld [vmem:[#allocation15 + $0x58] sm:$0xf0] }
 0x5b0   :  { %v5755_v37 = vmax.f32 %v5723_v10, 0.0  ;;  %v5378_v49 = vadd.f32 %v5300_v27, %v9953_v6  ;;  %v4865_v6 = vadd.f32 %v10057_v3, %v9832_v53  ;;  %v4866_v53 = vadd.f32 %v10063_v30, %v9845_v22  ;;  %v10107_v19 = vpop.f32.mrf.mxu0 }
 0x5b1   :  { %v4867_v3 = vadd.f32 %v10066_v58, %v9847_v45  ;;  %v4868_v45 = vadd.f32 %v10072_v54, %v9858_v21  ;;  %v4869_v30 = vadd.f32 %v10075_v16, %v9860_v23  ;;  %v4870_v21 = vadd.f32 %v10080_v39, %v9874_v51  ;;  %v7611_v39 = vld [vmem:[#allocation15 + $0x40] sm:$0xf] }
 0x5b2   :  { %5787 = vst [vmem:[#allocation6 + $0x20] sm:$0xff] %v5755_v37  ;;  %v5562_v35 = vmax.f32 %v5377_v62, %v5378_v49  ;;  %v8079_v49 = vld [vmem:[#allocation15 + $0x54] sm:$0xf]  ;;  %v4871_v23 = vadd.f32 %v10082_v8, %v9876_v33  ;;  %v8078_v33 = vld [vmem:[#allocation15 + $0x44] sm:$0xf0] }
 0x5b3   :  { %v5656_v43 = vld [vmem:[#allocation5 + $0x2a] sm:$0xff]  ;;  %5253 = vmatmul.bf16.gmra.mxu2 %v5084_v42  ;;  %5342 = vmatmul.bf16.gmra.mxu3 %v5084_v42  ;;  %v7624_v5 = vor.u32 %v8079_v49, %v7621_v46 }
 0x5b4   :  { %v5688_v59 = vmax.f32 %v5560_v13, %v5656_v43  ;;  %5594 = vst [vmem:[#allocation5 + $0x38] sm:$0xff] %v5562_v35 }
 0x5b5   :  { %6082 = vmatpush.bf16.msrb.mxu3 %v7624_v5 }
 0x5b6   :  { %v5724_v34 = vadd.f32 %v10061_v56, %v5688_v59  ;;  %v5214_v10 = vpop.f32.mrf.mxu2 }
 0x5b7   :  { %v5379_v18 = vadd.f32 %v5214_v10, %v4864_v48  ;;  %v5303_v62 = vpop.f32.mrf.mxu3  ;;  %v5085_v48 = vpack.c.bf16 %v5067_v1, %v5066_v50  ;;  %v5068_v1 = vld [vmem:[#allocation4 + $0xe8] sm:$0xff] }
 0x5b8   :  { %v5756_v13 = vmax.f32 %v5724_v34, 0.0  ;;  %v5380_v27 = vadd.f32 %v5303_v62, %v4865_v6 }
 0x5ba   :  { %5788 = vst [vmem:[#allocation6 + $0x28] sm:$0xff] %v5756_v13  ;;  %v5563_v37 = vmax.f32 %v5379_v18, %v5380_v27  ;;  %v10115_v18 = vpop.f32.mrf.mxu0  ;;  %v7547_v13 = vld [vmem:[#allocation15 + $0xc0] sm:$0xf]  ;;  %v8094_v27 = vld [vmem:[#allocation15 + $0xc4] sm:$0xf0] }
 0x5bb   :  { %v5657_v55 = vld [vmem:[#allocation5 + $0x32] sm:$0xff] }
 0x5bc   :  { %v5689_v42 = vmax.f32 %v5561_v20, %v5657_v55  ;;  %5595 = vst [vmem:[#allocation5 + $0x40] sm:$0xff] %v5563_v37  ;;  %v10109_v20 = vpop.f32.mrf.mxu1  ;;  %v7548_v55 = vor.u32 %v8094_v27, %v7547_v13 }
 0x5be   :  { %v5725_v35 = vadd.f32 %v10061_v56, %v5689_v42  ;;  %v5216_v47 = vpop.f32.mrf.mxu2  ;;  %5964 = vmatpush.bf16.msrb.mxu0 %v7548_v55  ;;  %v5069_v42 = vld [vmem:[#allocation4 + $0xf0] sm:$0xff]  ;;  %v8077_v55 = vld [vmem:[#allocation15 + $0x44] sm:$0xf] }
 0x5bf   :  { %v5381_v43 = vadd.f32 %v5216_v47, %v4866_v53  ;;  %v5305_v44 = vpop.f32.mrf.mxu3 }
 0x5c0   :  { %v5757_v14 = vmax.f32 %v5725_v35, 0.0  ;;  %v5382_v59 = vadd.f32 %v5305_v44, %v4867_v3  ;;  %v8093_v44 = vld [vmem:[#allocation15 + $0xc4] sm:$0xf] }
 0x5c2   :  { %5789 = vst [vmem:[#allocation6 + $0x30] sm:$0xff] %v5757_v14  ;;  %v5564_v22 = vmax.f32 %v5381_v43, %v5382_v59  ;;  %v5086_v43 = vpack.c.bf16 %v5069_v42, %v5068_v1  ;;  %v7549_v14 = vld [vmem:[#allocation15 + $0xc8] sm:$0xf0]  ;;  %v10124_v8 = vpop.f32.mrf.mxu0 }
 0x5c3   :  { %5258 = vmatmul.bf16.gmra.mxu2 %v5085_v48  ;;  %5347 = vmatmul.bf16.gmra.mxu3 %v5085_v48  ;;  %v7552_v51 = vor.u32 %v8093_v44, %v7549_v14  ;;  %v7612_v48 = vor.u32 %v8078_v33, %v7611_v39  ;;  %v10490_v14 = vld [vmem:[#allocation40_spill] sm:$0xff] }
 0x5c4   :  { %5596 = vst [vmem:[#allocation5 + $0x48] sm:$0xff] %v5564_v22  ;;  %v10117_v49 = vpop.f32.mrf.mxu1 }
 0x5c5   :  { %5977 = vmatpush.bf16.msra.mxu1 %v7552_v51  ;;  %6070 = vmatpush.bf16.msrb.mxu2 %v7612_v48 }
 0x5c6   :  { %v5219_v58 = vpop.f32.mrf.mxu2 }
 0x5c7   :  { %v5383_v6 = vadd.f32 %v5219_v58, %v4868_v45  ;;  %v5308_v34 = vpop.f32.mrf.mxu3  ;;  %v4872_v45 = vadd.f32 %v10086_v36, %v9888_v26  ;;  %v4873_v58 = vadd.f32 %v10088_v41, %v9890_v9  ;;  %v10489_v41 = vld [vmem:[#allocation70_spill] sm:$0xff] }
 0x5c8   :  { %v5384_v10 = vadd.f32 %v5308_v34, %v4869_v30 }
 0x5ca   :  { %v5565_v62 = vmax.f32 %v5383_v6, %v5384_v10  ;;  %v10135_v9 = vpop.f32.mrf.mxu0 }
 0x5cb   :  { %v5659_v46 = vld [vmem:[#allocation5 + $0x42] sm:$0xff] }
 0x5cc   :  { %v5691_v5 = vmax.f32 %v5563_v37, %v5659_v46  ;;  %5597 = vst [vmem:[#allocation5 + $0x50] sm:$0xff] %v5565_v62  ;;  %v10128_v30 = vpop.f32.mrf.mxu1 }
 0x5ce   :  { %v5727_v54 = vadd.f32 %v10061_v56, %v5691_v5  ;;  %v5221_v16 = vpop.f32.mrf.mxu2  ;;  %v7613_v5 = vld [vmem:[#allocation15 + $0x48] sm:$0xf0] }
 0x5cf   :  { %v5385_v53 = vadd.f32 %v5221_v16, %v4870_v21  ;;  %v5310_v3 = vpop.f32.mrf.mxu3  ;;  %v7616_v26 = vor.u32 %v8077_v55, %v7613_v5  ;;  %v4875_v16 = vadd.f32 %v10100_v17, %v10489_v41  ;;  %v4876_v17 = vadd.f32 %v10107_v19, %v10490_v14  ;;  %v10492_v55 = vld [vmem:[#allocation43_spill] sm:$0xff] }
 0x5d0   :  { %v5759_v35 = vmax.f32 %v5727_v54, 0.0  ;;  %v5386_v47 = vadd.f32 %v5310_v3, %v4871_v23  ;;  %v10488_v23 = vld [vmem:[#allocation37_spill] sm:$0xff]  ;;  %v5070_v3 = vld [vmem:[#allocation4 + $0xf8] sm:$0xff]  ;;  %v4878_v19 = vadd.f32 %v10115_v18, %v10492_v55  ;;  %v7603_v18 = vld [vmem:[#allocation15 + $0x30] sm:$0xf] }
 0x5d1   :  { %v4874_v54 = vadd.f32 %v10097_v31, %v10488_v23  ;;  %6083 = vmatpush.bf16.msrb.mxu3 %v7616_v26  ;;  %v10496_v55 = vld [vmem:[#allocation68_spill] sm:$0xff] }
 0x5d2   :  { %5791 = vst [vmem:[#allocation6 + $0x40] sm:$0xff] %v5759_v35  ;;  %v5566_v37 = vmax.f32 %v5385_v53, %v5386_v47  ;;  %v10146_v48 = vpop.f32.mrf.mxu0 }
 0x5d3   :  { %v5660_v59 = vld [vmem:[#allocation5 + $0x4a] sm:$0xff]  ;;  %5263 = vmatmul.bf16.gmra.mxu2 %v5086_v43  ;;  %5352 = vmatmul.bf16.gmra.mxu3 %v5086_v43 }
 0x5d4   :  { %v5692_v50 = vmax.f32 %v5564_v22, %v5660_v59  ;;  %5598 = vst [vmem:[#allocation5 + $0x58] sm:$0xff] %v5566_v37  ;;  %v10140_v35 = vpop.f32.mrf.mxu1  ;;  %v8197_v37 = vld [vmem:[#allocation3 + $0x100] sm:$0xff]  ;;  %v10491_v59 = vld [vmem:[#allocation69_spill] sm:$0xff] }
 0x5d5   :  { %v5087_v44 = vpack.c.bf16 %v8197_v37, %v5070_v3  ;;  %v4877_v51 = vadd.f32 %v10109_v20, %v10491_v59  ;;  %v10493_v20 = vld [vmem:[#allocation71_spill] sm:$0xff]  ;;  %v4880_v37 = vadd.f32 %v10124_v8, %v9936_v60  ;;  %v10495_v8 = vld [vmem:[#allocation72_spill] sm:$0xff] }
 0x5d6   :  { %v5728_v6 = vadd.f32 %v10061_v56, %v5692_v50  ;;  %v5224_v34 = vpop.f32.mrf.mxu2  ;;  %v4879_v5 = vadd.f32 %v10117_v49, %v10493_v20 }
 0x5d7   :  { %v5387_v10 = vadd.f32 %v5224_v34, %v4872_v45  ;;  %v5313_v13 = vpop.f32.mrf.mxu3  ;;  %v7539_v34 = vld [vmem:[#allocation15 + $0xb0] sm:$0xf] }
 0x5d8   :  { %v5760_v27 = vmax.f32 %v5728_v6, 0.0  ;;  %v5388_v46 = vadd.f32 %v5313_v13, %v4873_v58 }
 0x5da   :  { %5792 = vst [vmem:[#allocation6 + $0x48] sm:$0xff] %v5760_v27  ;;  %v5567_v22 = vmax.f32 %v5387_v10, %v5388_v46  ;;  %v8092_v10 = vld [vmem:[#allocation15 + $0xb4] sm:$0xf0] }
 0x5db   :  { %v5661_v21 = vld [vmem:[#allocation5 + $0x52] sm:$0xff]  ;;  %v7540_v27 = vor.u32 %v8092_v10, %v7539_v34  ;;  %v7605_v34 = vld [vmem:[#allocation15 + $0x38] sm:$0xf0] }
 0x5dc   :  { %v5693_v36 = vmax.f32 %v5565_v62, %v5661_v21  ;;  %5599 = vst [vmem:[#allocation5 + $0x60] sm:$0xff] %v5567_v22  ;;  %v10148_v58 = vpop.f32.mrf.mxu1 }
 0x5dd   :  { %5965 = vmatpush.bf16.msrb.mxu0 %v7540_v27 }
 0x5de   :  { %v5729_v42 = vadd.f32 %v10061_v56, %v5693_v36  ;;  %v5226_v53 = vpop.f32.mrf.mxu2 }
 0x5df   :  { %v5389_v47 = vadd.f32 %v5226_v53, %v4874_v54  ;;  %v5315_v1 = vpop.f32.mrf.mxu3  ;;  %v8091_v53 = vld [vmem:[#allocation15 + $0xb4] sm:$0xf] }
 0x5e0   :  { %v5761_v43 = vmax.f32 %v5729_v42, 0.0  ;;  %v5390_v62 = vadd.f32 %v5315_v1, %v4875_v16  ;;  %v4726_v16 = vpop.f32.mrf.mxu0 }
 0x5e2   :  { %5793 = vst [vmem:[#allocation6 + $0x50] sm:$0xff] %v5761_v43  ;;  %v5568_v31 = vmax.f32 %v5389_v47, %v5390_v62  ;;  %v8076_v43 = vld [vmem:[#allocation15 + $0x34] sm:$0xf0] }
 0x5e3   :  { %5268 = vmatmul.bf16.gmra.mxu2 %v5087_v44  ;;  %5357 = vmatmul.bf16.gmra.mxu3 %v5087_v44  ;;  %v7604_v49 = vor.u32 %v8076_v43, %v7603_v18  ;;  %v10494_v44 = vld [vmem:[#allocation41_spill] sm:$0xff] }
 0x5e4   :  { %5600 = vst [vmem:[#allocation5 + $0x68] sm:$0xff] %v5568_v31  ;;  %v4815_v3 = vpop.f32.mrf.mxu1  ;;  %v4881_v14 = vadd.f32 %v10128_v30, %v10494_v44  ;;  %v4882_v30 = vadd.f32 %v10135_v9, %v10495_v8  ;;  %v10498_v9 = vld [vmem:[#allocation44_spill] sm:$0xff] }
 0x5e5   :  { %6071 = vmatpush.bf16.msrb.mxu2 %v7604_v49  ;;  %v8090_v49 = vld [vmem:[#allocation15 + $0xa4] sm:$0xf0]  ;;  %v8089_v8 = vld [vmem:[#allocation15 + $0xa4] sm:$0xf] }
 0x5e6   :  { %v5229_v39 = vpop.f32.mrf.mxu2 }
 0x5e7   :  { %v5391_v33 = vadd.f32 %v5229_v39, %v4876_v17  ;;  %v5318_v50 = vpop.f32.mrf.mxu3 }
 0x5e8   :  { %v5392_v45 = vadd.f32 %v5318_v50, %v4877_v51  ;;  %v4729_v27 = vpop.f32.mrf.mxu0 }
 0x5ea   :  { %v5569_v6 = vmax.f32 %v5391_v33, %v5392_v45 }
 0x5eb   :  { %v5663_v13 = vld [vmem:[#allocation5 + $0x62] sm:$0xff] }
 0x5ec   :  { %v5695_v46 = vmax.f32 %v5567_v22, %v5663_v13  ;;  %5601 = vst [vmem:[#allocation5 + $0x70] sm:$0xff] %v5569_v6  ;;  %v7541_v22 = vld [vmem:[#allocation15 + $0xb8] sm:$0xf0] }
 0x5ed   :  { %v7544_v1 = vor.u32 %v8091_v53, %v7541_v22  ;;  %v4885_v53 = vadd.f32 %v10148_v58, %v10498_v9 }
 0x5ee   :  { %v5731_v21 = vadd.f32 %v10061_v56, %v5695_v46  ;;  %v5231_v26 = vpop.f32.mrf.mxu2  ;;  %v4818_v46 = vpop.f32.mrf.mxu1 }
 0x5ef   :  { %v5393_v36 = vadd.f32 %v5231_v26, %v4878_v19  ;;  %v5320_v23 = vpop.f32.mrf.mxu3  ;;  %5978 = vmatpush.bf16.msra.mxu1 %v7544_v1  ;;  %v4883_v19 = vadd.f32 %v10140_v35, %v10496_v55 }
 0x5f0   :  { %v5763_v54 = vmax.f32 %v5731_v21, 0.0  ;;  %v5394_v41 = vadd.f32 %v5320_v23, %v4879_v5 }
 0x5f2   :  { %5795 = vst [vmem:[#allocation6 + $0x60] sm:$0xff] %v5763_v54  ;;  %v5570_v42 = vmax.f32 %v5393_v36, %v5394_v41 }
 0x5f3   :  { %v5664_v47 = vld [vmem:[#allocation5 + $0x6a] sm:$0xff] }
 0x5f4   :  { %v5696_v62 = vmax.f32 %v5568_v31, %v5664_v47  ;;  %5602 = vst [vmem:[#allocation5 + $0x78] sm:$0xff] %v5570_v42  ;;  %v8075_v31 = vld [vmem:[#allocation15 + $0x34] sm:$0xf]  ;;  %v4731_v42 = vpop.f32.mrf.mxu0 }
 0x5f5   :  { %v7608_v13 = vor.u32 %v8075_v31, %v7605_v34 }
 0x5f6   :  { %v5732_v17 = vadd.f32 %v10061_v56, %v5696_v62  ;;  %v5234_v59 = vpop.f32.mrf.mxu2  ;;  %v4820_v47 = vpop.f32.mrf.mxu1  ;;  %v7531_v62 = vld [vmem:[#allocation15 + $0xa0] sm:$0xf] }
 0x5f7   :  { %v5395_v51 = vadd.f32 %v5234_v59, %v4880_v37  ;;  %v5323_v39 = vpop.f32.mrf.mxu3  ;;  %6084 = vmatpush.bf16.msrb.mxu3 %v7608_v13  ;;  %v7532_v44 = vor.u32 %v8090_v49, %v7531_v62 }
 0x5f8   :  { %v5764_v33 = vmax.f32 %v5732_v17, 0.0  ;;  %v5396_v50 = vadd.f32 %v5323_v39, %v4881_v14  ;;  %v10499_v17 = vld [vmem:[#allocation53_spill] sm:$0xff] }
 0x5f9   :  { %v4886_v59 = vadd.f32 %v4726_v16, %v10499_v17  ;;  %5966 = vmatpush.bf16.msrb.mxu0 %v7532_v44  ;;  %v8074_v16 = vld [vmem:[#allocation15 + $0x24] sm:$0xf0] }
 0x5fa   :  { %5796 = vst [vmem:[#allocation6 + $0x68] sm:$0xff] %v5764_v33  ;;  %v5571_v45 = vmax.f32 %v5395_v51, %v5396_v50 }
 0x5fb   :  { %v5665_v10 = vld [vmem:[#allocation5 + $0x72] sm:$0xff] }
 0x5fc   :  { %v5697_v60 = vmax.f32 %v5569_v6, %v5665_v10  ;;  %5603 = vst [vmem:[#allocation5 + $0x80] sm:$0xff] %v5571_v45  ;;  %v10497_v6 = vld [vmem:[#allocation45_spill] sm:$0xff]  ;;  %v4734_v31 = vpop.f32.mrf.mxu0 }
 0x5fd   :  { %v4884_v41 = vadd.f32 %v10146_v48, %v10497_v6  ;;  %v10500_v48 = vld [vmem:[#allocation48_spill] sm:$0xff] }
 0x5fe   :  { %v5733_v20 = vadd.f32 %v10061_v56, %v5697_v60  ;;  %v5236_v5 = vpop.f32.mrf.mxu2  ;;  %v4887_v51 = vadd.f32 %v4815_v3, %v10500_v48  ;;  %v4823_v13 = vpop.f32.mrf.mxu1 }
 0x5ff   :  { %v5397_v21 = vadd.f32 %v5236_v5, %v4882_v30  ;;  %v5325_v26 = vpop.f32.mrf.mxu3  ;;  %v7533_v30 = vld [vmem:[#allocation15 + $0xa8] sm:$0xf0]  ;;  %v4888_v5 = vadd.f32 %v4729_v27, %v9970_v2 }
 0x600   :  { %v5765_v36 = vmax.f32 %v5733_v20, 0.0  ;;  %v5398_v23 = vadd.f32 %v5325_v26, %v4883_v19  ;;  %v7536_v55 = vor.u32 %v8089_v8, %v7533_v30  ;;  %v7595_v19 = vld [vmem:[#allocation15 + $0x20] sm:$0xf]  ;;  %v10501_v27 = vld [vmem:[#allocation29_spill] sm:$0xff] }
 0x601   :  { %v7596_v3 = vor.u32 %v8074_v16, %v7595_v19  ;;  %v10502_v19 = vld [vmem:[#allocation59_spill] sm:$0xff] }
 0x602   :  { %5797 = vst [vmem:[#allocation6 + $0x70] sm:$0xff] %v5765_v36  ;;  %v5572_v54 = vmax.f32 %v5397_v21, %v5398_v23  ;;  %5979 = vmatpush.bf16.msra.mxu1 %v7536_v55  ;;  %v4889_v21 = vadd.f32 %v4818_v46, %v9972_v52  ;;  %v4890_v52 = vadd.f32 %v4731_v42, %v9977_v15 }
 0x603   :  { %6072 = vmatpush.bf16.msrb.mxu2 %v7596_v3  ;;  %v4891_v46 = vadd.f32 %v4820_v47, %v10501_v27 }
 0x604   :  { %5604 = vst [vmem:[#allocation5 + $0x88] sm:$0xff] %v5572_v54 }
 0x606   :  { %v5239_v22 = vpop.f32.mrf.mxu2 }
 0x607   :  { %v5399_v35 = vadd.f32 %v5239_v22, %v4884_v41  ;;  %v5328_v1 = vpop.f32.mrf.mxu3 }
 0x608   :  { %v5400_v18 = vadd.f32 %v5328_v1, %v4885_v53  ;;  %v4736_v53 = vpop.f32.mrf.mxu0  ;;  %v4825_v1 = vpop.f32.mrf.mxu1 }
 0x60a   :  { %v5573_v43 = vmax.f32 %v5399_v35, %v5400_v18  ;;  %v8073_v35 = vld [vmem:[#allocation15 + $0x24] sm:$0xf] }
 0x60b   :  { %v5667_v37 = vld [vmem:[#allocation5 + $0x82] sm:$0xff] }
 0x60c   :  { %v5699_v14 = vmax.f32 %v5571_v45, %v5667_v37  ;;  %5605 = vst [vmem:[#allocation5 + $0x90] sm:$0xff] %v5573_v43 }
 0x60e   :  { %v5735_v39 = vadd.f32 %v10061_v56, %v5699_v14  ;;  %v5241_v58 = vpop.f32.mrf.mxu2 }
 0x60f   :  { %v5401_v33 = vadd.f32 %v5241_v58, %v4886_v59  ;;  %v5330_v50 = vpop.f32.mrf.mxu3  ;;  %v4893_v58 = vadd.f32 %v4823_v13, %v9986_v12 }
 0x610   :  { %v5767_v34 = vmax.f32 %v5735_v39, 0.0  ;;  %v5402_v10 = vadd.f32 %v5330_v50, %v4887_v51  ;;  %v4739_v51 = vpop.f32.mrf.mxu0  ;;  %v4892_v39 = vadd.f32 %v4734_v31, %v9984_v61  ;;  %v4895_v61 = vadd.f32 %v4825_v1, %v10502_v19  ;;  %v7701_v19 = vld [vmem:[#allocation15 + $0x178] sm:$0xf0] }
 0x612   :  { %5799 = vst [vmem:[#allocation6 + $0x80] sm:$0xff] %v5767_v34  ;;  %v5574_v60 = vmax.f32 %v5401_v33, %v5402_v10  ;;  %v7523_v34 = vld [vmem:[#allocation15 + $0x90] sm:$0xf]  ;;  %v8088_v10 = vld [vmem:[#allocation15 + $0x94] sm:$0xf0] }
 0x613   :  { %v5668_v45 = vld [vmem:[#allocation5 + $0x8a] sm:$0xff]  ;;  %v7524_v8 = vor.u32 %v8088_v10, %v7523_v34  ;;  %v8085_v34 = vld [vmem:[#allocation15 + $0x84] sm:$0xf]  ;;  %v7517_v10 = vld [vmem:[#allocation15 + $0x88] sm:$0xf0] }
 0x614   :  { %v5700_v20 = vmax.f32 %v5572_v54, %v5668_v45  ;;  %5606 = vst [vmem:[#allocation5 + $0x98] sm:$0xff] %v5574_v60  ;;  %v7597_v54 = vld [vmem:[#allocation15 + $0x28] sm:$0xf0]  ;;  %v4894_v45 = vadd.f32 %v4736_v53, %v9991_v11  ;;  %v8072_v11 = vld [vmem:[#allocation15 + $0x14] sm:$0xf0] }
 0x615   :  { %v7600_v62 = vor.u32 %v8073_v35, %v7597_v54  ;;  %5967 = vmatpush.bf16.msrb.mxu0 %v7524_v8 }
 0x616   :  { %v5736_v26 = vadd.f32 %v10061_v56, %v5700_v20  ;;  %v5244_v36 = vpop.f32.mrf.mxu2 }
 0x617   :  { %v5403_v23 = vadd.f32 %v5244_v36, %v4888_v5  ;;  %v5333_v6 = vpop.f32.mrf.mxu3  ;;  %6085 = vmatpush.bf16.msrb.mxu3 %v7600_v62  ;;  %v7525_v36 = vld [vmem:[#allocation15 + $0x98] sm:$0xf0] }
 0x618   :  { %v5768_v41 = vmax.f32 %v5736_v26, 0.0  ;;  %v5404_v9 = vadd.f32 %v5333_v6, %v4889_v21  ;;  %v4741_v55 = vpop.f32.mrf.mxu0  ;;  %v8087_v26 = vld [vmem:[#allocation15 + $0x94] sm:$0xf] }
 0x619   :  { %v7528_v6 = vor.u32 %v8087_v26, %v7525_v36 }
 0x61a   :  { %5800 = vst [vmem:[#allocation6 + $0x88] sm:$0xff] %v5768_v41  ;;  %v5575_v22 = vmax.f32 %v5403_v23, %v5404_v9  ;;  %v7587_v41 = vld [vmem:[#allocation15 + $0x10] sm:$0xf] }
 0x61b   :  { %v5669_v18 = vld [vmem:[#allocation5 + $0x92] sm:$0xff]  ;;  %v7588_v53 = vor.u32 %v8072_v11, %v7587_v41  ;;  %5980 = vmatpush.bf16.msra.mxu1 %v7528_v6  ;;  %v7683_v41 = vld [vmem:[#allocation15 + $0x150] sm:$0xf]  ;;  %v8112_v11 = vld [vmem:[#allocation15 + $0x154] sm:$0xf0] }
 0x61c   :  { %v5701_v2 = vmax.f32 %v5573_v43, %v5669_v18  ;;  %5607 = vst [vmem:[#allocation5 + $0xa0] sm:$0xff] %v5575_v22  ;;  %v4828_v43 = vpop.f32.mrf.mxu1 }
 0x61d   :  { %v4897_v35 = vadd.f32 %v4828_v43, %v10000_v29  ;;  %6073 = vmatpush.bf16.msrb.mxu2 %v7588_v53  ;;  %v4898_v29 = vadd.f32 %v4741_v55, %v10005_v25  ;;  %v7520_v25 = vor.u32 %v8085_v34, %v7517_v10  ;;  %v7667_v34 = vld [vmem:[#allocation15 + $0x130] sm:$0xf]  ;;  %v8108_v10 = vld [vmem:[#allocation15 + $0x134] sm:$0xf0] }
 0x61e   :  { %v5737_v49 = vadd.f32 %v10061_v56, %v5701_v2  ;;  %v5246_v37 = vpop.f32.mrf.mxu2 }
 0x61f   :  { %v5405_v44 = vadd.f32 %v5246_v37, %v4890_v52  ;;  %v5335_v14 = vpop.f32.mrf.mxu3  ;;  %v8071_v37 = vld [vmem:[#allocation15 + $0x14] sm:$0xf]  ;;  %5981 = vmatpush.bf16.msra.mxu1 %v7520_v25  ;;  %v7668_v25 = vor.u32 %v8108_v10, %v7667_v34  ;;  %v8101_v34 = vld [vmem:[#allocation15 + $0x104] sm:$0xf] }
 0x620   :  { %v5769_v17 = vmax.f32 %v5737_v49, 0.0  ;;  %v5406_v59 = vadd.f32 %v5335_v14, %v4891_v46  ;;  %v4744_v2 = vpop.f32.mrf.mxu0 }
 0x622   :  { %5801 = vst [vmem:[#allocation6 + $0x90] sm:$0xff] %v5769_v17  ;;  %v5576_v48 = vmax.f32 %v5405_v44, %v5406_v59  ;;  %v7589_v44 = vld [vmem:[#allocation15 + $0x18] sm:$0xf0] }
 0x624   :  { %5608 = vst [vmem:[#allocation5 + $0xa8] sm:$0xff] %v5576_v48  ;;  %v4830_v13 = vpop.f32.mrf.mxu1 }
 0x625   :  { %v4899_v59 = vadd.f32 %v4830_v13, %v10007_v4  ;;  %v8115_v4 = vld [vmem:[#allocation15 + $0x174] sm:$0xf]  ;;  %v8114_v13 = vld [vmem:[#allocation15 + $0x164] sm:$0xf0] }
 0x626   :  { %v5249_v15 = vpop.f32.mrf.mxu2 }
 0x627   :  { %v5407_v42 = vadd.f32 %v5249_v15, %v4892_v39  ;;  %v5338_v33 = vpop.f32.mrf.mxu3 }
 0x628   :  { %v5408_v47 = vadd.f32 %v5338_v33, %v4893_v58  ;;  %v8086_v33 = vld [vmem:[#allocation15 + $0x84] sm:$0xf0] }
 0x62a   :  { %v5577_v50 = vmax.f32 %v5407_v42, %v5408_v47  ;;  %v7515_v42 = vld [vmem:[#allocation15 + $0x80] sm:$0xf] }
 0x62b   :  { %v5671_v60 = vld [vmem:[#allocation5 + $0xa2] sm:$0xff]  ;;  %v7516_v47 = vor.u32 %v8086_v33, %v7515_v42 }
 0x62c   :  { %v5703_v30 = vmax.f32 %v5575_v22, %v5671_v60  ;;  %5609 = vst [vmem:[#allocation5 + $0xb0] sm:$0xff] %v5577_v50  ;;  %v4896_v22 = vadd.f32 %v4739_v51, %v9998_v24  ;;  %v4833_v46 = vpop.f32.mrf.mxu1  ;;  %v7592_v24 = vor.u32 %v8071_v37, %v7589_v44  ;;  %v4746_v60 = vpop.f32.mrf.mxu0  ;;  %v8131_v33 = vld [vmem:[#allocation15 + $0x1f4] sm:$0xf] }
 0x62d   :  { %5968 = vmatpush.bf16.msrb.mxu0 %v7516_v47  ;;  %v7765_v47 = vld [vmem:[#allocation15 + $0x1f8] sm:$0xf0] }
 0x62e   :  { %v5739_v31 = vadd.f32 %v10061_v56, %v5703_v30  ;;  %v5251_v12 = vpop.f32.mrf.mxu2  ;;  %6086 = vmatpush.bf16.msrb.mxu3 %v7592_v24  ;;  %v8116_v30 = vld [vmem:[#allocation15 + $0x174] sm:$0xf0]  ;;  %v7581_v24 = vld [vmem:[#allocation15 + $0x8] sm:$0xf0] }
 0x62f   :  { %v5409_v16 = vadd.f32 %v5251_v12, %v4894_v45  ;;  %v5340_v20 = vpop.f32.mrf.mxu3  ;;  %v7691_v12 = vld [vmem:[#allocation15 + $0x160] sm:$0xf] }
 0x630   :  { %v5771_v3 = vmax.f32 %v5739_v31, 0.0  ;;  %v5410_v5 = vadd.f32 %v5340_v20, %v4895_v61  ;;  %v7704_v61 = vor.u32 %v8115_v4, %v7701_v19  ;;  %v4900_v31 = vadd.f32 %v4744_v2, %v10012_v0  ;;  %v7579_v2 = vld [vmem:[#allocation15] sm:$0xf]  ;;  %v7669_v4 = vld [vmem:[#allocation15 + $0x138] sm:$0xf0] }
 0x631   :  { %v4901_v20 = vadd.f32 %v4833_v46, %v10014_v63  ;;  %v7684_v0 = vor.u32 %v8112_v11, %v7683_v41  ;;  %v7755_v19 = vld [vmem:[#allocation15 + $0x1e0] sm:$0xf] }
 0x632   :  { %5803 = vst [vmem:[#allocation6 + $0xa0] sm:$0xff] %v5771_v3  ;;  %v5578_v21 = vmax.f32 %v5409_v16, %v5410_v5  ;;  %v8113_v16 = vld [vmem:[#allocation15 + $0x164] sm:$0xf]  ;;  %6220 = vmatpush.bf16.msrb.mxu1 %v7704_v61  ;;  %v7692_v5 = vor.u32 %v8114_v13, %v7691_v12  ;;  %v8130_v61 = vld [vmem:[#allocation15 + $0x1e4] sm:$0xf0] }
 0x633   :  { %v5672_v23 = vld [vmem:[#allocation5 + $0xaa] sm:$0xff]  ;;  %v7756_v12 = vor.u32 %v8130_v61, %v7755_v19  ;;  %v8129_v13 = vld [vmem:[#allocation15 + $0x1e4] sm:$0xf] }
 0x634   :  { %v5704_v9 = vmax.f32 %v5576_v48, %v5672_v23  ;;  %5610 = vst [vmem:[#allocation5 + $0xb8] sm:$0xff] %v5578_v21  ;;  %v4835_v45 = vpop.f32.mrf.mxu1  ;;  %v7693_v21 = vld [vmem:[#allocation15 + $0x168] sm:$0xf0]  ;;  %v4749_v63 = vpop.f32.mrf.mxu0  ;;  %v7733_v19 = vld [vmem:[#allocation15 + $0x1b8] sm:$0xf0] }
 0x635   :  { %v7696_v23 = vor.u32 %v8113_v16, %v7693_v21  ;;  %v4903_v46 = vadd.f32 %v4835_v45, %v10021_v32  ;;  %v8132_v32 = vld [vmem:[#allocation15 + $0x1f4] sm:$0xf0]  ;;  %v7757_v16 = vld [vmem:[#allocation15 + $0x1e8] sm:$0xf0]  ;;  %v8106_v21 = vld [vmem:[#allocation15 + $0x124] sm:$0xf0] }
 0x636   :  { %v5740_v54 = vadd.f32 %v10061_v56, %v5704_v9  ;;  %v5254_v1 = vpop.f32.mrf.mxu2  ;;  %v8111_v9 = vld [vmem:[#allocation15 + $0x154] sm:$0xf] }
 0x637   :  { %v5411_v18 = vadd.f32 %v5254_v1, %v4896_v22  ;;  %v5343_v62 = vpop.f32.mrf.mxu3  ;;  %6221 = vmatpush.bf16.msrb.mxu1 %v7696_v23  ;;  %v7685_v22 = vld [vmem:[#allocation15 + $0x158] sm:$0xf0] }
 0x638   :  { %v5772_v52 = vmax.f32 %v5740_v54, 0.0  ;;  %v5412_v27 = vadd.f32 %v5343_v62, %v4897_v35  ;;  %v7688_v54 = vor.u32 %v8111_v9, %v7685_v22  ;;  %v7661_v9 = vld [vmem:[#allocation15 + $0x128] sm:$0xf0]  ;;  %v8128_v22 = vld [vmem:[#allocation15 + $0x1d4] sm:$0xf0] }
 0x63a   :  { %5804 = vst [vmem:[#allocation6 + $0xa8] sm:$0xff] %v5772_v52  ;;  %v10186_v49 = vmax.f32 %v5411_v18, %v5412_v27  ;;  %v4902_v18 = vadd.f32 %v4746_v60, %v10019_v7  ;;  %v8070_v52 = vld [vmem:[#allocation15 + $0x4] sm:$0xf0]  ;;  %v8069_v27 = vld [vmem:[#allocation15 + $0x4] sm:$0xf]  ;;  %v7768_v60 = vor.u32 %v8131_v33, %v7765_v47 }
 0x63b   :  { %v5673_v14 = vld [vmem:[#allocation5 + $0xb2] sm:$0xff]  ;;  %6222 = vmatpush.bf16.msrb.mxu1 %v7688_v54 }
 0x63c   :  { %v5705_v17 = vmax.f32 %v5577_v50, %v5673_v14  ;;  %5611 = vst [vmem:[#allocation5 + $0xc0] sm:$0xff] %v10186_v49  ;;  %v7699_v50 = vld [vmem:[#allocation15 + $0x170] sm:$0xf]  ;;  %v4838_v62 = vpop.f32.mrf.mxu1  ;;  %v7580_v14 = vor.u32 %v8070_v52, %v7579_v2  ;;  %v8109_v7 = vld [vmem:[#allocation15 + $0x144] sm:$0xf] }
 0x63d   :  { %v7700_v55 = vor.u32 %v8116_v30, %v7699_v50  ;;  %v8107_v30 = vld [vmem:[#allocation15 + $0x134] sm:$0xf]  ;;  %v4905_v23 = vadd.f32 %v4838_v62, %v10028_v28  ;;  %v7749_v2 = vld [vmem:[#allocation15 + $0x1d8] sm:$0xf0]  ;;  %v7643_v47 = vld [vmem:[#allocation15 + $0x100] sm:$0xf] }
 0x63e   :  { %v5741_v48 = vadd.f32 %v10061_v56, %v5705_v17  ;;  %v5256_v51 = vpop.f32.mrf.mxu2  ;;  %v7675_v17 = vld [vmem:[#allocation15 + $0x140] sm:$0xf]  ;;  %6074 = vmatpush.bf16.msrb.mxu2 %v7580_v14 }
 0x63f   :  { %v5413_v39 = vadd.f32 %v5256_v51, %v4898_v29  ;;  %v5345_v43 = vpop.f32.mrf.mxu3  ;;  %6207 = vmatpush.bf16.msra.mxu0 %v7700_v55  ;;  %v8110_v29 = vld [vmem:[#allocation15 + $0x144] sm:$0xf0]  ;;  %v7672_v55 = vor.u32 %v8107_v30, %v7669_v4  ;;  %v7731_v30 = vld [vmem:[#allocation15 + $0x1b0] sm:$0xf] }
 0x640   :  { %v5773_v58 = vmax.f32 %v5741_v48, 0.0  ;;  %v5414_v15 = vadd.f32 %v5345_v43, %v4899_v59  ;;  %v7584_v48 = vor.u32 %v8069_v27, %v7581_v24  ;;  %v7676_v51 = vor.u32 %v8110_v29, %v7675_v17  ;;  %v7763_v43 = vld [vmem:[#allocation15 + $0x1f0] sm:$0xf]  ;;  %v7653_v24 = vld [vmem:[#allocation15 + $0x118] sm:$0xf0] }
 0x641   :  { %v7651_v27 = vld [vmem:[#allocation15 + $0x110] sm:$0xf]  ;;  %v7739_v17 = vld [vmem:[#allocation15 + $0x1c0] sm:$0xf] }
 0x642   :  { %5805 = vst [vmem:[#allocation6 + $0xb0] sm:$0xff] %v5773_v58  ;;  %v10192_v8 = vmax.f32 %v5413_v39, %v5414_v15  ;;  %v7677_v39 = vld [vmem:[#allocation15 + $0x148] sm:$0xf0]  ;;  %6087 = vmatpush.bf16.msrb.mxu3 %v7584_v48  ;;  %v8125_v48 = vld [vmem:[#allocation15 + $0x1c4] sm:$0xf] }
 0x643   :  { %6208 = vmatpush.bf16.msra.mxu0 %v7692_v5  ;;  %v7680_v42 = vor.u32 %v8109_v7, %v7677_v39  ;;  %v7659_v5 = vld [vmem:[#allocation15 + $0x120] sm:$0xf]  ;;  %v7741_v39 = vld [vmem:[#allocation15 + $0x1c8] sm:$0xf0] }
 0x644   :  { %5612 = vst [vmem:[#allocation5 + $0xc8] sm:$0xff] %v10192_v8  ;;  %v7660_v11 = vor.u32 %v8106_v21, %v7659_v5  ;;  %v8121_v21 = vld [vmem:[#allocation15 + $0x1a4] sm:$0xf] }
 0x645   :  { %6223 = vmatpush.bf16.msrb.mxu1 %v7680_v42 }
 0x646   :  { %v5259_v3 = vpop.f32.mrf.mxu2  ;;  %6362 = vmatpush.bf16.msra.mxu3 %v7768_v60 }
 0x647   :  { %v5415_v26 = vadd.f32 %v5259_v3, %v4900_v31  ;;  %v5348_v36 = vpop.f32.mrf.mxu3  ;;  %6209 = vmatpush.bf16.msra.mxu0 %v7684_v0  ;;  %v7760_v3 = vor.u32 %v8129_v13, %v7757_v16  ;;  %v7747_v0 = vld [vmem:[#allocation15 + $0x1d0] sm:$0xf]  ;;  %v7723_v13 = vld [vmem:[#allocation15 + $0x1a0] sm:$0xf]  ;;  %v8122_v16 = vld [vmem:[#allocation15 + $0x1a4] sm:$0xf0] }
 0x648   :  { %v5416_v6 = vadd.f32 %v5348_v36, %v4901_v20  ;;  %v4904_v20 = vadd.f32 %v4749_v63, %v10026_v40  ;;  %v4751_v36 = vpop.f32.mrf.mxu0  ;;  %v7724_v5 = vor.u32 %v8122_v16, %v7723_v13 }
 0x649   :  { %6224 = vmatpush.bf16.msrb.mxu1 %v7672_v55  ;;  %v8123_v55 = vld [vmem:[#allocation15 + $0x1b4] sm:$0xf] }
 0x64a   :  { %v10197_v53 = vmax.f32 %v5415_v26, %v5416_v6  ;;  %v8105_v26 = vld [vmem:[#allocation15 + $0x124] sm:$0xf]  ;;  %v10207_v6 = vld [vmem:[#allocation13] ss:$0 sm:$0xff]  ;;  %6363 = vmatpush.bf16.msra.mxu3 %v7760_v3 }
 0x64b   :  { %v5675_v35 = vld [vmem:[#allocation5 + $0xc2] sm:$0xff]  ;;  %6210 = vmatpush.bf16.msra.mxu0 %v7676_v51  ;;  %v7664_v63 = vor.u32 %v8105_v26, %v7661_v9  ;;  %v7725_v26 = vld [vmem:[#allocation15 + $0x1a8] sm:$0xf0] }
 0x64c   :  { %v5707_v1 = vmax.f32 %v10186_v49, %v5675_v35  ;;  %5613 = vst [vmem:[#allocation5 + $0xd0] sm:$0xff] %v10197_v53  ;;  %v4840_v35 = vpop.f32.mrf.mxu1 }
 0x64d   :  { %6225 = vmatpush.bf16.msrb.mxu1 %v7664_v63  ;;  %v7717_v63 = vld [vmem:[#allocation15 + $0x198] sm:$0xf0] }
 0x64e   :  { %v5743_v37 = vadd.f32 %v10061_v56, %v5707_v1  ;;  %v5261_v44 = vpop.f32.mrf.mxu2  ;;  %v7764_v56 = vor.u32 %v8132_v32, %v7763_v43  ;;  %v7748_v1 = vor.u32 %v8128_v22, %v7747_v0  ;;  %v4906_v43 = vadd.f32 %v4751_v36, %v10033_v38  ;;  %v7645_v38 = vld [vmem:[#allocation15 + $0x108] sm:$0xf0]  ;;  %v10504_v36 = vld [vmem:[#allocation64_spill] sm:$0xff]  ;;  %v7715_v0 = vld [vmem:[#allocation15 + $0x190] sm:$0xf] }
 0x64f   :  { %v5417_v49 = vadd.f32 %v5261_v44, %v4902_v18  ;;  %v5350_v59 = vpop.f32.mrf.mxu3  ;;  %6211 = vmatpush.bf16.msra.mxu0 %v7668_v25  ;;  %v8127_v18 = vld [vmem:[#allocation15 + $0x1d4] sm:$0xf]  ;;  %v8120_v22 = vld [vmem:[#allocation15 + $0x194] sm:$0xf0] }
 0x650   :  { %v5775_v58 = vmax.f32 %v5743_v37, 0.0  ;;  %v5418_v15 = vadd.f32 %v5350_v59, %v4903_v46  ;;  %6349 = vmatpush.bf16.msra.mxu2 %v7764_v56  ;;  %v7752_v62 = vor.u32 %v8127_v18, %v7749_v2  ;;  %v8104_v46 = vld [vmem:[#allocation15 + $0x114] sm:$0xf0]  ;;  %v8103_v37 = vld [vmem:[#allocation15 + $0x114] sm:$0xf]  ;;  %v4754_v10 = vpop.f32.mrf.mxu0 }
 0x651   :  { %v7652_v14 = vor.u32 %v8104_v46, %v7651_v27  ;;  %v8126_v59 = vld [vmem:[#allocation15 + $0x1c4] sm:$0xf0]  ;;  %v5816_v18 = vld [vmem:[#allocation6] ss:$32 sm:$0x2] }
 0x652   :  { %5807 = vst [vmem:[#allocation6 + $0xc0] sm:$0xff] %v5775_v58  ;;  %v5582_v50 = vmax.f32 %v5417_v49, %v5418_v15  ;;  %v7656_v49 = vor.u32 %v8103_v37, %v7653_v24  ;;  %6364 = vmatpush.bf16.msra.mxu3 %v7752_v62  ;;  %v7740_v7 = vor.u32 %v8126_v59, %v7739_v17  ;;  %v7707_v62 = vld [vmem:[#allocation15 + $0x180] sm:$0xf]  ;;  %v8118_v27 = vld [vmem:[#allocation15 + $0x184] sm:$0xf0] }
 0x653   :  { %v5676_v45 = vld [vmem:[#allocation5 + $0xca] sm:$0xff]  ;;  %6212 = vmatpush.bf16.msra.mxu0 %v7660_v11  ;;  %v7744_v58 = vor.u32 %v8125_v48, %v7741_v39  ;;  %v4907_v15 = vadd.f32 %v4840_v35, %v10035_v57  ;;  %v8119_v35 = vld [vmem:[#allocation15 + $0x194] sm:$0xf]  ;;  %v8117_v24 = vld [vmem:[#allocation15 + $0x184] sm:$0xf]  ;;  %v7708_v59 = vor.u32 %v8118_v27, %v7707_v62 }
 0x654   :  { %v5708_v31 = vmax.f32 %v10192_v8, %v5676_v45  ;;  %5614 = vst [vmem:[#allocation5 + $0xd8] sm:$0xff] %v5582_v50  ;;  %6350 = vmatpush.bf16.msra.mxu2 %v7756_v12  ;;  %6226 = vmatpush.bf16.msrb.mxu1 %v7656_v49  ;;  %v4843_v4 = vpop.f32.mrf.mxu1  ;;  %v7648_v45 = vor.u32 %v8101_v34, %v7645_v38  ;;  %v8124_v57 = vld [vmem:[#allocation15 + $0x1b4] sm:$0xf0]  ;;  %v7709_v17 = vld [vmem:[#allocation15 + $0x188] sm:$0xf0] }
 0x655   :  { %v7736_v12 = vor.u32 %v8123_v55, %v7733_v19  ;;  %v7720_v2 = vor.u32 %v8119_v35, %v7717_v63  ;;  %v5815_v49 = vld [vmem:[#allocation6] ss:$32 sm:$0x1]  ;;  %v7712_v48 = vor.u32 %v8117_v24, %v7709_v17  ;;  %v5851_v39 = vld [vmem:[#allocation6 + $0x4] ss:$32 sm:$0x4] }
 0x656   :  { %v5744_v41 = vadd.f32 %v10207_v6, %v5708_v31  ;;  %v5264_v8 = vpop.f32.mrf.mxu2  ;;  %6365 = vmatpush.bf16.msra.mxu3 %v7744_v58  ;;  %v7732_v31 = vor.u32 %v8124_v57, %v7731_v30  ;;  %v10506_v58 = vld [vmem:[#allocation47_spill] sm:$0xff]  ;;  %v5820_v34 = vld [vmem:[#allocation6] ss:$32 sm:$0x8] }
 0x657   :  { %v5419_v40 = vadd.f32 %v5264_v8, %v4904_v20  ;;  %v5353_v54 = vpop.f32.mrf.mxu3  ;;  %6213 = vmatpush.bf16.msra.mxu0 %v7652_v14  ;;  %v10503_v20 = vld [vmem:[#allocation46_spill] sm:$0xff]  ;;  %v7728_v8 = vor.u32 %v8121_v21, %v7725_v26  ;;  %v5848_v14 = vld [vmem:[#allocation6 + $0x4] ss:$32 sm:$0x1] }
 0x658   :  { %v5776_v52 = vmax.f32 %v5744_v41, 0.0  ;;  %v5420_v28 = vadd.f32 %v5353_v54, %v4905_v23  ;;  %6351 = vmatpush.bf16.msra.mxu2 %v7748_v1  ;;  %6227 = vmatpush.bf16.msrb.mxu1 %v7648_v45  ;;  %v4908_v3 = vadd.f32 %v4754_v10, %v10503_v20  ;;  %v4909_v23 = vadd.f32 %v4843_v4, %v10504_v36  ;;  %v5849_v1 = vld [vmem:[#allocation6 + $0x4] ss:$32 sm:$0x2] }
 0x659   :  { %v7716_v54 = vor.u32 %v8120_v22, %v7715_v0  ;;  %v5855_v38 = vld [vmem:[#allocation6 + $0x4] ss:$32 sm:$0x10]  ;;  %v5822_v30 = vld [vmem:[#allocation6] ss:$32 sm:$0x10] }
 0x65a   :  { %5808 = vst [vmem:[#allocation6 + $0xc8] sm:$0xff] %v5776_v52  ;;  %v10210_v44 = vmax.f32 %v5419_v40, %v5420_v28  ;;  %6366 = vmatpush.bf16.msra.mxu3 %v7736_v12  ;;  %v4756_v52 = vpop.f32.mrf.mxu0  ;;  %v5857_v57 = vld [vmem:[#allocation6 + $0x4] ss:$32 sm:$0x20]  ;;  %v8147_v0 = vld [vmem:[#allocation15 + $0x274] sm:$0xf] }
 0x65b   :  { %v5677_v29 = vld [vmem:[#allocation5 + $0xd2] sm:$0xff]  ;;  %v5859_v20 = vld [vmem:[#allocation6 + $0x4] ss:$32 sm:$0x40]  ;;  %v7829_v22 = vld [vmem:[#allocation15 + $0x278] sm:$0xf0] }
 0x65c   :  { %v5709_v51 = vmax.f32 %v10197_v53, %v5677_v29  ;;  %5615 = vst [vmem:[#allocation5 + $0xe0] sm:$0xff] %v10210_v44  ;;  %6352 = vmatpush.bf16.msra.mxu2 %v7740_v7  ;;  %v8102_v53 = vld [vmem:[#allocation15 + $0x104] sm:$0xf0]  ;;  %v4845_v46 = vpop.f32.mrf.mxu1  ;;  %v6095_v36 = vld [vmem:[#allocation6 + $0x8] ss:$32 sm:$0x2]  ;;  %v7832_v27 = vor.u32 %v8147_v0, %v7829_v22 }
 0x65d   :  { %v7644_v25 = vor.u32 %v8102_v53, %v7643_v47  ;;  %v5853_v53 = vld [vmem:[#allocation6 + $0x4] ss:$32 sm:$0x8]  ;;  %v6094_v35 = vld [vmem:[#allocation6 + $0x8] ss:$32 sm:$0x1] }
 0x65e   :  { %v5745_v42 = vadd.f32 %v10207_v6, %v5709_v51  ;;  %v5266_v32 = vpop.f32.mrf.mxu2  ;;  %6367 = vmatpush.bf16.msra.mxu3 %v7728_v8  ;;  %v10505_v51 = vld [vmem:[#allocation56_spill] sm:$0xff]  ;;  %v7797_v0 = vld [vmem:[#allocation15 + $0x238] sm:$0xf0] }
 0x65f   :  { %v5421_v33 = vadd.f32 %v5266_v32, %v4906_v43  ;;  %v5355_v56 = vpop.f32.mrf.mxu3  ;;  %6214 = vmatpush.bf16.msra.mxu0 %v7644_v25  ;;  %v4910_v7 = vadd.f32 %v4756_v52, %v10505_v51  ;;  %v5818_v43 = vld [vmem:[#allocation6] ss:$32 sm:$0x4]  ;;  %v7821_v51 = vld [vmem:[#allocation15 + $0x268] sm:$0xf0] }
 0x660   :  { %v5777_v50 = vmax.f32 %v5745_v42, 0.0  ;;  %v5422_v60 = vadd.f32 %v5355_v56, %v4907_v15  ;;  %6353 = vmatpush.bf16.msra.mxu2 %v7732_v31  ;;  %v4911_v15 = vadd.f32 %v4845_v46, %v10506_v58  ;;  %v5817_v56 = vor.u32 %v5816_v18, %v5815_v49  ;;  %v5824_v31 = vld [vmem:[#allocation6] ss:$32 sm:$0x20] }
 0x661   :  { %v6097_v18 = vld [vmem:[#allocation6 + $0x8] ss:$32 sm:$0x4]  ;;  %v6096_v46 = vor.u32 %v6095_v36, %v6094_v35  ;;  %v6379_v22 = vld [vmem:[#allocation6 + $0x10] ss:$32 sm:$0x2] }
 0x662   :  { %5809 = vst [vmem:[#allocation6 + $0xd0] sm:$0xff] %v5777_v50  ;;  %v10217_v61 = vmax.f32 %v5421_v33, %v5422_v60  ;;  %6368 = vmatpush.bf16.msra.mxu3 %v7720_v2  ;;  %v5850_v33 = vor.u32 %v5849_v1, %v5848_v14  ;;  %v5819_v25 = vor.u32 %v5818_v43, %v5817_v56  ;;  %v6236_v2 = vld [vmem:[#allocation6 + $0xc] ss:$32 sm:$0x1] }
 0x663   :  { %v6099_v49 = vld [vmem:[#allocation6 + $0x8] ss:$32 sm:$0x8]  ;;  %v6378_v35 = vld [vmem:[#allocation6 + $0x10] ss:$32 sm:$0x1] }
 0x664   :  { %5616 = vst [vmem:[#allocation5 + $0xe8] sm:$0xff] %v10217_v61  ;;  %6354 = vmatpush.bf16.msra.mxu2 %v7724_v5  ;;  %v5852_v60 = vor.u32 %v5851_v39, %v5850_v33  ;;  %v5821_v55 = vor.u32 %v5820_v34, %v5819_v25  ;;  %v6101_v58 = vld [vmem:[#allocation6 + $0x8] ss:$32 sm:$0x10]  ;;  %v8144_v34 = vld [vmem:[#allocation15 + $0x254] sm:$0xf0] }
 0x665   :  { %v6243_v33 = vld [vmem:[#allocation6 + $0xc] ss:$32 sm:$0x10] }
 0x666   :  { %v5269_v41 = vpop.f32.mrf.mxu2  ;;  %6369 = vmatpush.bf16.msra.mxu3 %v7712_v48  ;;  %v5854_v45 = vor.u32 %v5853_v53, %v5852_v60  ;;  %v5823_v16 = vor.u32 %v5822_v30, %v5821_v55  ;;  %v8145_v48 = vld [vmem:[#allocation15 + $0x264] sm:$0xf]  ;;  %v7811_v53 = vld [vmem:[#allocation15 + $0x250] sm:$0xf]  ;;  %v8142_v30 = vld [vmem:[#allocation15 + $0x244] sm:$0xf0] }
 0x667   :  { %v5423_v11 = vadd.f32 %v5269_v41, %v4908_v3  ;;  %v5358_v9 = vpop.f32.mrf.mxu3  ;;  %v5826_v3 = vld [vmem:[#allocation6] ss:$32 sm:$0x40]  ;;  %v8148_v41 = vld [vmem:[#allocation15 + $0x274] sm:$0xf0] }
 0x668   :  { %v5424_v40 = vadd.f32 %v5358_v9, %v4909_v23  ;;  %6355 = vmatpush.bf16.msra.mxu2 %v7716_v54  ;;  %v5856_v13 = vor.u32 %v5855_v38, %v5854_v45  ;;  %v5825_v26 = vor.u32 %v5824_v31, %v5823_v16  ;;  %v7827_v23 = vld [vmem:[#allocation15 + $0x270] sm:$0xf]  ;;  %v6245_v25 = vld [vmem:[#allocation6 + $0xc] ss:$32 sm:$0x20] }
 0x669   :  { %v7828_v62 = vor.u32 %v8148_v41, %v7827_v23  ;;  %v7803_v38 = vld [vmem:[#allocation15 + $0x240] sm:$0xf]  ;;  %v7795_v41 = vld [vmem:[#allocation15 + $0x230] sm:$0xf] }
 0x66a   :  { %v10222_v28 = vmax.f32 %v5423_v11, %v5424_v40  ;;  %v5858_v21 = vor.u32 %v5857_v57, %v5856_v13  ;;  %v5827_v9 = vor.u32 %v5826_v3, %v5825_v26  ;;  %v6237_v40 = vld [vmem:[#allocation6 + $0xc] ss:$32 sm:$0x2]  ;;  %v7812_v57 = vor.u32 %v8144_v34, %v7811_v53  ;;  %v7805_v13 = vld [vmem:[#allocation15 + $0x248] sm:$0xf0] }
 0x66b   :  { %v5679_v37 = vld [vmem:[#allocation5 + $0xe2] sm:$0xff]  ;;  %v6238_v39 = vor.u32 %v6237_v40, %v6236_v2  ;;  %v7804_v26 = vor.u32 %v8142_v30, %v7803_v38  ;;  %v8138_v2 = vld [vmem:[#allocation15 + $0x224] sm:$0xf0] }
 0x66c   :  { %v5711_v29 = vmax.f32 %v10210_v44, %v5679_v37  ;;  %5617 = vst [vmem:[#allocation5 + $0xf0] sm:$0xff] %v10222_v28  ;;  %6356 = vmatpush.bf16.msra.mxu2 %v7708_v59  ;;  %v5860_v11 = vor.u32 %v5859_v20, %v5858_v21  ;;  %v6239_v37 = vld [vmem:[#allocation6 + $0xc] ss:$32 sm:$0x4]  ;;  %v8146_v59 = vld [vmem:[#allocation15 + $0x264] sm:$0xf0] }
 0x66d   :  { %v8163_v38 = vld [vmem:[#allocation16 + $0x70] sm:$0xff]  ;;  %v8154_v30 = vld [vmem:[#allocation16 + $0x28] sm:$0xff] }
 0x66e   :  { %v5747_v42 = vadd.f32 %v10207_v6, %v5711_v29  ;;  %v5271_v32 = vpop.f32.mrf.mxu2  ;;  %v7819_v29 = vld [vmem:[#allocation15 + $0x260] sm:$0xf] }
 0x66f   :  { %v5425_v47 = vadd.f32 %v5271_v32, %v4910_v7  ;;  %v5360_v44 = vpop.f32.mrf.mxu3  ;;  %v6098_v7 = vor.u32 %v6097_v18, %v6096_v46  ;;  %v6103_v32 = vld [vmem:[#allocation6 + $0x8] ss:$32 sm:$0x20]  ;;  %v6383_v46 = vld [vmem:[#allocation6 + $0x10] ss:$32 sm:$0x8] }
 0x670   :  { %v5779_v10 = vmax.f32 %v5747_v42, 0.0  ;;  %v5426_v50 = vadd.f32 %v5360_v44, %v4911_v15  ;;  %v6241_v15 = vld [vmem:[#allocation6 + $0xc] ss:$32 sm:$0x8]  ;;  %v7824_v44 = vor.u32 %v8145_v48, %v7821_v51  ;;  %v7781_v48 = vld [vmem:[#allocation15 + $0x218] sm:$0xf0] }
 0x671   :  { %v6100_v42 = vor.u32 %v6099_v49, %v6098_v7  ;;  %v8136_v49 = vld [vmem:[#allocation15 + $0x214] sm:$0xf0]  ;;  %v6387_v7 = vld [vmem:[#allocation6 + $0x10] ss:$32 sm:$0x20] }
 0x672   :  { %5811 = vst [vmem:[#allocation6 + $0xe0] sm:$0xff] %v5779_v10  ;;  %v5586_v4 = vmax.f32 %v5425_v47, %v5426_v50  ;;  %v7820_v47 = vor.u32 %v8146_v59, %v7819_v29  ;;  %v8143_v10 = vld [vmem:[#allocation15 + $0x254] sm:$0xf]  ;;  %v7813_v50 = vld [vmem:[#allocation15 + $0x258] sm:$0xf0] }
 0x673   :  { %v5680_v19 = vld [vmem:[#allocation5 + $0xea] sm:$0xff]  ;;  %v6102_v60 = vor.u32 %v6101_v58, %v6100_v42  ;;  %v7816_v55 = vor.u32 %v8143_v10, %v7813_v50  ;;  %v6385_v29 = vld [vmem:[#allocation6 + $0x10] ss:$32 sm:$0x10]  ;;  %v8135_v59 = vld [vmem:[#allocation15 + $0x214] sm:$0xf] }
 0x674   :  { %v5712_v12 = vmax.f32 %v10217_v61, %v5680_v19  ;;  %5618 = vst [vmem:[#allocation5 + $0xf8] sm:$0xff] %v5586_v4  ;;  %v6105_v4 = vld [vmem:[#allocation6 + $0x8] ss:$32 sm:$0x40]  ;;  %v8141_v19 = vld [vmem:[#allocation15 + $0x244] sm:$0xf]  ;;  %v7784_v58 = vor.u32 %v8135_v59, %v7781_v48 }
 0x675   :  { %v6104_v31 = vor.u32 %v6103_v32, %v6102_v60  ;;  %v7808_v36 = vor.u32 %v8141_v19, %v7805_v13  ;;  %v6389_v42 = vld [vmem:[#allocation6 + $0x10] ss:$32 sm:$0x40]  ;;  %v8134_v32 = vld [vmem:[#allocation15 + $0x204] sm:$0xf0]  ;;  %v8164_v60 = vld [vmem:[#allocation16 + $0x78] sm:$0xff] }
 0x676   :  { %v5748_v5 = vadd.f32 %v10207_v6, %v5712_v12  ;;  %v6247_v12 = vld [vmem:[#allocation6 + $0xc] ss:$32 sm:$0x40]  ;;  %v8160_v19 = vld [vmem:[#allocation16 + $0x58] sm:$0xff] }
 0x677   :  { %v6106_v3 = vor.u32 %v6105_v4, %v6104_v31  ;;  %v8162_v4 = vld [vmem:[#allocation16 + $0x68] sm:$0xff]  ;;  %v8151_v31 = vld [vmem:[#allocation16 + $0x10] sm:$0xff] }
 0x678   :  { %v5780_v8 = vmax.f32 %v5748_v5, 0.0 }
 0x679   :  { %v5861_v61 = vld [vmem:[#allocation6 + $0x4] ss:$32 sm:$0x80]  ;;  %v5828_v54 = vld [vmem:[#allocation6] ss:$32 sm:$0x80] }
 0x67a   :  { %5812 = vst [vmem:[#allocation6 + $0xe8] sm:$0xff] %v5780_v8  ;;  %v5862_v63 = vor.u32 %v5861_v61, %v5860_v11  ;;  %v5829_v1 = vor.u32 %v5828_v54, %v5827_v9  ;;  %v8140_v11 = vld [vmem:[#allocation15 + $0x234] sm:$0xf0]  ;;  %v8139_v9 = vld [vmem:[#allocation15 + $0x234] sm:$0xf] }
 0x67b   :  { %v5681_v52 = vld [vmem:[#allocation5 + $0xf2] sm:$0xff]  ;;  %v7796_v61 = vor.u32 %v8140_v11, %v7795_v41  ;;  %v7800_v54 = vor.u32 %v8139_v9, %v7797_v0  ;;  %v8171_v11 = vld [vmem:[#allocation18 + $0x30] sm:$0xff] }
 0x67c   :  { %v5713_v14 = vmax.f32 %v10222_v28, %v5681_v52  ;;  %v5863_v24 = vpack.c.bf16 %v5862_v63, %v5862_v63  ;;  %v5830_v17 = vpack.c.bf16 %v5829_v1, %v5829_v1  ;;  %v6240_v28 = vor.u32 %v6239_v37, %v6238_v39  ;;  %v7787_v63 = vld [vmem:[#allocation15 + $0x220] sm:$0xf]  ;;  %v6381_v1 = vld [vmem:[#allocation6 + $0x10] ss:$32 sm:$0x4] }
 0x67d   :  { %v8137_v52 = vld [vmem:[#allocation15 + $0x224] sm:$0xf] }
 0x67e   :  { %v5749_v43 = vadd.f32 %v10207_v6, %v5713_v14  ;;  %5969 = vmatmul.bf16.vlgmr.msrb.gmra.mxu0 %v5863_v24  ;;  %5982 = vmatmul.bf16.vlgmr.msra.gmra.mxu1 %v5863_v24  ;;  %v6242_v6 = vor.u32 %v6241_v15, %v6240_v28  ;;  %v7788_v14 = vor.u32 %v8138_v2, %v7787_v63  ;;  %v7771_v15 = vld [vmem:[#allocation15 + $0x200] sm:$0xf]  ;;  %v8133_v28 = vld [vmem:[#allocation15 + $0x204] sm:$0xf]  ;;  %v8168_v2 = vld [vmem:[#allocation18 + $0x18] sm:$0xff] }
 0x67f   :  { %6075 = vmatmul.bf16.vlgmr.msrb.gmra.mxu2 %v5830_v17  ;;  %6088 = vmatmul.bf16.vlgmr.msrb.gmra.mxu3 %v5830_v17  ;;  %v7779_v17 = vld [vmem:[#allocation15 + $0x210] sm:$0xf]  ;;  %v7772_v53 = vor.u32 %v8134_v32, %v7771_v15  ;;  %v8157_v41 = vld [vmem:[#allocation16 + $0x40] sm:$0xff] }
 0x680   :  { %v5781_v56 = vmax.f32 %v5749_v43, 0.0  ;;  %6491 = vmatpush.bf16.msrb.mxu0 %v7828_v62  ;;  %6504 = vmatpush.bf16.msra.mxu1 %v7832_v27  ;;  %v6244_v45 = vor.u32 %v6243_v33, %v6242_v6  ;;  %v7789_v62 = vld [vmem:[#allocation15 + $0x228] sm:$0xf0]  ;;  %v6380_v27 = vor.u32 %v6379_v22, %v6378_v35  ;;  %v7780_v43 = vor.u32 %v8136_v49, %v7779_v17  ;;  %v8156_v6 = vld [vmem:[#allocation16 + $0x38] sm:$0xff] }
 0x681   :  { %v6107_v16 = vld [vmem:[#allocation6 + $0x8] ss:$32 sm:$0x80]  ;;  %v6249_v5 = vld [vmem:[#allocation6 + $0xc] ss:$32 sm:$0x80]  ;;  %v7792_v24 = vor.u32 %v8137_v52, %v7789_v62  ;;  %6663 = vmatpush.bf16.msrb.mxu2 %v8156_v6  ;;  %6676 = vmatpush.bf16.msrb.mxu3 %v8164_v60 }
 0x682   :  { %5813 = vst [vmem:[#allocation6 + $0xf0] sm:$0xff] %v5781_v56  ;;  %v6246_v20 = vor.u32 %v6245_v25, %v6244_v45  ;;  %v6108_v23 = vor.u32 %v6107_v16, %v6106_v3  ;;  %v6382_v37 = vor.u32 %v6381_v1, %v6380_v27  ;;  %v7773_v33 = vld [vmem:[#allocation15 + $0x208] sm:$0xf0]  ;;  %v8155_v25 = vld [vmem:[#allocation16 + $0x30] sm:$0xff]  ;;  %v8153_v45 = vld [vmem:[#allocation16 + $0x20] sm:$0xff] }
 0x683   :  { %v7776_v34 = vor.u32 %v8133_v28, %v7773_v33  ;;  %v8167_v27 = vld [vmem:[#allocation18 + $0x10] sm:$0xff] }
 0x684   :  { %6492 = vmatpush.bf16.msrb.mxu0 %v7820_v47  ;;  %6505 = vmatpush.bf16.msra.mxu1 %v7824_v44  ;;  %v6248_v21 = vor.u32 %v6247_v12, %v6246_v20  ;;  %v6109_v40 = vpack.c.bf16 %v6108_v23, %v6108_v23  ;;  %v6384_v51 = vor.u32 %v6383_v46, %v6382_v37  ;;  %v8159_v12 = vld [vmem:[#allocation16 + $0x50] sm:$0xff]  ;;  %v8149_v23 = vld [vmem:[#allocation16] sm:$0xff]  ;;  %v6519_v46 = vld [vmem:[%s10251_s6] sm:$0x3] }
 0x685   :  { %6664 = vmatpush.bf16.msrb.mxu2 %v8155_v25  ;;  %6677 = vmatpush.bf16.msrb.mxu3 %v8163_v38  ;;  %v6521_v59 = vperm.slane %v6519_v46, 0  ;;  %v6522_v48 = vperm.slane %v6519_v46, 1 }
 0x686   :  { %v6250_v8 = vor.u32 %v6249_v5, %v6248_v21  ;;  %v6386_v39 = vor.u32 %v6385_v29, %v6384_v51 }
 0x688   :  { %6493 = vmatpush.bf16.msrb.mxu0 %v7812_v57  ;;  %6506 = vmatpush.bf16.msra.mxu1 %v7816_v55  ;;  %v6251_v18 = vpack.c.bf16 %v6250_v8, %v6250_v8  ;;  %v6388_v56 = vor.u32 %v6387_v7, %v6386_v39  ;;  %v8161_v57 = vld [vmem:[#allocation16 + $0x60] sm:$0xff]  ;;  %v8152_v55 = vld [vmem:[#allocation16 + $0x18] sm:$0xff] }
 0x689   :  { %v6391_v47 = vld [vmem:[#allocation6 + $0x10] ss:$32 sm:$0x80]  ;;  %6665 = vmatpush.bf16.msrb.mxu2 %v8154_v30  ;;  %6678 = vmatpush.bf16.msrb.mxu3 %v8162_v4  ;;  %v8172_v8 = vld [vmem:[#allocation18 + $0x38] sm:$0xff] }
 0x68a   :  { %v6390_v44 = vor.u32 %v6389_v42, %v6388_v56 }
 0x68c   :  { %6494 = vmatpush.bf16.msrb.mxu0 %v7804_v26  ;;  %6507 = vmatpush.bf16.msra.mxu1 %v7808_v36  ;;  %v6392_v10 = vor.u32 %v6391_v47, %v6390_v44  ;;  %v8150_v26 = vld [vmem:[#allocation16 + $0x8] sm:$0xff] }
 0x68d   :  { %6666 = vmatpush.bf16.msrb.mxu2 %v8153_v45  ;;  %6679 = vmatpush.bf16.msrb.mxu3 %v8161_v57  ;;  %v8158_v36 = vld [vmem:[#allocation16 + $0x48] sm:$0xff]  ;;  %v8195_v45 = vld [vmem:[%s10255_s10] ss:$0 sm:$0xff] }
 0x68e   :  { %6215 = vmatmul.bf16.vlgmr.msra.gmra.mxu0 %v6109_v40  ;;  %6228 = vmatmul.bf16.vlgmr.msrb.gmra.mxu1 %v6109_v40  ;;  %v6393_v50 = vpack.c.bf16 %v6392_v10, %v6392_v10  ;;  %v8170_v40 = vld [vmem:[#allocation18 + $0x28] sm:$0xff] }
 0x68f   :  { %6357 = vmatmul.bf16.vlgmr.msra.gmra.mxu2 %v6251_v18  ;;  %6370 = vmatmul.bf16.vlgmr.msra.gmra.mxu3 %v6251_v18  ;;  %v8166_v44 = vld [vmem:[#allocation18 + $0x8] sm:$0xff] }
 0x690   :  { %6495 = vmatpush.bf16.msrb.mxu0 %v7796_v61  ;;  %6508 = vmatpush.bf16.msra.mxu1 %v7800_v54  ;;  %v8169_v61 = vld [vmem:[#allocation18 + $0x20] sm:$0xff] }
 0x691   :  { %6667 = vmatpush.bf16.msrb.mxu2 %v8152_v55  ;;  %6680 = vmatpush.bf16.msrb.mxu3 %v8160_v19 }
 0x694   :  { %6496 = vmatpush.bf16.msrb.mxu0 %v7788_v14  ;;  %6509 = vmatpush.bf16.msra.mxu1 %v7792_v24 }
 0x695   :  { %6668 = vmatpush.bf16.msrb.mxu2 %v8151_v31  ;;  %6681 = vmatpush.bf16.msrb.mxu3 %v8159_v12 }
 0x698   :  { %6497 = vmatpush.bf16.msrb.mxu0 %v7780_v43  ;;  %6510 = vmatpush.bf16.msra.mxu1 %v7784_v58 }
 0x699   :  { %6669 = vmatpush.bf16.msrb.mxu2 %v8150_v26  ;;  %6682 = vmatpush.bf16.msrb.mxu3 %v8158_v36 }
 0x69c   :  { %6498 = vmatpush.bf16.msrb.mxu0 %v7772_v53  ;;  %6511 = vmatpush.bf16.msra.mxu1 %v7776_v34  ;;  %v8165_v53 = vld [vmem:[#allocation18] sm:$0xff]  ;;  %v8194_v34 = vld [vmem:[%s10253_s8] ss:$0 sm:$0xff] }
 0x69d   :  { %6670 = vmatpush.bf16.msrb.mxu2 %v8149_v23  ;;  %6683 = vmatpush.bf16.msrb.mxu3 %v8157_v41 }
 0x69f   :  { %6499 = vmatmul.bf16.vlgmr.msrb.gmra.mxu0 %v6393_v50  ;;  %6512 = vmatmul.bf16.vlgmr.msra.gmra.mxu1 %v6393_v50 }
 0x6a0   :  { %6759 = vmatpush.bf16.msra.mxu0 %v8172_v8 }
 0x6a4   :  { %6760 = vmatpush.bf16.msra.mxu0 %v8171_v11 }
 0x6a8   :  { %6761 = vmatpush.bf16.msra.mxu0 %v8170_v40 }
 0x6ac   :  { %6762 = vmatpush.bf16.msra.mxu0 %v8169_v61 }
 0x6b0   :  { %6763 = vmatpush.bf16.msra.mxu0 %v8168_v2 }
 0x6b4   :  { %6764 = vmatpush.bf16.msra.mxu0 %v8167_v27 }
 0x6b8   :  { %6765 = vmatpush.bf16.msra.mxu0 %v8166_v44 }
 0x6bc   :  { %6766 = vmatpush.bf16.msra.mxu0 %v8165_v53 }
 0x6fb   :  { %v5970_v13 = vpop.f32.mrf.mxu0  ;;  %v5983_v16 = vpop.f32.mrf.mxu1 }
 0x702   :  { %v6076_v20 = vpop.f32.mrf.mxu2  ;;  %v6089_v3 = vpop.f32.mrf.mxu3 }
 0x703   :  { %v5972_v5 = vpop.f32.mrf.mxu0  ;;  %v5985_v21 = vpop.f32.mrf.mxu1  ;;  %v6077_v52 = vadd.f32 %v6076_v20, %v5970_v13  ;;  %v6090_v62 = vadd.f32 %v6089_v3, %v5983_v16 }
 0x70a   :  { %v6078_v9 = vpop.f32.mrf.mxu2  ;;  %v6091_v0 = vpop.f32.mrf.mxu3 }
 0x70b   :  { %v6216_v22 = vpop.f32.mrf.mxu0  ;;  %v6229_v35 = vpop.f32.mrf.mxu1 }
 0x70c   :  { %v6233_v37 = vadd.f32 %v6216_v22, %v6077_v52  ;;  %v6234_v14 = vadd.f32 %v6229_v35, %v6090_v62 }
 0x712   :  { %v6358_v54 = vpop.f32.mrf.mxu2  ;;  %v6371_v63 = vpop.f32.mrf.mxu3 }
 0x713   :  { %v6218_v1 = vpop.f32.mrf.mxu0  ;;  %v6231_v18 = vpop.f32.mrf.mxu1  ;;  %v6375_v29 = vadd.f32 %v6358_v54, %v6233_v37  ;;  %v6376_v49 = vadd.f32 %v6371_v63, %v6234_v14 }
 0x71a   :  { %v6360_v24 = vpop.f32.mrf.mxu2  ;;  %v6373_v17 = vpop.f32.mrf.mxu3 }
 0x71c   :  { %v6500_v51 = vpop.f32.mrf.mxu0  ;;  %v6513_v7 = vpop.f32.mrf.mxu1 }
 0x71d   :  { %v6517_v39 = vadd.f32 %v6500_v51, %v6375_v29  ;;  %v6518_v43 = vadd.f32 %v6513_v7, %v6376_v49 }
 0x71f   :  { %v6525_v58 = vadd.f32 %v6521_v59, %v6517_v39  ;;  %v6526_v15 = vadd.f32 %v6522_v48, %v6518_v43 }
 0x721   :  { %v6527_v42 = vmax.f32 %v6525_v58, 0.0  ;;  %v6528_v32 = vmax.f32 %v6526_v15, 0.0 }
 0x723   :  { %v6529_v28 = vpack.c.bf16 %v6527_v42, %v6527_v42  ;;  %v6530_v33 = vpack.c.bf16 %v6528_v32, %v6528_v32 }
 0x724   :  { %v6502_v56 = vpop.f32.mrf.mxu0  ;;  %v6515_v47 = vpop.f32.mrf.mxu1 }
 0x725   :  { %6671 = vmatmul.bf16.vlgmr.msrb.gmra.mxu2 %v6529_v28  ;;  %6684 = vmatmul.bf16.vlgmr.msrb.gmra.mxu3 %v6530_v33 }
 0x7a8   :  { %v6672_v10 = vpop.f32.mrf.mxu2  ;;  %v6685_v50 = vpop.f32.mrf.mxu3 }
 0x7a9   :  { %v6673_v6 = vadd.f32 %v8194_v34, %v6672_v10 }
 0x7ab   :  { %v6686_v60 = vadd.f32 %v6685_v50, %v6673_v6 }
 0x7ad   :  { %v6689_v25 = vmax.f32 %v6686_v60, 0.0 }
 0x7af   :  { %v6690_v38 = vpack.c.bf16 %v6689_v25, %v6689_v25 }
 0x7b0   :  { %v6674_v30 = vpop.f32.mrf.mxu2  ;;  %v6687_v4 = vpop.f32.mrf.mxu3 }
 0x7b1   :  { %6767 = vmatmul.bf16.vlgmr.msra.gmra.mxu0 %v6690_v38 }
 0x82e   :  { %v6768_v57 = vpop.f32.mrf.mxu0 }
 0x82f   :  { %v6769_v55 = vadd.f32 %v8195_v45, %v6768_v57 }
 0x831   :  { %6772 = vst [vmem:[#allocation19] sm:$0xff] %v6769_v55 }
 0x832   :  { %6783 = dma.vmem_to_hbm [thread:$0]  %s6779_s18, 128, %s6781_s21, [#allocation9]  }
 0x836   :  { %v6770_v19 = vpop.f32.mrf.mxu0 }
 0x837   :  { %8399 = dma.done.wait [#allocation9], 128  }
 0x838   :  { %8400 = vsyncadd [#allocation9], 4294967168 }
 0x839   :  { %6788 = vsyncpa [#allocation8], 1 }
 0x83a   :  { %6789 = vsyncpa [#allocation11], 1 }
 0x83b   :  { %6790 = vsyncpa [#allocation14], 1 }
 0x83c   :  { %6791 = vsyncpa [#allocation17], 1 }
 0x83d   :  { %6792 = vsyncpa [#allocation9], 1 }

</bundles_post_ra>
